<compile_context>
chip_gen: v7x
topology: tpu7x:2x2x1
jax: 0.10.0
libtpu: 0.0.40
codegen_flags: <defaults>
</compile_context>

<pallas_src>
import functools

import numpy as np
import jax
import jax.numpy as jnp
from jax.experimental import pallas as pl
from jax.experimental.pallas import tpu as pltpu


_PARAM_NAMES = (
    "w1d", "b1d", "w1r", "b1r",
    "w2d", "b2d", "w2r", "b2r",
    "w3d", "b3d", "w3r", "b3r",
    "w4d", "b4d", "wcc", "bcc",
    "we1", "be1", "we21", "be21",
    "we2", "be2", "we3", "be3",
    "we4", "be4", "we5", "be5",
    "we6", "be6",
)


# ----------------------------------------------------------------------------
# Fused kernel
# ----------------------------------------------------------------------------

def _cfrb_kernel(*refs, cfg):
    (x_ref, mask_ref, mask2_ref, gsel_ref, mup_ref, scat_ref, gath_ref) = refs[:7]
    prm = dict(zip(_PARAM_NAMES, refs[7:7 + len(_PARAM_NAMES)]))
    o_ref = refs[7 + len(_PARAM_NAMES)]

    f32 = jnp.float32
    H, W = cfg["H"], cfg["W"]
    Wp = W + 2
    P = (H + 2) * Wp
    W2 = cfg["W2"]
    Hm, Wm = cfg["Hm"], cfg["Wm"]
    Wp2 = Wm + 2
    START, L = Wp + 1, (H - 1) * Wp + W
    START2, L2 = Wp2 + 1, (Hm - 1) * Wp2 + Wm
    ns = cfg["neg_slope"]

    x0 = x_ref[0].astype(f32)          # (C, P) padded-flat, zero border
    mask = mask_ref[...]               # (1, P)
    mask2 = mask2_ref[...]             # (1, P2)

    def lrelu(v):
        return jnp.where(v >= 0, v, ns * v)

    def conv1x1(xf, wname, bname):
        w = prm[wname][...]            # (Cout, Cin)
        b = prm[bname][...]            # (Cout, 1)
        return jnp.dot(w, xf, preferred_element_type=f32) + b

    def conv3x3(xf, wname, bname, wp, start, span, msk):
        """3x3 pad-1 stride-1 conv on a zero-bordered padded-flat image."""
        w_ref = prm[wname]             # (9, Cout, Cin), tap = dy*3+dx
        b = prm[bname][...]            # (Cout, 1)
        cout = w_ref.shape[1]
        acc = jnp.zeros((cout, span), f32)
        for t in range(9):
            dy, dx = t // 3, t % 3
            off = start + (dy - 1) * wp + (dx - 1)
            acc = acc + jnp.dot(w_ref[t], xf[:, off:off + span],
                                preferred_element_type=f32)
        acc = acc + b
        pfull = xf.shape[1]
        out = jnp.concatenate(
            [jnp.zeros((cout, start), f32), acc,
             jnp.zeros((cout, pfull - start - span), f32)], axis=1)
        return out * msk               # restore zero border

    # ---------------- CFRB main chain ----------------
    d1 = conv1x1(x0, "w1d", "b1d")                                     # (d, P)
    xa = lrelu(conv3x3(x0, "w1r", "b1r", Wp, START, L, mask) + x0)
    d2 = conv1x1(xa, "w2d", "b2d")
    xb = lrelu(conv3x3(xa, "w2r", "b2r", Wp, START, L, mask) + xa)
    d3 = conv1x1(xb, "w3d", "b3d")
    xc = lrelu(conv3x3(xb, "w3r", "b3r", Wp, START, L, mask) + xb)
    x4 = conv3x3(xc, "w4d", "b4d", Wp, START, L, mask)                 # (d, P)
    tcat = lrelu(jnp.concatenate([d1, d2, d3, x4], axis=0))            # (4d, P)
    y = conv1x1(tcat, "wcc", "bcc")                                    # (C, P)

    # ---------------- ESA ----------------
    x1 = conv1x1(y, "we1", "be1")                                      # (r, P)

    # conv2: 3x3 stride-2 pad-0 = full stride-1 tap matmuls + one-hot selection
    r = x1.shape[0]
    pf = P - 2 * Wp - 2
    w2_ref = prm["we2"]
    F = jnp.zeros((r, pf), f32)
    for t in range(9):
        dy, dx = t // 3, t % 3
        off = dy * Wp + dx
        F = F + jnp.dot(w2_ref[t], x1[:, off:off + pf],
                        preferred_element_type=f32)
    c2 = jnp.dot(F, gsel_ref[...], preferred_element_type=f32) \
        + prm["be2"][...]                                              # (r, H2*W2)

    # max_pool2d(kernel=7, stride=3) on the (H2, W2) grid
    pooled_cols = []
    for ph in range(Hm):
        for pw in range(Wm):
            m = None
            for rr in range(7):
                s = (3 * ph + rr) * W2 + 3 * pw
                sl = c2[:, s:s + 7]                                    # (r, 7)
                m = sl if m is None else jnp.maximum(m, sl)
            pooled_cols.append(jnp.max(m, axis=1, keepdims=True))      # (r, 1)
    pooled = (pooled_cols[0] if len(pooled_cols) == 1
              else jnp.concatenate(pooled_cols, axis=1))               # (r, Hm*Wm)

    # scatter pooled values onto a tiny zero-bordered padded-flat canvas
    small = jnp.dot(pooled, scat_ref[...], preferred_element_type=f32)  # (r, P2)
    z = jnp.maximum(conv3x3(small, "we3", "be3", Wp2, START2, L2, mask2), 0.0)
    z = jnp.maximum(conv3x3(z, "we4", "be4", Wp2, START2, L2, mask2), 0.0)
    z = conv3x3(z, "we5", "be5", Wp2, START2, L2, mask2)               # (r, P2)

    # bilinear upsample (align_corners=False) as a single matmul
    zv = jnp.dot(z, gath_ref[...], preferred_element_type=f32)         # (r, Hm*Wm)
    u = jnp.dot(zv, mup_ref[...], preferred_element_type=f32)          # (r, P)

    gate = u + conv1x1(x1, "we21", "be21")                             # (r, P)
    pre = conv1x1(gate, "we6", "be6")                                  # (C, P)
    o_ref[0] = (y * jax.nn.sigmoid(pre)).astype(o_ref.dtype)


# ----------------------------------------------------------------------------
# Host-side glue: constant matrices + pallas_call wrapper
# ----------------------------------------------------------------------------

def _interp_matrix(out_size, in_size):
    """PyTorch F.interpolate(mode='bilinear', align_corners=False) weights."""
    A = np.zeros((out_size, in_size), np.float32)
    scale = in_size / out_size
    for i in range(out_size):
        src = max((i + 0.5) * scale - 0.5, 0.0)
        i0 = min(int(np.floor(src)), in_size - 1)
        i1 = min(i0 + 1, in_size - 1)
        t = src - i0
        A[i, i0] += 1.0 - t
        A[i, i1] += t
    return A


def cfrb_forward(x_nchw, params, *, neg_slope=0.05):
    """CFRB.forward (PyTorch semantics). Input/output NCHW."""
    N, C, H, W = x_nchw.shape
    Hp, Wp = H + 2, W + 2
    P = Hp * Wp
    H2 = (H - 3) // 2 + 1
    W2 = (W - 3) // 2 + 1
    assert H2 >= 7 and W2 >= 7, "spatial too small for ESA max_pool2d(7, 3)"
    Hm = (H2 - 7) // 3 + 1
    Wm = (W2 - 7) // 3 + 1
    Wp2 = Wm + 2
    P2 = (Hm + 2) * Wp2
    Pf = P - 2 * Wp - 2
    Q = H2 * W2
    K = Hm * Wm

    # zero-padded, channel-major, spatially flattened input  (N, C, P)
    x_pf = jnp.pad(x_nchw, ((0, 0), (0, 0), (1, 1), (1, 1))).reshape(N, C, P)

    # --- precomputed constant matrices (numpy) ---
    mcan = np.zeros((1, Hp, Wp), np.float32)
    mcan[0, 1:H + 1, 1:W + 1] = 1.0
    mask = jnp.asarray(mcan.reshape(1, P))

    m2can = np.zeros((1, Hm + 2, Wp2), np.float32)
    m2can[0, 1:Hm + 1, 1:Wm + 1] = 1.0
    mask2 = jnp.asarray(m2can.reshape(1, P2))

    gsel_np = np.zeros((Pf, Q), np.float32)            # stride-2 column selector
    for h2 in range(H2):
        for w2 in range(W2):
            gsel_np[(2 * h2 + 1) * Wp + (2 * w2 + 1), h2 * W2 + w2] = 1.0
    gsel = jnp.asarray(gsel_np)

    Ah = _interp_matrix(H, Hm)                          # (H, Hm)
    Aw = _interp_matrix(W, Wm)                          # (W, Wm)
    mup_img = np.einsum("ia,jb->abij", Ah, Aw).reshape(K, H, W)
    mup_can = np.zeros((K, Hp, Wp), np.float32)
    mup_can[:, 1:H + 1, 1:W + 1] = mup_img
    mup = jnp.asarray(mup_can.reshape(K, P))            # bilinear upsample matrix

    scat_np = np.zeros((K, P2), np.float32)             # pooled -> padded canvas
    for a in range(Hm):
        for b in range(Wm):
            scat_np[a * Wm + b, (a + 1) * Wp2 + (b + 1)] = 1.0
    scat = jnp.asarray(scat_np)
    gath = jnp.asarray(np.ascontiguousarray(scat_np.T))  # canvas -> valid values

    cfg = dict(H=H, W=W, H2=H2, W2=W2, Hm=Hm, Wm=Wm, neg_slope=neg_slope)

    const_inputs = [mask, mask2, gsel, mup, scat, gath] + \
                   [params[k] for k in _PARAM_NAMES]

    def _bcast_spec(a):
        nd = a.ndim
        return pl.BlockSpec(a.shape, lambda n, _nd=nd: (0,) * _nd)

    in_specs = ([pl.BlockSpec((1, C, P), lambda n: (n, 0, 0))] +
                [_bcast_spec(a) for a in const_inputs])
    out_spec = pl.BlockSpec((1, C, P), lambda n: (n, 0, 0))

    out_flat = pl.pallas_call(
        functools.partial(_cfrb_kernel, cfg=cfg),
        out_shape=jax.ShapeDtypeStruct((N, C, P), x_nchw.dtype),
        grid=(N,),
        in_specs=in_specs,
        out_specs=out_spec,
        compiler_params=pltpu.CompilerParams(
            dimension_semantics=("parallel",),
            vmem_limit_bytes=32 * 1024 * 1024),
    )(x_pf, *const_inputs)

    out = out_flat.reshape(N, C, Hp, Wp)[:, :, 1:H + 1, 1:W + 1]
    return out


# ----------------------------------------------------------------------------
# Parameter construction (kernel-layout weights)
# ----------------------------------------------------------------------------

def init_params(key, in_channels=16, out_channels=16, d_rate=0.5):
    C = in_channels
    Co = out_channels
    d = int(C * d_rate)
    r = C // 4                         # ESA reduction = 4
    keys = iter(jax.random.split(key, 64))

    def w(shape, scale=0.1):
        return jax.random.normal(next(keys), shape, jnp.float32) * scale

    def b(cout):
        return jax.random.normal(next(keys), (cout, 1), jnp.float32) * 0.01

    return dict(
        # CFRB main chain: 1x1 weights (Cout, Cin); 3x3 weights (9, Cout, Cin)
        w1d=w((d, C)), b1d=b(d),
        w1r=w((9, C, C)), b1r=b(C),
        w2d=w((d, C)), b2d=b(d),
        w2r=w((9, C, C)), b2r=b(C),
        w3d=w((d, C)), b3d=b(d),
        w3r=w((9, C, C)), b3r=b(C),
        w4d=w((9, d, C)), b4d=b(d),
        wcc=w((Co, 4 * d)), bcc=b(Co),
        # ESA
        we1=w((r, Co)), be1=b(r),
        we21=w((r, r)), be21=b(r),
        we2=w((9, r, r)), be2=b(r),
        we3=w((9, r, r)), be3=b(r),
        we4=w((9, r, r)), be4=b(r),
        we5=w((9, r, r)), be5=b(r),
        we6=w((Co, r)), be6=b(Co),
    )


if __name__ == "__main__":
    key = jax.random.PRNGKey(0)
    kx, kp = jax.random.split(key)

    # small shapes consistent with the module (H must give H2 >= 7 for the pool)
    N, C, H, W = 2, 16, 24, 24
    x = jax.random.normal(kx, (N, C, H, W), jnp.float32)
    params = init_params(kp, in_channels=C, out_channels=C, d_rate=0.5)

    y = cfrb_forward(x, params)
    jax.block_until_ready(y)
    assert y.shape == (N, C, H, W)
    assert bool(jnp.all(jnp.isfinite(y)))
    print("KERNEL_OK")
</pallas_src>

<mosaic_0001>
module attributes {stable_mosaic.version = 11 : i64} {
  func.func @_cfrb_kernel(%arg0: i32, %arg1: memref<1x16x676xf32, #tpu.memory_space<vmem>>, %arg2: memref<1x676xf32, #tpu.memory_space<vmem>>, %arg3: memref<1x16xf32, #tpu.memory_space<vmem>>, %arg4: memref<622x121xf32, #tpu.memory_space<vmem>>, %arg5: memref<4x676xf32, #tpu.memory_space<vmem>>, %arg6: memref<4x16xf32, #tpu.memory_space<vmem>>, %arg7: memref<16x4xf32, #tpu.memory_space<vmem>>, %arg8: memref<8x16xf32, #tpu.memory_space<vmem>>, %arg9: memref<8x1xf32, #tpu.memory_space<vmem>>, %arg10: memref<9x16x16xf32, #tpu.memory_space<vmem>>, %arg11: memref<16x1xf32, #tpu.memory_space<vmem>>, %arg12: memref<8x16xf32, #tpu.memory_space<vmem>>, %arg13: memref<8x1xf32, #tpu.memory_space<vmem>>, %arg14: memref<9x16x16xf32, #tpu.memory_space<vmem>>, %arg15: memref<16x1xf32, #tpu.memory_space<vmem>>, %arg16: memref<8x16xf32, #tpu.memory_space<vmem>>, %arg17: memref<8x1xf32, #tpu.memory_space<vmem>>, %arg18: memref<9x16x16xf32, #tpu.memory_space<vmem>>, %arg19: memref<16x1xf32, #tpu.memory_space<vmem>>, %arg20: memref<9x8x16xf32, #tpu.memory_space<vmem>>, %arg21: memref<8x1xf32, #tpu.memory_space<vmem>>, %arg22: memref<16x32xf32, #tpu.memory_space<vmem>>, %arg23: memref<16x1xf32, #tpu.memory_space<vmem>>, %arg24: memref<4x16xf32, #tpu.memory_space<vmem>>, %arg25: memref<4x1xf32, #tpu.memory_space<vmem>>, %arg26: memref<4x4xf32, #tpu.memory_space<vmem>>, %arg27: memref<4x1xf32, #tpu.memory_space<vmem>>, %arg28: memref<9x4x4xf32, #tpu.memory_space<vmem>>, %arg29: memref<4x1xf32, #tpu.memory_space<vmem>>, %arg30: memref<9x4x4xf32, #tpu.memory_space<vmem>>, %arg31: memref<4x1xf32, #tpu.memory_space<vmem>>, %arg32: memref<9x4x4xf32, #tpu.memory_space<vmem>>, %arg33: memref<4x1xf32, #tpu.memory_space<vmem>>, %arg34: memref<9x4x4xf32, #tpu.memory_space<vmem>>, %arg35: memref<4x1xf32, #tpu.memory_space<vmem>>, %arg36: memref<16x4xf32, #tpu.memory_space<vmem>>, %arg37: memref<16x1xf32, #tpu.memory_space<vmem>>, %arg38: memref<1x16x676xf32, #tpu.memory_space<vmem>>) attributes {dimension_semantics = [#tpu.dimension_semantics<parallel>], iteration_bounds = array<i64: 2>, scalar_prefetch = 0 : i64, scratch_operands = 0 : i64, tpu.core_type = #tpu.core_type<tc>, window_params = [{transform_indices = @transform_0, window_bounds = array<i64: 1, 16, 676>}, {pipeline_mode = #tpu.pipeline_mode<synchronous>, transform_indices = @transform_1, window_bounds = array<i64: 1, 676>}, {pipeline_mode = #tpu.pipeline_mode<synchronous>, transform_indices = @transform_2, window_bounds = array<i64: 1, 16>}, {pipeline_mode = #tpu.pipeline_mode<synchronous>, transform_indices = @transform_3, window_bounds = array<i64: 622, 121>}, {pipeline_mode = #tpu.pipeline_mode<synchronous>, transform_indices = @transform_4, window_bounds = array<i64: 4, 676>}, {pipeline_mode = #tpu.pipeline_mode<synchronous>, transform_indices = @transform_5, window_bounds = array<i64: 4, 16>}, {pipeline_mode = #tpu.pipeline_mode<synchronous>, transform_indices = @transform_6, window_bounds = array<i64: 16, 4>}, {pipeline_mode = #tpu.pipeline_mode<synchronous>, transform_indices = @transform_7, window_bounds = array<i64: 8, 16>}, {pipeline_mode = #tpu.pipeline_mode<synchronous>, transform_indices = @transform_8, window_bounds = array<i64: 8, 1>}, {pipeline_mode = #tpu.pipeline_mode<synchronous>, transform_indices = @transform_9, window_bounds = array<i64: 9, 16, 16>}, {pipeline_mode = #tpu.pipeline_mode<synchronous>, transform_indices = @transform_10, window_bounds = array<i64: 16, 1>}, {pipeline_mode = #tpu.pipeline_mode<synchronous>, transform_indices = @transform_11, window_bounds = array<i64: 8, 16>}, {pipeline_mode = #tpu.pipeline_mode<synchronous>, transform_indices = @transform_12, window_bounds = array<i64: 8, 1>}, {pipeline_mode = #tpu.pipeline_mode<synchronous>, transform_indices = @transform_13, window_bounds = array<i64: 9, 16, 16>}, {pipeline_mode = #tpu.pipeline_mode<synchronous>, transform_indices = @transform_14, window_bounds = array<i64: 16, 1>}, {pipeline_mode = #tpu.pipeline_mode<synchronous>, transform_indices = @transform_15, window_bounds = array<i64: 8, 16>}, {pipeline_mode = #tpu.pipeline_mode<synchronous>, transform_indices = @transform_16, window_bounds = array<i64: 8, 1>}, {pipeline_mode = #tpu.pipeline_mode<synchronous>, transform_indices = @transform_17, window_bounds = array<i64: 9, 16, 16>}, {pipeline_mode = #tpu.pipeline_mode<synchronous>, transform_indices = @transform_18, window_bounds = array<i64: 16, 1>}, {pipeline_mode = #tpu.pipeline_mode<synchronous>, transform_indices = @transform_19, window_bounds = array<i64: 9, 8, 16>}, {pipeline_mode = #tpu.pipeline_mode<synchronous>, transform_indices = @transform_20, window_bounds = array<i64: 8, 1>}, {pipeline_mode = #tpu.pipeline_mode<synchronous>, transform_indices = @transform_21, window_bounds = array<i64: 16, 32>}, {pipeline_mode = #tpu.pipeline_mode<synchronous>, transform_indices = @transform_22, window_bounds = array<i64: 16, 1>}, {pipeline_mode = #tpu.pipeline_mode<synchronous>, transform_indices = @transform_23, window_bounds = array<i64: 4, 16>}, {pipeline_mode = #tpu.pipeline_mode<synchronous>, transform_indices = @transform_24, window_bounds = array<i64: 4, 1>}, {pipeline_mode = #tpu.pipeline_mode<synchronous>, transform_indices = @transform_25, window_bounds = array<i64: 4, 4>}, {pipeline_mode = #tpu.pipeline_mode<synchronous>, transform_indices = @transform_26, window_bounds = array<i64: 4, 1>}, {pipeline_mode = #tpu.pipeline_mode<synchronous>, transform_indices = @transform_27, window_bounds = array<i64: 9, 4, 4>}, {pipeline_mode = #tpu.pipeline_mode<synchronous>, transform_indices = @transform_28, window_bounds = array<i64: 4, 1>}, {pipeline_mode = #tpu.pipeline_mode<synchronous>, transform_indices = @transform_29, window_bounds = array<i64: 9, 4, 4>}, {pipeline_mode = #tpu.pipeline_mode<synchronous>, transform_indices = @transform_30, window_bounds = array<i64: 4, 1>}, {pipeline_mode = #tpu.pipeline_mode<synchronous>, transform_indices = @transform_31, window_bounds = array<i64: 9, 4, 4>}, {pipeline_mode = #tpu.pipeline_mode<synchronous>, transform_indices = @transform_32, window_bounds = array<i64: 4, 1>}, {pipeline_mode = #tpu.pipeline_mode<synchronous>, transform_indices = @transform_33, window_bounds = array<i64: 9, 4, 4>}, {pipeline_mode = #tpu.pipeline_mode<synchronous>, transform_indices = @transform_34, window_bounds = array<i64: 4, 1>}, {pipeline_mode = #tpu.pipeline_mode<synchronous>, transform_indices = @transform_35, window_bounds = array<i64: 16, 4>}, {pipeline_mode = #tpu.pipeline_mode<synchronous>, transform_indices = @transform_36, window_bounds = array<i64: 16, 1>}, {transform_indices = @transform_37, window_bounds = array<i64: 1, 16, 676>}]} {
    %c0 = arith.constant 0 : index
    %c0_0 = arith.constant 0 : index
    %c0_1 = arith.constant 0 : index
    %0 = vector.load %arg1[%c0, %c0_0, %c0_1] : memref<1x16x676xf32, #tpu.memory_space<vmem>>, vector<1x16x676xf32>
    %1 = vector.shape_cast %0 : vector<1x16x676xf32> to vector<16x676xf32>
    %c0_2 = arith.constant 0 : index
    %c0_3 = arith.constant 0 : index
    %2 = vector.load %arg2[%c0_2, %c0_3] : memref<1x676xf32, #tpu.memory_space<vmem>>, vector<1x676xf32>
    %c0_4 = arith.constant 0 : index
    %c0_5 = arith.constant 0 : index
    %3 = vector.load %arg3[%c0_4, %c0_5] : memref<1x16xf32, #tpu.memory_space<vmem>>, vector<1x16xf32>
    %c0_6 = arith.constant 0 : index
    %c0_7 = arith.constant 0 : index
    %4 = vector.load %arg8[%c0_6, %c0_7] : memref<8x16xf32, #tpu.memory_space<vmem>>, vector<8x16xf32>
    %c0_8 = arith.constant 0 : index
    %c0_9 = arith.constant 0 : index
    %5 = vector.load %arg9[%c0_8, %c0_9] : memref<8x1xf32, #tpu.memory_space<vmem>>, vector<8x1xf32>
    %cst = arith.constant dense<0.000000e+00> : vector<8x676xf32>
    %6 = tpu.matmul %4, %1, %cst {dimension_numbers = #tpu.dot_dimension_numbers<[1], [0], [0], [1], [0, 0, 1, 1], [], []>} : vector<8x16xf32>, vector<16x676xf32>, vector<8x676xf32> -> vector<8x676xf32>
    %7 = vector.broadcast %5 : vector<8x1xf32> to vector<8x676xf32>
    %8 = arith.addf %6, %7 : vector<8x676xf32>
    %c0_10 = arith.constant 0 : index
    %c0_11 = arith.constant 0 : index
    %9 = vector.load %arg11[%c0_10, %c0_11] : memref<16x1xf32, #tpu.memory_space<vmem>>, vector<16x1xf32>
    %cst_12 = arith.constant 0.000000e+00 : f32
    %10 = vector.broadcast %cst_12 : f32 to vector<16x622xf32>
    %c0_13 = arith.constant 0 : index
    %c0_14 = arith.constant 0 : index
    %c0_15 = arith.constant 0 : index
    %11 = vector.load %arg10[%c0_13, %c0_14, %c0_15] : memref<9x16x16xf32, #tpu.memory_space<vmem>>, vector<1x16x16xf32>
    %12 = vector.shape_cast %11 : vector<1x16x16xf32> to vector<16x16xf32>
    %13 = vector.extract_strided_slice %1 {offsets = [0, 0], sizes = [16, 622], strides = [1, 1]} : vector<16x676xf32> to vector<16x622xf32>
    %cst_16 = arith.constant dense<0.000000e+00> : vector<16x622xf32>
    %14 = tpu.matmul %12, %13, %cst_16 {dimension_numbers = #tpu.dot_dimension_numbers<[1], [0], [0], [1], [0, 0, 1, 1], [], []>} : vector<16x16xf32>, vector<16x622xf32>, vector<16x622xf32> -> vector<16x622xf32>
    %15 = arith.addf %10, %14 : vector<16x622xf32>
    %c1 = arith.constant 1 : index
    %c0_17 = arith.constant 0 : index
    %c0_18 = arith.constant 0 : index
    %16 = vector.load %arg10[%c1, %c0_17, %c0_18] : memref<9x16x16xf32, #tpu.memory_space<vmem>>, vector<1x16x16xf32>
    %17 = vector.shape_cast %16 : vector<1x16x16xf32> to vector<16x16xf32>
    %18 = vector.extract_strided_slice %1 {offsets = [0, 1], sizes = [16, 622], strides = [1, 1]} : vector<16x676xf32> to vector<16x622xf32>
    %cst_19 = arith.constant dense<0.000000e+00> : vector<16x622xf32>
    %19 = tpu.matmul %17, %18, %cst_19 {dimension_numbers = #tpu.dot_dimension_numbers<[1], [0], [0], [1], [0, 0, 1, 1], [], []>} : vector<16x16xf32>, vector<16x622xf32>, vector<16x622xf32> -> vector<16x622xf32>
    %20 = arith.addf %15, %19 : vector<16x622xf32>
    %c2 = arith.constant 2 : index
    %c0_20 = arith.constant 0 : index
    %c0_21 = arith.constant 0 : index
    %21 = vector.load %arg10[%c2, %c0_20, %c0_21] : memref<9x16x16xf32, #tpu.memory_space<vmem>>, vector<1x16x16xf32>
    %22 = vector.shape_cast %21 : vector<1x16x16xf32> to vector<16x16xf32>
    %23 = vector.extract_strided_slice %1 {offsets = [0, 2], sizes = [16, 622], strides = [1, 1]} : vector<16x676xf32> to vector<16x622xf32>
    %cst_22 = arith.constant dense<0.000000e+00> : vector<16x622xf32>
    %24 = tpu.matmul %22, %23, %cst_22 {dimension_numbers = #tpu.dot_dimension_numbers<[1], [0], [0], [1], [0, 0, 1, 1], [], []>} : vector<16x16xf32>, vector<16x622xf32>, vector<16x622xf32> -> vector<16x622xf32>
    %25 = arith.addf %20, %24 : vector<16x622xf32>
    %c3 = arith.constant 3 : index
    %c0_23 = arith.constant 0 : index
    %c0_24 = arith.constant 0 : index
    %26 = vector.load %arg10[%c3, %c0_23, %c0_24] : memref<9x16x16xf32, #tpu.memory_space<vmem>>, vector<1x16x16xf32>
    %27 = vector.shape_cast %26 : vector<1x16x16xf32> to vector<16x16xf32>
    %28 = vector.extract_strided_slice %1 {offsets = [0, 26], sizes = [16, 622], strides = [1, 1]} : vector<16x676xf32> to vector<16x622xf32>
    %cst_25 = arith.constant dense<0.000000e+00> : vector<16x622xf32>
    %29 = tpu.matmul %27, %28, %cst_25 {dimension_numbers = #tpu.dot_dimension_numbers<[1], [0], [0], [1], [0, 0, 1, 1], [], []>} : vector<16x16xf32>, vector<16x622xf32>, vector<16x622xf32> -> vector<16x622xf32>
    %30 = arith.addf %25, %29 : vector<16x622xf32>
    %c4 = arith.constant 4 : index
    %c0_26 = arith.constant 0 : index
    %c0_27 = arith.constant 0 : index
    %31 = vector.load %arg10[%c4, %c0_26, %c0_27] : memref<9x16x16xf32, #tpu.memory_space<vmem>>, vector<1x16x16xf32>
    %32 = vector.shape_cast %31 : vector<1x16x16xf32> to vector<16x16xf32>
    %33 = vector.extract_strided_slice %1 {offsets = [0, 27], sizes = [16, 622], strides = [1, 1]} : vector<16x676xf32> to vector<16x622xf32>
    %cst_28 = arith.constant dense<0.000000e+00> : vector<16x622xf32>
    %34 = tpu.matmul %32, %33, %cst_28 {dimension_numbers = #tpu.dot_dimension_numbers<[1], [0], [0], [1], [0, 0, 1, 1], [], []>} : vector<16x16xf32>, vector<16x622xf32>, vector<16x622xf32> -> vector<16x622xf32>
    %35 = arith.addf %30, %34 : vector<16x622xf32>
    %c5 = arith.constant 5 : index
    %c0_29 = arith.constant 0 : index
    %c0_30 = arith.constant 0 : index
    %36 = vector.load %arg10[%c5, %c0_29, %c0_30] : memref<9x16x16xf32, #tpu.memory_space<vmem>>, vector<1x16x16xf32>
    %37 = vector.shape_cast %36 : vector<1x16x16xf32> to vector<16x16xf32>
    %38 = vector.extract_strided_slice %1 {offsets = [0, 28], sizes = [16, 622], strides = [1, 1]} : vector<16x676xf32> to vector<16x622xf32>
    %cst_31 = arith.constant dense<0.000000e+00> : vector<16x622xf32>
    %39 = tpu.matmul %37, %38, %cst_31 {dimension_numbers = #tpu.dot_dimension_numbers<[1], [0], [0], [1], [0, 0, 1, 1], [], []>} : vector<16x16xf32>, vector<16x622xf32>, vector<16x622xf32> -> vector<16x622xf32>
    %40 = arith.addf %35, %39 : vector<16x622xf32>
    %c6 = arith.constant 6 : index
    %c0_32 = arith.constant 0 : index
    %c0_33 = arith.constant 0 : index
    %41 = vector.load %arg10[%c6, %c0_32, %c0_33] : memref<9x16x16xf32, #tpu.memory_space<vmem>>, vector<1x16x16xf32>
    %42 = vector.shape_cast %41 : vector<1x16x16xf32> to vector<16x16xf32>
    %43 = vector.extract_strided_slice %1 {offsets = [0, 52], sizes = [16, 622], strides = [1, 1]} : vector<16x676xf32> to vector<16x622xf32>
    %cst_34 = arith.constant dense<0.000000e+00> : vector<16x622xf32>
    %44 = tpu.matmul %42, %43, %cst_34 {dimension_numbers = #tpu.dot_dimension_numbers<[1], [0], [0], [1], [0, 0, 1, 1], [], []>} : vector<16x16xf32>, vector<16x622xf32>, vector<16x622xf32> -> vector<16x622xf32>
    %45 = arith.addf %40, %44 : vector<16x622xf32>
    %c7 = arith.constant 7 : index
    %c0_35 = arith.constant 0 : index
    %c0_36 = arith.constant 0 : index
    %46 = vector.load %arg10[%c7, %c0_35, %c0_36] : memref<9x16x16xf32, #tpu.memory_space<vmem>>, vector<1x16x16xf32>
    %47 = vector.shape_cast %46 : vector<1x16x16xf32> to vector<16x16xf32>
    %48 = vector.extract_strided_slice %1 {offsets = [0, 53], sizes = [16, 622], strides = [1, 1]} : vector<16x676xf32> to vector<16x622xf32>
    %cst_37 = arith.constant dense<0.000000e+00> : vector<16x622xf32>
    %49 = tpu.matmul %47, %48, %cst_37 {dimension_numbers = #tpu.dot_dimension_numbers<[1], [0], [0], [1], [0, 0, 1, 1], [], []>} : vector<16x16xf32>, vector<16x622xf32>, vector<16x622xf32> -> vector<16x622xf32>
    %50 = arith.addf %45, %49 : vector<16x622xf32>
    %c8 = arith.constant 8 : index
    %c0_38 = arith.constant 0 : index
    %c0_39 = arith.constant 0 : index
    %51 = vector.load %arg10[%c8, %c0_38, %c0_39] : memref<9x16x16xf32, #tpu.memory_space<vmem>>, vector<1x16x16xf32>
    %52 = vector.shape_cast %51 : vector<1x16x16xf32> to vector<16x16xf32>
    %53 = vector.extract_strided_slice %1 {offsets = [0, 54], sizes = [16, 622], strides = [1, 1]} : vector<16x676xf32> to vector<16x622xf32>
    %cst_40 = arith.constant dense<0.000000e+00> : vector<16x622xf32>
    %54 = tpu.matmul %52, %53, %cst_40 {dimension_numbers = #tpu.dot_dimension_numbers<[1], [0], [0], [1], [0, 0, 1, 1], [], []>} : vector<16x16xf32>, vector<16x622xf32>, vector<16x622xf32> -> vector<16x622xf32>
    %55 = arith.addf %50, %54 : vector<16x622xf32>
    %56 = vector.broadcast %9 : vector<16x1xf32> to vector<16x622xf32>
    %57 = arith.addf %55, %56 : vector<16x622xf32>
    %cst_41 = arith.constant 0.000000e+00 : f32
    %58 = vector.broadcast %cst_41 : f32 to vector<16x27xf32>
    %cst_42 = arith.constant 0.000000e+00 : f32
    %59 = vector.broadcast %cst_42 : f32 to vector<16x27xf32>
    %60 = tpu.concatenate %58, %57, %59 in 1 : vector<16x27xf32>, vector<16x622xf32>, vector<16x27xf32> -> vector<16x676xf32>
    %61 = vector.broadcast %2 : vector<1x676xf32> to vector<16x676xf32>
    %62 = arith.mulf %60, %61 : vector<16x676xf32>
    %63 = arith.addf %62, %1 : vector<16x676xf32>
    %cst_43 = arith.constant 0.000000e+00 : f32
    %64 = vector.broadcast %cst_43 : f32 to vector<16x676xf32>
    %65 = arith.cmpf oge, %63, %64 : vector<16x676xf32>
    %cst_44 = arith.constant 5.000000e-02 : f32
    %66 = vector.broadcast %cst_44 : f32 to vector<16x676xf32>
    %67 = arith.mulf %66, %63 : vector<16x676xf32>
    %68 = arith.select %65, %63, %67 : vector<16x676xi1>, vector<16x676xf32>
    %c0_45 = arith.constant 0 : index
    %c0_46 = arith.constant 0 : index
    %69 = vector.load %arg12[%c0_45, %c0_46] : memref<8x16xf32, #tpu.memory_space<vmem>>, vector<8x16xf32>
    %c0_47 = arith.constant 0 : index
    %c0_48 = arith.constant 0 : index
    %70 = vector.load %arg13[%c0_47, %c0_48] : memref<8x1xf32, #tpu.memory_space<vmem>>, vector<8x1xf32>
    %cst_49 = arith.constant dense<0.000000e+00> : vector<8x676xf32>
    %71 = tpu.matmul %69, %68, %cst_49 {dimension_numbers = #tpu.dot_dimension_numbers<[1], [0], [0], [1], [0, 0, 1, 1], [], []>} : vector<8x16xf32>, vector<16x676xf32>, vector<8x676xf32> -> vector<8x676xf32>
    %72 = vector.broadcast %70 : vector<8x1xf32> to vector<8x676xf32>
    %73 = arith.addf %71, %72 : vector<8x676xf32>
    %c0_50 = arith.constant 0 : index
    %c0_51 = arith.constant 0 : index
    %74 = vector.load %arg15[%c0_50, %c0_51] : memref<16x1xf32, #tpu.memory_space<vmem>>, vector<16x1xf32>
    %cst_52 = arith.constant 0.000000e+00 : f32
    %75 = vector.broadcast %cst_52 : f32 to vector<16x622xf32>
    %c0_53 = arith.constant 0 : index
    %c0_54 = arith.constant 0 : index
    %c0_55 = arith.constant 0 : index
    %76 = vector.load %arg14[%c0_53, %c0_54, %c0_55] : memref<9x16x16xf32, #tpu.memory_space<vmem>>, vector<1x16x16xf32>
    %77 = vector.shape_cast %76 : vector<1x16x16xf32> to vector<16x16xf32>
    %78 = vector.extract_strided_slice %68 {offsets = [0, 0], sizes = [16, 622], strides = [1, 1]} : vector<16x676xf32> to vector<16x622xf32>
    %cst_56 = arith.constant dense<0.000000e+00> : vector<16x622xf32>
    %79 = tpu.matmul %77, %78, %cst_56 {dimension_numbers = #tpu.dot_dimension_numbers<[1], [0], [0], [1], [0, 0, 1, 1], [], []>} : vector<16x16xf32>, vector<16x622xf32>, vector<16x622xf32> -> vector<16x622xf32>
    %80 = arith.addf %75, %79 : vector<16x622xf32>
    %c1_57 = arith.constant 1 : index
    %c0_58 = arith.constant 0 : index
    %c0_59 = arith.constant 0 : index
    %81 = vector.load %arg14[%c1_57, %c0_58, %c0_59] : memref<9x16x16xf32, #tpu.memory_space<vmem>>, vector<1x16x16xf32>
    %82 = vector.shape_cast %81 : vector<1x16x16xf32> to vector<16x16xf32>
    %83 = vector.extract_strided_slice %68 {offsets = [0, 1], sizes = [16, 622], strides = [1, 1]} : vector<16x676xf32> to vector<16x622xf32>
    %cst_60 = arith.constant dense<0.000000e+00> : vector<16x622xf32>
    %84 = tpu.matmul %82, %83, %cst_60 {dimension_numbers = #tpu.dot_dimension_numbers<[1], [0], [0], [1], [0, 0, 1, 1], [], []>} : vector<16x16xf32>, vector<16x622xf32>, vector<16x622xf32> -> vector<16x622xf32>
    %85 = arith.addf %80, %84 : vector<16x622xf32>
    %c2_61 = arith.constant 2 : index
    %c0_62 = arith.constant 0 : index
    %c0_63 = arith.constant 0 : index
    %86 = vector.load %arg14[%c2_61, %c0_62, %c0_63] : memref<9x16x16xf32, #tpu.memory_space<vmem>>, vector<1x16x16xf32>
    %87 = vector.shape_cast %86 : vector<1x16x16xf32> to vector<16x16xf32>
    %88 = vector.extract_strided_slice %68 {offsets = [0, 2], sizes = [16, 622], strides = [1, 1]} : vector<16x676xf32> to vector<16x622xf32>
    %cst_64 = arith.constant dense<0.000000e+00> : vector<16x622xf32>
    %89 = tpu.matmul %87, %88, %cst_64 {dimension_numbers = #tpu.dot_dimension_numbers<[1], [0], [0], [1], [0, 0, 1, 1], [], []>} : vector<16x16xf32>, vector<16x622xf32>, vector<16x622xf32> -> vector<16x622xf32>
    %90 = arith.addf %85, %89 : vector<16x622xf32>
    %c3_65 = arith.constant 3 : index
    %c0_66 = arith.constant 0 : index
    %c0_67 = arith.constant 0 : index
    %91 = vector.load %arg14[%c3_65, %c0_66, %c0_67] : memref<9x16x16xf32, #tpu.memory_space<vmem>>, vector<1x16x16xf32>
    %92 = vector.shape_cast %91 : vector<1x16x16xf32> to vector<16x16xf32>
    %93 = vector.extract_strided_slice %68 {offsets = [0, 26], sizes = [16, 622], strides = [1, 1]} : vector<16x676xf32> to vector<16x622xf32>
    %cst_68 = arith.constant dense<0.000000e+00> : vector<16x622xf32>
    %94 = tpu.matmul %92, %93, %cst_68 {dimension_numbers = #tpu.dot_dimension_numbers<[1], [0], [0], [1], [0, 0, 1, 1], [], []>} : vector<16x16xf32>, vector<16x622xf32>, vector<16x622xf32> -> vector<16x622xf32>
    %95 = arith.addf %90, %94 : vector<16x622xf32>
    %c4_69 = arith.constant 4 : index
    %c0_70 = arith.constant 0 : index
    %c0_71 = arith.constant 0 : index
    %96 = vector.load %arg14[%c4_69, %c0_70, %c0_71] : memref<9x16x16xf32, #tpu.memory_space<vmem>>, vector<1x16x16xf32>
    %97 = vector.shape_cast %96 : vector<1x16x16xf32> to vector<16x16xf32>
    %98 = vector.extract_strided_slice %68 {offsets = [0, 27], sizes = [16, 622], strides = [1, 1]} : vector<16x676xf32> to vector<16x622xf32>
    %cst_72 = arith.constant dense<0.000000e+00> : vector<16x622xf32>
    %99 = tpu.matmul %97, %98, %cst_72 {dimension_numbers = #tpu.dot_dimension_numbers<[1], [0], [0], [1], [0, 0, 1, 1], [], []>} : vector<16x16xf32>, vector<16x622xf32>, vector<16x622xf32> -> vector<16x622xf32>
    %100 = arith.addf %95, %99 : vector<16x622xf32>
    %c5_73 = arith.constant 5 : index
    %c0_74 = arith.constant 0 : index
    %c0_75 = arith.constant 0 : index
    %101 = vector.load %arg14[%c5_73, %c0_74, %c0_75] : memref<9x16x16xf32, #tpu.memory_space<vmem>>, vector<1x16x16xf32>
    %102 = vector.shape_cast %101 : vector<1x16x16xf32> to vector<16x16xf32>
    %103 = vector.extract_strided_slice %68 {offsets = [0, 28], sizes = [16, 622], strides = [1, 1]} : vector<16x676xf32> to vector<16x622xf32>
    %cst_76 = arith.constant dense<0.000000e+00> : vector<16x622xf32>
    %104 = tpu.matmul %102, %103, %cst_76 {dimension_numbers = #tpu.dot_dimension_numbers<[1], [0], [0], [1], [0, 0, 1, 1], [], []>} : vector<16x16xf32>, vector<16x622xf32>, vector<16x622xf32> -> vector<16x622xf32>
    %105 = arith.addf %100, %104 : vector<16x622xf32>
    %c6_77 = arith.constant 6 : index
    %c0_78 = arith.constant 0 : index
    %c0_79 = arith.constant 0 : index
    %106 = vector.load %arg14[%c6_77, %c0_78, %c0_79] : memref<9x16x16xf32, #tpu.memory_space<vmem>>, vector<1x16x16xf32>
    %107 = vector.shape_cast %106 : vector<1x16x16xf32> to vector<16x16xf32>
    %108 = vector.extract_strided_slice %68 {offsets = [0, 52], sizes = [16, 622], strides = [1, 1]} : vector<16x676xf32> to vector<16x622xf32>
    %cst_80 = arith.constant dense<0.000000e+00> : vector<16x622xf32>
    %109 = tpu.matmul %107, %108, %cst_80 {dimension_numbers = #tpu.dot_dimension_numbers<[1], [0], [0], [1], [0, 0, 1, 1], [], []>} : vector<16x16xf32>, vector<16x622xf32>, vector<16x622xf32> -> vector<16x622xf32>
    %110 = arith.addf %105, %109 : vector<16x622xf32>
    %c7_81 = arith.constant 7 : index
    %c0_82 = arith.constant 0 : index
    %c0_83 = arith.constant 0 : index
    %111 = vector.load %arg14[%c7_81, %c0_82, %c0_83] : memref<9x16x16xf32, #tpu.memory_space<vmem>>, vector<1x16x16xf32>
    %112 = vector.shape_cast %111 : vector<1x16x16xf32> to vector<16x16xf32>
    %113 = vector.extract_strided_slice %68 {offsets = [0, 53], sizes = [16, 622], strides = [1, 1]} : vector<16x676xf32> to vector<16x622xf32>
    %cst_84 = arith.constant dense<0.000000e+00> : vector<16x622xf32>
    %114 = tpu.matmul %112, %113, %cst_84 {dimension_numbers = #tpu.dot_dimension_numbers<[1], [0], [0], [1], [0, 0, 1, 1], [], []>} : vector<16x16xf32>, vector<16x622xf32>, vector<16x622xf32> -> vector<16x622xf32>
    %115 = arith.addf %110, %114 : vector<16x622xf32>
    %c8_85 = arith.constant 8 : index
    %c0_86 = arith.constant 0 : index
    %c0_87 = arith.constant 0 : index
    %116 = vector.load %arg14[%c8_85, %c0_86, %c0_87] : memref<9x16x16xf32, #tpu.memory_space<vmem>>, vector<1x16x16xf32>
    %117 = vector.shape_cast %116 : vector<1x16x16xf32> to vector<16x16xf32>
    %118 = vector.extract_strided_slice %68 {offsets = [0, 54], sizes = [16, 622], strides = [1, 1]} : vector<16x676xf32> to vector<16x622xf32>
    %cst_88 = arith.constant dense<0.000000e+00> : vector<16x622xf32>
    %119 = tpu.matmul %117, %118, %cst_88 {dimension_numbers = #tpu.dot_dimension_numbers<[1], [0], [0], [1], [0, 0, 1, 1], [], []>} : vector<16x16xf32>, vector<16x622xf32>, vector<16x622xf32> -> vector<16x622xf32>
    %120 = arith.addf %115, %119 : vector<16x622xf32>
    %121 = vector.broadcast %74 : vector<16x1xf32> to vector<16x622xf32>
    %122 = arith.addf %120, %121 : vector<16x622xf32>
    %cst_89 = arith.constant 0.000000e+00 : f32
    %123 = vector.broadcast %cst_89 : f32 to vector<16x27xf32>
    %cst_90 = arith.constant 0.000000e+00 : f32
    %124 = vector.broadcast %cst_90 : f32 to vector<16x27xf32>
    %125 = tpu.concatenate %123, %122, %124 in 1 : vector<16x27xf32>, vector<16x622xf32>, vector<16x27xf32> -> vector<16x676xf32>
    %126 = vector.broadcast %2 : vector<1x676xf32> to vector<16x676xf32>
    %127 = arith.mulf %125, %126 : vector<16x676xf32>
    %128 = arith.addf %127, %68 : vector<16x676xf32>
    %cst_91 = arith.constant 0.000000e+00 : f32
    %129 = vector.broadcast %cst_91 : f32 to vector<16x676xf32>
    %130 = arith.cmpf oge, %128, %129 : vector<16x676xf32>
    %cst_92 = arith.constant 5.000000e-02 : f32
    %131 = vector.broadcast %cst_92 : f32 to vector<16x676xf32>
    %132 = arith.mulf %131, %128 : vector<16x676xf32>
    %133 = arith.select %130, %128, %132 : vector<16x676xi1>, vector<16x676xf32>
    %c0_93 = arith.constant 0 : index
    %c0_94 = arith.constant 0 : index
    %134 = vector.load %arg16[%c0_93, %c0_94] : memref<8x16xf32, #tpu.memory_space<vmem>>, vector<8x16xf32>
    %c0_95 = arith.constant 0 : index
    %c0_96 = arith.constant 0 : index
    %135 = vector.load %arg17[%c0_95, %c0_96] : memref<8x1xf32, #tpu.memory_space<vmem>>, vector<8x1xf32>
    %cst_97 = arith.constant dense<0.000000e+00> : vector<8x676xf32>
    %136 = tpu.matmul %134, %133, %cst_97 {dimension_numbers = #tpu.dot_dimension_numbers<[1], [0], [0], [1], [0, 0, 1, 1], [], []>} : vector<8x16xf32>, vector<16x676xf32>, vector<8x676xf32> -> vector<8x676xf32>
    %137 = vector.broadcast %135 : vector<8x1xf32> to vector<8x676xf32>
    %138 = arith.addf %136, %137 : vector<8x676xf32>
    %c0_98 = arith.constant 0 : index
    %c0_99 = arith.constant 0 : index
    %139 = vector.load %arg19[%c0_98, %c0_99] : memref<16x1xf32, #tpu.memory_space<vmem>>, vector<16x1xf32>
    %cst_100 = arith.constant 0.000000e+00 : f32
    %140 = vector.broadcast %cst_100 : f32 to vector<16x622xf32>
    %c0_101 = arith.constant 0 : index
    %c0_102 = arith.constant 0 : index
    %c0_103 = arith.constant 0 : index
    %141 = vector.load %arg18[%c0_101, %c0_102, %c0_103] : memref<9x16x16xf32, #tpu.memory_space<vmem>>, vector<1x16x16xf32>
    %142 = vector.shape_cast %141 : vector<1x16x16xf32> to vector<16x16xf32>
    %143 = vector.extract_strided_slice %133 {offsets = [0, 0], sizes = [16, 622], strides = [1, 1]} : vector<16x676xf32> to vector<16x622xf32>
    %cst_104 = arith.constant dense<0.000000e+00> : vector<16x622xf32>
    %144 = tpu.matmul %142, %143, %cst_104 {dimension_numbers = #tpu.dot_dimension_numbers<[1], [0], [0], [1], [0, 0, 1, 1], [], []>} : vector<16x16xf32>, vector<16x622xf32>, vector<16x622xf32> -> vector<16x622xf32>
    %145 = arith.addf %140, %144 : vector<16x622xf32>
    %c1_105 = arith.constant 1 : index
    %c0_106 = arith.constant 0 : index
    %c0_107 = arith.constant 0 : index
    %146 = vector.load %arg18[%c1_105, %c0_106, %c0_107] : memref<9x16x16xf32, #tpu.memory_space<vmem>>, vector<1x16x16xf32>
    %147 = vector.shape_cast %146 : vector<1x16x16xf32> to vector<16x16xf32>
    %148 = vector.extract_strided_slice %133 {offsets = [0, 1], sizes = [16, 622], strides = [1, 1]} : vector<16x676xf32> to vector<16x622xf32>
    %cst_108 = arith.constant dense<0.000000e+00> : vector<16x622xf32>
    %149 = tpu.matmul %147, %148, %cst_108 {dimension_numbers = #tpu.dot_dimension_numbers<[1], [0], [0], [1], [0, 0, 1, 1], [], []>} : vector<16x16xf32>, vector<16x622xf32>, vector<16x622xf32> -> vector<16x622xf32>
    %150 = arith.addf %145, %149 : vector<16x622xf32>
    %c2_109 = arith.constant 2 : index
    %c0_110 = arith.constant 0 : index
    %c0_111 = arith.constant 0 : index
    %151 = vector.load %arg18[%c2_109, %c0_110, %c0_111] : memref<9x16x16xf32, #tpu.memory_space<vmem>>, vector<1x16x16xf32>
    %152 = vector.shape_cast %151 : vector<1x16x16xf32> to vector<16x16xf32>
    %153 = vector.extract_strided_slice %133 {offsets = [0, 2], sizes = [16, 622], strides = [1, 1]} : vector<16x676xf32> to vector<16x622xf32>
    %cst_112 = arith.constant dense<0.000000e+00> : vector<16x622xf32>
    %154 = tpu.matmul %152, %153, %cst_112 {dimension_numbers = #tpu.dot_dimension_numbers<[1], [0], [0], [1], [0, 0, 1, 1], [], []>} : vector<16x16xf32>, vector<16x622xf32>, vector<16x622xf32> -> vector<16x622xf32>
    %155 = arith.addf %150, %154 : vector<16x622xf32>
    %c3_113 = arith.constant 3 : index
    %c0_114 = arith.constant 0 : index
    %c0_115 = arith.constant 0 : index
    %156 = vector.load %arg18[%c3_113, %c0_114, %c0_115] : memref<9x16x16xf32, #tpu.memory_space<vmem>>, vector<1x16x16xf32>
    %157 = vector.shape_cast %156 : vector<1x16x16xf32> to vector<16x16xf32>
    %158 = vector.extract_strided_slice %133 {offsets = [0, 26], sizes = [16, 622], strides = [1, 1]} : vector<16x676xf32> to vector<16x622xf32>
    %cst_116 = arith.constant dense<0.000000e+00> : vector<16x622xf32>
    %159 = tpu.matmul %157, %158, %cst_116 {dimension_numbers = #tpu.dot_dimension_numbers<[1], [0], [0], [1], [0, 0, 1, 1], [], []>} : vector<16x16xf32>, vector<16x622xf32>, vector<16x622xf32> -> vector<16x622xf32>
    %160 = arith.addf %155, %159 : vector<16x622xf32>
    %c4_117 = arith.constant 4 : index
    %c0_118 = arith.constant 0 : index
    %c0_119 = arith.constant 0 : index
    %161 = vector.load %arg18[%c4_117, %c0_118, %c0_119] : memref<9x16x16xf32, #tpu.memory_space<vmem>>, vector<1x16x16xf32>
    %162 = vector.shape_cast %161 : vector<1x16x16xf32> to vector<16x16xf32>
    %163 = vector.extract_strided_slice %133 {offsets = [0, 27], sizes = [16, 622], strides = [1, 1]} : vector<16x676xf32> to vector<16x622xf32>
    %cst_120 = arith.constant dense<0.000000e+00> : vector<16x622xf32>
    %164 = tpu.matmul %162, %163, %cst_120 {dimension_numbers = #tpu.dot_dimension_numbers<[1], [0], [0], [1], [0, 0, 1, 1], [], []>} : vector<16x16xf32>, vector<16x622xf32>, vector<16x622xf32> -> vector<16x622xf32>
    %165 = arith.addf %160, %164 : vector<16x622xf32>
    %c5_121 = arith.constant 5 : index
    %c0_122 = arith.constant 0 : index
    %c0_123 = arith.constant 0 : index
    %166 = vector.load %arg18[%c5_121, %c0_122, %c0_123] : memref<9x16x16xf32, #tpu.memory_space<vmem>>, vector<1x16x16xf32>
    %167 = vector.shape_cast %166 : vector<1x16x16xf32> to vector<16x16xf32>
    %168 = vector.extract_strided_slice %133 {offsets = [0, 28], sizes = [16, 622], strides = [1, 1]} : vector<16x676xf32> to vector<16x622xf32>
    %cst_124 = arith.constant dense<0.000000e+00> : vector<16x622xf32>
    %169 = tpu.matmul %167, %168, %cst_124 {dimension_numbers = #tpu.dot_dimension_numbers<[1], [0], [0], [1], [0, 0, 1, 1], [], []>} : vector<16x16xf32>, vector<16x622xf32>, vector<16x622xf32> -> vector<16x622xf32>
    %170 = arith.addf %165, %169 : vector<16x622xf32>
    %c6_125 = arith.constant 6 : index
    %c0_126 = arith.constant 0 : index
    %c0_127 = arith.constant 0 : index
    %171 = vector.load %arg18[%c6_125, %c0_126, %c0_127] : memref<9x16x16xf32, #tpu.memory_space<vmem>>, vector<1x16x16xf32>
    %172 = vector.shape_cast %171 : vector<1x16x16xf32> to vector<16x16xf32>
    %173 = vector.extract_strided_slice %133 {offsets = [0, 52], sizes = [16, 622], strides = [1, 1]} : vector<16x676xf32> to vector<16x622xf32>
    %cst_128 = arith.constant dense<0.000000e+00> : vector<16x622xf32>
    %174 = tpu.matmul %172, %173, %cst_128 {dimension_numbers = #tpu.dot_dimension_numbers<[1], [0], [0], [1], [0, 0, 1, 1], [], []>} : vector<16x16xf32>, vector<16x622xf32>, vector<16x622xf32> -> vector<16x622xf32>
    %175 = arith.addf %170, %174 : vector<16x622xf32>
    %c7_129 = arith.constant 7 : index
    %c0_130 = arith.constant 0 : index
    %c0_131 = arith.constant 0 : index
    %176 = vector.load %arg18[%c7_129, %c0_130, %c0_131] : memref<9x16x16xf32, #tpu.memory_space<vmem>>, vector<1x16x16xf32>
    %177 = vector.shape_cast %176 : vector<1x16x16xf32> to vector<16x16xf32>
    %178 = vector.extract_strided_slice %133 {offsets = [0, 53], sizes = [16, 622], strides = [1, 1]} : vector<16x676xf32> to vector<16x622xf32>
    %cst_132 = arith.constant dense<0.000000e+00> : vector<16x622xf32>
    %179 = tpu.matmul %177, %178, %cst_132 {dimension_numbers = #tpu.dot_dimension_numbers<[1], [0], [0], [1], [0, 0, 1, 1], [], []>} : vector<16x16xf32>, vector<16x622xf32>, vector<16x622xf32> -> vector<16x622xf32>
    %180 = arith.addf %175, %179 : vector<16x622xf32>
    %c8_133 = arith.constant 8 : index
    %c0_134 = arith.constant 0 : index
    %c0_135 = arith.constant 0 : index
    %181 = vector.load %arg18[%c8_133, %c0_134, %c0_135] : memref<9x16x16xf32, #tpu.memory_space<vmem>>, vector<1x16x16xf32>
    %182 = vector.shape_cast %181 : vector<1x16x16xf32> to vector<16x16xf32>
    %183 = vector.extract_strided_slice %133 {offsets = [0, 54], sizes = [16, 622], strides = [1, 1]} : vector<16x676xf32> to vector<16x622xf32>
    %cst_136 = arith.constant dense<0.000000e+00> : vector<16x622xf32>
    %184 = tpu.matmul %182, %183, %cst_136 {dimension_numbers = #tpu.dot_dimension_numbers<[1], [0], [0], [1], [0, 0, 1, 1], [], []>} : vector<16x16xf32>, vector<16x622xf32>, vector<16x622xf32> -> vector<16x622xf32>
    %185 = arith.addf %180, %184 : vector<16x622xf32>
    %186 = vector.broadcast %139 : vector<16x1xf32> to vector<16x622xf32>
    %187 = arith.addf %185, %186 : vector<16x622xf32>
    %cst_137 = arith.constant 0.000000e+00 : f32
    %188 = vector.broadcast %cst_137 : f32 to vector<16x27xf32>
    %cst_138 = arith.constant 0.000000e+00 : f32
    %189 = vector.broadcast %cst_138 : f32 to vector<16x27xf32>
    %190 = tpu.concatenate %188, %187, %189 in 1 : vector<16x27xf32>, vector<16x622xf32>, vector<16x27xf32> -> vector<16x676xf32>
    %191 = vector.broadcast %2 : vector<1x676xf32> to vector<16x676xf32>
    %192 = arith.mulf %190, %191 : vector<16x676xf32>
    %193 = arith.addf %192, %133 : vector<16x676xf32>
    %cst_139 = arith.constant 0.000000e+00 : f32
    %194 = vector.broadcast %cst_139 : f32 to vector<16x676xf32>
    %195 = arith.cmpf oge, %193, %194 : vector<16x676xf32>
    %cst_140 = arith.constant 5.000000e-02 : f32
    %196 = vector.broadcast %cst_140 : f32 to vector<16x676xf32>
    %197 = arith.mulf %196, %193 : vector<16x676xf32>
    %198 = arith.select %195, %193, %197 : vector<16x676xi1>, vector<16x676xf32>
    %c0_141 = arith.constant 0 : index
    %c0_142 = arith.constant 0 : index
    %199 = vector.load %arg21[%c0_141, %c0_142] : memref<8x1xf32, #tpu.memory_space<vmem>>, vector<8x1xf32>
    %cst_143 = arith.constant 0.000000e+00 : f32
    %200 = vector.broadcast %cst_143 : f32 to vector<8x622xf32>
    %c0_144 = arith.constant 0 : index
    %c0_145 = arith.constant 0 : index
    %c0_146 = arith.constant 0 : index
    %201 = vector.load %arg20[%c0_144, %c0_145, %c0_146] : memref<9x8x16xf32, #tpu.memory_space<vmem>>, vector<1x8x16xf32>
    %202 = vector.shape_cast %201 : vector<1x8x16xf32> to vector<8x16xf32>
    %203 = vector.extract_strided_slice %198 {offsets = [0, 0], sizes = [16, 622], strides = [1, 1]} : vector<16x676xf32> to vector<16x622xf32>
    %cst_147 = arith.constant dense<0.000000e+00> : vector<8x622xf32>
    %204 = tpu.matmul %202, %203, %cst_147 {dimension_numbers = #tpu.dot_dimension_numbers<[1], [0], [0], [1], [0, 0, 1, 1], [], []>} : vector<8x16xf32>, vector<16x622xf32>, vector<8x622xf32> -> vector<8x622xf32>
    %205 = arith.addf %200, %204 : vector<8x622xf32>
    %c1_148 = arith.constant 1 : index
    %c0_149 = arith.constant 0 : index
    %c0_150 = arith.constant 0 : index
    %206 = vector.load %arg20[%c1_148, %c0_149, %c0_150] : memref<9x8x16xf32, #tpu.memory_space<vmem>>, vector<1x8x16xf32>
    %207 = vector.shape_cast %206 : vector<1x8x16xf32> to vector<8x16xf32>
    %208 = vector.extract_strided_slice %198 {offsets = [0, 1], sizes = [16, 622], strides = [1, 1]} : vector<16x676xf32> to vector<16x622xf32>
    %cst_151 = arith.constant dense<0.000000e+00> : vector<8x622xf32>
    %209 = tpu.matmul %207, %208, %cst_151 {dimension_numbers = #tpu.dot_dimension_numbers<[1], [0], [0], [1], [0, 0, 1, 1], [], []>} : vector<8x16xf32>, vector<16x622xf32>, vector<8x622xf32> -> vector<8x622xf32>
    %210 = arith.addf %205, %209 : vector<8x622xf32>
    %c2_152 = arith.constant 2 : index
    %c0_153 = arith.constant 0 : index
    %c0_154 = arith.constant 0 : index
    %211 = vector.load %arg20[%c2_152, %c0_153, %c0_154] : memref<9x8x16xf32, #tpu.memory_space<vmem>>, vector<1x8x16xf32>
    %212 = vector.shape_cast %211 : vector<1x8x16xf32> to vector<8x16xf32>
    %213 = vector.extract_strided_slice %198 {offsets = [0, 2], sizes = [16, 622], strides = [1, 1]} : vector<16x676xf32> to vector<16x622xf32>
    %cst_155 = arith.constant dense<0.000000e+00> : vector<8x622xf32>
    %214 = tpu.matmul %212, %213, %cst_155 {dimension_numbers = #tpu.dot_dimension_numbers<[1], [0], [0], [1], [0, 0, 1, 1], [], []>} : vector<8x16xf32>, vector<16x622xf32>, vector<8x622xf32> -> vector<8x622xf32>
    %215 = arith.addf %210, %214 : vector<8x622xf32>
    %c3_156 = arith.constant 3 : index
    %c0_157 = arith.constant 0 : index
    %c0_158 = arith.constant 0 : index
    %216 = vector.load %arg20[%c3_156, %c0_157, %c0_158] : memref<9x8x16xf32, #tpu.memory_space<vmem>>, vector<1x8x16xf32>
    %217 = vector.shape_cast %216 : vector<1x8x16xf32> to vector<8x16xf32>
    %218 = vector.extract_strided_slice %198 {offsets = [0, 26], sizes = [16, 622], strides = [1, 1]} : vector<16x676xf32> to vector<16x622xf32>
    %cst_159 = arith.constant dense<0.000000e+00> : vector<8x622xf32>
    %219 = tpu.matmul %217, %218, %cst_159 {dimension_numbers = #tpu.dot_dimension_numbers<[1], [0], [0], [1], [0, 0, 1, 1], [], []>} : vector<8x16xf32>, vector<16x622xf32>, vector<8x622xf32> -> vector<8x622xf32>
    %220 = arith.addf %215, %219 : vector<8x622xf32>
    %c4_160 = arith.constant 4 : index
    %c0_161 = arith.constant 0 : index
    %c0_162 = arith.constant 0 : index
    %221 = vector.load %arg20[%c4_160, %c0_161, %c0_162] : memref<9x8x16xf32, #tpu.memory_space<vmem>>, vector<1x8x16xf32>
    %222 = vector.shape_cast %221 : vector<1x8x16xf32> to vector<8x16xf32>
    %223 = vector.extract_strided_slice %198 {offsets = [0, 27], sizes = [16, 622], strides = [1, 1]} : vector<16x676xf32> to vector<16x622xf32>
    %cst_163 = arith.constant dense<0.000000e+00> : vector<8x622xf32>
    %224 = tpu.matmul %222, %223, %cst_163 {dimension_numbers = #tpu.dot_dimension_numbers<[1], [0], [0], [1], [0, 0, 1, 1], [], []>} : vector<8x16xf32>, vector<16x622xf32>, vector<8x622xf32> -> vector<8x622xf32>
    %225 = arith.addf %220, %224 : vector<8x622xf32>
    %c5_164 = arith.constant 5 : index
    %c0_165 = arith.constant 0 : index
    %c0_166 = arith.constant 0 : index
    %226 = vector.load %arg20[%c5_164, %c0_165, %c0_166] : memref<9x8x16xf32, #tpu.memory_space<vmem>>, vector<1x8x16xf32>
    %227 = vector.shape_cast %226 : vector<1x8x16xf32> to vector<8x16xf32>
    %228 = vector.extract_strided_slice %198 {offsets = [0, 28], sizes = [16, 622], strides = [1, 1]} : vector<16x676xf32> to vector<16x622xf32>
    %cst_167 = arith.constant dense<0.000000e+00> : vector<8x622xf32>
    %229 = tpu.matmul %227, %228, %cst_167 {dimension_numbers = #tpu.dot_dimension_numbers<[1], [0], [0], [1], [0, 0, 1, 1], [], []>} : vector<8x16xf32>, vector<16x622xf32>, vector<8x622xf32> -> vector<8x622xf32>
    %230 = arith.addf %225, %229 : vector<8x622xf32>
    %c6_168 = arith.constant 6 : index
    %c0_169 = arith.constant 0 : index
    %c0_170 = arith.constant 0 : index
    %231 = vector.load %arg20[%c6_168, %c0_169, %c0_170] : memref<9x8x16xf32, #tpu.memory_space<vmem>>, vector<1x8x16xf32>
    %232 = vector.shape_cast %231 : vector<1x8x16xf32> to vector<8x16xf32>
    %233 = vector.extract_strided_slice %198 {offsets = [0, 52], sizes = [16, 622], strides = [1, 1]} : vector<16x676xf32> to vector<16x622xf32>
    %cst_171 = arith.constant dense<0.000000e+00> : vector<8x622xf32>
    %234 = tpu.matmul %232, %233, %cst_171 {dimension_numbers = #tpu.dot_dimension_numbers<[1], [0], [0], [1], [0, 0, 1, 1], [], []>} : vector<8x16xf32>, vector<16x622xf32>, vector<8x622xf32> -> vector<8x622xf32>
    %235 = arith.addf %230, %234 : vector<8x622xf32>
    %c7_172 = arith.constant 7 : index
    %c0_173 = arith.constant 0 : index
    %c0_174 = arith.constant 0 : index
    %236 = vector.load %arg20[%c7_172, %c0_173, %c0_174] : memref<9x8x16xf32, #tpu.memory_space<vmem>>, vector<1x8x16xf32>
    %237 = vector.shape_cast %236 : vector<1x8x16xf32> to vector<8x16xf32>
    %238 = vector.extract_strided_slice %198 {offsets = [0, 53], sizes = [16, 622], strides = [1, 1]} : vector<16x676xf32> to vector<16x622xf32>
    %cst_175 = arith.constant dense<0.000000e+00> : vector<8x622xf32>
    %239 = tpu.matmul %237, %238, %cst_175 {dimension_numbers = #tpu.dot_dimension_numbers<[1], [0], [0], [1], [0, 0, 1, 1], [], []>} : vector<8x16xf32>, vector<16x622xf32>, vector<8x622xf32> -> vector<8x622xf32>
    %240 = arith.addf %235, %239 : vector<8x622xf32>
    %c8_176 = arith.constant 8 : index
    %c0_177 = arith.constant 0 : index
    %c0_178 = arith.constant 0 : index
    %241 = vector.load %arg20[%c8_176, %c0_177, %c0_178] : memref<9x8x16xf32, #tpu.memory_space<vmem>>, vector<1x8x16xf32>
    %242 = vector.shape_cast %241 : vector<1x8x16xf32> to vector<8x16xf32>
    %243 = vector.extract_strided_slice %198 {offsets = [0, 54], sizes = [16, 622], strides = [1, 1]} : vector<16x676xf32> to vector<16x622xf32>
    %cst_179 = arith.constant dense<0.000000e+00> : vector<8x622xf32>
    %244 = tpu.matmul %242, %243, %cst_179 {dimension_numbers = #tpu.dot_dimension_numbers<[1], [0], [0], [1], [0, 0, 1, 1], [], []>} : vector<8x16xf32>, vector<16x622xf32>, vector<8x622xf32> -> vector<8x622xf32>
    %245 = arith.addf %240, %244 : vector<8x622xf32>
    %246 = vector.broadcast %199 : vector<8x1xf32> to vector<8x622xf32>
    %247 = arith.addf %245, %246 : vector<8x622xf32>
    %cst_180 = arith.constant 0.000000e+00 : f32
    %248 = vector.broadcast %cst_180 : f32 to vector<8x27xf32>
    %cst_181 = arith.constant 0.000000e+00 : f32
    %249 = vector.broadcast %cst_181 : f32 to vector<8x27xf32>
    %250 = tpu.concatenate %248, %247, %249 in 1 : vector<8x27xf32>, vector<8x622xf32>, vector<8x27xf32> -> vector<8x676xf32>
    %251 = vector.broadcast %2 : vector<1x676xf32> to vector<8x676xf32>
    %252 = arith.mulf %250, %251 : vector<8x676xf32>
    %253 = tpu.concatenate %8, %73, %138, %252 in 0 : vector<8x676xf32>, vector<8x676xf32>, vector<8x676xf32>, vector<8x676xf32> -> vector<32x676xf32>
    %cst_182 = arith.constant 0.000000e+00 : f32
    %254 = vector.broadcast %cst_182 : f32 to vector<32x676xf32>
    %255 = arith.cmpf oge, %253, %254 : vector<32x676xf32>
    %cst_183 = arith.constant 5.000000e-02 : f32
    %256 = vector.broadcast %cst_183 : f32 to vector<32x676xf32>
    %257 = arith.mulf %256, %253 : vector<32x676xf32>
    %258 = arith.select %255, %253, %257 : vector<32x676xi1>, vector<32x676xf32>
    %c0_184 = arith.constant 0 : index
    %c0_185 = arith.constant 0 : index
    %259 = vector.load %arg22[%c0_184, %c0_185] : memref<16x32xf32, #tpu.memory_space<vmem>>, vector<16x32xf32>
    %c0_186 = arith.constant 0 : index
    %c0_187 = arith.constant 0 : index
    %260 = vector.load %arg23[%c0_186, %c0_187] : memref<16x1xf32, #tpu.memory_space<vmem>>, vector<16x1xf32>
    %cst_188 = arith.constant dense<0.000000e+00> : vector<16x676xf32>
    %261 = tpu.matmul %259, %258, %cst_188 {dimension_numbers = #tpu.dot_dimension_numbers<[1], [0], [0], [1], [0, 0, 1, 1], [], []>} : vector<16x32xf32>, vector<32x676xf32>, vector<16x676xf32> -> vector<16x676xf32>
    %262 = vector.broadcast %260 : vector<16x1xf32> to vector<16x676xf32>
    %263 = arith.addf %261, %262 : vector<16x676xf32>
    %c0_189 = arith.constant 0 : index
    %c0_190 = arith.constant 0 : index
    %264 = vector.load %arg24[%c0_189, %c0_190] : memref<4x16xf32, #tpu.memory_space<vmem>>, vector<4x16xf32>
    %c0_191 = arith.constant 0 : index
    %c0_192 = arith.constant 0 : index
    %265 = vector.load %arg25[%c0_191, %c0_192] : memref<4x1xf32, #tpu.memory_space<vmem>>, vector<4x1xf32>
    %cst_193 = arith.constant dense<0.000000e+00> : vector<4x676xf32>
    %266 = tpu.matmul %264, %263, %cst_193 {dimension_numbers = #tpu.dot_dimension_numbers<[1], [0], [0], [1], [0, 0, 1, 1], [], []>} : vector<4x16xf32>, vector<16x676xf32>, vector<4x676xf32> -> vector<4x676xf32>
    %267 = vector.broadcast %265 : vector<4x1xf32> to vector<4x676xf32>
    %268 = arith.addf %266, %267 : vector<4x676xf32>
    %cst_194 = arith.constant 0.000000e+00 : f32
    %269 = vector.broadcast %cst_194 : f32 to vector<4x622xf32>
    %c0_195 = arith.constant 0 : index
    %c0_196 = arith.constant 0 : index
    %c0_197 = arith.constant 0 : index
    %270 = vector.load %arg28[%c0_195, %c0_196, %c0_197] : memref<9x4x4xf32, #tpu.memory_space<vmem>>, vector<1x4x4xf32>
    %271 = vector.shape_cast %270 : vector<1x4x4xf32> to vector<4x4xf32>
    %272 = vector.extract_strided_slice %268 {offsets = [0, 0], sizes = [4, 622], strides = [1, 1]} : vector<4x676xf32> to vector<4x622xf32>
    %cst_198 = arith.constant dense<0.000000e+00> : vector<4x622xf32>
    %273 = tpu.matmul %271, %272, %cst_198 {dimension_numbers = #tpu.dot_dimension_numbers<[1], [0], [0], [1], [0, 0, 1, 1], [], []>} : vector<4x4xf32>, vector<4x622xf32>, vector<4x622xf32> -> vector<4x622xf32>
    %274 = arith.addf %269, %273 : vector<4x622xf32>
    %c1_199 = arith.constant 1 : index
    %c0_200 = arith.constant 0 : index
    %c0_201 = arith.constant 0 : index
    %275 = vector.load %arg28[%c1_199, %c0_200, %c0_201] : memref<9x4x4xf32, #tpu.memory_space<vmem>>, vector<1x4x4xf32>
    %276 = vector.shape_cast %275 : vector<1x4x4xf32> to vector<4x4xf32>
    %277 = vector.extract_strided_slice %268 {offsets = [0, 1], sizes = [4, 622], strides = [1, 1]} : vector<4x676xf32> to vector<4x622xf32>
    %cst_202 = arith.constant dense<0.000000e+00> : vector<4x622xf32>
    %278 = tpu.matmul %276, %277, %cst_202 {dimension_numbers = #tpu.dot_dimension_numbers<[1], [0], [0], [1], [0, 0, 1, 1], [], []>} : vector<4x4xf32>, vector<4x622xf32>, vector<4x622xf32> -> vector<4x622xf32>
    %279 = arith.addf %274, %278 : vector<4x622xf32>
    %c2_203 = arith.constant 2 : index
    %c0_204 = arith.constant 0 : index
    %c0_205 = arith.constant 0 : index
    %280 = vector.load %arg28[%c2_203, %c0_204, %c0_205] : memref<9x4x4xf32, #tpu.memory_space<vmem>>, vector<1x4x4xf32>
    %281 = vector.shape_cast %280 : vector<1x4x4xf32> to vector<4x4xf32>
    %282 = vector.extract_strided_slice %268 {offsets = [0, 2], sizes = [4, 622], strides = [1, 1]} : vector<4x676xf32> to vector<4x622xf32>
    %cst_206 = arith.constant dense<0.000000e+00> : vector<4x622xf32>
    %283 = tpu.matmul %281, %282, %cst_206 {dimension_numbers = #tpu.dot_dimension_numbers<[1], [0], [0], [1], [0, 0, 1, 1], [], []>} : vector<4x4xf32>, vector<4x622xf32>, vector<4x622xf32> -> vector<4x622xf32>
    %284 = arith.addf %279, %283 : vector<4x622xf32>
    %c3_207 = arith.constant 3 : index
    %c0_208 = arith.constant 0 : index
    %c0_209 = arith.constant 0 : index
    %285 = vector.load %arg28[%c3_207, %c0_208, %c0_209] : memref<9x4x4xf32, #tpu.memory_space<vmem>>, vector<1x4x4xf32>
    %286 = vector.shape_cast %285 : vector<1x4x4xf32> to vector<4x4xf32>
    %287 = vector.extract_strided_slice %268 {offsets = [0, 26], sizes = [4, 622], strides = [1, 1]} : vector<4x676xf32> to vector<4x622xf32>
    %cst_210 = arith.constant dense<0.000000e+00> : vector<4x622xf32>
    %288 = tpu.matmul %286, %287, %cst_210 {dimension_numbers = #tpu.dot_dimension_numbers<[1], [0], [0], [1], [0, 0, 1, 1], [], []>} : vector<4x4xf32>, vector<4x622xf32>, vector<4x622xf32> -> vector<4x622xf32>
    %289 = arith.addf %284, %288 : vector<4x622xf32>
    %c4_211 = arith.constant 4 : index
    %c0_212 = arith.constant 0 : index
    %c0_213 = arith.constant 0 : index
    %290 = vector.load %arg28[%c4_211, %c0_212, %c0_213] : memref<9x4x4xf32, #tpu.memory_space<vmem>>, vector<1x4x4xf32>
    %291 = vector.shape_cast %290 : vector<1x4x4xf32> to vector<4x4xf32>
    %292 = vector.extract_strided_slice %268 {offsets = [0, 27], sizes = [4, 622], strides = [1, 1]} : vector<4x676xf32> to vector<4x622xf32>
    %cst_214 = arith.constant dense<0.000000e+00> : vector<4x622xf32>
    %293 = tpu.matmul %291, %292, %cst_214 {dimension_numbers = #tpu.dot_dimension_numbers<[1], [0], [0], [1], [0, 0, 1, 1], [], []>} : vector<4x4xf32>, vector<4x622xf32>, vector<4x622xf32> -> vector<4x622xf32>
    %294 = arith.addf %289, %293 : vector<4x622xf32>
    %c5_215 = arith.constant 5 : index
    %c0_216 = arith.constant 0 : index
    %c0_217 = arith.constant 0 : index
    %295 = vector.load %arg28[%c5_215, %c0_216, %c0_217] : memref<9x4x4xf32, #tpu.memory_space<vmem>>, vector<1x4x4xf32>
    %296 = vector.shape_cast %295 : vector<1x4x4xf32> to vector<4x4xf32>
    %297 = vector.extract_strided_slice %268 {offsets = [0, 28], sizes = [4, 622], strides = [1, 1]} : vector<4x676xf32> to vector<4x622xf32>
    %cst_218 = arith.constant dense<0.000000e+00> : vector<4x622xf32>
    %298 = tpu.matmul %296, %297, %cst_218 {dimension_numbers = #tpu.dot_dimension_numbers<[1], [0], [0], [1], [0, 0, 1, 1], [], []>} : vector<4x4xf32>, vector<4x622xf32>, vector<4x622xf32> -> vector<4x622xf32>
    %299 = arith.addf %294, %298 : vector<4x622xf32>
    %c6_219 = arith.constant 6 : index
    %c0_220 = arith.constant 0 : index
    %c0_221 = arith.constant 0 : index
    %300 = vector.load %arg28[%c6_219, %c0_220, %c0_221] : memref<9x4x4xf32, #tpu.memory_space<vmem>>, vector<1x4x4xf32>
    %301 = vector.shape_cast %300 : vector<1x4x4xf32> to vector<4x4xf32>
    %302 = vector.extract_strided_slice %268 {offsets = [0, 52], sizes = [4, 622], strides = [1, 1]} : vector<4x676xf32> to vector<4x622xf32>
    %cst_222 = arith.constant dense<0.000000e+00> : vector<4x622xf32>
    %303 = tpu.matmul %301, %302, %cst_222 {dimension_numbers = #tpu.dot_dimension_numbers<[1], [0], [0], [1], [0, 0, 1, 1], [], []>} : vector<4x4xf32>, vector<4x622xf32>, vector<4x622xf32> -> vector<4x622xf32>
    %304 = arith.addf %299, %303 : vector<4x622xf32>
    %c7_223 = arith.constant 7 : index
    %c0_224 = arith.constant 0 : index
    %c0_225 = arith.constant 0 : index
    %305 = vector.load %arg28[%c7_223, %c0_224, %c0_225] : memref<9x4x4xf32, #tpu.memory_space<vmem>>, vector<1x4x4xf32>
    %306 = vector.shape_cast %305 : vector<1x4x4xf32> to vector<4x4xf32>
    %307 = vector.extract_strided_slice %268 {offsets = [0, 53], sizes = [4, 622], strides = [1, 1]} : vector<4x676xf32> to vector<4x622xf32>
    %cst_226 = arith.constant dense<0.000000e+00> : vector<4x622xf32>
    %308 = tpu.matmul %306, %307, %cst_226 {dimension_numbers = #tpu.dot_dimension_numbers<[1], [0], [0], [1], [0, 0, 1, 1], [], []>} : vector<4x4xf32>, vector<4x622xf32>, vector<4x622xf32> -> vector<4x622xf32>
    %309 = arith.addf %304, %308 : vector<4x622xf32>
    %c8_227 = arith.constant 8 : index
    %c0_228 = arith.constant 0 : index
    %c0_229 = arith.constant 0 : index
    %310 = vector.load %arg28[%c8_227, %c0_228, %c0_229] : memref<9x4x4xf32, #tpu.memory_space<vmem>>, vector<1x4x4xf32>
    %311 = vector.shape_cast %310 : vector<1x4x4xf32> to vector<4x4xf32>
    %312 = vector.extract_strided_slice %268 {offsets = [0, 54], sizes = [4, 622], strides = [1, 1]} : vector<4x676xf32> to vector<4x622xf32>
    %cst_230 = arith.constant dense<0.000000e+00> : vector<4x622xf32>
    %313 = tpu.matmul %311, %312, %cst_230 {dimension_numbers = #tpu.dot_dimension_numbers<[1], [0], [0], [1], [0, 0, 1, 1], [], []>} : vector<4x4xf32>, vector<4x622xf32>, vector<4x622xf32> -> vector<4x622xf32>
    %314 = arith.addf %309, %313 : vector<4x622xf32>
    %c0_231 = arith.constant 0 : index
    %c0_232 = arith.constant 0 : index
    %315 = vector.load %arg4[%c0_231, %c0_232] : memref<622x121xf32, #tpu.memory_space<vmem>>, vector<622x121xf32>
    %cst_233 = arith.constant dense<0.000000e+00> : vector<4x121xf32>
    %316 = tpu.matmul %314, %315, %cst_233 {dimension_numbers = #tpu.dot_dimension_numbers<[1], [0], [0], [1], [0, 0, 1, 1], [], []>} : vector<4x622xf32>, vector<622x121xf32>, vector<4x121xf32> -> vector<4x121xf32>
    %c0_234 = arith.constant 0 : index
    %c0_235 = arith.constant 0 : index
    %317 = vector.load %arg29[%c0_234, %c0_235] : memref<4x1xf32, #tpu.memory_space<vmem>>, vector<4x1xf32>
    %318 = vector.broadcast %317 : vector<4x1xf32> to vector<4x121xf32>
    %319 = arith.addf %316, %318 : vector<4x121xf32>
    %320 = vector.extract_strided_slice %319 {offsets = [0, 0], sizes = [4, 7], strides = [1, 1]} : vector<4x121xf32> to vector<4x7xf32>
    %321 = vector.extract_strided_slice %319 {offsets = [0, 11], sizes = [4, 7], strides = [1, 1]} : vector<4x121xf32> to vector<4x7xf32>
    %322 = arith.maximumf %320, %321 : vector<4x7xf32>
    %323 = vector.extract_strided_slice %319 {offsets = [0, 22], sizes = [4, 7], strides = [1, 1]} : vector<4x121xf32> to vector<4x7xf32>
    %324 = arith.maximumf %322, %323 : vector<4x7xf32>
    %325 = vector.extract_strided_slice %319 {offsets = [0, 33], sizes = [4, 7], strides = [1, 1]} : vector<4x121xf32> to vector<4x7xf32>
    %326 = arith.maximumf %324, %325 : vector<4x7xf32>
    %327 = vector.extract_strided_slice %319 {offsets = [0, 44], sizes = [4, 7], strides = [1, 1]} : vector<4x121xf32> to vector<4x7xf32>
    %328 = arith.maximumf %326, %327 : vector<4x7xf32>
    %329 = vector.extract_strided_slice %319 {offsets = [0, 55], sizes = [4, 7], strides = [1, 1]} : vector<4x121xf32> to vector<4x7xf32>
    %330 = arith.maximumf %328, %329 : vector<4x7xf32>
    %331 = vector.extract_strided_slice %319 {offsets = [0, 66], sizes = [4, 7], strides = [1, 1]} : vector<4x121xf32> to vector<4x7xf32>
    %332 = arith.maximumf %330, %331 : vector<4x7xf32>
    %cst_236 = arith.constant dense<0xFF800000> : vector<4xf32>
    %333 = vector.multi_reduction <maximumf>, %332, %cst_236 [1] : vector<4x7xf32> to vector<4xf32>
    %334 = vector.shape_cast %333 : vector<4xf32> to vector<4x1xf32>
    %335 = vector.extract_strided_slice %319 {offsets = [0, 3], sizes = [4, 7], strides = [1, 1]} : vector<4x121xf32> to vector<4x7xf32>
    %336 = vector.extract_strided_slice %319 {offsets = [0, 14], sizes = [4, 7], strides = [1, 1]} : vector<4x121xf32> to vector<4x7xf32>
    %337 = arith.maximumf %335, %336 : vector<4x7xf32>
    %338 = vector.extract_strided_slice %319 {offsets = [0, 25], sizes = [4, 7], strides = [1, 1]} : vector<4x121xf32> to vector<4x7xf32>
    %339 = arith.maximumf %337, %338 : vector<4x7xf32>
    %340 = vector.extract_strided_slice %319 {offsets = [0, 36], sizes = [4, 7], strides = [1, 1]} : vector<4x121xf32> to vector<4x7xf32>
    %341 = arith.maximumf %339, %340 : vector<4x7xf32>
    %342 = vector.extract_strided_slice %319 {offsets = [0, 47], sizes = [4, 7], strides = [1, 1]} : vector<4x121xf32> to vector<4x7xf32>
    %343 = arith.maximumf %341, %342 : vector<4x7xf32>
    %344 = vector.extract_strided_slice %319 {offsets = [0, 58], sizes = [4, 7], strides = [1, 1]} : vector<4x121xf32> to vector<4x7xf32>
    %345 = arith.maximumf %343, %344 : vector<4x7xf32>
    %346 = vector.extract_strided_slice %319 {offsets = [0, 69], sizes = [4, 7], strides = [1, 1]} : vector<4x121xf32> to vector<4x7xf32>
    %347 = arith.maximumf %345, %346 : vector<4x7xf32>
    %cst_237 = arith.constant dense<0xFF800000> : vector<4xf32>
    %348 = vector.multi_reduction <maximumf>, %347, %cst_237 [1] : vector<4x7xf32> to vector<4xf32>
    %349 = vector.shape_cast %348 : vector<4xf32> to vector<4x1xf32>
    %350 = vector.extract_strided_slice %319 {offsets = [0, 33], sizes = [4, 7], strides = [1, 1]} : vector<4x121xf32> to vector<4x7xf32>
    %351 = vector.extract_strided_slice %319 {offsets = [0, 44], sizes = [4, 7], strides = [1, 1]} : vector<4x121xf32> to vector<4x7xf32>
    %352 = arith.maximumf %350, %351 : vector<4x7xf32>
    %353 = vector.extract_strided_slice %319 {offsets = [0, 55], sizes = [4, 7], strides = [1, 1]} : vector<4x121xf32> to vector<4x7xf32>
    %354 = arith.maximumf %352, %353 : vector<4x7xf32>
    %355 = vector.extract_strided_slice %319 {offsets = [0, 66], sizes = [4, 7], strides = [1, 1]} : vector<4x121xf32> to vector<4x7xf32>
    %356 = arith.maximumf %354, %355 : vector<4x7xf32>
    %357 = vector.extract_strided_slice %319 {offsets = [0, 77], sizes = [4, 7], strides = [1, 1]} : vector<4x121xf32> to vector<4x7xf32>
    %358 = arith.maximumf %356, %357 : vector<4x7xf32>
    %359 = vector.extract_strided_slice %319 {offsets = [0, 88], sizes = [4, 7], strides = [1, 1]} : vector<4x121xf32> to vector<4x7xf32>
    %360 = arith.maximumf %358, %359 : vector<4x7xf32>
    %361 = vector.extract_strided_slice %319 {offsets = [0, 99], sizes = [4, 7], strides = [1, 1]} : vector<4x121xf32> to vector<4x7xf32>
    %362 = arith.maximumf %360, %361 : vector<4x7xf32>
    %cst_238 = arith.constant dense<0xFF800000> : vector<4xf32>
    %363 = vector.multi_reduction <maximumf>, %362, %cst_238 [1] : vector<4x7xf32> to vector<4xf32>
    %364 = vector.shape_cast %363 : vector<4xf32> to vector<4x1xf32>
    %365 = vector.extract_strided_slice %319 {offsets = [0, 36], sizes = [4, 7], strides = [1, 1]} : vector<4x121xf32> to vector<4x7xf32>
    %366 = vector.extract_strided_slice %319 {offsets = [0, 47], sizes = [4, 7], strides = [1, 1]} : vector<4x121xf32> to vector<4x7xf32>
    %367 = arith.maximumf %365, %366 : vector<4x7xf32>
    %368 = vector.extract_strided_slice %319 {offsets = [0, 58], sizes = [4, 7], strides = [1, 1]} : vector<4x121xf32> to vector<4x7xf32>
    %369 = arith.maximumf %367, %368 : vector<4x7xf32>
    %370 = vector.extract_strided_slice %319 {offsets = [0, 69], sizes = [4, 7], strides = [1, 1]} : vector<4x121xf32> to vector<4x7xf32>
    %371 = arith.maximumf %369, %370 : vector<4x7xf32>
    %372 = vector.extract_strided_slice %319 {offsets = [0, 80], sizes = [4, 7], strides = [1, 1]} : vector<4x121xf32> to vector<4x7xf32>
    %373 = arith.maximumf %371, %372 : vector<4x7xf32>
    %374 = vector.extract_strided_slice %319 {offsets = [0, 91], sizes = [4, 7], strides = [1, 1]} : vector<4x121xf32> to vector<4x7xf32>
    %375 = arith.maximumf %373, %374 : vector<4x7xf32>
    %376 = vector.extract_strided_slice %319 {offsets = [0, 102], sizes = [4, 7], strides = [1, 1]} : vector<4x121xf32> to vector<4x7xf32>
    %377 = arith.maximumf %375, %376 : vector<4x7xf32>
    %cst_239 = arith.constant dense<0xFF800000> : vector<4xf32>
    %378 = vector.multi_reduction <maximumf>, %377, %cst_239 [1] : vector<4x7xf32> to vector<4xf32>
    %379 = vector.shape_cast %378 : vector<4xf32> to vector<4x1xf32>
    %380 = tpu.concatenate %334, %349, %364, %379 in 1 : vector<4x1xf32>, vector<4x1xf32>, vector<4x1xf32>, vector<4x1xf32> -> vector<4x4xf32>
    %c0_240 = arith.constant 0 : index
    %c0_241 = arith.constant 0 : index
    %381 = vector.load %arg6[%c0_240, %c0_241] : memref<4x16xf32, #tpu.memory_space<vmem>>, vector<4x16xf32>
    %cst_242 = arith.constant dense<0.000000e+00> : vector<4x16xf32>
    %382 = tpu.matmul %380, %381, %cst_242 {dimension_numbers = #tpu.dot_dimension_numbers<[1], [0], [0], [1], [0, 0, 1, 1], [], []>} : vector<4x4xf32>, vector<4x16xf32>, vector<4x16xf32> -> vector<4x16xf32>
    %c0_243 = arith.constant 0 : index
    %c0_244 = arith.constant 0 : index
    %383 = vector.load %arg31[%c0_243, %c0_244] : memref<4x1xf32, #tpu.memory_space<vmem>>, vector<4x1xf32>
    %cst_245 = arith.constant 0.000000e+00 : f32
    %384 = vector.broadcast %cst_245 : f32 to vector<4x6xf32>
    %c0_246 = arith.constant 0 : index
    %c0_247 = arith.constant 0 : index
    %c0_248 = arith.constant 0 : index
    %385 = vector.load %arg30[%c0_246, %c0_247, %c0_248] : memref<9x4x4xf32, #tpu.memory_space<vmem>>, vector<1x4x4xf32>
    %386 = vector.shape_cast %385 : vector<1x4x4xf32> to vector<4x4xf32>
    %387 = vector.extract_strided_slice %382 {offsets = [0, 0], sizes = [4, 6], strides = [1, 1]} : vector<4x16xf32> to vector<4x6xf32>
    %cst_249 = arith.constant dense<0.000000e+00> : vector<4x6xf32>
    %388 = tpu.matmul %386, %387, %cst_249 {dimension_numbers = #tpu.dot_dimension_numbers<[1], [0], [0], [1], [0, 0, 1, 1], [], []>} : vector<4x4xf32>, vector<4x6xf32>, vector<4x6xf32> -> vector<4x6xf32>
    %389 = arith.addf %384, %388 : vector<4x6xf32>
    %c1_250 = arith.constant 1 : index
    %c0_251 = arith.constant 0 : index
    %c0_252 = arith.constant 0 : index
    %390 = vector.load %arg30[%c1_250, %c0_251, %c0_252] : memref<9x4x4xf32, #tpu.memory_space<vmem>>, vector<1x4x4xf32>
    %391 = vector.shape_cast %390 : vector<1x4x4xf32> to vector<4x4xf32>
    %392 = vector.extract_strided_slice %382 {offsets = [0, 1], sizes = [4, 6], strides = [1, 1]} : vector<4x16xf32> to vector<4x6xf32>
    %cst_253 = arith.constant dense<0.000000e+00> : vector<4x6xf32>
    %393 = tpu.matmul %391, %392, %cst_253 {dimension_numbers = #tpu.dot_dimension_numbers<[1], [0], [0], [1], [0, 0, 1, 1], [], []>} : vector<4x4xf32>, vector<4x6xf32>, vector<4x6xf32> -> vector<4x6xf32>
    %394 = arith.addf %389, %393 : vector<4x6xf32>
    %c2_254 = arith.constant 2 : index
    %c0_255 = arith.constant 0 : index
    %c0_256 = arith.constant 0 : index
    %395 = vector.load %arg30[%c2_254, %c0_255, %c0_256] : memref<9x4x4xf32, #tpu.memory_space<vmem>>, vector<1x4x4xf32>
    %396 = vector.shape_cast %395 : vector<1x4x4xf32> to vector<4x4xf32>
    %397 = vector.extract_strided_slice %382 {offsets = [0, 2], sizes = [4, 6], strides = [1, 1]} : vector<4x16xf32> to vector<4x6xf32>
    %cst_257 = arith.constant dense<0.000000e+00> : vector<4x6xf32>
    %398 = tpu.matmul %396, %397, %cst_257 {dimension_numbers = #tpu.dot_dimension_numbers<[1], [0], [0], [1], [0, 0, 1, 1], [], []>} : vector<4x4xf32>, vector<4x6xf32>, vector<4x6xf32> -> vector<4x6xf32>
    %399 = arith.addf %394, %398 : vector<4x6xf32>
    %c3_258 = arith.constant 3 : index
    %c0_259 = arith.constant 0 : index
    %c0_260 = arith.constant 0 : index
    %400 = vector.load %arg30[%c3_258, %c0_259, %c0_260] : memref<9x4x4xf32, #tpu.memory_space<vmem>>, vector<1x4x4xf32>
    %401 = vector.shape_cast %400 : vector<1x4x4xf32> to vector<4x4xf32>
    %402 = vector.extract_strided_slice %382 {offsets = [0, 4], sizes = [4, 6], strides = [1, 1]} : vector<4x16xf32> to vector<4x6xf32>
    %cst_261 = arith.constant dense<0.000000e+00> : vector<4x6xf32>
    %403 = tpu.matmul %401, %402, %cst_261 {dimension_numbers = #tpu.dot_dimension_numbers<[1], [0], [0], [1], [0, 0, 1, 1], [], []>} : vector<4x4xf32>, vector<4x6xf32>, vector<4x6xf32> -> vector<4x6xf32>
    %404 = arith.addf %399, %403 : vector<4x6xf32>
    %c4_262 = arith.constant 4 : index
    %c0_263 = arith.constant 0 : index
    %c0_264 = arith.constant 0 : index
    %405 = vector.load %arg30[%c4_262, %c0_263, %c0_264] : memref<9x4x4xf32, #tpu.memory_space<vmem>>, vector<1x4x4xf32>
    %406 = vector.shape_cast %405 : vector<1x4x4xf32> to vector<4x4xf32>
    %407 = vector.extract_strided_slice %382 {offsets = [0, 5], sizes = [4, 6], strides = [1, 1]} : vector<4x16xf32> to vector<4x6xf32>
    %cst_265 = arith.constant dense<0.000000e+00> : vector<4x6xf32>
    %408 = tpu.matmul %406, %407, %cst_265 {dimension_numbers = #tpu.dot_dimension_numbers<[1], [0], [0], [1], [0, 0, 1, 1], [], []>} : vector<4x4xf32>, vector<4x6xf32>, vector<4x6xf32> -> vector<4x6xf32>
    %409 = arith.addf %404, %408 : vector<4x6xf32>
    %c5_266 = arith.constant 5 : index
    %c0_267 = arith.constant 0 : index
    %c0_268 = arith.constant 0 : index
    %410 = vector.load %arg30[%c5_266, %c0_267, %c0_268] : memref<9x4x4xf32, #tpu.memory_space<vmem>>, vector<1x4x4xf32>
    %411 = vector.shape_cast %410 : vector<1x4x4xf32> to vector<4x4xf32>
    %412 = vector.extract_strided_slice %382 {offsets = [0, 6], sizes = [4, 6], strides = [1, 1]} : vector<4x16xf32> to vector<4x6xf32>
    %cst_269 = arith.constant dense<0.000000e+00> : vector<4x6xf32>
    %413 = tpu.matmul %411, %412, %cst_269 {dimension_numbers = #tpu.dot_dimension_numbers<[1], [0], [0], [1], [0, 0, 1, 1], [], []>} : vector<4x4xf32>, vector<4x6xf32>, vector<4x6xf32> -> vector<4x6xf32>
    %414 = arith.addf %409, %413 : vector<4x6xf32>
    %c6_270 = arith.constant 6 : index
    %c0_271 = arith.constant 0 : index
    %c0_272 = arith.constant 0 : index
    %415 = vector.load %arg30[%c6_270, %c0_271, %c0_272] : memref<9x4x4xf32, #tpu.memory_space<vmem>>, vector<1x4x4xf32>
    %416 = vector.shape_cast %415 : vector<1x4x4xf32> to vector<4x4xf32>
    %417 = vector.extract_strided_slice %382 {offsets = [0, 8], sizes = [4, 6], strides = [1, 1]} : vector<4x16xf32> to vector<4x6xf32>
    %cst_273 = arith.constant dense<0.000000e+00> : vector<4x6xf32>
    %418 = tpu.matmul %416, %417, %cst_273 {dimension_numbers = #tpu.dot_dimension_numbers<[1], [0], [0], [1], [0, 0, 1, 1], [], []>} : vector<4x4xf32>, vector<4x6xf32>, vector<4x6xf32> -> vector<4x6xf32>
    %419 = arith.addf %414, %418 : vector<4x6xf32>
    %c7_274 = arith.constant 7 : index
    %c0_275 = arith.constant 0 : index
    %c0_276 = arith.constant 0 : index
    %420 = vector.load %arg30[%c7_274, %c0_275, %c0_276] : memref<9x4x4xf32, #tpu.memory_space<vmem>>, vector<1x4x4xf32>
    %421 = vector.shape_cast %420 : vector<1x4x4xf32> to vector<4x4xf32>
    %422 = vector.extract_strided_slice %382 {offsets = [0, 9], sizes = [4, 6], strides = [1, 1]} : vector<4x16xf32> to vector<4x6xf32>
    %cst_277 = arith.constant dense<0.000000e+00> : vector<4x6xf32>
    %423 = tpu.matmul %421, %422, %cst_277 {dimension_numbers = #tpu.dot_dimension_numbers<[1], [0], [0], [1], [0, 0, 1, 1], [], []>} : vector<4x4xf32>, vector<4x6xf32>, vector<4x6xf32> -> vector<4x6xf32>
    %424 = arith.addf %419, %423 : vector<4x6xf32>
    %c8_278 = arith.constant 8 : index
    %c0_279 = arith.constant 0 : index
    %c0_280 = arith.constant 0 : index
    %425 = vector.load %arg30[%c8_278, %c0_279, %c0_280] : memref<9x4x4xf32, #tpu.memory_space<vmem>>, vector<1x4x4xf32>
    %426 = vector.shape_cast %425 : vector<1x4x4xf32> to vector<4x4xf32>
    %427 = vector.extract_strided_slice %382 {offsets = [0, 10], sizes = [4, 6], strides = [1, 1]} : vector<4x16xf32> to vector<4x6xf32>
    %cst_281 = arith.constant dense<0.000000e+00> : vector<4x6xf32>
    %428 = tpu.matmul %426, %427, %cst_281 {dimension_numbers = #tpu.dot_dimension_numbers<[1], [0], [0], [1], [0, 0, 1, 1], [], []>} : vector<4x4xf32>, vector<4x6xf32>, vector<4x6xf32> -> vector<4x6xf32>
    %429 = arith.addf %424, %428 : vector<4x6xf32>
    %430 = vector.broadcast %383 : vector<4x1xf32> to vector<4x6xf32>
    %431 = arith.addf %429, %430 : vector<4x6xf32>
    %cst_282 = arith.constant 0.000000e+00 : f32
    %432 = vector.broadcast %cst_282 : f32 to vector<4x5xf32>
    %cst_283 = arith.constant 0.000000e+00 : f32
    %433 = vector.broadcast %cst_283 : f32 to vector<4x5xf32>
    %434 = tpu.concatenate %432, %431, %433 in 1 : vector<4x5xf32>, vector<4x6xf32>, vector<4x5xf32> -> vector<4x16xf32>
    %435 = vector.broadcast %3 : vector<1x16xf32> to vector<4x16xf32>
    %436 = arith.mulf %434, %435 : vector<4x16xf32>
    %cst_284 = arith.constant 0.000000e+00 : f32
    %437 = vector.broadcast %cst_284 : f32 to vector<4x16xf32>
    %438 = arith.maximumf %436, %437 : vector<4x16xf32>
    %c0_285 = arith.constant 0 : index
    %c0_286 = arith.constant 0 : index
    %439 = vector.load %arg33[%c0_285, %c0_286] : memref<4x1xf32, #tpu.memory_space<vmem>>, vector<4x1xf32>
    %cst_287 = arith.constant 0.000000e+00 : f32
    %440 = vector.broadcast %cst_287 : f32 to vector<4x6xf32>
    %c0_288 = arith.constant 0 : index
    %c0_289 = arith.constant 0 : index
    %c0_290 = arith.constant 0 : index
    %441 = vector.load %arg32[%c0_288, %c0_289, %c0_290] : memref<9x4x4xf32, #tpu.memory_space<vmem>>, vector<1x4x4xf32>
    %442 = vector.shape_cast %441 : vector<1x4x4xf32> to vector<4x4xf32>
    %443 = vector.extract_strided_slice %438 {offsets = [0, 0], sizes = [4, 6], strides = [1, 1]} : vector<4x16xf32> to vector<4x6xf32>
    %cst_291 = arith.constant dense<0.000000e+00> : vector<4x6xf32>
    %444 = tpu.matmul %442, %443, %cst_291 {dimension_numbers = #tpu.dot_dimension_numbers<[1], [0], [0], [1], [0, 0, 1, 1], [], []>} : vector<4x4xf32>, vector<4x6xf32>, vector<4x6xf32> -> vector<4x6xf32>
    %445 = arith.addf %440, %444 : vector<4x6xf32>
    %c1_292 = arith.constant 1 : index
    %c0_293 = arith.constant 0 : index
    %c0_294 = arith.constant 0 : index
    %446 = vector.load %arg32[%c1_292, %c0_293, %c0_294] : memref<9x4x4xf32, #tpu.memory_space<vmem>>, vector<1x4x4xf32>
    %447 = vector.shape_cast %446 : vector<1x4x4xf32> to vector<4x4xf32>
    %448 = vector.extract_strided_slice %438 {offsets = [0, 1], sizes = [4, 6], strides = [1, 1]} : vector<4x16xf32> to vector<4x6xf32>
    %cst_295 = arith.constant dense<0.000000e+00> : vector<4x6xf32>
    %449 = tpu.matmul %447, %448, %cst_295 {dimension_numbers = #tpu.dot_dimension_numbers<[1], [0], [0], [1], [0, 0, 1, 1], [], []>} : vector<4x4xf32>, vector<4x6xf32>, vector<4x6xf32> -> vector<4x6xf32>
    %450 = arith.addf %445, %449 : vector<4x6xf32>
    %c2_296 = arith.constant 2 : index
    %c0_297 = arith.constant 0 : index
    %c0_298 = arith.constant 0 : index
    %451 = vector.load %arg32[%c2_296, %c0_297, %c0_298] : memref<9x4x4xf32, #tpu.memory_space<vmem>>, vector<1x4x4xf32>
    %452 = vector.shape_cast %451 : vector<1x4x4xf32> to vector<4x4xf32>
    %453 = vector.extract_strided_slice %438 {offsets = [0, 2], sizes = [4, 6], strides = [1, 1]} : vector<4x16xf32> to vector<4x6xf32>
    %cst_299 = arith.constant dense<0.000000e+00> : vector<4x6xf32>
    %454 = tpu.matmul %452, %453, %cst_299 {dimension_numbers = #tpu.dot_dimension_numbers<[1], [0], [0], [1], [0, 0, 1, 1], [], []>} : vector<4x4xf32>, vector<4x6xf32>, vector<4x6xf32> -> vector<4x6xf32>
    %455 = arith.addf %450, %454 : vector<4x6xf32>
    %c3_300 = arith.constant 3 : index
    %c0_301 = arith.constant 0 : index
    %c0_302 = arith.constant 0 : index
    %456 = vector.load %arg32[%c3_300, %c0_301, %c0_302] : memref<9x4x4xf32, #tpu.memory_space<vmem>>, vector<1x4x4xf32>
    %457 = vector.shape_cast %456 : vector<1x4x4xf32> to vector<4x4xf32>
    %458 = vector.extract_strided_slice %438 {offsets = [0, 4], sizes = [4, 6], strides = [1, 1]} : vector<4x16xf32> to vector<4x6xf32>
    %cst_303 = arith.constant dense<0.000000e+00> : vector<4x6xf32>
    %459 = tpu.matmul %457, %458, %cst_303 {dimension_numbers = #tpu.dot_dimension_numbers<[1], [0], [0], [1], [0, 0, 1, 1], [], []>} : vector<4x4xf32>, vector<4x6xf32>, vector<4x6xf32> -> vector<4x6xf32>
    %460 = arith.addf %455, %459 : vector<4x6xf32>
    %c4_304 = arith.constant 4 : index
    %c0_305 = arith.constant 0 : index
    %c0_306 = arith.constant 0 : index
    %461 = vector.load %arg32[%c4_304, %c0_305, %c0_306] : memref<9x4x4xf32, #tpu.memory_space<vmem>>, vector<1x4x4xf32>
    %462 = vector.shape_cast %461 : vector<1x4x4xf32> to vector<4x4xf32>
    %463 = vector.extract_strided_slice %438 {offsets = [0, 5], sizes = [4, 6], strides = [1, 1]} : vector<4x16xf32> to vector<4x6xf32>
    %cst_307 = arith.constant dense<0.000000e+00> : vector<4x6xf32>
    %464 = tpu.matmul %462, %463, %cst_307 {dimension_numbers = #tpu.dot_dimension_numbers<[1], [0], [0], [1], [0, 0, 1, 1], [], []>} : vector<4x4xf32>, vector<4x6xf32>, vector<4x6xf32> -> vector<4x6xf32>
    %465 = arith.addf %460, %464 : vector<4x6xf32>
    %c5_308 = arith.constant 5 : index
    %c0_309 = arith.constant 0 : index
    %c0_310 = arith.constant 0 : index
    %466 = vector.load %arg32[%c5_308, %c0_309, %c0_310] : memref<9x4x4xf32, #tpu.memory_space<vmem>>, vector<1x4x4xf32>
    %467 = vector.shape_cast %466 : vector<1x4x4xf32> to vector<4x4xf32>
    %468 = vector.extract_strided_slice %438 {offsets = [0, 6], sizes = [4, 6], strides = [1, 1]} : vector<4x16xf32> to vector<4x6xf32>
    %cst_311 = arith.constant dense<0.000000e+00> : vector<4x6xf32>
    %469 = tpu.matmul %467, %468, %cst_311 {dimension_numbers = #tpu.dot_dimension_numbers<[1], [0], [0], [1], [0, 0, 1, 1], [], []>} : vector<4x4xf32>, vector<4x6xf32>, vector<4x6xf32> -> vector<4x6xf32>
    %470 = arith.addf %465, %469 : vector<4x6xf32>
    %c6_312 = arith.constant 6 : index
    %c0_313 = arith.constant 0 : index
    %c0_314 = arith.constant 0 : index
    %471 = vector.load %arg32[%c6_312, %c0_313, %c0_314] : memref<9x4x4xf32, #tpu.memory_space<vmem>>, vector<1x4x4xf32>
    %472 = vector.shape_cast %471 : vector<1x4x4xf32> to vector<4x4xf32>
    %473 = vector.extract_strided_slice %438 {offsets = [0, 8], sizes = [4, 6], strides = [1, 1]} : vector<4x16xf32> to vector<4x6xf32>
    %cst_315 = arith.constant dense<0.000000e+00> : vector<4x6xf32>
    %474 = tpu.matmul %472, %473, %cst_315 {dimension_numbers = #tpu.dot_dimension_numbers<[1], [0], [0], [1], [0, 0, 1, 1], [], []>} : vector<4x4xf32>, vector<4x6xf32>, vector<4x6xf32> -> vector<4x6xf32>
    %475 = arith.addf %470, %474 : vector<4x6xf32>
    %c7_316 = arith.constant 7 : index
    %c0_317 = arith.constant 0 : index
    %c0_318 = arith.constant 0 : index
    %476 = vector.load %arg32[%c7_316, %c0_317, %c0_318] : memref<9x4x4xf32, #tpu.memory_space<vmem>>, vector<1x4x4xf32>
    %477 = vector.shape_cast %476 : vector<1x4x4xf32> to vector<4x4xf32>
    %478 = vector.extract_strided_slice %438 {offsets = [0, 9], sizes = [4, 6], strides = [1, 1]} : vector<4x16xf32> to vector<4x6xf32>
    %cst_319 = arith.constant dense<0.000000e+00> : vector<4x6xf32>
    %479 = tpu.matmul %477, %478, %cst_319 {dimension_numbers = #tpu.dot_dimension_numbers<[1], [0], [0], [1], [0, 0, 1, 1], [], []>} : vector<4x4xf32>, vector<4x6xf32>, vector<4x6xf32> -> vector<4x6xf32>
    %480 = arith.addf %475, %479 : vector<4x6xf32>
    %c8_320 = arith.constant 8 : index
    %c0_321 = arith.constant 0 : index
    %c0_322 = arith.constant 0 : index
    %481 = vector.load %arg32[%c8_320, %c0_321, %c0_322] : memref<9x4x4xf32, #tpu.memory_space<vmem>>, vector<1x4x4xf32>
    %482 = vector.shape_cast %481 : vector<1x4x4xf32> to vector<4x4xf32>
    %483 = vector.extract_strided_slice %438 {offsets = [0, 10], sizes = [4, 6], strides = [1, 1]} : vector<4x16xf32> to vector<4x6xf32>
    %cst_323 = arith.constant dense<0.000000e+00> : vector<4x6xf32>
    %484 = tpu.matmul %482, %483, %cst_323 {dimension_numbers = #tpu.dot_dimension_numbers<[1], [0], [0], [1], [0, 0, 1, 1], [], []>} : vector<4x4xf32>, vector<4x6xf32>, vector<4x6xf32> -> vector<4x6xf32>
    %485 = arith.addf %480, %484 : vector<4x6xf32>
    %486 = vector.broadcast %439 : vector<4x1xf32> to vector<4x6xf32>
    %487 = arith.addf %485, %486 : vector<4x6xf32>
    %cst_324 = arith.constant 0.000000e+00 : f32
    %488 = vector.broadcast %cst_324 : f32 to vector<4x5xf32>
    %cst_325 = arith.constant 0.000000e+00 : f32
    %489 = vector.broadcast %cst_325 : f32 to vector<4x5xf32>
    %490 = tpu.concatenate %488, %487, %489 in 1 : vector<4x5xf32>, vector<4x6xf32>, vector<4x5xf32> -> vector<4x16xf32>
    %491 = vector.broadcast %3 : vector<1x16xf32> to vector<4x16xf32>
    %492 = arith.mulf %490, %491 : vector<4x16xf32>
    %cst_326 = arith.constant 0.000000e+00 : f32
    %493 = vector.broadcast %cst_326 : f32 to vector<4x16xf32>
    %494 = arith.maximumf %492, %493 : vector<4x16xf32>
    %c0_327 = arith.constant 0 : index
    %c0_328 = arith.constant 0 : index
    %495 = vector.load %arg35[%c0_327, %c0_328] : memref<4x1xf32, #tpu.memory_space<vmem>>, vector<4x1xf32>
    %cst_329 = arith.constant 0.000000e+00 : f32
    %496 = vector.broadcast %cst_329 : f32 to vector<4x6xf32>
    %c0_330 = arith.constant 0 : index
    %c0_331 = arith.constant 0 : index
    %c0_332 = arith.constant 0 : index
    %497 = vector.load %arg34[%c0_330, %c0_331, %c0_332] : memref<9x4x4xf32, #tpu.memory_space<vmem>>, vector<1x4x4xf32>
    %498 = vector.shape_cast %497 : vector<1x4x4xf32> to vector<4x4xf32>
    %499 = vector.extract_strided_slice %494 {offsets = [0, 0], sizes = [4, 6], strides = [1, 1]} : vector<4x16xf32> to vector<4x6xf32>
    %cst_333 = arith.constant dense<0.000000e+00> : vector<4x6xf32>
    %500 = tpu.matmul %498, %499, %cst_333 {dimension_numbers = #tpu.dot_dimension_numbers<[1], [0], [0], [1], [0, 0, 1, 1], [], []>} : vector<4x4xf32>, vector<4x6xf32>, vector<4x6xf32> -> vector<4x6xf32>
    %501 = arith.addf %496, %500 : vector<4x6xf32>
    %c1_334 = arith.constant 1 : index
    %c0_335 = arith.constant 0 : index
    %c0_336 = arith.constant 0 : index
    %502 = vector.load %arg34[%c1_334, %c0_335, %c0_336] : memref<9x4x4xf32, #tpu.memory_space<vmem>>, vector<1x4x4xf32>
    %503 = vector.shape_cast %502 : vector<1x4x4xf32> to vector<4x4xf32>
    %504 = vector.extract_strided_slice %494 {offsets = [0, 1], sizes = [4, 6], strides = [1, 1]} : vector<4x16xf32> to vector<4x6xf32>
    %cst_337 = arith.constant dense<0.000000e+00> : vector<4x6xf32>
    %505 = tpu.matmul %503, %504, %cst_337 {dimension_numbers = #tpu.dot_dimension_numbers<[1], [0], [0], [1], [0, 0, 1, 1], [], []>} : vector<4x4xf32>, vector<4x6xf32>, vector<4x6xf32> -> vector<4x6xf32>
    %506 = arith.addf %501, %505 : vector<4x6xf32>
    %c2_338 = arith.constant 2 : index
    %c0_339 = arith.constant 0 : index
    %c0_340 = arith.constant 0 : index
    %507 = vector.load %arg34[%c2_338, %c0_339, %c0_340] : memref<9x4x4xf32, #tpu.memory_space<vmem>>, vector<1x4x4xf32>
    %508 = vector.shape_cast %507 : vector<1x4x4xf32> to vector<4x4xf32>
    %509 = vector.extract_strided_slice %494 {offsets = [0, 2], sizes = [4, 6], strides = [1, 1]} : vector<4x16xf32> to vector<4x6xf32>
    %cst_341 = arith.constant dense<0.000000e+00> : vector<4x6xf32>
    %510 = tpu.matmul %508, %509, %cst_341 {dimension_numbers = #tpu.dot_dimension_numbers<[1], [0], [0], [1], [0, 0, 1, 1], [], []>} : vector<4x4xf32>, vector<4x6xf32>, vector<4x6xf32> -> vector<4x6xf32>
    %511 = arith.addf %506, %510 : vector<4x6xf32>
    %c3_342 = arith.constant 3 : index
    %c0_343 = arith.constant 0 : index
    %c0_344 = arith.constant 0 : index
    %512 = vector.load %arg34[%c3_342, %c0_343, %c0_344] : memref<9x4x4xf32, #tpu.memory_space<vmem>>, vector<1x4x4xf32>
    %513 = vector.shape_cast %512 : vector<1x4x4xf32> to vector<4x4xf32>
    %514 = vector.extract_strided_slice %494 {offsets = [0, 4], sizes = [4, 6], strides = [1, 1]} : vector<4x16xf32> to vector<4x6xf32>
    %cst_345 = arith.constant dense<0.000000e+00> : vector<4x6xf32>
    %515 = tpu.matmul %513, %514, %cst_345 {dimension_numbers = #tpu.dot_dimension_numbers<[1], [0], [0], [1], [0, 0, 1, 1], [], []>} : vector<4x4xf32>, vector<4x6xf32>, vector<4x6xf32> -> vector<4x6xf32>
    %516 = arith.addf %511, %515 : vector<4x6xf32>
    %c4_346 = arith.constant 4 : index
    %c0_347 = arith.constant 0 : index
    %c0_348 = arith.constant 0 : index
    %517 = vector.load %arg34[%c4_346, %c0_347, %c0_348] : memref<9x4x4xf32, #tpu.memory_space<vmem>>, vector<1x4x4xf32>
    %518 = vector.shape_cast %517 : vector<1x4x4xf32> to vector<4x4xf32>
    %519 = vector.extract_strided_slice %494 {offsets = [0, 5], sizes = [4, 6], strides = [1, 1]} : vector<4x16xf32> to vector<4x6xf32>
    %cst_349 = arith.constant dense<0.000000e+00> : vector<4x6xf32>
    %520 = tpu.matmul %518, %519, %cst_349 {dimension_numbers = #tpu.dot_dimension_numbers<[1], [0], [0], [1], [0, 0, 1, 1], [], []>} : vector<4x4xf32>, vector<4x6xf32>, vector<4x6xf32> -> vector<4x6xf32>
    %521 = arith.addf %516, %520 : vector<4x6xf32>
    %c5_350 = arith.constant 5 : index
    %c0_351 = arith.constant 0 : index
    %c0_352 = arith.constant 0 : index
    %522 = vector.load %arg34[%c5_350, %c0_351, %c0_352] : memref<9x4x4xf32, #tpu.memory_space<vmem>>, vector<1x4x4xf32>
    %523 = vector.shape_cast %522 : vector<1x4x4xf32> to vector<4x4xf32>
    %524 = vector.extract_strided_slice %494 {offsets = [0, 6], sizes = [4, 6], strides = [1, 1]} : vector<4x16xf32> to vector<4x6xf32>
    %cst_353 = arith.constant dense<0.000000e+00> : vector<4x6xf32>
    %525 = tpu.matmul %523, %524, %cst_353 {dimension_numbers = #tpu.dot_dimension_numbers<[1], [0], [0], [1], [0, 0, 1, 1], [], []>} : vector<4x4xf32>, vector<4x6xf32>, vector<4x6xf32> -> vector<4x6xf32>
    %526 = arith.addf %521, %525 : vector<4x6xf32>
    %c6_354 = arith.constant 6 : index
    %c0_355 = arith.constant 0 : index
    %c0_356 = arith.constant 0 : index
    %527 = vector.load %arg34[%c6_354, %c0_355, %c0_356] : memref<9x4x4xf32, #tpu.memory_space<vmem>>, vector<1x4x4xf32>
    %528 = vector.shape_cast %527 : vector<1x4x4xf32> to vector<4x4xf32>
    %529 = vector.extract_strided_slice %494 {offsets = [0, 8], sizes = [4, 6], strides = [1, 1]} : vector<4x16xf32> to vector<4x6xf32>
    %cst_357 = arith.constant dense<0.000000e+00> : vector<4x6xf32>
    %530 = tpu.matmul %528, %529, %cst_357 {dimension_numbers = #tpu.dot_dimension_numbers<[1], [0], [0], [1], [0, 0, 1, 1], [], []>} : vector<4x4xf32>, vector<4x6xf32>, vector<4x6xf32> -> vector<4x6xf32>
    %531 = arith.addf %526, %530 : vector<4x6xf32>
    %c7_358 = arith.constant 7 : index
    %c0_359 = arith.constant 0 : index
    %c0_360 = arith.constant 0 : index
    %532 = vector.load %arg34[%c7_358, %c0_359, %c0_360] : memref<9x4x4xf32, #tpu.memory_space<vmem>>, vector<1x4x4xf32>
    %533 = vector.shape_cast %532 : vector<1x4x4xf32> to vector<4x4xf32>
    %534 = vector.extract_strided_slice %494 {offsets = [0, 9], sizes = [4, 6], strides = [1, 1]} : vector<4x16xf32> to vector<4x6xf32>
    %cst_361 = arith.constant dense<0.000000e+00> : vector<4x6xf32>
    %535 = tpu.matmul %533, %534, %cst_361 {dimension_numbers = #tpu.dot_dimension_numbers<[1], [0], [0], [1], [0, 0, 1, 1], [], []>} : vector<4x4xf32>, vector<4x6xf32>, vector<4x6xf32> -> vector<4x6xf32>
    %536 = arith.addf %531, %535 : vector<4x6xf32>
    %c8_362 = arith.constant 8 : index
    %c0_363 = arith.constant 0 : index
    %c0_364 = arith.constant 0 : index
    %537 = vector.load %arg34[%c8_362, %c0_363, %c0_364] : memref<9x4x4xf32, #tpu.memory_space<vmem>>, vector<1x4x4xf32>
    %538 = vector.shape_cast %537 : vector<1x4x4xf32> to vector<4x4xf32>
    %539 = vector.extract_strided_slice %494 {offsets = [0, 10], sizes = [4, 6], strides = [1, 1]} : vector<4x16xf32> to vector<4x6xf32>
    %cst_365 = arith.constant dense<0.000000e+00> : vector<4x6xf32>
    %540 = tpu.matmul %538, %539, %cst_365 {dimension_numbers = #tpu.dot_dimension_numbers<[1], [0], [0], [1], [0, 0, 1, 1], [], []>} : vector<4x4xf32>, vector<4x6xf32>, vector<4x6xf32> -> vector<4x6xf32>
    %541 = arith.addf %536, %540 : vector<4x6xf32>
    %542 = vector.broadcast %495 : vector<4x1xf32> to vector<4x6xf32>
    %543 = arith.addf %541, %542 : vector<4x6xf32>
    %cst_366 = arith.constant 0.000000e+00 : f32
    %544 = vector.broadcast %cst_366 : f32 to vector<4x5xf32>
    %cst_367 = arith.constant 0.000000e+00 : f32
    %545 = vector.broadcast %cst_367 : f32 to vector<4x5xf32>
    %546 = tpu.concatenate %544, %543, %545 in 1 : vector<4x5xf32>, vector<4x6xf32>, vector<4x5xf32> -> vector<4x16xf32>
    %547 = vector.broadcast %3 : vector<1x16xf32> to vector<4x16xf32>
    %548 = arith.mulf %546, %547 : vector<4x16xf32>
    %c0_368 = arith.constant 0 : index
    %c0_369 = arith.constant 0 : index
    %549 = vector.load %arg7[%c0_368, %c0_369] : memref<16x4xf32, #tpu.memory_space<vmem>>, vector<16x4xf32>
    %cst_370 = arith.constant dense<0.000000e+00> : vector<4x4xf32>
    %550 = tpu.matmul %548, %549, %cst_370 {dimension_numbers = #tpu.dot_dimension_numbers<[1], [0], [0], [1], [0, 0, 1, 1], [], []>} : vector<4x16xf32>, vector<16x4xf32>, vector<4x4xf32> -> vector<4x4xf32>
    %c0_371 = arith.constant 0 : index
    %c0_372 = arith.constant 0 : index
    %551 = vector.load %arg5[%c0_371, %c0_372] : memref<4x676xf32, #tpu.memory_space<vmem>>, vector<4x676xf32>
    %cst_373 = arith.constant dense<0.000000e+00> : vector<4x676xf32>
    %552 = tpu.matmul %550, %551, %cst_373 {dimension_numbers = #tpu.dot_dimension_numbers<[1], [0], [0], [1], [0, 0, 1, 1], [], []>} : vector<4x4xf32>, vector<4x676xf32>, vector<4x676xf32> -> vector<4x676xf32>
    %c0_374 = arith.constant 0 : index
    %c0_375 = arith.constant 0 : index
    %553 = vector.load %arg26[%c0_374, %c0_375] : memref<4x4xf32, #tpu.memory_space<vmem>>, vector<4x4xf32>
    %c0_376 = arith.constant 0 : index
    %c0_377 = arith.constant 0 : index
    %554 = vector.load %arg27[%c0_376, %c0_377] : memref<4x1xf32, #tpu.memory_space<vmem>>, vector<4x1xf32>
    %cst_378 = arith.constant dense<0.000000e+00> : vector<4x676xf32>
    %555 = tpu.matmul %553, %268, %cst_378 {dimension_numbers = #tpu.dot_dimension_numbers<[1], [0], [0], [1], [0, 0, 1, 1], [], []>} : vector<4x4xf32>, vector<4x676xf32>, vector<4x676xf32> -> vector<4x676xf32>
    %556 = vector.broadcast %554 : vector<4x1xf32> to vector<4x676xf32>
    %557 = arith.addf %555, %556 : vector<4x676xf32>
    %558 = arith.addf %552, %557 : vector<4x676xf32>
    %c0_379 = arith.constant 0 : index
    %c0_380 = arith.constant 0 : index
    %559 = vector.load %arg36[%c0_379, %c0_380] : memref<16x4xf32, #tpu.memory_space<vmem>>, vector<16x4xf32>
    %c0_381 = arith.constant 0 : index
    %c0_382 = arith.constant 0 : index
    %560 = vector.load %arg37[%c0_381, %c0_382] : memref<16x1xf32, #tpu.memory_space<vmem>>, vector<16x1xf32>
    %cst_383 = arith.constant dense<0.000000e+00> : vector<16x676xf32>
    %561 = tpu.matmul %559, %558, %cst_383 {dimension_numbers = #tpu.dot_dimension_numbers<[1], [0], [0], [1], [0, 0, 1, 1], [], []>} : vector<16x4xf32>, vector<4x676xf32>, vector<16x676xf32> -> vector<16x676xf32>
    %562 = vector.broadcast %560 : vector<16x1xf32> to vector<16x676xf32>
    %563 = arith.addf %561, %562 : vector<16x676xf32>
    %564 = arith.negf %563 : vector<16x676xf32>
    %565 = math.exp %564 : vector<16x676xf32>
    %cst_384 = arith.constant 1.000000e+00 : f32
    %566 = vector.broadcast %cst_384 : f32 to vector<16x676xf32>
    %567 = arith.addf %566, %565 : vector<16x676xf32>
    %568 = arith.divf %566, %567 : vector<16x676xf32>
    %569 = arith.mulf %263, %568 : vector<16x676xf32>
    %c0_385 = arith.constant 0 : index
    %c0_386 = arith.constant 0 : index
    %c0_387 = arith.constant 0 : index
    %570 = vector.load %arg38[%c0_385, %c0_386, %c0_387] : memref<1x16x676xf32, #tpu.memory_space<vmem>>, vector<1x16x676xf32>
    %571 = vector.shape_cast %570 : vector<1x16x676xf32> to vector<16x676xf32>
    %572 = vector.shape_cast %569 : vector<16x676xf32> to vector<1x16x676xf32>
    tpu.vector_store %arg38[%c0_385, %c0_386, %c0_387], %572 {strides = array<i32>} : memref<1x16x676xf32, #tpu.memory_space<vmem>>, vector<1x16x676xf32>,
    return
  }
  func.func @transform_0(%arg0: i32) -> (i32, i32, i32) {
    %c0_i32 = arith.constant 0 : i32
    %c0_i32_0 = arith.constant 0 : i32
    %c0_i32_1 = arith.constant 0 : i32
    return %arg0, %c0_i32, %c0_i32_0 : i32, i32, i32
  }
  func.func @transform_1(%arg0: i32) -> (i32, i32) {
    %c0_i32 = arith.constant 0 : i32
    %c0_i32_0 = arith.constant 0 : i32
    %c0_i32_1 = arith.constant 0 : i32
    return %c0_i32, %c0_i32_0 : i32, i32
  }
  func.func @transform_2(%arg0: i32) -> (i32, i32) {
    %c0_i32 = arith.constant 0 : i32
    %c0_i32_0 = arith.constant 0 : i32
    %c0_i32_1 = arith.constant 0 : i32
    return %c0_i32, %c0_i32_0 : i32, i32
  }
  func.func @transform_3(%arg0: i32) -> (i32, i32) {
    %c0_i32 = arith.constant 0 : i32
    %c0_i32_0 = arith.constant 0 : i32
    %c0_i32_1 = arith.constant 0 : i32
    return %c0_i32, %c0_i32_0 : i32, i32
  }
  func.func @transform_4(%arg0: i32) -> (i32, i32) {
    %c0_i32 = arith.constant 0 : i32
    %c0_i32_0 = arith.constant 0 : i32
    %c0_i32_1 = arith.constant 0 : i32
    return %c0_i32, %c0_i32_0 : i32, i32
  }
  func.func @transform_5(%arg0: i32) -> (i32, i32) {
    %c0_i32 = arith.constant 0 : i32
    %c0_i32_0 = arith.constant 0 : i32
    %c0_i32_1 = arith.constant 0 : i32
    return %c0_i32, %c0_i32_0 : i32, i32
  }
  func.func @transform_6(%arg0: i32) -> (i32, i32) {
    %c0_i32 = arith.constant 0 : i32
    %c0_i32_0 = arith.constant 0 : i32
    %c0_i32_1 = arith.constant 0 : i32
    return %c0_i32, %c0_i32_0 : i32, i32
  }
  func.func @transform_7(%arg0: i32) -> (i32, i32) {
    %c0_i32 = arith.constant 0 : i32
    %c0_i32_0 = arith.constant 0 : i32
    %c0_i32_1 = arith.constant 0 : i32
    return %c0_i32, %c0_i32_0 : i32, i32
  }
  func.func @transform_8(%arg0: i32) -> (i32, i32) {
    %c0_i32 = arith.constant 0 : i32
    %c0_i32_0 = arith.constant 0 : i32
    %c0_i32_1 = arith.constant 0 : i32
    return %c0_i32, %c0_i32_0 : i32, i32
  }
  func.func @transform_9(%arg0: i32) -> (i32, i32, i32) {
    %c0_i32 = arith.constant 0 : i32
    %c0_i32_0 = arith.constant 0 : i32
    %c0_i32_1 = arith.constant 0 : i32
    %c0_i32_2 = arith.constant 0 : i32
    return %c0_i32, %c0_i32_0, %c0_i32_1 : i32, i32, i32
  }
  func.func @transform_10(%arg0: i32) -> (i32, i32) {
    %c0_i32 = arith.constant 0 : i32
    %c0_i32_0 = arith.constant 0 : i32
    %c0_i32_1 = arith.constant 0 : i32
    return %c0_i32, %c0_i32_0 : i32, i32
  }
  func.func @transform_11(%arg0: i32) -> (i32, i32) {
    %c0_i32 = arith.constant 0 : i32
    %c0_i32_0 = arith.constant 0 : i32
    %c0_i32_1 = arith.constant 0 : i32
    return %c0_i32, %c0_i32_0 : i32, i32
  }
  func.func @transform_12(%arg0: i32) -> (i32, i32) {
    %c0_i32 = arith.constant 0 : i32
    %c0_i32_0 = arith.constant 0 : i32
    %c0_i32_1 = arith.constant 0 : i32
    return %c0_i32, %c0_i32_0 : i32, i32
  }
  func.func @transform_13(%arg0: i32) -> (i32, i32, i32) {
    %c0_i32 = arith.constant 0 : i32
    %c0_i32_0 = arith.constant 0 : i32
    %c0_i32_1 = arith.constant 0 : i32
    %c0_i32_2 = arith.constant 0 : i32
    return %c0_i32, %c0_i32_0, %c0_i32_1 : i32, i32, i32
  }
  func.func @transform_14(%arg0: i32) -> (i32, i32) {
    %c0_i32 = arith.constant 0 : i32
    %c0_i32_0 = arith.constant 0 : i32
    %c0_i32_1 = arith.constant 0 : i32
    return %c0_i32, %c0_i32_0 : i32, i32
  }
  func.func @transform_15(%arg0: i32) -> (i32, i32) {
    %c0_i32 = arith.constant 0 : i32
    %c0_i32_0 = arith.constant 0 : i32
    %c0_i32_1 = arith.constant 0 : i32
    return %c0_i32, %c0_i32_0 : i32, i32
  }
  func.func @transform_16(%arg0: i32) -> (i32, i32) {
    %c0_i32 = arith.constant 0 : i32
    %c0_i32_0 = arith.constant 0 : i32
    %c0_i32_1 = arith.constant 0 : i32
    return %c0_i32, %c0_i32_0 : i32, i32
  }
  func.func @transform_17(%arg0: i32) -> (i32, i32, i32) {
    %c0_i32 = arith.constant 0 : i32
    %c0_i32_0 = arith.constant 0 : i32
    %c0_i32_1 = arith.constant 0 : i32
    %c0_i32_2 = arith.constant 0 : i32
    return %c0_i32, %c0_i32_0, %c0_i32_1 : i32, i32, i32
  }
  func.func @transform_18(%arg0: i32) -> (i32, i32) {
    %c0_i32 = arith.constant 0 : i32
    %c0_i32_0 = arith.constant 0 : i32
    %c0_i32_1 = arith.constant 0 : i32
    return %c0_i32, %c0_i32_0 : i32, i32
  }
  func.func @transform_19(%arg0: i32) -> (i32, i32, i32) {
    %c0_i32 = arith.constant 0 : i32
    %c0_i32_0 = arith.constant 0 : i32
    %c0_i32_1 = arith.constant 0 : i32
    %c0_i32_2 = arith.constant 0 : i32
    return %c0_i32, %c0_i32_0, %c0_i32_1 : i32, i32, i32
  }
  func.func @transform_20(%arg0: i32) -> (i32, i32) {
    %c0_i32 = arith.constant 0 : i32
    %c0_i32_0 = arith.constant 0 : i32
    %c0_i32_1 = arith.constant 0 : i32
    return %c0_i32, %c0_i32_0 : i32, i32
  }
  func.func @transform_21(%arg0: i32) -> (i32, i32) {
    %c0_i32 = arith.constant 0 : i32
    %c0_i32_0 = arith.constant 0 : i32
    %c0_i32_1 = arith.constant 0 : i32
    return %c0_i32, %c0_i32_0 : i32, i32
  }
  func.func @transform_22(%arg0: i32) -> (i32, i32) {
    %c0_i32 = arith.constant 0 : i32
    %c0_i32_0 = arith.constant 0 : i32
    %c0_i32_1 = arith.constant 0 : i32
    return %c0_i32, %c0_i32_0 : i32, i32
  }
  func.func @transform_23(%arg0: i32) -> (i32, i32) {
    %c0_i32 = arith.constant 0 : i32
    %c0_i32_0 = arith.constant 0 : i32
    %c0_i32_1 = arith.constant 0 : i32
    return %c0_i32, %c0_i32_0 : i32, i32
  }
  func.func @transform_24(%arg0: i32) -> (i32, i32) {
    %c0_i32 = arith.constant 0 : i32
    %c0_i32_0 = arith.constant 0 : i32
    %c0_i32_1 = arith.constant 0 : i32
    return %c0_i32, %c0_i32_0 : i32, i32
  }
  func.func @transform_25(%arg0: i32) -> (i32, i32) {
    %c0_i32 = arith.constant 0 : i32
    %c0_i32_0 = arith.constant 0 : i32
    %c0_i32_1 = arith.constant 0 : i32
    return %c0_i32, %c0_i32_0 : i32, i32
  }
  func.func @transform_26(%arg0: i32) -> (i32, i32) {
    %c0_i32 = arith.constant 0 : i32
    %c0_i32_0 = arith.constant 0 : i32
    %c0_i32_1 = arith.constant 0 : i32
    return %c0_i32, %c0_i32_0 : i32, i32
  }
  func.func @transform_27(%arg0: i32) -> (i32, i32, i32) {
    %c0_i32 = arith.constant 0 : i32
    %c0_i32_0 = arith.constant 0 : i32
    %c0_i32_1 = arith.constant 0 : i32
    %c0_i32_2 = arith.constant 0 : i32
    return %c0_i32, %c0_i32_0, %c0_i32_1 : i32, i32, i32
  }
  func.func @transform_28(%arg0: i32) -> (i32, i32) {
    %c0_i32 = arith.constant 0 : i32
    %c0_i32_0 = arith.constant 0 : i32
    %c0_i32_1 = arith.constant 0 : i32
    return %c0_i32, %c0_i32_0 : i32, i32
  }
  func.func @transform_29(%arg0: i32) -> (i32, i32, i32) {
    %c0_i32 = arith.constant 0 : i32
    %c0_i32_0 = arith.constant 0 : i32
    %c0_i32_1 = arith.constant 0 : i32
    %c0_i32_2 = arith.constant 0 : i32
    return %c0_i32, %c0_i32_0, %c0_i32_1 : i32, i32, i32
  }
  func.func @transform_30(%arg0: i32) -> (i32, i32) {
    %c0_i32 = arith.constant 0 : i32
    %c0_i32_0 = arith.constant 0 : i32
    %c0_i32_1 = arith.constant 0 : i32
    return %c0_i32, %c0_i32_0 : i32, i32
  }
  func.func @transform_31(%arg0: i32) -> (i32, i32, i32) {
    %c0_i32 = arith.constant 0 : i32
    %c0_i32_0 = arith.constant 0 : i32
    %c0_i32_1 = arith.constant 0 : i32
    %c0_i32_2 = arith.constant 0 : i32
    return %c0_i32, %c0_i32_0, %c0_i32_1 : i32, i32, i32
  }
  func.func @transform_32(%arg0: i32) -> (i32, i32) {
    %c0_i32 = arith.constant 0 : i32
    %c0_i32_0 = arith.constant 0 : i32
    %c0_i32_1 = arith.constant 0 : i32
    return %c0_i32, %c0_i32_0 : i32, i32
  }
  func.func @transform_33(%arg0: i32) -> (i32, i32, i32) {
    %c0_i32 = arith.constant 0 : i32
    %c0_i32_0 = arith.constant 0 : i32
    %c0_i32_1 = arith.constant 0 : i32
    %c0_i32_2 = arith.constant 0 : i32
    return %c0_i32, %c0_i32_0, %c0_i32_1 : i32, i32, i32
  }
  func.func @transform_34(%arg0: i32) -> (i32, i32) {
    %c0_i32 = arith.constant 0 : i32
    %c0_i32_0 = arith.constant 0 : i32
    %c0_i32_1 = arith.constant 0 : i32
    return %c0_i32, %c0_i32_0 : i32, i32
  }
  func.func @transform_35(%arg0: i32) -> (i32, i32) {
    %c0_i32 = arith.constant 0 : i32
    %c0_i32_0 = arith.constant 0 : i32
    %c0_i32_1 = arith.constant 0 : i32
    return %c0_i32, %c0_i32_0 : i32, i32
  }
  func.func @transform_36(%arg0: i32) -> (i32, i32) {
    %c0_i32 = arith.constant 0 : i32
    %c0_i32_0 = arith.constant 0 : i32
    %c0_i32_1 = arith.constant 0 : i32
    return %c0_i32, %c0_i32_0 : i32, i32
  }
  func.func @transform_37(%arg0: i32) -> (i32, i32, i32) {
    %c0_i32 = arith.constant 0 : i32
    %c0_i32_0 = arith.constant 0 : i32
    %c0_i32_1 = arith.constant 0 : i32
    return %arg0, %c0_i32, %c0_i32_0 : i32, i32, i32
  }
}

</mosaic_0001>

<bundles_post_ra>
// kernel: tpu_custom_call.1
= control target key start
LH: loop header
LB: loop body
LE: loop exit
PB: predicated region body
PF: predicated region fallthrough
CT: control target
= control target key end

     0   :  { %s22809_s6 = smov 1   ;;  %s22810_s10 = smov 2   ;;  %s26017_s0 = inlined_call_operand.smem [shape: u32[38], index: -1, kind: input, shape index: {}] }
   0x1   :  { %s22898_s5 = sld [smem:[%s26017_s0]]   ;;  %s22811_s14 = smov 3  }
   0x2   :  { %s22903_s9 = sld [smem:[%s26017_s0 + %s22809_s6]]   ;;  %s22812_s18 = smov 4  }
   0x3   :  { %s22908_s13 = sld [smem:[%s26017_s0 + %s22810_s10]]   ;;  %s22813_s22 = smov 5  }
   0x4   :  { %s22913_s17 = sld [smem:[%s26017_s0 + %s22811_s14]]   ;;  %s22814_s26 = smov 6  }
   0x5   :  { %s22918_s21 = sld [smem:[%s26017_s0 + %s22812_s18]]   ;;  %s22815_s30 = smov 7  }
   0x6   :  { %s22923_s25 = sld [smem:[%s26017_s0 + %s22813_s22]]   ;;  %s22816_s4 = smov 8  }
   0x7   :  { %26081 = sst [smem:[#allocation31_spill]] %s22898_s5  ;;  %s22817_s10 = smov 9  }
   0x8   :  { %s22928_s29 = sld [smem:[%s26017_s0 + %s22814_s26]]   ;;  %s22818_s15 = smov 10  }
   0x9   :  { %26082 = sst [smem:[#allocation32_spill]] %s22908_s13  ;;  %s22819_s20 = smov 11  }
   0xa   :  { %s22933_s3 = sld [smem:[%s26017_s0 + %s22815_s30]]   ;;  %s22820_s26 = smov 12  }
   0xb   :  { %s22938_s8 = sld [smem:[%s26017_s0 + %s22816_s4]]   ;;  %s22821_s1 = smov 13  }
   0xc   :  { %s22943_s14 = sld [smem:[%s26017_s0 + %s22817_s10]]   ;;  %s22822_s7 = smov 14  }
   0xd   :  { %s22948_s19 = sld [smem:[%s26017_s0 + %s22818_s15]]   ;;  %s22823_s15 = smov 15  }
   0xe   :  { %26083 = sst [smem:[#allocation33_spill]] %s22928_s29  ;;  %s22824_s22 = smov 16  }
   0xf   :  { %s22953_s24 = sld [smem:[%s26017_s0 + %s22819_s20]]   ;;  %s22825_s28 = smov 17  }
  0x10   :  { %26084 = sst [smem:[#allocation34_spill]] %s22933_s3 }
  0x11   :  { %26085 = sst [smem:[#allocation35_spill]] %s22938_s8 }
  0x12   :  { %26086 = sst [smem:[#allocation36_spill]] %s22943_s14 }
  0x13   :  { %s22958_s30 = sld [smem:[%s26017_s0 + %s22820_s26]]  }
  0x14   :  { %s22963_s6 = sld [smem:[%s26017_s0 + %s22821_s1]]  }
  0x15   :  { %s22968_s12 = sld [smem:[%s26017_s0 + %s22822_s7]]   ;;  %s22826_s7 = smov 18  }
  0x16   :  { %s22973_s20 = sld [smem:[%s26017_s0 + %s22823_s15]]   ;;  %s22827_s15 = smov 19  }
  0x17   :  { %s22978_s27 = sld [smem:[%s26017_s0 + %s22824_s22]]   ;;  %s22828_s22 = smov 20  }
  0x18   :  { %s22983_s4 = sld [smem:[%s26017_s0 + %s22825_s28]]   ;;  %s22829_s28 = smov 21  }
  0x19   :  { %26087 = sst [smem:[#allocation37_spill]] %s22958_s30 }
  0x1a   :  { %26088 = sst [smem:[#allocation38_spill]] %s22963_s6 }
  0x1b   :  { %26089 = sst [smem:[#allocation39_spill]] %s22968_s12 }
  0x1c   :  { %s22988_s29 = sld [smem:[%s26017_s0 + %s22826_s7]]   ;;  %s22830_s7 = smov 22  }
  0x1d   :  { %26090 = sst [smem:[#allocation40_spill]] %s22978_s27 }
  0x1e   :  { %26091 = sst [smem:[#allocation41_spill]] %s22983_s4 }
  0x1f   :  { %s22993_s30 = sld [smem:[%s26017_s0 + %s22827_s15]]   ;;  %s22831_s15 = smov 23  }
  0x20   :  { %s22998_s27 = sld [smem:[%s26017_s0 + %s22828_s22]]   ;;  %s22832_s22 = smov 24  }
  0x21   :  { %s23003_s8 = sld [smem:[%s26017_s0 + %s22829_s28]]   ;;  %s22833_s28 = smov 25  }
  0x22   :  { %26092 = sst [smem:[#allocation42_spill]] %s22988_s29 }
  0x23   :  { %s23008_s29 = sld [smem:[%s26017_s0 + %s22830_s7]]   ;;  %s22834_s7 = smov 26  }
  0x25   :  { %26093 = sst [smem:[#allocation43_spill]] %s22993_s30 }
  0x26   :  { %26094 = sst [smem:[#allocation44_spill]] %s22998_s27 }
  0x27   :  { %26095 = sst [smem:[#allocation45_spill]] %s23003_s8 }
  0x28   :  { %s23013_s30 = sld [smem:[%s26017_s0 + %s22831_s15]]   ;;  %s22835_s15 = smov 27  }
  0x29   :  { %26096 = sst [smem:[#allocation46_spill]] %s23008_s29 }
  0x2a   :  { %s23018_s27 = sld [smem:[%s26017_s0 + %s22832_s22]]   ;;  %s22836_s22 = smov 28  }
  0x2b   :  { %s23023_s8 = sld [smem:[%s26017_s0 + %s22833_s28]]   ;;  %s22837_s28 = smov 29  }
  0x2c   :  { %s23028_s29 = sld [smem:[%s26017_s0 + %s22834_s7]]   ;;  %s22838_s7 = smov 30  }
  0x2d   :  { %s23033_s12 = sld [smem:[%s26017_s0 + %s22835_s15]]   ;;  %s22839_s15 = smov 31  }
  0x2e   :  { %s23043_s14 = sld [smem:[%s26017_s0 + %s22837_s28]]   ;;  %s22841_s28 = smov 33  }
  0x30   :  { %26097 = sst [smem:[#allocation47_spill]] %s23018_s27 }
  0x31   :  { %26098 = sst [smem:[#allocation48_spill]] %s23023_s8 }
  0x32   :  { %26099 = sst [smem:[#allocation49_spill]] %s23028_s29 }
  0x33   :  { %26100 = sst [smem:[#allocation50_spill]] %s23033_s12 }
  0x34   :  { %s23038_s27 = sld [smem:[%s26017_s0 + %s22836_s22]]   ;;  %s22840_s22 = smov 32  }
  0x35   :  { %26102 = sst [smem:[#allocation52_spill]] %s23043_s14 }
  0x36   :  { %s23048_s29 = sld [smem:[%s26017_s0 + %s22838_s7]]   ;;  %s22842_s7 = smov 34  }
  0x37   :  { %s23053_s12 = sld [smem:[%s26017_s0 + %s22839_s15]]   ;;  %s22843_s15 = smov 35  }
  0x38   :  { %s23063_s14 = sld [smem:[%s26017_s0 + %s22841_s28]]   ;;  %s22845_s28 = smov 37  }
  0x3a   :  { %26101 = sst [smem:[#allocation51_spill]] %s23038_s27 }
  0x3b   :  { %s23058_s27 = sld [smem:[%s26017_s0 + %s22840_s22]]   ;;  %s22844_s22 = smov 36  }
  0x3c   :  { %26103 = sst [smem:[#allocation53_spill]] %s23048_s29 }
  0x3d   :  { %26104 = sst [smem:[#allocation54_spill]] %s23053_s12 }
  0x3e   :  { %26106 = sst [smem:[#allocation56_spill]] %s23063_s14 }
  0x3f   :  { %s23068_s29 = sld [smem:[%s26017_s0 + %s22842_s7]]  }
  0x40   :  { %s23073_s12 = sld [smem:[%s26017_s0 + %s22843_s15]]  }
  0x41   :  { %26105 = sst [smem:[#allocation55_spill]] %s23058_s27 }
  0x42   :  { %s23078_s27 = sld [smem:[%s26017_s0 + %s22844_s22]]  }
  0x43   :  { %s23083_s14 = sld [smem:[%s26017_s0 + %s22845_s28]]  }
  0x44   :  { %80 = vsyncpa [#allocation3], 0 }
  0x45   :  { %81 = vsyncpa [#allocation6], 0 }
  0x46   :  { %82 = vsyncpa [#allocation9], 0 }
  0x47   :  { %83 = vsyncpa [#allocation12], 0 }
  0x48   :  { %84 = vsyncpa [#allocation15], 0 }
  0x49   :  { %85 = vsyncpa [#allocation18], 0 }
  0x4a   :  { %86 = vsyncpa [#allocation21], 0 }
  0x4b   :  { %87 = vsyncpa [#allocation4], 0 }
  0x4c   :  { %89 = vsyncpa [#allocation4 + $0x1], 0  ;;  %s23085_s7 = smov 0   ;;  %s23087_s10 = smov 0  }
  0x4d   :  { %s23089_s11 = smov 0   ;;  %s23091_s15 = smov 0  }
  0x4e LB: > { %s26107_s8 = sld [smem:[#allocation48_spill]]  ;;  %s26108_s4 = sld [smem:[#allocation41_spill]]  ;;  %s22795_s7 = sphi %s23085_s7, %s26235_s7   ;;  %s22807_s15 = sphi %s23091_s15, %s26232_s15   ;;  %s22803_s11 = sphi %s23089_s11, %s26234_s11   ;;  %s22799_s10 = sphi %s23087_s10, %s26236_s10  }
  0x4f   : > { %s26109_s6 = sld [smem:[#allocation38_spill]]  ;;  %s26110_s3 = sld [smem:[#allocation34_spill]] }
  0x50   : > { %s26111_s13 = sld [smem:[#allocation32_spill]]  ;;  %26112 = sst [smem:[#allocation57_spill]] %s22795_s7 }
  0x51   : > { %26113 = sst [smem:[#allocation58_spill]] %s22803_s11  ;;  %s23106_s0 = sadd.s32 4294967295, %s22807_s15  }
  0x52   : > { %s19008_s16 = sadd.s32 4294967294, %s22807_s15   ;;  %s23110_s18 = sadd.s32 1, %s22807_s15  }
  0x53   : > { %26114 = sst [smem:[#allocation59_spill]] %s23110_s18  ;;  %s884_s22 = sadd.s32 1, %s22803_s11 }
  0x54   : > { %s881_s23 = ssub.s32 %s22807_s15, %s23110_s18  ;;  %p894_p0 = scmp.ne.s32.totalorder %s22803_s11, %s22799_s10 }
  0x55   : > { %p882_p1 = scmp.eq.s32.totalorder %s881_s23, 0  ;;  %p895_p2 = scmp.eq.s32.totalorder %s23106_s0, 1 }
  0x56   : > { %p900_p3 = scmp.ne.s32.totalorder %s22799_s10, %s22795_s7  ;;  %p901_p4 = scmp.eq.s32.totalorder %s19008_s16, 1 }
  0x57   : > { %s23121_s26 = scalar_select %p882_p1, %s22803_s11, %s884_s22  }
  0x58   : > { %p23123_p5 = por %p895_p2, %p894_p0  ;;  %p23127_p6 = por %p901_p4, %p900_p3 }
  0x59   : > { %26115 = sst [smem:[#allocation60_spill]] %s23121_s26  ;;  %p19009_p7 = scmp.ge.s32.totalorder %s22807_s15, 1 }
  0x5a   : > { %s26116_s28 = scalar_select %p23123_p5, 1, 0 }
  0x5b   : > { %s26117_s1 = scalar_select %p23127_p6, 1, 0 }
  0x5c   : > { %p908_p8 = scmp.lt.s32.totalorder %s22807_s15, 3  ;;  %p26034_p9 = scmp.eq.s32.totalorder %s23106_s0, 0 }
  0x5d   : > { %26118 = sst [smem:[#allocation61_spill]] %s26117_s1  ;;  %s22846_s16 = smov [#allocation5]  }
  0x5e   : > { %p23134_p10 = pnand %p19009_p7, %p908_p8  ;;  %s932_s22 = sshll.u32 %s22846_s16, 4  ;;  %s933_s22 = int_to_ptr.vmem [resolvable:$true] %s932_s22 }
  0x5f   : > { %s22847_s23 = smov [#allocation8]   ;;  %s22848_s18 = smov [#allocation11]  }
  0x60   : > { %s26119_s2 = scalar_select %p23134_p10, 1, 0 }
  0x61   : > { %p21218_p11 = pneg %p23134_p10  ;;  %s956_s26 = sshll.u32 %s22847_s23, 4  ;;  %s23146_s26 = int_to_ptr.vmem [resolvable:$true] %s956_s26 }
  0x62   : > { %s981_s1 = sshll.u32 %s22848_s18, 4  ;;  %s22381_s7 = scalar_lea.hbm %s26111_s13, 16  ;;  %s23148_s1 = int_to_ptr.vmem [resolvable:$true] %s981_s1 }
  0x63   : > { %p23142_p12 = pnand %p26034_p9, %p21218_p11  ;;  %p22382_p13 = scmp.ne.s32.totalorder %s26111_s13, %s22381_s7 }
  0x64   : > { %p22388_p3 = scmp.lt.u32.totalorder %s22381_s7, %s26111_s13 }
  0x65   : > { %p23154_p0 = pneg %p23142_p12 }
  0x67   : > { %p22384_p1 = pnand %p23154_p0, %p22382_p13 }
  0x69   : > { %p22385_p2 = pneg %p22384_p1 }
  0x6b   : > { %p22390_p4 = pnand %p22388_p3, %p22385_p2 }
  0x6d   : > { %22393 = shalt.err (!%p22390_p4)
}
  0x6e   : > { %s22394_s23 = scalar_lea.vmem %s933_s22, 16  ;;  %s22401_s18 = scalar_lea.vmem %s933_s22, 32 }
  0x6f   : > { %p22395_p7 = scmp.ne.s32.totalorder %s933_s22, %s22394_s23  ;;  %p22402_p9 = scmp.lt.s32.totalorder %s933_s22, %s933_s22 }
  0x70   : > { %p22403_p6 = scmp.lt.s32.totalorder %s22401_s18, %s22394_s23 }
  0x71   : > { %p22397_p8 = pnand %p22395_p7, %p23154_p0 }
  0x72   : > { %p22404_p5 = por %p22403_p6, %p22402_p9 }
  0x73   : > { %p22398_p11 = pneg %p22397_p8 }
  0x75   : > { %p22405_p10 = pnand %p22404_p5, %p22398_p11 }
  0x77   : > { %22408 = shalt.err (!%p22405_p10)
}
  0x78   : > { %21224 = dma.hbm_to_vmem [thread:$0]  (!%p23142_p12), %s26111_s13, 16, %s933_s22, [#allocation6]  }
  0x79   : > { %s22409_s7 = scalar_lea.hbm %s22918_s21, 384 }
  0x7a   : > { %p22410_p13 = scmp.ne.s32.totalorder %s22918_s21, %s22409_s7  ;;  %p22416_p3 = scmp.lt.u32.totalorder %s22409_s7, %s22918_s21 }
  0x7c   : > { %p22412_p1 = pnand %p22410_p13, %p23154_p0 }
  0x7e   : > { %p22413_p2 = pneg %p22412_p1 }
  0x80   : > { %p22418_p4 = pnand %p22416_p3, %p22413_p2 }
  0x82   : > { %22421 = shalt.err (!%p22418_p4)
}
  0x83   : > { %s22422_s23 = scalar_lea.vmem %s23146_s26, 384  ;;  %p22430_p10 = scmp.lt.s32.totalorder %s23146_s26, %s23146_s26 }
  0x84   : > { %p22423_p5 = scmp.ne.s32.totalorder %s23146_s26, %s22422_s23  ;;  %p22431_p7 = scmp.lt.s32.totalorder %s22422_s23, %s22422_s23 }
  0x86   : > { %p22425_p6 = pnand %p22423_p5, %p23154_p0  ;;  %p22432_p8 = por %p22431_p7, %p22430_p10 }
  0x88   : > { %p22426_p9 = pneg %p22425_p6 }
  0x8a   : > { %p22433_p11 = pnand %p22432_p8, %p22426_p9 }
  0x8c   : > { %22436 = shalt.err (!%p22433_p11)
}
  0x8d   : > { %21230 = dma.hbm_to_vmem [thread:$0]  (!%p23142_p12), %s22918_s21, 384, %s23146_s26, [#allocation9]  }
  0x8e   : > { %s22437_s22 = scalar_lea.hbm %s26110_s3, 128 }
  0x8f   : > { %p22438_p13 = scmp.ne.s32.totalorder %s26110_s3, %s22437_s22  ;;  %p22444_p3 = scmp.lt.u32.totalorder %s22437_s22, %s26110_s3 }
  0x91   : > { %p22440_p1 = pnand %p22438_p13, %p23154_p0 }
  0x93   : > { %p22441_p2 = pneg %p22440_p1 }
  0x95   : > { %p22446_p4 = pnand %p22444_p3, %p22441_p2 }
  0x97   : > { %22449 = shalt.err (!%p22446_p4)
}
  0x98   : > { %s22450_s18 = scalar_lea.vmem %s23148_s1, 128  ;;  %p22458_p10 = scmp.lt.s32.totalorder %s23148_s1, %s23148_s1 }
  0x99   : > { %p22451_p5 = scmp.ne.s32.totalorder %s23148_s1, %s22450_s18  ;;  %p22459_p7 = scmp.lt.s32.totalorder %s22450_s18, %s22450_s18 }
  0x9b   : > { %p22453_p6 = pnand %p22451_p5, %p23154_p0  ;;  %p22460_p8 = por %p22459_p7, %p22458_p10 }
  0x9d   : > { %p22454_p9 = pneg %p22453_p6 }
  0x9f   : > { %p22461_p11 = pnand %p22460_p8, %p22454_p9 }
  0xa1   : > { %22464 = shalt.err (!%p22461_p11)
}
  0xa2   : > { %21236 = dma.hbm_to_vmem [thread:$0]  (!%p23142_p12), %s26110_s3, 128, %s23148_s1, [#allocation12]  }
  0xa3   : > { %s22849_s26 = smov [#allocation14]   ;;  %s22850_s23 = smov [#allocation17]  }
  0xa4   : > { %s1014_s7 = sshll.u32 %s22849_s26, 4  ;;  %s1044_s22 = sshll.u32 %s22850_s23, 4  ;;  %s1015_s7 = int_to_ptr.vmem [resolvable:$true] %s1014_s7  ;;  %s1045_s22 = int_to_ptr.vmem [resolvable:$true] %s1044_s22 }
  0xa5   : > { %s22465_s13 = scalar_lea.hbm %s26109_s6, 2304 }
  0xa6   : > { %p22466_p13 = scmp.ne.s32.totalorder %s26109_s6, %s22465_s13  ;;  %p22472_p3 = scmp.lt.u32.totalorder %s22465_s13, %s26109_s6 }
  0xa8   : > { %p22468_p1 = pnand %p22466_p13, %p23154_p0 }
  0xaa   : > { %p22469_p2 = pneg %p22468_p1 }
  0xac   : > { %p22474_p4 = pnand %p22472_p3, %p22469_p2 }
  0xae   : > { %22477 = shalt.err (!%p22474_p4)
}
  0xaf   : > { %s22478_s18 = scalar_lea.vmem %s1015_s7, 2304  ;;  %p22486_p10 = scmp.lt.s32.totalorder %s1015_s7, %s1015_s7 }
  0xb0   : > { %p22479_p5 = scmp.ne.s32.totalorder %s1015_s7, %s22478_s18  ;;  %p22487_p7 = scmp.lt.s32.totalorder %s22478_s18, %s22478_s18 }
  0xb2   : > { %p22481_p6 = pnand %p22479_p5, %p23154_p0  ;;  %p22488_p8 = por %p22487_p7, %p22486_p10 }
  0xb4   : > { %p22482_p9 = pneg %p22481_p6 }
  0xb6   : > { %p22489_p11 = pnand %p22488_p8, %p22482_p9 }
  0xb8   : > { %22492 = shalt.err (!%p22489_p11)
}
  0xb9   : > { %s22851_s1 = smov 128   ;;  %s22852_s13 = smov 8  }
  0xba   : > { %21242 = dma.hbm_to_vmem [thread:$0]  (!%p23142_p12), %s26109_s6, 2304, %s1015_s7, [#allocation15], %s22851_s1, %s22851_s1, %s22852_s13  }
  0xbb   : > { %s22493_s26 = scalar_lea.hbm %s26108_s4, 2304 }
  0xbc   : > { %p22494_p13 = scmp.ne.s32.totalorder %s26108_s4, %s22493_s26  ;;  %p22500_p3 = scmp.lt.u32.totalorder %s22493_s26, %s26108_s4 }
  0xbe   : > { %p22496_p1 = pnand %p22494_p13, %p23154_p0 }
  0xc0   : > { %p22497_p2 = pneg %p22496_p1 }
  0xc2   : > { %p22502_p4 = pnand %p22500_p3, %p22497_p2 }
  0xc4   : > { %22505 = shalt.err (!%p22502_p4)
}
  0xc5   : > { %s22506_s23 = scalar_lea.vmem %s1045_s22, 2304  ;;  %p22514_p10 = scmp.lt.s32.totalorder %s1045_s22, %s1045_s22 }
  0xc6   : > { %p22507_p5 = scmp.ne.s32.totalorder %s1045_s22, %s22506_s23  ;;  %p22515_p7 = scmp.lt.s32.totalorder %s22506_s23, %s22506_s23 }
  0xc8   : > { %p22509_p6 = pnand %p22507_p5, %p23154_p0  ;;  %p22516_p8 = por %p22515_p7, %p22514_p10 }
  0xca   : > { %p22510_p9 = pneg %p22509_p6 }
  0xcc   : > { %p22517_p11 = pnand %p22516_p8, %p22510_p9 }
  0xce   : > { %22520 = shalt.err (!%p22517_p11)
}
  0xcf   : > { %21248 = dma.hbm_to_vmem [thread:$0]  (!%p23142_p12), %s26108_s4, 2304, %s1045_s22, [#allocation18], %s22851_s1, %s22851_s1, %s22852_s13  }
  0xd0   : > { %s22853_s7 = smov [#allocation2]   ;;  %s22854_s26 = smov [#allocation7]  }
  0xd1   : > { %s921_s18 = sshll.u32 %s22853_s7, 4  ;;  %s942_s3 = sshll.u32 %s22854_s26, 4  ;;  %s922_s18 = int_to_ptr.vmem [resolvable:$true] %s921_s18  ;;  %s943_s3 = int_to_ptr.vmem [resolvable:$true] %s942_s3 }
  0xd2   : > { %s22521_s23 = scalar_lea.hbm %s22903_s9, 96 }
  0xd3   : > { %p22522_p13 = scmp.ne.s32.totalorder %s22903_s9, %s22521_s23  ;;  %p22528_p3 = scmp.lt.u32.totalorder %s22521_s23, %s22903_s9 }
  0xd5   : > { %p22524_p1 = pnand %p22522_p13, %p23154_p0 }
  0xd7   : > { %p22525_p2 = pneg %p22524_p1 }
  0xd9   : > { %p22530_p4 = pnand %p22528_p3, %p22525_p2 }
  0xdb   : > { %22533 = shalt.err (!%p22530_p4)
}
  0xdc   : > { %s22534_s6 = scalar_lea.vmem %s922_s18, 96  ;;  %p22542_p10 = scmp.lt.s32.totalorder %s922_s18, %s922_s18 }
  0xdd   : > { %p22535_p5 = scmp.ne.s32.totalorder %s922_s18, %s22534_s6  ;;  %p22543_p7 = scmp.lt.s32.totalorder %s22534_s6, %s22534_s6 }
  0xdf   : > { %p22537_p6 = pnand %p22535_p5, %p23154_p0  ;;  %p22544_p8 = por %p22543_p7, %p22542_p10 }
  0xe1   : > { %p22538_p9 = pneg %p22537_p6 }
  0xe3   : > { %p22545_p11 = pnand %p22544_p8, %p22538_p9 }
  0xe5   : > { %22548 = shalt.err (!%p22545_p11)
}
  0xe6   : > { %21221 = dma.hbm_to_vmem [thread:$0]  (!%p23142_p12), %s22903_s9, 96, %s922_s18, [#allocation3]  }
  0xe7   : > { %s22549_s22 = scalar_lea.hbm %s22913_s17, 9984 }
  0xe8   : > { %p22550_p13 = scmp.ne.s32.totalorder %s22913_s17, %s22549_s22  ;;  %p22556_p3 = scmp.lt.u32.totalorder %s22549_s22, %s22913_s17 }
  0xea   : > { %p22552_p1 = pnand %p22550_p13, %p23154_p0 }
  0xec   : > { %p22553_p2 = pneg %p22552_p1 }
  0xee   : > { %p22558_p4 = pnand %p22556_p3, %p22553_p2 }
  0xf0   : > { %22561 = shalt.err (!%p22558_p4)
}
  0xf1   : > { %s22562_s6 = scalar_lea.vmem %s943_s3, 9984  ;;  %p22570_p10 = scmp.lt.s32.totalorder %s943_s3, %s943_s3 }
  0xf2   : > { %p22563_p5 = scmp.ne.s32.totalorder %s943_s3, %s22562_s6  ;;  %p22571_p7 = scmp.lt.s32.totalorder %s22562_s6, %s22562_s6 }
  0xf4   : > { %p22565_p6 = pnand %p22563_p5, %p23154_p0  ;;  %p22572_p8 = por %p22571_p7, %p22570_p10 }
  0xf6   : > { %p22566_p9 = pneg %p22565_p6 }
  0xf8   : > { %p22573_p11 = pnand %p22572_p8, %p22566_p9 }
  0xfa   : > { %22576 = shalt.err (!%p22573_p11)
}
  0xfb   : > { %21227 = dma.hbm_to_vmem [thread:$0]  (!%p23142_p12), %s22913_s17, 9984, %s943_s3, [#allocation6], %s22851_s1, %s22851_s1, %s22852_s13  }
  0xfc   : > { %s22855_s7 = smov [#allocation10]   ;;  %s22856_s26 = smov [#allocation13]  }
  0xfd   : > { %s967_s18 = sshll.u32 %s22855_s7, 4  ;;  %s1001_s23 = sshll.u32 %s22856_s26, 4  ;;  %s968_s18 = int_to_ptr.vmem [resolvable:$true] %s967_s18  ;;  %s1002_s23 = int_to_ptr.vmem [resolvable:$true] %s1001_s23 }
  0xfe   : > { %s22577_s22 = scalar_lea.hbm %s22923_s25, 64 }
  0xff   : > { %p22578_p13 = scmp.ne.s32.totalorder %s22923_s25, %s22577_s22  ;;  %p22584_p3 = scmp.lt.u32.totalorder %s22577_s22, %s22923_s25 }
 0x101   : > { %p22580_p1 = pnand %p22578_p13, %p23154_p0 }
 0x103   : > { %p22581_p2 = pneg %p22580_p1 }
 0x105   : > { %p22586_p4 = pnand %p22584_p3, %p22581_p2 }
 0x107   : > { %22589 = shalt.err (!%p22586_p4)
}
 0x108   : > { %s22590_s6 = scalar_lea.vmem %s968_s18, 64  ;;  %p22598_p10 = scmp.lt.s32.totalorder %s968_s18, %s968_s18 }
 0x109   : > { %p22591_p5 = scmp.ne.s32.totalorder %s968_s18, %s22590_s6  ;;  %p22599_p7 = scmp.lt.s32.totalorder %s22590_s6, %s22590_s6 }
 0x10b   : > { %p22593_p6 = pnand %p22591_p5, %p23154_p0  ;;  %p22600_p8 = por %p22599_p7, %p22598_p10 }
 0x10d   : > { %p22594_p9 = pneg %p22593_p6 }
 0x10f   : > { %p22601_p11 = pnand %p22600_p8, %p22594_p9 }
 0x111   : > { %22604 = shalt.err (!%p22601_p11)
}
 0x112   : > { %21233 = dma.hbm_to_vmem [thread:$0]  (!%p23142_p12), %s22923_s25, 64, %s968_s18, [#allocation9]  }
 0x113   : > { %s22605_s3 = scalar_lea.hbm %s22953_s24, 128 }
 0x114   : > { %p22606_p13 = scmp.ne.s32.totalorder %s22953_s24, %s22605_s3  ;;  %p22612_p3 = scmp.lt.u32.totalorder %s22605_s3, %s22953_s24 }
 0x116   : > { %p22608_p1 = pnand %p22606_p13, %p23154_p0 }
 0x118   : > { %p22609_p2 = pneg %p22608_p1 }
 0x11a   : > { %p22614_p4 = pnand %p22612_p3, %p22609_p2 }
 0x11c   : > { %22617 = shalt.err (!%p22614_p4)
}
 0x11d   : > { %s22618_s1 = scalar_lea.vmem %s1002_s23, 128  ;;  %p22626_p10 = scmp.lt.s32.totalorder %s1002_s23, %s1002_s23 }
 0x11e   : > { %p22619_p5 = scmp.ne.s32.totalorder %s1002_s23, %s22618_s1  ;;  %p22627_p7 = scmp.lt.s32.totalorder %s22618_s1, %s22618_s1 }
 0x120   : > { %p22621_p6 = pnand %p22619_p5, %p23154_p0  ;;  %p22628_p8 = por %p22627_p7, %p22626_p10 }
 0x122   : > { %p22622_p9 = pneg %p22621_p6 }
 0x124   : > { %p22629_p11 = pnand %p22628_p8, %p22622_p9 }
 0x126   : > { %22632 = shalt.err (!%p22629_p11)
}
 0x127   : > { %21239 = dma.hbm_to_vmem [thread:$0]  (!%p23142_p12), %s22953_s24, 128, %s1002_s23, [#allocation12]  }
 0x128   : > { %s22857_s13 = smov [#allocation16]   ;;  %s22858_s18 = smov [#allocation19]  }
 0x129   : > { %s1031_s7 = sshll.u32 %s22857_s13, 4  ;;  %s1073_s26 = sshll.u32 %s22858_s18, 4  ;;  %s1032_s7 = int_to_ptr.vmem [resolvable:$true] %s1031_s7  ;;  %s1074_s26 = int_to_ptr.vmem [resolvable:$true] %s1073_s26 }
 0x12a   : > { %s22633_s22 = scalar_lea.hbm %s22973_s20, 128 }
 0x12b   : > { %p22634_p13 = scmp.ne.s32.totalorder %s22973_s20, %s22633_s22  ;;  %p22640_p3 = scmp.lt.u32.totalorder %s22633_s22, %s22973_s20 }
 0x12d   : > { %p22636_p1 = pnand %p22634_p13, %p23154_p0 }
 0x12f   : > { %p22637_p2 = pneg %p22636_p1 }
 0x131   : > { %p22642_p4 = pnand %p22640_p3, %p22637_p2 }
 0x133   : > { %22645 = shalt.err (!%p22642_p4)
}
 0x134   : > { %s22646_s6 = scalar_lea.vmem %s1032_s7, 128  ;;  %p22654_p10 = scmp.lt.s32.totalorder %s1032_s7, %s1032_s7 }
 0x135   : > { %p22647_p5 = scmp.ne.s32.totalorder %s1032_s7, %s22646_s6  ;;  %p22655_p7 = scmp.lt.s32.totalorder %s22646_s6, %s22646_s6 }
 0x137   : > { %p22649_p6 = pnand %p22647_p5, %p23154_p0  ;;  %p22656_p8 = por %p22655_p7, %p22654_p10 }
 0x139   : > { %p22650_p9 = pneg %p22649_p6 }
 0x13b   : > { %p22657_p11 = pnand %p22656_p8, %p22650_p9 }
 0x13d   : > { %22660 = shalt.err (!%p22657_p11)
}
 0x13e   : > { %21245 = dma.hbm_to_vmem [thread:$0]  (!%p23142_p12), %s22973_s20, 128, %s1032_s7, [#allocation15]  }
 0x13f   : > { %s22661_s23 = scalar_lea.hbm %s23013_s30, 64 }
 0x140   : > { %p22662_p13 = scmp.ne.s32.totalorder %s23013_s30, %s22661_s23  ;;  %p22668_p3 = scmp.lt.u32.totalorder %s22661_s23, %s23013_s30 }
 0x142   : > { %p22664_p1 = pnand %p22662_p13, %p23154_p0 }
 0x144   : > { %p22665_p2 = pneg %p22664_p1 }
 0x146   : > { %p22670_p4 = pnand %p22668_p3, %p22665_p2 }
 0x148   : > { %22673 = shalt.err (!%p22670_p4)
}
 0x149   : > { %s22674_s3 = scalar_lea.vmem %s1074_s26, 64  ;;  %p22682_p10 = scmp.lt.s32.totalorder %s1074_s26, %s1074_s26 }
 0x14a   : > { %p22675_p5 = scmp.ne.s32.totalorder %s1074_s26, %s22674_s3  ;;  %p22683_p7 = scmp.lt.s32.totalorder %s22674_s3, %s22674_s3 }
 0x14c   : > { %p22677_p6 = pnand %p22675_p5, %p23154_p0  ;;  %p22684_p8 = por %p22683_p7, %p22682_p10 }
 0x14e   : > { %p22678_p9 = pneg %p22677_p6 }
 0x150   : > { %p22685_p11 = pnand %p22684_p8, %p22678_p9 }
 0x152   : > { %22688 = shalt.err (!%p22685_p11)
}
 0x153   : > { %21251 = dma.hbm_to_vmem [thread:$0]  (!%p23142_p12), %s23013_s30, 64, %s1074_s26, [#allocation18]  }
 0x154   : > { %s22859_s1 = smov [#allocation20]   ;;  %s22689_s7 = scalar_lea.hbm %s26107_s8, 64 }
 0x155   : > { %s1087_s13 = sshll.u32 %s22859_s1, 4  ;;  %p22690_p13 = scmp.ne.s32.totalorder %s26107_s8, %s22689_s7  ;;  %s1088_s13 = int_to_ptr.vmem [resolvable:$true] %s1087_s13 }
 0x156   : > { %p22696_p3 = scmp.lt.u32.totalorder %s22689_s7, %s26107_s8 }
 0x157   : > { %p22692_p1 = pnand %p22690_p13, %p23154_p0 }
 0x159   : > { %p22693_p2 = pneg %p22692_p1 }
 0x15b   : > { %p22698_p4 = pnand %p22696_p3, %p22693_p2 }
 0x15d   : > { %22701 = shalt.err (!%p22698_p4)
}
 0x15e   : > { %s22702_s18 = scalar_lea.vmem %s1088_s13, 64  ;;  %p22710_p10 = scmp.lt.s32.totalorder %s1088_s13, %s1088_s13 }
 0x15f   : > { %p22703_p5 = scmp.ne.s32.totalorder %s1088_s13, %s22702_s18  ;;  %p22711_p7 = scmp.lt.s32.totalorder %s22702_s18, %s22702_s18 }
 0x161   : > { %p22705_p6 = pnand %p22703_p5, %p23154_p0  ;;  %p22712_p8 = por %p22711_p7, %p22710_p10 }
 0x163   : > { %p22706_p9 = pneg %p22705_p6 }
 0x165   : > { %p22713_p11 = pnand %p22712_p8, %p22706_p9 }
 0x167   : > { %22716 = shalt.err (!%p22713_p11)
}
 0x168   : > { %21254 = dma.hbm_to_vmem [thread:$0]  (!%p23142_p12), %s26107_s8, 64, %s1088_s13, [#allocation21]  }
 0x169   : > { %p26122_p13 = scmp.ne.s32.totalorder %s26119_s2, 0 }
 0x16a   : > { %p26123_p1 = scmp.eq.s32.totalorder (!%p26122_p13), %s23106_s0, 0 }
 0x16b   : > { %1141 = sbr.rel (%p26122_p13) target bundleno = 6499 (0x1963), region = 168 }
 0x172   : > { %22762 = dma.done.wait (%p26123_p1), [#allocation3], 96   ;;  %p26124_p2 = pmov %p26123_p1 }
 0x173   : > { %p26125_p0 = pmov %p26123_p1 }
 0x174   : > { %22764 = vsyncadd (%p26124_p2), [#allocation3], 4294967200 }
 0x175   : > { %22766 = dma.done.wait (%p26125_p0), [#allocation6], 10000   ;;  %p26126_p3 = pmov %p26125_p0 }
 0x176   : > { %p26127_p4 = pmov %p26125_p0 }
 0x177   : > { %22768 = vsyncadd (%p26126_p3), [#allocation6], 4294957296 }
 0x178   : > { %22770 = dma.done.wait (%p26127_p4), [#allocation9], 448   ;;  %p26128_p12 = pmov %p26125_p0 }
 0x179   : > { %p26129_p5 = pmov %p26125_p0 }
 0x17a   : > { %22772 = vsyncadd (%p26128_p12), [#allocation9], 4294966848 }
 0x17b   : > { %22774 = dma.done.wait (%p26129_p5), [#allocation12], 256   ;;  %p26130_p6 = pmov %p26125_p0 }
 0x17c   : > { %p26131_p9 = pmov %p26125_p0 }
 0x17d   : > { %22776 = vsyncadd (%p26130_p6), [#allocation12], 4294967040 }
 0x17e   : > { %22778 = dma.done.wait (%p26131_p9), [#allocation15], 2432   ;;  %p26132_p10 = pmov %p26125_p0 }
 0x17f   : > { %p26133_p7 = pmov %p26125_p0 }
 0x180   : > { %22780 = vsyncadd (%p26132_p10), [#allocation15], 4294964864 }
 0x181   : > { %22782 = dma.done.wait (%p26133_p7), [#allocation18], 2368   ;;  %p26134_p8 = pmov %p26125_p0 }
 0x182   : > { %p26135_p11 = pmov %p26125_p0 }
 0x183   : > { %22784 = vsyncadd (%p26134_p8), [#allocation18], 4294964928 }
 0x184   : > { %22786 = dma.done.wait (%p26135_p11), [#allocation21], 64   ;;  %p26136_p13 = pmov %p26125_p0 }
 0x185   : > { %s26137_s5 = sld [smem:[#allocation31_spill]]  ;;  %p1277_p1 = scmp.lt.s32.totalorder %s23106_s0, 1  ;;  %v26061_v0 = vmov 0.0   ;;  %v1296_v23 = vld [vmem:[#allocation11] sm:$0xff]  ;;  %vm1303_vm0 = vcmask 130048   ;;  %v1520_v32 = vld [vmem:[%s22948_s19] sm:$0xff] }
 0x186   : > { %22788 = vsyncadd (%p26136_p13), [#allocation21], 4294967232  ;;  %1442 = vmatprep.mubr.f32.mxu1 %v26061_v0  ;;  %1371 = vmatprep.mubr.f32.mxu0 %v26061_v0  ;;  %s26043_s26 = smov 127   ;;  %s26041_s22 = smov 126   ;;  %v1521_v33 = vld [vmem:[%s22948_s19 + $0x8] sm:$0xff]  ;;  %v22869_v34 = vmov 0  }
 0x187   : > { %s1278_s11 = scalar_select %p1277_p1, %s23106_s0, 1  ;;  %21626 = vset.pattern.permute.xlu0 %v22869_v34  ;;  %21627 = vset.pattern.permute.xlu1 %v22869_v34  ;;  %vm1557_vm1 = vcmask 1039360   ;;  %vm2069_vm2 = vcmask 1031168   ;;  %vm2362_vm3 = vcmask 834560   ;;  %vm2655_vm4 = vcmask 826368  }
 0x188   : > { %s22863_s6 = smov 102   ;;  %s22864_s23 = smov 101   ;;  %vm2948_vm5 = vcmask 818176   ;;  %vm26064_vm6 = vcmask 621568   ;;  %vm26063_vm7 = vcmask 613376   ;;  %vm26040_vm8 = vcmask 605184  }
 0x189   : > { %s21166_s2 = smul.u32 96, %s1278_s11  ;;  %s26050_s3 = smov 100   ;;  %vm4143_vm9 = vcmask 220160   ;;  %vm4166_vm10 = vcmask 72704  }
 0x18a   : > { %s26047_s1 = smov 76   ;;  %s22867_s13 = smov 75  }
 0x18b   : > { %s23330_s16 = scalar_lea.vmem %s26137_s5, %s21166_s2  ;;  %s26065_s7 = smov 74  }
 0x18c   : > { %v1283_v1 = vld [vmem:[%s23330_s16 + $0x8] sm:$0xff]  ;;  %v1284_v2 = vld [vmem:[%s23330_s16 + $0x10] sm:$0xff]  ;;  %v23335_v3 = vld [vmem:[%s23330_s16] sm:$0xff]  ;;  %s26138_s18 = sld [smem:[#allocation36_spill]]  ;;  %s26045_s11 = smov 27  }
 0x18d   : > { %v23337_v4 = vpack.i.bf16 %v1284_v2, %v1283_v1  ;;  %v23340_v5 = vld [vmem:[%s23330_s16 + $0x30] sm:$0xff]  ;;  %v1289_v6 = vld [vmem:[%s23330_s16 + $0x38] sm:$0xff]  ;;  %v1290_v7 = vld [vmem:[%s23330_s16 + $0x40] sm:$0xff]  ;;  %s26139_s2 = sld [smem:[#allocation39_spill]]  ;;  %s26199_s4 = smov 74  }
 0x18e   : > { %v23346_v8 = vpack.i.bf16 %v23340_v5, %v23335_v3  ;;  %v23349_v9 = vld [vmem:[%s23330_s16 + $0x20] sm:$0xff]  ;;  %v23352_v10 = vld [vmem:[%s23330_s16 + $0x50] sm:$0xff]  ;;  %v23356_v11 = vpack.i.bf16 %v1290_v7, %v1289_v6  ;;  %v23366_v13 = vld [vmem:[%s23330_s16 + $0x18] sm:$0xff]  ;;  %v23381_v17 = vpack.c.bf16 %v1290_v7, %v1284_v2  ;;  %v23385_v20 = vpack.c.bf16 %v1289_v6, %v1283_v1  ;;  %s26078_s5 = smov 120   ;;  %s26225_s8 = smov 120  }
 0x18f   : > { %21397 = vrot.lane.b32.xlu0 %v23337_v4, %s26043_s26  ;;  %v21411_v12 = vpack.i.bf16 %v23352_v10, %v23349_v9  ;;  %v23369_v14 = vld [vmem:[%s23330_s16 + $0x48] sm:$0xff]  ;;  %v1293_v19 = vld [vmem:[%s23330_s16 + $0x58] sm:$0xff]  ;;  %v23389_v21 = vpack.c.bf16 %v23340_v5, %v23335_v3  ;;  %v23400_v24 = vpack.c.bf16 %v23352_v10, %v23349_v9  ;;  %v21581_v27 = vpack.i.bf16 %v23349_v9, %v23366_v13  ;;  %p26228_p0 = scmp.ne.s32.totalorder %s26116_s28, 0 }
 0x190   : > { %21407 = vrot.lane.b32.xlu1 %v23346_v8, %s26043_s26  ;;  %v21431_v15 = vpack.i.bf16 %v23369_v14, %v23366_v13  ;;  %v23379_v16 = vpack.c.bf16 %v23369_v14, %v23366_v13  ;;  %v1287_v18 = vld [vmem:[%s23330_s16 + $0x28] sm:$0xff]  ;;  %20250 = vmatprep.subr.bf16.mxu0 %v23385_v20  ;;  %v21461_v26 = vpack.i.bf16 %v1293_v19, %v23352_v10 }
 0x191   : > { %v20257_v22 = vpack.c.bf16 %v1293_v19, %v1287_v18  ;;  %20252 = vmatpush1.bf16.msra.mxu0 %v23389_v21  ;;  %v21456_v25 = vpack.i.bf16 %v1287_v18, %v23349_v9  ;;  %v21586_v28 = vpack.i.bf16 %v23352_v10, %v23369_v14  ;;  %v21591_v29 = vpack.i.bf16 %v1293_v19, %v1287_v18 }
 0x192   : > { %20254 = vmatprep.subr.bf16.mxu1 %v23379_v16  ;;  %v21606_v30 = vpack.i.bf16 %v23366_v13, %v23335_v3  ;;  %v21611_v31 = vpack.i.bf16 %v23340_v5, %v23349_v9  ;;  %v19040_v56 = vld [vmem:[%s26138_s18 + $0x10] sm:$0xff]  ;;  %v19041_v61 = vld [vmem:[%s26138_s18 + $0x18] sm:$0xff]  ;;  %v1522_v13 = vld [vmem:[%s26138_s18] sm:$0xff] }
 0x193   : > { %21402 = vrot.lane.b32.xlu0 %v23356_v11, %s26043_s26  ;;  %20256 = vmatpush1.bf16.msra.mxu1 %v23381_v17 }
 0x194   : > { %21412 = vrot.lane.b32.xlu1 %v21411_v12, %s26043_s26  ;;  %20258 = vmatprep.subr.bf16.mxu0 %v20257_v22  ;;  %v1523_v22 = vld [vmem:[%s26138_s18 + $0x8] sm:$0xff] }
 0x195   : > { %19037 = vmatmul.mubr.msk.f32.vlgmr.msra.gmra.mrb[0].mxu0 %vm1303_vm0, %v1296_v23 }
 0x196   : > { %19038 = vmatmul.mubr.msk.f32.vlgmr.msra.gmra.mrb[0].mxu1 %vm1303_vm0, %v1296_v23  ;;  %20260 = vmatpush1.bf16.msra.mxu0 %v23400_v24 }
 0x197   : > { %21417 = vrot.lane.b32.xlu0 %v23337_v4, %s26041_s22  ;;  %1646 = vmatprep.mubr.f32.mxu1 %v26061_v0 }
 0x198   : > { %21422 = vrot.lane.b32.xlu1 %v23356_v11, %s26041_s22  ;;  %1513 = vmatprep.mubr.f32.mxu0 %v26061_v0 }
 0x199   : > { %19039 = vmatmul.mubr.msk.f32.vlgmr.msra.gmra.mrb[2].mxu0 %vm1303_vm0, %v1296_v23 }
 0x19a   : > { %1723 = vmatprep.mubr.f32.mxu0 %v26061_v0 }
 0x19b   : > { %21427 = vrot.lane.b32.xlu0 %v23346_v8, %s26041_s22 }
 0x19c   : > { %21432 = vrot.lane.b32.xlu1 %v21431_v15, %s26043_s26 }
 0x19f   : > { %21437 = vrot.lane.b32.xlu0 %v21411_v12, %s26041_s22 }
 0x1a0   : > { %21442 = vrot.lane.b32.xlu1 %v23337_v4, %s22863_s6 }
 0x1a3   : > { %21447 = vrot.lane.b32.xlu0 %v23356_v11, %s22863_s6 }
 0x1a4   : > { %21452 = vrot.lane.b32.xlu1 %v23346_v8, %s22863_s6 }
 0x1a7   : > { %21457 = vrot.lane.b32.xlu0 %v21456_v25, %s22863_s6 }
 0x1a8   : > { %21462 = vrot.lane.b32.xlu1 %v21461_v26, %s22863_s6 }
 0x1ab   : > { %21467 = vrot.lane.b32.xlu0 %v23337_v4, %s22864_s23 }
 0x1ac   : > { %21472 = vrot.lane.b32.xlu1 %v23356_v11, %s22864_s23 }
 0x1af   : > { %21477 = vrot.lane.b32.xlu0 %v21431_v15, %s26041_s22 }
 0x1b0   : > { %21482 = vrot.lane.b32.xlu1 %v23346_v8, %s22864_s23 }
 0x1b3   : > { %21487 = vrot.lane.b32.xlu0 %v21456_v25, %s22864_s23 }
 0x1b4   : > { %21492 = vrot.lane.b32.xlu1 %v21461_v26, %s22864_s23 }
 0x1b7   : > { %21497 = vrot.lane.b32.xlu0 %v21431_v15, %s22863_s6 }
 0x1b8   : > { %21502 = vrot.lane.b32.xlu1 %v23337_v4, %s26050_s3 }
 0x1bb   : > { %21507 = vrot.lane.b32.xlu0 %v23356_v11, %s26050_s3 }
 0x1bc   : > { %21512 = vrot.lane.b32.xlu1 %v23346_v8, %s26050_s3 }
 0x1bf   : > { %21517 = vrot.lane.b32.xlu0 %v21431_v15, %s22864_s23 }
 0x1c0   : > { %21522 = vrot.lane.b32.xlu1 %v21456_v25, %s26050_s3 }
 0x1c3   : > { %21527 = vrot.lane.b32.xlu0 %v21461_v26, %s26050_s3 }
 0x1c4   : > { %21532 = vrot.lane.b32.xlu1 %v23337_v4, %s26047_s1 }
 0x1c7   : > { %21537 = vrot.lane.b32.xlu0 %v23356_v11, %s26047_s1 }
 0x1c8   : > { %21542 = vrot.lane.b32.xlu1 %v21431_v15, %s26050_s3 }
 0x1cb   : > { %21547 = vrot.lane.b32.xlu0 %v23346_v8, %s26047_s1 }
 0x1cc   : > { %21552 = vrot.lane.b32.xlu1 %v21456_v25, %s26047_s1 }
 0x1cf   : > { %21557 = vrot.lane.b32.xlu0 %v21461_v26, %s26047_s1 }
 0x1d0   : > { %21562 = vrot.lane.b32.xlu1 %v21431_v15, %s26047_s1 }
 0x1d3   : > { %21567 = vrot.lane.b32.xlu0 %v23337_v4, %s22867_s13 }
 0x1d4   : > { %21572 = vrot.lane.b32.xlu1 %v23356_v11, %s22867_s13 }
 0x1d7   : > { %21577 = vrot.lane.b32.xlu0 %v23346_v8, %s22867_s13 }
 0x1d8   : > { %21582 = vrot.lane.b32.xlu1 %v21581_v27, %s22867_s13 }
 0x1db   : > { %21587 = vrot.lane.b32.xlu0 %v21586_v28, %s22867_s13 }
 0x1dc   : > { %21592 = vrot.lane.b32.xlu1 %v21591_v29, %s22867_s13 }
 0x1df   : > { %21597 = vrot.lane.b32.xlu0 %v23337_v4, %s26065_s7 }
 0x1e0   : > { %21602 = vrot.lane.b32.xlu1 %v23356_v11, %s26065_s7 }
 0x1e3   : > { %21607 = vrot.lane.b32.xlu0 %v21606_v30, %s26065_s7 }
 0x1e4   : > { %21612 = vrot.lane.b32.xlu1 %v21611_v31, %s26065_s7 }
 0x1e7   : > { %21617 = vrot.lane.b32.xlu0 %v21586_v28, %s26065_s7 }
 0x1e8   : > { %21622 = vrot.lane.b32.xlu1 %v21591_v29, %s26065_s7 }
 0x1eb   : > { %4095 = vperm.xlu0 %21626, %v1520_v32  }
 0x1ec   : > { %4100 = vperm.xlu1 %21627, %v1521_v33  }
 0x201   : > { %v21398_v35 = vpop.permute.xlu0 %21397 }
 0x202   : > { %v21408_v36 = vpop.permute.xlu1 %21407  ;;  %v21400_v37 = vunpack.i.h.bf16 %v21398_v35  ;;  %v21399_v38 = vunpack.i.l.bf16 %v21398_v35 }
 0x203   : > { %v21410_v39 = vunpack.i.h.bf16 %v21408_v36  ;;  %v21409_v40 = vunpack.i.l.bf16 %v21408_v36 }
 0x204   : > { %v1559_v49 = vsel %vm1557_vm1, %v21399_v38, %v21400_v37 }
 0x205   : > { %v21403_v41 = vpop.permute.xlu0 %21402  ;;  %v1558_v47 = vsel %vm1557_vm1, %v21409_v40, %v21399_v38 }
 0x206   : > { %v21405_v42 = vunpack.i.h.bf16 %v21403_v41  ;;  %v21404_v43 = vunpack.i.l.bf16 %v21403_v41  ;;  %v21413_v44 = vpop.permute.xlu1 %21412 }
 0x207   : > { %v21415_v45 = vunpack.i.h.bf16 %v21413_v44  ;;  %v21414_v46 = vunpack.i.l.bf16 %v21413_v44 }
 0x208   : > { %v1562_v48 = vsel %vm1557_vm1, %v21410_v39, %v21404_v43  ;;  %v1563_v50 = vsel %vm1557_vm1, %v21404_v43, %v21405_v42 }
 0x209   : > { %v23480_v51 = vpop.permute.xlu0 %21417  ;;  %v20261_v52 = vpack.c.bf16 %v1563_v50, %v1559_v49  ;;  %v20263_v53 = vpack.c.bf16 %v1562_v48, %v1558_v47  ;;  %v20269_v54 = vpack.c.bf16 %v21415_v45, %v21414_v46 }
 0x20a   : > { %v23482_v55 = vpop.permute.xlu1 %21422  ;;  %v21420_v7 = vunpack.i.h.bf16 %v23480_v51  ;;  %v21419_v8 = vunpack.i.l.bf16 %v23480_v51 }
 0x20b   : > { %20262 = vmatprep.subr.bf16.mxu1 %v20261_v52  ;;  %v21425_v9 = vunpack.i.h.bf16 %v23482_v55  ;;  %v21424_v10 = vunpack.i.l.bf16 %v23482_v55 }
 0x20c   : > { %20264 = vmatpush1.bf16.msra.mxu1 %v20263_v53  ;;  %v2071_v14 = vsel %vm2069_vm2, %v21419_v8, %v21420_v7 }
 0x20d   : > { %v21428_v57 = vpop.permute.xlu0 %21427  ;;  %20270 = vmatprep.subr.bf16.mxu1 %v20269_v54  ;;  %v2075_v15 = vsel %vm2069_vm2, %v21424_v10, %v21425_v9 }
 0x20e   : > { %v21433_v58 = vpop.permute.xlu1 %21432  ;;  %v21430_v19 = vunpack.i.h.bf16 %v21428_v57 }
 0x20f   : > { %v21435_v59 = vunpack.i.h.bf16 %v21433_v58  ;;  %v21434_v60 = vunpack.i.l.bf16 %v21433_v58  ;;  %19042 = vmatmul.mubr.msk.f32.vlgmr.msra.gmra.mrb[2].mxu1 %vm1303_vm0, %v19040_v56 }
 0x210   : > { %1652 = vmatprep.mubr.f32.mxu1 %v26061_v0  ;;  %20272 = vmatpush3.bf16.msra.mxu1 %v20269_v54  ;;  %v2074_v26 = vsel %vm2069_vm2, %v21430_v19, %v21424_v10 }
 0x211   : > { %v1564_v62 = vsel %vm1557_vm1, %v21405_v42, %v21435_v59  ;;  %v1560_v63 = vsel %vm1557_vm1, %v21400_v37, %v21434_v60  ;;  %v23490_v1 = vpop.permute.xlu0 %21437  ;;  %v1561_v2 = vsel %vm1557_vm1, %v21434_v60, %v21414_v46  ;;  %v1565_v3 = vsel %vm1557_vm1, %v21435_v59, %v21415_v45  ;;  %20274 = vmatprep.subr.bf16.mxu1 %v23385_v20  ;;  %v19054_v42 = vld [vmem:[%s26138_s18 + $0x20] sm:$0xff] }
 0x212   : > { %v23495_v4 = vpop.permute.xlu1 %21442  ;;  %v20265_v5 = vpack.c.bf16 %v1565_v3, %v1561_v2  ;;  %v20267_v6 = vpack.c.bf16 %v1564_v62, %v1560_v63  ;;  %v21440_v27 = vunpack.i.h.bf16 %v23490_v1 }
 0x213   : > { %19043 = vmatmul.mubr.msk.f32.gmra.mrb[4].mxu1 %vm1303_vm0, %v19041_v61  ;;  %v21444_v29 = vunpack.i.l.bf16 %v23495_v4 }
 0x214   : > { %20266 = vmatprep.subr.bf16.mxu0 %v20265_v5  ;;  %19778 = vmatprep.mubr.msk.f32.mxu1 %vm1303_vm0, %v19040_v56 }
 0x215   : > { %20268 = vmatpush1.bf16.msra.mxu0 %v20267_v6  ;;  %v23503_v11 = vpop.permute.xlu0 %21447 }
 0x216   : > { %v23505_v12 = vpop.permute.xlu1 %21452  ;;  %20278 = vmatprep.subr.bf16.mxu0 %v23379_v16  ;;  %v21429_v16 = vunpack.i.l.bf16 %v21428_v57  ;;  %v21450_v30 = vunpack.i.h.bf16 %v23503_v11  ;;  %v21449_v31 = vunpack.i.l.bf16 %v23503_v11 }
 0x217   : > { %19779 = vmatmul.mubr.msk.f32.vlgmr.msra.gmra.mrb[6].mxu1 %vm1303_vm0, %v19041_v61  ;;  %v21455_v47 = vunpack.i.h.bf16 %v23505_v12  ;;  %v21454_v48 = vunpack.i.l.bf16 %v23505_v12 }
 0x218   : > { %20276 = vmatpush1.bf16.msra.mxu1 %v23389_v21  ;;  %1881 = vmatprep.mubr.f32.mxu1 %v26061_v0  ;;  %v20285_v21 = vpack.c.bf16 %v2075_v15, %v2071_v14  ;;  %v2070_v25 = vsel %vm2069_vm2, %v21429_v16, %v21419_v8  ;;  %v2369_v39 = vsel %vm2362_vm3, %v21449_v31, %v21450_v30  ;;  %v19062_v16 = vld [vmem:[%s26138_s18 + $0x30] sm:$0xff] }
 0x219   : > { %v23514_v18 = vpop.permute.xlu0 %21457  ;;  %20282 = vmatprep.subr.bf16.mxu1 %v23400_v24  ;;  %19044 = vmatmul.mubr.msk.f32.vlgmr.msra.gmra.mrb[4].mxu0 %vm1303_vm0, %v19040_v56  ;;  %v20287_v36 = vpack.c.bf16 %v2074_v26, %v2070_v25  ;;  %v19055_v56 = vld [vmem:[%s26138_s18 + $0x28] sm:$0xff]  ;;  %v2368_v2 = vsel %vm2362_vm3, %v21455_v47, %v21449_v31  ;;  %v2363_v3 = vsel %vm2362_vm3, %v21454_v48, %v21444_v29 }
 0x21a   : > { %v23518_v20 = vpop.permute.xlu1 %21462  ;;  %1729 = vmatprep.mubr.f32.mxu0 %v26061_v0  ;;  %20280 = vmatpush1.bf16.msra.mxu0 %v23381_v17  ;;  %v21439_v17 = vunpack.i.l.bf16 %v23490_v1  ;;  %v21460_v52 = vunpack.i.h.bf16 %v23514_v18  ;;  %v21459_v53 = vunpack.i.l.bf16 %v23514_v18  ;;  %v20299_v14 = vpack.c.bf16 %v2368_v2, %v2363_v3 }
 0x21b   : > { %19048 = vmatmul.mubr.msk.f32.vlgmr.msra.gmra.mrb[2].mxu1 %vm1303_vm0, %v1522_v13  ;;  %v21465_v54 = vunpack.i.h.bf16 %v23518_v20  ;;  %v21464_v55 = vunpack.i.l.bf16 %v23518_v20 }
 0x21c   : > { %20284 = vmatpush3.bf16.msra.mxu1 %v23400_v24  ;;  %1887 = vmatprep.mubr.f32.mxu1 %v26061_v0  ;;  %v21445_v24 = vunpack.i.h.bf16 %v23495_v4  ;;  %v20293_v37 = vpack.c.bf16 %v21440_v27, %v21439_v17  ;;  %v2367_v4 = vsel %vm2362_vm3, %v21459_v53, %v21460_v52 }
 0x21d   : > { %20286 = vmatprep.subr.bf16.mxu1 %v20285_v21  ;;  %v23526_v23 = vpop.permute.xlu0 %21467  ;;  %19045 = vmatmul.mubr.msk.f32.gmra.mrb[6].mxu0 %vm1303_vm0, %v19041_v61  ;;  %v2372_v5 = vsel %vm2362_vm3, %v21464_v55, %v21465_v54 }
 0x21e   : > { %v23533_v28 = vpop.permute.xlu1 %21472  ;;  %1958 = vmatprep.mubr.f32.mxu0 %v26061_v0  ;;  %v2364_v38 = vsel %vm2362_vm3, %v21444_v29, %v21445_v24  ;;  %v21470_v57 = vunpack.i.h.bf16 %v23526_v23  ;;  %v21469_v58 = vunpack.i.l.bf16 %v23526_v23  ;;  %v20305_v19 = vpack.c.bf16 %v2372_v5, %v2367_v4 }
 0x21f   : > { %19049 = vmatmul.mubr.msk.f32.gmra.mrb[4].mxu1 %vm1303_vm0, %v1523_v22  ;;  %v20297_v51 = vpack.c.bf16 %v2369_v39, %v2364_v38  ;;  %v21475_v60 = vunpack.i.h.bf16 %v23533_v28  ;;  %v21474_v61 = vunpack.i.l.bf16 %v23533_v28 }
 0x220   : > { %19785 = vmatprep.mubr.msk.f32.mxu1 %vm1303_vm0, %v1522_v13  ;;  %v2657_v15 = vsel %vm2655_vm4, %v21469_v58, %v21470_v57 }
 0x221   : > { %v21478_v32 = vpop.permute.xlu0 %21477  ;;  %19050 = vmatmul.mubr.msk.f32.vlgmr.msra.gmra.mrb[4].mxu0 %vm1303_vm0, %v1522_v13  ;;  %v2662_v18 = vsel %vm2655_vm4, %v21474_v61, %v21475_v60 }
 0x222   : > { %v21480_v33 = vunpack.i.h.bf16 %v21478_v32  ;;  %v21479_v34 = vunpack.i.l.bf16 %v21478_v32  ;;  %v23543_v35 = vpop.permute.xlu1 %21482  ;;  %1964 = vmatprep.mubr.f32.mxu0 %v26061_v0  ;;  %v20309_v21 = vpack.c.bf16 %v2662_v18, %v2657_v15 }
 0x223   : > { %19786 = vmatmul.mubr.msk.f32.vlgmr.msra.gmra.mrb[6].mxu1 %vm1303_vm0, %v1523_v22  ;;  %v21485_v28 = vunpack.i.h.bf16 %v23543_v35 }
 0x224   : > { %v2072_v40 = vsel %vm2069_vm2, %v21420_v7, %v21479_v34  ;;  %v2076_v41 = vsel %vm2069_vm2, %v21425_v9, %v21480_v33  ;;  %20288 = vmatpush1.bf16.msra.mxu1 %v20287_v36  ;;  %2158 = vmatprep.mubr.f32.mxu1 %v26061_v0  ;;  %v2073_v43 = vsel %vm2069_vm2, %v21479_v34, %v21439_v17 }
 0x225   : > { %20294 = vmatprep.subr.bf16.mxu1 %v20293_v37  ;;  %v23554_v44 = vpop.permute.xlu0 %21487  ;;  %v2077_v45 = vsel %vm2069_vm2, %v21480_v33, %v21440_v27  ;;  %v20291_v46 = vpack.c.bf16 %v2076_v41, %v2072_v40  ;;  %19051 = vmatmul.mubr.msk.f32.gmra.mrb[6].mxu0 %vm1303_vm0, %v1523_v22  ;;  %v21484_v22 = vunpack.i.l.bf16 %v23543_v35  ;;  %v19063_v33 = vld [vmem:[%s26138_s18 + $0x38] sm:$0xff]  ;;  %v2661_v41 = vsel %vm2655_vm4, %v21485_v28, %v21474_v61 }
 0x226   : > { %v23559_v49 = vpop.permute.xlu1 %21492  ;;  %v20289_v50 = vpack.c.bf16 %v2077_v45, %v2073_v43  ;;  %2235 = vmatprep.mubr.f32.mxu0 %v26061_v0  ;;  %v21489_v25 = vunpack.i.l.bf16 %v23554_v44 }
 0x227   : > { %19056 = vmatmul.mubr.msk.f32.vlgmr.msra.gmra.mrb[2].mxu1 %vm1303_vm0, %v19054_v42  ;;  %v21495_v29 = vunpack.i.h.bf16 %v23559_v49  ;;  %v2656_v38 = vsel %vm2655_vm4, %v21484_v22, %v21469_v58 }
 0x228   : > { %20290 = vmatprep.subr.bf16.mxu0 %v20289_v50  ;;  %20296 = vmatpush3.bf16.msra.mxu1 %v20293_v37 }
 0x229   : > { %20292 = vmatpush1.bf16.msra.mxu0 %v20291_v46  ;;  %20298 = vmatprep.subr.bf16.mxu1 %v20297_v51  ;;  %v21498_v59 = vpop.permute.xlu0 %21497  ;;  %v20311_v51 = vpack.c.bf16 %v2661_v41, %v2656_v38 }
 0x22a   : > { %v21500_v62 = vunpack.i.h.bf16 %v21498_v59  ;;  %v21499_v63 = vunpack.i.l.bf16 %v21498_v59  ;;  %v23573_v1 = vpop.permute.xlu1 %21502  ;;  %2164 = vmatprep.mubr.f32.mxu1 %v26061_v0 }
 0x22b   : > { %19057 = vmatmul.mubr.msk.f32.gmra.mrb[4].mxu1 %vm1303_vm0, %v19055_v56  ;;  %v21504_v23 = vunpack.i.l.bf16 %v23573_v1 }
 0x22c   : > { %v2365_v6 = vsel %vm2362_vm3, %v21445_v24, %v21499_v63  ;;  %v2370_v7 = vsel %vm2362_vm3, %v21450_v30, %v21500_v62  ;;  %19792 = vmatprep.mubr.msk.f32.mxu1 %vm1303_vm0, %v19054_v42  ;;  %v2366_v8 = vsel %vm2362_vm3, %v21499_v63, %v21459_v53  ;;  %v2371_v9 = vsel %vm2362_vm3, %v21500_v62, %v21464_v55  ;;  %v19070_v55 = vld [vmem:[%s26138_s18 + $0x40] sm:$0xff] }
 0x22d   : > { %v23586_v10 = vpop.permute.xlu0 %21507  ;;  %v20301_v11 = vpack.c.bf16 %v2371_v9, %v2366_v8  ;;  %19058 = vmatmul.mubr.msk.f32.vlgmr.msra.gmra.mrb[4].mxu0 %vm1303_vm0, %v19054_v42  ;;  %v20303_v12 = vpack.c.bf16 %v2370_v7, %v2365_v6  ;;  %v21490_v24 = vunpack.i.h.bf16 %v23554_v44  ;;  %v21494_v30 = vunpack.i.l.bf16 %v23559_v49  ;;  %v19071_v6 = vld [vmem:[%s26138_s18 + $0x48] sm:$0xff] }
 0x22e   : > { %v23589_v13 = vpop.permute.xlu1 %21512  ;;  %2241 = vmatprep.mubr.f32.mxu0 %v26061_v0  ;;  %v21505_v44 = vunpack.i.h.bf16 %v23573_v1  ;;  %v21510_v45 = vunpack.i.h.bf16 %v23586_v10  ;;  %v21509_v46 = vunpack.i.l.bf16 %v23586_v10 }
 0x22f   : > { %19793 = vmatmul.mubr.msk.f32.vlgmr.msra.gmra.mrb[6].mxu1 %vm1303_vm0, %v19055_v56  ;;  %20302 = vmatprep.subr.bf16.mxu0 %v20301_v11  ;;  %v2660_v42 = vsel %vm2655_vm4, %v21489_v25, %v21490_v24  ;;  %v2665_v43 = vsel %vm2655_vm4, %v21494_v30, %v21495_v29  ;;  %v21515_v63 = vunpack.i.h.bf16 %v23589_v13  ;;  %v21514_v1 = vunpack.i.l.bf16 %v23589_v13 }
 0x230   : > { %20300 = vmatpush1.bf16.msra.mxu1 %v20299_v14  ;;  %20304 = vmatpush1.bf16.msra.mxu0 %v20303_v12  ;;  %v20317_v54 = vpack.c.bf16 %v2665_v43, %v2660_v42 }
 0x231   : > { %20306 = vmatprep.subr.bf16.mxu1 %v20305_v19  ;;  %v21518_v20 = vpop.permute.xlu0 %21517  ;;  %2453 = vmatprep.mubr.f32.mxu1 %v26061_v0  ;;  %v2954_v11 = vsel %vm2948_vm5, %v21515_v63, %v21509_v46  ;;  %v2949_v12 = vsel %vm2948_vm5, %v21514_v1, %v21504_v23 }
 0x232   : > { %v21520_v26 = vunpack.i.h.bf16 %v21518_v20  ;;  %v21519_v27 = vunpack.i.l.bf16 %v21518_v20  ;;  %v23601_v17 = vpop.permute.xlu1 %21522  ;;  %19059 = vmatmul.mubr.msk.f32.gmra.mrb[6].mxu0 %vm1303_vm0, %v19055_v56  ;;  %v2950_v56 = vsel %vm2948_vm5, %v21504_v23, %v21505_v44  ;;  %v23674_v20 = vld [vmem:[%s26138_s18 + $0x50] sm:$0xff] }
 0x233   : > { %19064 = vmatmul.mubr.msk.f32.vlgmr.msra.gmra.mrb[2].mxu1 %vm1303_vm0, %v19062_v16  ;;  %2530 = vmatprep.mubr.f32.mxu0 %v26061_v0  ;;  %v21524_v47 = vunpack.i.l.bf16 %v23601_v17  ;;  %v21525_v7 = vunpack.i.h.bf16 %v23601_v17 }
 0x234   : > { %v2658_v31 = vsel %vm2655_vm4, %v21470_v57, %v21519_v27  ;;  %v2663_v32 = vsel %vm2655_vm4, %v21475_v60, %v21520_v26  ;;  %20308 = vmatpush3.bf16.msra.mxu1 %v20305_v19  ;;  %2459 = vmatprep.mubr.f32.mxu1 %v26061_v0  ;;  %v2659_v34 = vsel %vm2655_vm4, %v21519_v27, %v21489_v25 }
 0x235   : > { %20310 = vmatprep.subr.bf16.mxu1 %v20309_v21  ;;  %v23615_v35 = vpop.permute.xlu0 %21527  ;;  %v2664_v36 = vsel %vm2655_vm4, %v21520_v26, %v21494_v30  ;;  %v20315_v37 = vpack.c.bf16 %v2663_v32, %v2658_v31  ;;  %v2955_v57 = vsel %vm2948_vm5, %v21509_v46, %v21510_v45  ;;  %v2953_v25 = vsel %vm2948_vm5, %v21524_v47, %v21525_v7 }
 0x236   : > { %v23621_v39 = vpop.permute.xlu1 %21532  ;;  %v20313_v40 = vpack.c.bf16 %v2664_v36, %v2659_v34  ;;  %19066 = vmatmul.mubr.msk.f32.vlgmr.msra.gmra.mrb[4].mxu0 %vm1303_vm0, %v19062_v16  ;;  %v21529_v48 = vunpack.i.l.bf16 %v23615_v35  ;;  %v20321_v5 = vpack.c.bf16 %v2955_v57, %v2950_v56  ;;  %v21530_v8 = vunpack.i.h.bf16 %v23615_v35  ;;  %v19079_v35 = vld [vmem:[%s26138_s18 + $0x58] sm:$0xff] }
 0x237   : > { %19065 = vmatmul.mubr.msk.f32.gmra.mrb[4].mxu1 %vm1303_vm0, %v19063_v33  ;;  %2536 = vmatprep.mubr.f32.mxu0 %v26061_v0  ;;  %v21535_v15 = vunpack.i.h.bf16 %v23621_v39  ;;  %v21534_v21 = vunpack.i.l.bf16 %v23621_v39  ;;  %v20323_v31 = vpack.c.bf16 %v2954_v11, %v2949_v12 }
 0x238   : > { %20314 = vmatprep.subr.bf16.mxu0 %v20313_v40  ;;  %19799 = vmatprep.mubr.msk.f32.mxu1 %vm1303_vm0, %v19062_v16  ;;  %v2958_v26 = vsel %vm2948_vm5, %v21529_v48, %v21530_v8 }
 0x239   : > { %20316 = vmatpush1.bf16.msra.mxu0 %v20315_v37  ;;  %v23636_v49 = vpop.permute.xlu0 %21537  ;;  %v20329_v34 = vpack.c.bf16 %v2958_v26, %v2953_v25  ;;  %v3243_v36 = vsel %vm26064_vm6, %v21534_v21, %v21535_v15 }
 0x23a   : > { %v21543_v50 = vpop.permute.xlu1 %21542  ;;  %19067 = vmatmul.mubr.msk.f32.gmra.mrb[6].mxu0 %vm1303_vm0, %v19063_v33  ;;  %v21540_v18 = vunpack.i.h.bf16 %v23636_v49  ;;  %v21539_v22 = vunpack.i.l.bf16 %v23636_v49 }
 0x23b   : > { %v21545_v52 = vunpack.i.h.bf16 %v21543_v50  ;;  %v21544_v53 = vunpack.i.l.bf16 %v21543_v50  ;;  %19800 = vmatmul.mubr.msk.f32.vlgmr.msra.gmra.mrb[6].mxu1 %vm1303_vm0, %v19063_v33  ;;  %2823 = vmatprep.mubr.f32.mxu0 %v26061_v0 }
 0x23c   : > { %20312 = vmatpush1.bf16.msra.mxu1 %v20311_v51  ;;  %2746 = vmatprep.mubr.f32.mxu1 %v26061_v0  ;;  %v3248_v37 = vsel %vm26064_vm6, %v21539_v22, %v21540_v18 }
 0x23d   : > { %v2956_v58 = vsel %vm2948_vm5, %v21510_v45, %v21545_v52  ;;  %v2951_v59 = vsel %vm2948_vm5, %v21505_v44, %v21544_v53  ;;  %20318 = vmatprep.subr.bf16.mxu1 %v20317_v54  ;;  %v23647_v60 = vpop.permute.xlu0 %21547  ;;  %v2952_v61 = vsel %vm2948_vm5, %v21544_v53, %v21524_v47  ;;  %v2957_v62 = vsel %vm2948_vm5, %v21545_v52, %v21529_v48  ;;  %v23715_v45 = vld [vmem:[%s26138_s18 + $0x60] sm:$0xff] }
 0x23e   : > { %v23653_v2 = vpop.permute.xlu1 %21552  ;;  %v20325_v3 = vpack.c.bf16 %v2957_v62, %v2952_v61  ;;  %19074 = vmatmul.mubr.msk.f32.vlgmr.msra.gmra.mrb[4].mxu0 %vm1303_vm0, %v19070_v55  ;;  %v20327_v4 = vpack.c.bf16 %v2956_v58, %v2951_v59  ;;  %v21549_v38 = vunpack.i.l.bf16 %v23647_v60  ;;  %v21550_v40 = vunpack.i.h.bf16 %v23647_v60  ;;  %v19087_v59 = vld [vmem:[%s26138_s18 + $0x68] sm:$0xff] }
 0x23f   : > { %19072 = vmatmul.mubr.msk.f32.vlgmr.msra.gmra.mrb[2].mxu1 %vm1303_vm0, %v19070_v55  ;;  %2829 = vmatprep.mubr.f32.mxu0 %v26061_v0  ;;  %v21554_v9 = vunpack.i.l.bf16 %v23653_v2  ;;  %v21555_v42 = vunpack.i.h.bf16 %v23653_v2  ;;  %v20333_v23 = vpack.c.bf16 %v3248_v37, %v3243_v36 }
 0x240   : > { %20320 = vmatpush3.bf16.msra.mxu1 %v20317_v54  ;;  %20326 = vmatprep.subr.bf16.mxu0 %v20325_v3  ;;  %v3242_v48 = vsel %vm26064_vm6, %v21549_v38, %v21534_v21  ;;  %v19095_v21 = vld [vmem:[%s26138_s18 + $0x78] sm:$0xff] }
 0x241   : > { %20322 = vmatprep.subr.bf16.mxu1 %v20321_v5  ;;  %20328 = vmatpush1.bf16.msra.mxu0 %v20327_v4  ;;  %v23662_v10 = vpop.permute.xlu0 %21557  ;;  %v3246_v57 = vsel %vm26064_vm6, %v21554_v9, %v21555_v42 }
 0x242   : > { %v21559_v13 = vunpack.i.l.bf16 %v23662_v10  ;;  %v21563_v14 = vpop.permute.xlu1 %21562  ;;  %2752 = vmatprep.mubr.f32.mxu1 %v26061_v0  ;;  %19075 = vmatmul.mubr.msk.f32.gmra.mrb[6].mxu0 %vm1303_vm0, %v19071_v6  ;;  %v21560_v43 = vunpack.i.h.bf16 %v23662_v10 }
 0x243   : > { %v21565_v19 = vunpack.i.h.bf16 %v21563_v14  ;;  %v21564_v16 = vunpack.i.l.bf16 %v21563_v14  ;;  %19073 = vmatmul.mubr.msk.f32.gmra.mrb[4].mxu1 %vm1303_vm0, %v19071_v6  ;;  %3116 = vmatprep.mubr.f32.mxu0 %v26061_v0 }
 0x244   : > { %19806 = vmatprep.mubr.msk.f32.mxu1 %vm1303_vm0, %v19070_v55  ;;  %v3247_v55 = vsel %vm26064_vm6, %v21550_v40, %v21539_v22  ;;  %v3251_v58 = vsel %vm26064_vm6, %v21559_v13, %v21560_v43  ;;  %v19102_v40 = vld [vmem:[%s26138_s18 + $0x80] sm:$0xff] }
 0x245   : > { %v3249_v27 = vsel %vm26064_vm6, %v21540_v18, %v21565_v19  ;;  %v3244_v17 = vsel %vm26064_vm6, %v21535_v15, %v21564_v16  ;;  %v23683_v28 = vpop.permute.xlu0 %21567  ;;  %v3245_v24 = vsel %vm26064_vm6, %v21564_v16, %v21554_v9  ;;  %v3250_v29 = vsel %vm26064_vm6, %v21565_v19, %v21559_v13  ;;  %v23761_v9 = vld [vmem:[%s26138_s18 + $0x70] sm:$0xff] }
 0x246   : > { %v23691_v30 = vpop.permute.xlu1 %21572  ;;  %v20337_v32 = vpack.c.bf16 %v3250_v29, %v3245_v24  ;;  %19082 = vmatmul.mubr.msk.f32.vlgmr.msra.gmra.mrb[4].mxu0 %vm1303_vm0, %v23674_v20  ;;  %v20339_v33 = vpack.c.bf16 %v3249_v27, %v3244_v17  ;;  %v21570_v46 = vunpack.i.h.bf16 %v23683_v28  ;;  %v21569_v56 = vunpack.i.l.bf16 %v23683_v28 }
 0x247   : > { %19807 = vmatmul.mubr.msk.f32.vlgmr.msra.gmra.mrb[6].mxu1 %vm1303_vm0, %v19071_v6  ;;  %3122 = vmatprep.mubr.f32.mxu0 %v26061_v0  ;;  %v21575_v50 = vunpack.i.h.bf16 %v23691_v30  ;;  %v21574_v60 = vunpack.i.l.bf16 %v23691_v30  ;;  %v20335_v5 = vpack.c.bf16 %v3247_v55, %v3242_v48  ;;  %v20341_v6 = vpack.c.bf16 %v3251_v58, %v3246_v57  ;;  %v19103_v48 = vld [vmem:[%s26138_s18 + $0x88] sm:$0xff] }
 0x248   : > { %20324 = vmatpush1.bf16.msra.mxu1 %v20323_v31  ;;  %20338 = vmatprep.subr.bf16.mxu0 %v20337_v32  ;;  %v3536_v7 = vsel %vm26063_vm7, %v21569_v56, %v21570_v46 }
 0x249   : > { %20330 = vmatprep.subr.bf16.mxu1 %v20329_v34  ;;  %20340 = vmatpush1.bf16.msra.mxu0 %v20339_v33  ;;  %v23701_v39 = vpop.permute.xlu0 %21577  ;;  %v3541_v8 = vsel %vm26063_vm7, %v21574_v60, %v21575_v50 }
 0x24a   : > { %v23704_v41 = vpop.permute.xlu1 %21582  ;;  %3039 = vmatprep.mubr.f32.mxu1 %v26061_v0  ;;  %19083 = vmatmul.mubr.msk.f32.gmra.mrb[6].mxu0 %vm1303_vm0, %v19079_v35  ;;  %v21579_v10 = vunpack.i.l.bf16 %v23701_v39  ;;  %v21580_v12 = vunpack.i.h.bf16 %v23701_v39  ;;  %v20345_v19 = vpack.c.bf16 %v3541_v8, %v3536_v7 }
 0x24b   : > { %v21585_v44 = vunpack.i.h.bf16 %v23704_v41  ;;  %19080 = vmatmul.mubr.msk.f32.vlgmr.msra.gmra.mrb[2].mxu1 %vm1303_vm0, %v23674_v20  ;;  %3409 = vmatprep.mubr.f32.mxu0 %v26061_v0  ;;  %v21584_v47 = vunpack.i.l.bf16 %v23704_v41 }
 0x24c   : > { %20332 = vmatpush3.bf16.msra.mxu1 %v20329_v34  ;;  %3045 = vmatprep.mubr.f32.mxu1 %v26061_v0  ;;  %v3535_v22 = vsel %vm26063_vm7, %v21579_v10, %v21569_v56  ;;  %v3540_v24 = vsel %vm26063_vm7, %v21580_v12, %v21574_v60 }
 0x24d   : > { %20334 = vmatprep.subr.bf16.mxu1 %v20333_v23  ;;  %v23721_v49 = vpop.permute.xlu0 %21587  ;;  %v3538_v54 = vsel %vm26063_vm7, %v21584_v47, %v21585_v44  ;;  %v3537_v61 = vsel %vm26063_vm7, %v21570_v46, %v21584_v47  ;;  %v20347_v38 = vpack.c.bf16 %v3540_v24, %v3535_v22 }
 0x24e   : > { %v21590_v51 = vunpack.i.h.bf16 %v23721_v49  ;;  %v21589_v52 = vunpack.i.l.bf16 %v23721_v49  ;;  %v23726_v53 = vpop.permute.xlu1 %21592  ;;  %19090 = vmatmul.mubr.msk.f32.vlgmr.msra.gmra.mrb[4].mxu0 %vm1303_vm0, %v23715_v45 }
 0x24f   : > { %19081 = vmatmul.mubr.msk.f32.gmra.mrb[4].mxu1 %vm1303_vm0, %v19079_v35  ;;  %3415 = vmatprep.mubr.f32.mxu0 %v26061_v0  ;;  %v21595_v14 = vunpack.i.h.bf16 %v23726_v53  ;;  %v21594_v15 = vunpack.i.l.bf16 %v23726_v53 }
 0x250   : > { %v3542_v62 = vsel %vm26063_vm7, %v21575_v50, %v21589_v52  ;;  %19813 = vmatprep.mubr.msk.f32.mxu1 %vm1303_vm0, %v23674_v20  ;;  %v3543_v63 = vsel %vm26063_vm7, %v21589_v52, %v21590_v51 }
 0x251   : > { %v23752_v1 = vpop.permute.xlu0 %21597  ;;  %v20349_v2 = vpack.c.bf16 %v3543_v63, %v3538_v54  ;;  %v20351_v3 = vpack.c.bf16 %v3542_v62, %v3537_v61  ;;  %v3539_v30 = vsel %vm26063_vm7, %v21585_v44, %v21594_v15  ;;  %v3544_v31 = vsel %vm26063_vm7, %v21590_v51, %v21595_v14 }
 0x252   : > { %v23754_v4 = vpop.permute.xlu1 %21602  ;;  %19091 = vmatmul.mubr.msk.f32.gmra.mrb[6].mxu0 %vm1303_vm0, %v19087_v59  ;;  %v21600_v16 = vunpack.i.h.bf16 %v23752_v1  ;;  %v21599_v29 = vunpack.i.l.bf16 %v23752_v1  ;;  %v20353_v39 = vpack.c.bf16 %v3544_v31, %v3539_v30 }
 0x253   : > { %19814 = vmatmul.mubr.msk.f32.vlgmr.msra.gmra.mrb[6].mxu1 %vm1303_vm0, %v19079_v35  ;;  %20350 = vmatprep.subr.bf16.mxu0 %v20349_v2  ;;  %v21605_v26 = vunpack.i.h.bf16 %v23754_v4  ;;  %v21604_v32 = vunpack.i.l.bf16 %v23754_v4 }
 0x254   : > { %20336 = vmatpush1.bf16.msra.mxu1 %v20335_v5  ;;  %20352 = vmatpush1.bf16.msra.mxu0 %v20351_v3  ;;  %v3829_v41 = vsel %vm26040_vm8, %v21599_v29, %v21600_v16 }
 0x255   : > { %20342 = vmatprep.subr.bf16.mxu1 %v20341_v6  ;;  %v23764_v11 = vpop.permute.xlu0 %21607  ;;  %3332 = vmatprep.mubr.f32.mxu1 %v26061_v0  ;;  %v3834_v42 = vsel %vm26040_vm8, %v21604_v32, %v21605_v26 }
 0x256   : > { %v23768_v13 = vpop.permute.xlu1 %21612  ;;  %3702 = vmatprep.mubr.f32.mxu0 %v26061_v0  ;;  %v21610_v20 = vunpack.i.h.bf16 %v23764_v11  ;;  %v21609_v44 = vunpack.i.l.bf16 %v23764_v11 }
 0x257   : > { %v21614_v18 = vunpack.i.l.bf16 %v23768_v13  ;;  %19088 = vmatmul.mubr.msk.f32.vlgmr.msra.gmra.mrb[2].mxu1 %vm1303_vm0, %v23715_v45  ;;  %19098 = vmatmul.mubr.msk.f32.vlgmr.msra.gmra.mrb[4].mxu0 %vm1303_vm0, %v23761_v9  ;;  %v21615_v23 = vunpack.i.h.bf16 %v23768_v13 }
 0x258   : > { %20344 = vmatpush3.bf16.msra.mxu1 %v20341_v6  ;;  %3338 = vmatprep.mubr.f32.mxu1 %v26061_v0  ;;  %v3830_v33 = vsel %vm26040_vm8, %v21600_v16, %v21610_v20  ;;  %v3828_v49 = vsel %vm26040_vm8, %v21609_v44, %v21599_v29 }
 0x259   : > { %20346 = vmatprep.subr.bf16.mxu1 %v20345_v19  ;;  %v21618_v25 = vpop.permute.xlu0 %21617  ;;  %3708 = vmatprep.mubr.f32.mxu0 %v26061_v0  ;;  %v3831_v28 = vsel %vm26040_vm8, %v21610_v20, %v21614_v18  ;;  %v3833_v50 = vsel %vm26040_vm8, %v21615_v23, %v21604_v32  ;;  %v22370_v23 = vld [vmem:[%s23330_s16 + $0x10] sm:$0xff] }
 0x25a   : > { %v21620_v27 = vunpack.i.h.bf16 %v21618_v25  ;;  %v21619_v17 = vunpack.i.l.bf16 %v21618_v25  ;;  %v21623_v43 = vpop.permute.xlu1 %21622  ;;  %v20359_v53 = vpack.c.bf16 %v3833_v50, %v3828_v49 }
 0x25b   : > { %19089 = vmatmul.mubr.msk.f32.gmra.mrb[4].mxu1 %vm1303_vm0, %v19087_v59  ;;  %19099 = vmatmul.mubr.msk.f32.gmra.mrb[6].mxu0 %vm1303_vm0, %v19095_v21  ;;  %v21625_v46 = vunpack.i.h.bf16 %v21623_v43  ;;  %v21624_v47 = vunpack.i.l.bf16 %v21623_v43  ;;  %v22369_v43 = vld [vmem:[%s23330_s16 + $0x8] sm:$0xff] }
 0x25c   : > { %v3835_v34 = vsel %vm26040_vm8, %v21605_v26, %v21619_v17  ;;  %19820 = vmatprep.mubr.msk.f32.mxu1 %vm1303_vm0, %v23715_v45  ;;  %v3836_v35 = vsel %vm26040_vm8, %v21619_v17, %v21620_v27  ;;  %3995 = vmatprep.mubr.f32.mxu0 %v26061_v0  ;;  %v20357_v45 = vpack.c.bf16 %v3834_v42, %v3829_v41  ;;  %v1294_v17 = vld [vmem:[#allocation2] sm:$0x3f] }
 0x25d   : > { %v20361_v36 = vpack.c.bf16 %v3836_v35, %v3831_v28  ;;  %v20363_v37 = vpack.c.bf16 %v3835_v34, %v3830_v33  ;;  %v3832_v51 = vsel %vm26040_vm8, %v21614_v18, %v21624_v47  ;;  %v3837_v52 = vsel %vm26040_vm8, %v21620_v27, %v21625_v46 }
 0x25e   : > { %v20365_v54 = vpack.c.bf16 %v3837_v52, %v3832_v51 }
 0x25f   : > { %19821 = vmatmul.mubr.msk.f32.vlgmr.msra.gmra.mrb[6].mxu1 %vm1303_vm0, %v19087_v59  ;;  %20362 = vmatprep.subr.bf16.mxu0 %v20361_v36 }
 0x260   : > { %20348 = vmatpush1.bf16.msra.mxu1 %v20347_v38  ;;  %20364 = vmatpush1.bf16.msra.mxu0 %v20363_v37 }
 0x261   : > { %20354 = vmatprep.subr.bf16.mxu1 %v20353_v39  ;;  %3625 = vmatprep.mubr.f32.mxu1 %v26061_v0 }
 0x263   : > { %19096 = vmatmul.mubr.msk.f32.vlgmr.msra.gmra.mrb[2].mxu1 %vm1303_vm0, %v23761_v9  ;;  %19106 = vmatmul.mubr.msk.f32.vlgmr.msra.gmra.mrb[4].mxu0 %vm1303_vm0, %v19102_v40 }
 0x264   : > { %20356 = vmatpush3.bf16.msra.mxu1 %v20353_v39  ;;  %3631 = vmatprep.mubr.f32.mxu1 %v26061_v0 }
 0x265   : > { %20358 = vmatprep.subr.bf16.mxu1 %v20357_v45  ;;  %4001 = vmatprep.mubr.f32.mxu0 %v26061_v0 }
 0x267   : > { %19097 = vmatmul.mubr.msk.f32.gmra.mrb[4].mxu1 %vm1303_vm0, %v19095_v21  ;;  %19107 = vmatmul.mubr.msk.f32.gmra.mrb[6].mxu0 %vm1303_vm0, %v19103_v48 }
 0x268   : > { %19827 = vmatprep.mubr.msk.f32.mxu1 %vm1303_vm0, %v23761_v9  ;;  %4334 = vmatprep.mubr.f32.mxu0 %v26061_v0  ;;  %v23834_v57 = vpop.f32.mrb[0].mxu0 }
 0x269   : > { %v23829_v55 = vpop.f32.mrb[0].mxu1  ;;  %v23837_v58 = vpop.f32.mrb[1].mxu0 }
 0x26a   : > { %v23831_v56 = vpop.f32.mrb[1].mxu1  ;;  %v4096_v61 = vpop.permute.xlu0 %4095 }
 0x26b   : > { %19828 = vmatmul.mubr.msk.f32.vlgmr.msra.gmra.mrb[6].mxu1 %vm1303_vm0, %v19095_v21  ;;  %v4101_v2 = vpop.permute.xlu1 %4100  ;;  %v4170_v21 = vlaneseq }
 0x26c   : > { %20360 = vmatpush1.bf16.msra.mxu1 %v20359_v53  ;;  %3918 = vmatprep.mubr.f32.mxu1 %v26061_v0  ;;  %v23840_v59 = vpop.f32.mrb[2].mxu0 }
 0x26d   : > { %20366 = vmatprep.subr.bf16.mxu1 %v20365_v54  ;;  %v23842_v60 = vpop.f32.mrb[3].mxu0  ;;  %v4171_v22 = vshrl.u32 %v4170_v21, 7 }
 0x26f   : > { %19104 = vmatmul.mubr.msk.f32.vlgmr.msra.gmra.mrb[2].mxu1 %vm1303_vm0, %v19102_v40  ;;  %v4176_v25 = vsub.s32 1, %v4171_v22  ;;  %v4180_v26 = vsub.s32 2, %v4171_v22  ;;  %v4172_v24 = vsub.s32 0, %v4171_v22  ;;  %v4184_v34 = vsub.s32 3, %v4171_v22 }
 0x270   : > { %20368 = vmatpush3.bf16.msra.mxu1 %v20365_v54  ;;  %3924 = vmatprep.mubr.f32.mxu1 %v26061_v0  ;;  %v4188_v38 = vsub.s32 4, %v4171_v22  ;;  %v4192_v41 = vsub.s32 5, %v4171_v22 }
 0x271   : > { %v23857_v29 = vrot.slane %v1294_v17, %v4176_v25  ;;  %v23859_v30 = vrot.slane %v1294_v17, %v4180_v26  ;;  %v23861_v32 = vrot.slane %v1294_v17, %v4172_v24  ;;  %v22375_v26 = vld [vmem:[%s23330_s16 + $0x18] sm:$0xff] }
 0x272   : > { %v23876_v51 = vrot.slane %v1294_v17, %v4188_v38 }
 0x273   : > { %19105 = vmatmul.mubr.msk.f32.gmra.mrb[4].mxu1 %vm1303_vm0, %v19103_v48 }
 0x274   : > { %19834 = vmatprep.mubr.msk.f32.mxu1 %vm1303_vm0, %v19102_v40 }
 0x277   : > { %19835 = vmatmul.mubr.msk.f32.vlgmr.msra.gmra.mrb[6].mxu1 %vm1303_vm0, %v19103_v48  ;;  %v23871_v48 = vrot.slane %v1294_v17, %v4184_v34 }
 0x278   : > { %7256 = vmatprep.mubr.f32.mxu1 %v26061_v0 }
 0x336   : > { %v3997_v62 = vpop.f32.mrb[4].mxu0 }
 0x337   : > { %v4105_v63 = vadd.f32 %v4096_v61, %v3997_v62  ;;  %v3999_v1 = vpop.f32.mrb[5].mxu0 }
 0x338   : > { %v4106_v18 = vadd.f32 %v4096_v61, %v3999_v1  ;;  %v22371_v1 = vld [vmem:[%s23330_s16] sm:$0xff] }
 0x339   : > { %4127 = vrot.lane.b32.xlu1 %v4105_v63, %s26045_s11  ;;  %v23881_v63 = vrot.slane %v1294_v17, %v4192_v41 }
 0x33a   : > { %v4003_v3 = vpop.f32.mrb[6].mxu0 }
 0x33b   : > { %v4110_v4 = vadd.f32 %v4101_v2, %v4003_v3  ;;  %v4005_v5 = vpop.f32.mrb[7].mxu0 }
 0x33c   : > { %v4111_v16 = vadd.f32 %v4101_v2, %v4005_v5 }
 0x33d   : > { %4137 = vrot.lane.b32.xlu0 %v4110_v4, %s26045_s11 }
 0x342   : > { %v3920_v6 = vpop.f32.mrb[2].mxu1 }
 0x343   : > { %v4103_v7 = vadd.f32 %v4096_v61, %v3920_v6  ;;  %v3922_v8 = vpop.f32.mrb[3].mxu1 }
 0x344   : > { %v4104_v9 = vadd.f32 %v4096_v61, %v3922_v8  ;;  %v22372_v8 = vld [vmem:[%s23330_s16 + $0x40] sm:$0xff] }
 0x345   : > { %4123 = vrot.lane.b32.xlu1 %v4103_v7, %s26045_s11 }
 0x346   : > { %v3926_v10 = vpop.f32.mrb[4].mxu1  ;;  %4125 = vrot.lane.b32.xlu0 %v4104_v9, %s26045_s11 }
 0x347   : > { %v4108_v11 = vadd.f32 %v4101_v2, %v3926_v10  ;;  %v3928_v12 = vpop.f32.mrb[5].mxu1  ;;  %v22373_v10 = vld [vmem:[%s23330_s16 + $0x38] sm:$0xff] }
 0x348   : > { %v4109_v13 = vadd.f32 %v4101_v2, %v3928_v12 }
 0x34a   : > { %v19836_v14 = vpop.f32.mrb[6].mxu1  ;;  %4135 = vrot.lane.b32.xlu1 %v4109_v13, %s26045_s11  ;;  %4133 = vrot.lane.b32.xlu0 %v4108_v11, %s26045_s11 }
 0x34b   : > { %v4074_v15 = vpop.f32.mrb[7].mxu1  ;;  %v4112_v20 = vadd.f32 %v19836_v14, %v4101_v2  ;;  %v22374_v14 = vld [vmem:[%s23330_s16 + $0x30] sm:$0xff] }
 0x34c   : > { %v4107_v19 = vadd.f32 %v4096_v61, %v4074_v15 }
 0x34e   : > { %4129 = vrot.lane.b32.xlu1 %v4106_v18, %s26045_s11  ;;  %4131 = vrot.lane.b32.xlu0 %v4107_v19, %s26045_s11 }
 0x352   : > { %4141 = vrot.lane.b32.xlu0 %v4112_v20, %s26045_s11  ;;  %4139 = vrot.lane.b32.xlu1 %v4111_v16, %s26045_s11 }
 0x3ab   : > { %v4128_v27 = vpop.permute.xlu1 %4127 }
 0x3af   : > { %v23855_v28 = vpop.permute.xlu0 %4137 }
 0x3b7   : > { %v4124_v31 = vpop.permute.xlu1 %4123 }
 0x3b8   : > { %v4126_v33 = vpop.permute.xlu0 %4125  ;;  %v4164_v35 = vsel %vm4143_vm9, 0.0, %v4124_v31 }
 0x3b9   : > { %v4144_v36 = vsel %vm4143_vm9, %v4124_v31, %v4126_v33  ;;  %v4145_v37 = vsel %vm4143_vm9, %v4126_v33, %v4128_v27  ;;  %v4200_v42 = vmul.f32 %v23861_v32, %v4164_v35  ;;  %v22376_v33 = vld [vmem:[%s23330_s16 + $0x20] sm:$0xff] }
 0x3ba   : > { %v4201_v39 = vmul.f32 %v23857_v29, %v4144_v36  ;;  %v4202_v40 = vmul.f32 %v23859_v30, %v4145_v37 }
 0x3bb   : > { %v4212_v2 = vadd.f32 %v22371_v1, %v4200_v42 }
 0x3bc   : > { %v4213_v44 = vadd.f32 %v22369_v43, %v4201_v39  ;;  %v4214_v45 = vadd.f32 %v22370_v23, %v4202_v40  ;;  %v4136_v46 = vpop.permute.xlu1 %4135  ;;  %v4134_v47 = vpop.permute.xlu0 %4133 }
 0x3bd   : > { %v4149_v49 = vsel %vm4143_vm9, %v4136_v46, %v23855_v28  ;;  %v4148_v50 = vsel %vm4143_vm9, %v4134_v47, %v4136_v46  ;;  %v4165_v61 = vsel %vm4143_vm9, 0.0, %v4134_v47  ;;  %vm4224_vm15 = vcmp.ge.f32.partialorder %v4212_v2, 0.0 }
 0x3be   : > { %vm4225_vm11 = vcmp.ge.f32.partialorder %v4213_v44, 0.0  ;;  %vm4226_vm12 = vcmp.ge.f32.partialorder %v4214_v45, 0.0  ;;  %v4237_v52 = vmul.f32 0.05, %v4213_v44  ;;  %v4238_v53 = vmul.f32 0.05, %v4214_v45 }
 0x3bf   : > { %v4208_v54 = vmul.f32 %v23859_v30, %v4149_v49  ;;  %v4207_v62 = vmul.f32 %v23857_v29, %v4148_v50  ;;  %v4206_v5 = vmul.f32 %v23861_v32, %v4165_v61  ;;  %v4236_v22 = vmul.f32 0.05, %v4212_v2 }
 0x3c0   : > { %v23884_v3 = vsel %vm4225_vm11, %v4213_v44, %v4237_v52  ;;  %v23886_v4 = vsel %vm4226_vm12, %v4214_v45, %v4238_v53  ;;  %v4130_v6 = vpop.permute.xlu1 %4129  ;;  %v4132_v7 = vpop.permute.xlu0 %4131  ;;  %v22378_v52 = vld [vmem:[%s23330_s16 + $0x58] sm:$0xff] }
 0x3c1   : > { %v4220_v9 = vadd.f32 %v22372_v8, %v4208_v54  ;;  %v4219_v11 = vadd.f32 %v22373_v10, %v4207_v62  ;;  %v4146_v12 = vsel %vm4143_vm9, %v4128_v27, %v4130_v6  ;;  %v4147_v13 = vsel %vm4143_vm9, %v4130_v6, %v4132_v7  ;;  %v22379_v62 = vld [vmem:[%s23330_s16 + $0x48] sm:$0xff]  ;;  %v22380_v8 = vld [vmem:[%s23330_s16 + $0x50] sm:$0xff] }
 0x3c2   : > { %v4218_v15 = vadd.f32 %v22374_v14, %v4206_v5  ;;  %v4203_v18 = vmul.f32 %v23871_v48, %v4146_v12  ;;  %v4167_v19 = vsel %vm4166_vm10, %v4132_v7, 0.0  ;;  %v4204_v16 = vmul.f32 %v23876_v51, %v4147_v13 }
 0x3c3   : > { %vm4232_vm13 = vcmp.ge.f32.partialorder %v4220_v9, 0.0  ;;  %v4244_v20 = vmul.f32 0.05, %v4220_v9  ;;  %vm4231_vm14 = vcmp.ge.f32.partialorder %v4219_v11, 0.0  ;;  %v4243_v21 = vmul.f32 0.05, %v4219_v11 }
 0x3c4   : > { %v4242_v25 = vmul.f32 0.05, %v4218_v15  ;;  %v4215_v27 = vadd.f32 %v22375_v26, %v4203_v18  ;;  %v4142_v17 = vpop.permute.xlu0 %4141  ;;  %v4140_v24 = vpop.permute.xlu1 %4139  ;;  %vm4230_vm11 = vcmp.ge.f32.partialorder %v4218_v15, 0.0  ;;  %v4205_v31 = vmul.f32 %v23881_v63, %v4167_v19 }
 0x3c5   : > { %v4216_v34 = vadd.f32 %v22376_v33, %v4204_v16  ;;  %v23902_v35 = vpack.i.bf16 %v23886_v4, %v23884_v3  ;;  %v23905_v36 = vsel %vm4232_vm13, %v4220_v9, %v4244_v20  ;;  %v23907_v37 = vsel %vm4231_vm14, %v4219_v11, %v4243_v21  ;;  %v4260_v11 = vld [vmem:[#allocation13] sm:$0xff] }
 0x3c6   : > { %vm4227_vm12 = vcmp.ge.f32.partialorder %v4215_v27, 0.0  ;;  %v4239_v38 = vmul.f32 0.05, %v4215_v27  ;;  %v4168_v40 = vsel %vm4166_vm10, %v4142_v17, 0.0  ;;  %v4150_v41 = vsel %vm4143_vm9, %v23855_v28, %v4140_v24  ;;  %v22377_v28 = vld [vmem:[%s23330_s16 + $0x28] sm:$0xff]  ;;  %s26149_s16 = sld [smem:[#allocation42_spill]] }
 0x3c7   : > { %vm4228_vm8 = vcmp.ge.f32.partialorder %v4216_v34, 0.0  ;;  %v4240_v39 = vmul.f32 0.05, %v4216_v34  ;;  %21629 = vrot.lane.b32.xlu1 %v23902_v35, %s26043_s26  ;;  %v23915_v42 = vsel %vm4224_vm15, %v4212_v2, %v4236_v22  ;;  %v23917_v43 = vsel %vm4230_vm11, %v4218_v15, %v4242_v25 }
 0x3c8   : > { %v23919_v44 = vsel %vm4227_vm12, %v4215_v27, %v4239_v38  ;;  %v4211_v23 = vmul.f32 %v23881_v63, %v4168_v40  ;;  %v4151_v46 = vsel %vm4143_vm9, %v4140_v24, %v4142_v17  ;;  %v4209_v47 = vmul.f32 %v23871_v48, %v4150_v41  ;;  %v4484_v27 = vld [vmem:[%s26139_s2 + $0x8] sm:$0xff]  ;;  %v4483_v17 = vld [vmem:[%s26139_s2] sm:$0xff]  ;;  %s26164_s2 = smov 76  }
 0x3c9   : > { %v23922_v45 = vsel %vm4228_vm8, %v4216_v34, %v4240_v39  ;;  %v23928_v49 = vpack.i.bf16 %v23905_v36, %v23907_v37  ;;  %v4217_v50 = vadd.f32 %v22377_v28, %v4205_v31  ;;  %v4210_v54 = vmul.f32 %v23876_v51, %v4151_v46 }
 0x3ca   : > { %v4223_v53 = vadd.f32 %v22378_v52, %v4211_v23  ;;  %v23935_v61 = vpack.c.bf16 %v23907_v37, %v23884_v3  ;;  %v4221_v1 = vadd.f32 %v22379_v62, %v4209_v47  ;;  %v23942_v2 = vpack.i.bf16 %v23917_v43, %v23915_v42 }
 0x3cb   : > { %21634 = vrot.lane.b32.xlu0 %v23928_v49, %s26043_s26  ;;  %v23946_v5 = vpack.c.bf16 %v23917_v43, %v23915_v42  ;;  %v23950_v6 = vpack.i.bf16 %v23922_v45, %v23919_v44  ;;  %v4222_v9 = vadd.f32 %v22380_v8, %v4210_v54  ;;  %v4241_v12 = vmul.f32 0.05, %v4217_v50 }
 0x3cc   : > { %v4247_v7 = vmul.f32 0.05, %v4223_v53  ;;  %20370 = vmatprep.subr.bf16.mxu0 %v23935_v61  ;;  %vm4235_vm8 = vcmp.ge.f32.partialorder %v4223_v53, 0.0  ;;  %vm4233_vm13 = vcmp.ge.f32.partialorder %v4221_v1, 0.0  ;;  %v4245_v10 = vmul.f32 0.05, %v4221_v1  ;;  %21639 = vrot.lane.b32.xlu1 %v23942_v2, %s26043_s26 }
 0x3cd   : > { %20372 = vmatpush1.bf16.msra.mxu0 %v23946_v5  ;;  %vm4234_vm14 = vcmp.ge.f32.partialorder %v4222_v9, 0.0  ;;  %v4246_v13 = vmul.f32 0.05, %v4222_v9  ;;  %vm4229_vm15 = vcmp.ge.f32.partialorder %v4217_v50, 0.0  ;;  %v23978_v21 = vpack.c.bf16 %v23905_v36, %v23886_v4 }
 0x3ce   : > { %v23957_v14 = vsel %vm4233_vm13, %v4221_v1, %v4245_v10  ;;  %v23961_v15 = vsel %vm4235_vm8, %v4223_v53, %v4247_v7  ;;  %v23973_v20 = vsel %vm4229_vm15, %v4217_v50, %v4241_v12  ;;  %v4488_v1 = vld [vmem:[#allocation14 + $0x10] sm:$0xff]  ;;  %vm26140_vm11 = vcmask 605184  }
 0x3cf   : > { %21644 = vrot.lane.b32.xlu0 %v23950_v6, %s26043_s26  ;;  %v23963_v18 = vsel %vm4234_vm14, %v4222_v9, %v4246_v13  ;;  %v23967_v19 = vpack.c.bf16 %v23957_v14, %v23919_v44  ;;  %v20377_v22 = vpack.c.bf16 %v23961_v15, %v23973_v20  ;;  %v21708_v26 = vpack.i.bf16 %v23961_v15, %v23973_v20  ;;  %vm26141_vm12 = vmmov %vm26140_vm11 }
 0x3d0   : > { %19110 = vmatmul.mubr.msk.f32.vlgmr.msra.gmra.mrb[8].mxu0 %vm1303_vm0, %v4260_v11  ;;  %v21648_v16 = vpack.i.bf16 %v23963_v18, %v23957_v14  ;;  %v23992_v25 = vpack.c.bf16 %v23963_v18, %v23922_v45  ;;  %vm26142_vm8 = vmmov %vm26140_vm11 }
 0x3d1   : > { %4405 = vmatprep.mubr.f32.mxu0 %v26061_v0  ;;  %20374 = vmatprep.subr.bf16.mxu0 %v23967_v19  ;;  %vm26143_vm13 = vmmov %vm26142_vm8 }
 0x3d2   : > { %21649 = vrot.lane.b32.xlu1 %v21648_v16, %s26043_s26  ;;  %20376 = vmatpush1.bf16.msra.mxu0 %v23978_v21  ;;  %vm26144_vm14 = vmmov %vm26142_vm8 }
 0x3d3   : > { %21654 = vrot.lane.b32.xlu0 %v23902_v35, %s26041_s22  ;;  %20378 = vmatprep.subr.bf16.mxu0 %v20377_v22  ;;  %vm26145_vm15 = vmmov %vm26142_vm8 }
 0x3d5   : > { %19111 = vmatmul.mubr.msk.f32.vlgmr.msra.gmra.mrb[10].mxu0 %vm1303_vm0, %v4260_v11 }
 0x3d6   : > { %21659 = vrot.lane.b32.xlu1 %v23928_v49, %s26041_s22  ;;  %20380 = vmatpush1.bf16.msra.mxu0 %v23992_v25 }
 0x3d7   : > { %21664 = vrot.lane.b32.xlu0 %v23942_v2, %s26041_s22  ;;  %4476 = vmatprep.mubr.f32.mxu0 %v26061_v0 }
 0x3d9   : > { %19112 = vmatmul.mubr.msk.f32.vlgmr.msra.gmra.mrb[12].mxu0 %vm1303_vm0, %v4260_v11  ;;  %v4489_v11 = vld [vmem:[#allocation14 + $0x18] sm:$0xff] }
 0x3da   : > { %21669 = vrot.lane.b32.xlu1 %v23950_v6, %s26041_s22  ;;  %4608 = vmatprep.mubr.f32.mxu0 %v26061_v0 }
 0x3db   : > { %21674 = vrot.lane.b32.xlu0 %v21648_v16, %s26041_s22 }
 0x3de   : > { %21679 = vrot.lane.b32.xlu1 %v23902_v35, %s22863_s6 }
 0x3df   : > { %21684 = vrot.lane.b32.xlu0 %v23928_v49, %s22863_s6 }
 0x3e2   : > { %21689 = vrot.lane.b32.xlu1 %v23942_v2, %s22863_s6 }
 0x3e3   : > { %21694 = vrot.lane.b32.xlu0 %v23950_v6, %s22863_s6 }
 0x3e6   : > { %21699 = vrot.lane.b32.xlu1 %v21648_v16, %s22863_s6 }
 0x3e7   : > { %21709 = vrot.lane.b32.xlu0 %v21708_v26, %s22863_s6 }
 0x3ea   : > { %21704 = vrot.lane.b32.xlu1 %v23902_v35, %s22864_s23 }
 0x3eb   : > { %21714 = vrot.lane.b32.xlu0 %v23928_v49, %s22864_s23 }
 0x3ee   : > { %21719 = vrot.lane.b32.xlu1 %v23942_v2, %s22864_s23 }
 0x3ef   : > { %21724 = vrot.lane.b32.xlu0 %v23950_v6, %s22864_s23 }
 0x3f2   : > { %21729 = vrot.lane.b32.xlu1 %v21648_v16, %s22864_s23 }
 0x3f3   : > { %21739 = vrot.lane.b32.xlu0 %v21708_v26, %s22864_s23 }
 0x3f6   : > { %21734 = vrot.lane.b32.xlu1 %v23902_v35, %s26050_s3 }
 0x3f7   : > { %21744 = vrot.lane.b32.xlu0 %v23928_v49, %s26050_s3 }
 0x3fa   : > { %21749 = vrot.lane.b32.xlu1 %v23942_v2, %s26050_s3 }
 0x3fb   : > { %21754 = vrot.lane.b32.xlu0 %v23950_v6, %s26050_s3 }
 0x3fe   : > { %21759 = vrot.lane.b32.xlu1 %v21648_v16, %s26050_s3 }
 0x3ff   : > { %21769 = vrot.lane.b32.xlu0 %v21708_v26, %s26050_s3 }
 0x402   : > { %21764 = vrot.lane.b32.xlu1 %v23902_v35, %s26047_s1 }
 0x403   : > { %21774 = vrot.lane.b32.xlu0 %v23928_v49, %s26047_s1 }
 0x406   : > { %21779 = vrot.lane.b32.xlu1 %v23942_v2, %s26047_s1 }
 0x407   : > { %21784 = vrot.lane.b32.xlu0 %v23950_v6, %s26047_s1 }
 0x40a   : > { %21789 = vrot.lane.b32.xlu1 %v21648_v16, %s26047_s1 }
 0x40b   : > { %21799 = vrot.lane.b32.xlu0 %v21708_v26, %s26047_s1 }
 0x40e   : > { %21794 = vrot.lane.b32.xlu1 %v23902_v35, %s22867_s13 }
 0x40f   : > { %21804 = vrot.lane.b32.xlu0 %v23928_v49, %s22867_s13 }
 0x412   : > { %21809 = vrot.lane.b32.xlu1 %v23942_v2, %s22867_s13 }
 0x413   : > { %21814 = vrot.lane.b32.xlu0 %v23950_v6, %s22867_s13 }
 0x416   : > { %21819 = vrot.lane.b32.xlu1 %v21648_v16, %s22867_s13 }
 0x417   : > { %21829 = vrot.lane.b32.xlu0 %v21708_v26, %s22867_s13 }
 0x41a   : > { %21824 = vrot.lane.b32.xlu1 %v23902_v35, %s26065_s7 }
 0x41b   : > { %21834 = vrot.lane.b32.xlu0 %v23928_v49, %s26065_s7 }
 0x41e   : > { %21839 = vrot.lane.b32.xlu1 %v23942_v2, %s26065_s7 }
 0x41f   : > { %21844 = vrot.lane.b32.xlu0 %v23950_v6, %s26065_s7 }
 0x422   : > { %21849 = vrot.lane.b32.xlu1 %v21648_v16, %s26065_s7 }
 0x423   : > { %21854 = vrot.lane.b32.xlu0 %v21708_v26, %s26065_s7  ;;  %v4485_v26 = vld [vmem:[#allocation14] sm:$0xff] }
 0x426   : > { %7050 = vperm.xlu1 %21627, %v4483_v17  }
 0x427   : > { %7055 = vperm.xlu0 %21626, %v4484_v27  }
 0x439   : > { %v21630_v24 = vpop.permute.xlu1 %21629 }
 0x43a   : > { %v21632_v31 = vunpack.i.h.bf16 %v21630_v24  ;;  %v21631_v33 = vunpack.i.l.bf16 %v21630_v24 }
 0x43c   : > { %v4521_v23 = vsel %vm1557_vm1, %v21631_v33, %v21632_v31 }
 0x43d   : > { %v21635_v34 = vpop.permute.xlu0 %21634 }
 0x43e   : > { %v21637_v38 = vunpack.i.h.bf16 %v21635_v34  ;;  %v21636_v35 = vunpack.i.l.bf16 %v21635_v34  ;;  %v21640_v39 = vpop.permute.xlu1 %21639 }
 0x43f   : > { %v21642_v40 = vunpack.i.h.bf16 %v21640_v39  ;;  %v21641_v41 = vunpack.i.l.bf16 %v21640_v39 }
 0x440   : > { %v4525_v46 = vsel %vm1557_vm1, %v21636_v35, %v21637_v38 }
 0x441   : > { %v21645_v47 = vpop.permute.xlu0 %21644  ;;  %v20381_v49 = vpack.c.bf16 %v4525_v46, %v4521_v23  ;;  %v4524_v28 = vsel %vm1557_vm1, %v21642_v40, %v21636_v35  ;;  %v4520_v50 = vsel %vm1557_vm1, %v21641_v41, %v21631_v33 }
 0x442   : > { %v20383_v52 = vpack.c.bf16 %v4524_v28, %v4520_v50  ;;  %v21647_v53 = vunpack.i.h.bf16 %v21645_v47  ;;  %v21646_v54 = vunpack.i.l.bf16 %v21645_v47 }
 0x443   : > { %20382 = vmatprep.subr.bf16.mxu0 %v20381_v49 }
 0x444   : > { %20384 = vmatpush1.bf16.msra.mxu0 %v20383_v52  ;;  %v21650_v62 = vpop.permute.xlu1 %21649  ;;  %v4522_v7 = vsel %vm1557_vm1, %v21632_v31, %v21646_v54  ;;  %v4523_v9 = vsel %vm1557_vm1, %v21646_v54, %v21647_v53  ;;  %v4486_v31 = vld [vmem:[#allocation14 + $0x8] sm:$0xff] }
 0x445   : > { %v21652_v2 = vunpack.i.h.bf16 %v21650_v62  ;;  %v21651_v6 = vunpack.i.l.bf16 %v21650_v62  ;;  %v21655_v22 = vpop.permute.xlu0 %21654 }
 0x446   : > { %v21657_v33 = vunpack.i.h.bf16 %v21655_v22 }
 0x447   : > { %v4526_v8 = vsel %vm1557_vm1, %v21637_v38, %v21651_v6  ;;  %19113 = vmatmul.mubr.msk.f32.vlgmr.msra.gmra.mrb[14].mxu0 %vm1303_vm0, %v4488_v1  ;;  %v4527_v10 = vsel %vm1557_vm1, %v21651_v6, %v21652_v2  ;;  %v20389_v16 = vpack.c.bf16 %v21652_v2, %v21647_v53  ;;  %v5009_v2 = vld [vmem:[#allocation14 + $0x20] sm:$0xff] }
 0x448   : > { %4614 = vmatprep.mubr.f32.mxu0 %v26061_v0  ;;  %v20385_v12 = vpack.c.bf16 %v4527_v10, %v4523_v9  ;;  %v20387_v13 = vpack.c.bf16 %v4526_v8, %v4522_v7  ;;  %v21660_v27 = vpop.permute.xlu1 %21659 }
 0x449   : > { %v21665_v17 = vpop.permute.xlu0 %21664  ;;  %v21662_v24 = vunpack.i.h.bf16 %v21660_v27 }
 0x44a   : > { %20386 = vmatprep.subr.bf16.mxu0 %v20385_v12  ;;  %v21667_v39 = vunpack.i.h.bf16 %v21665_v17  ;;  %v21666_v40 = vunpack.i.l.bf16 %v21665_v17 }
 0x44b   : > { %19114 = vmatmul.mubr.msk.f32.gmra.mrb[16].mxu0 %vm1303_vm0, %v4489_v11 }
 0x44c   : > { %20388 = vmatpush1.bf16.msra.mxu0 %v20387_v13  ;;  %4685 = vmatprep.mubr.f32.mxu0 %v26061_v0  ;;  %v21670_v38 = vpop.permute.xlu1 %21669 }
 0x44d   : > { %20390 = vmatprep.subr.bf16.mxu0 %v20389_v16  ;;  %v21675_v34 = vpop.permute.xlu0 %21674  ;;  %v21672_v46 = vunpack.i.h.bf16 %v21670_v38  ;;  %v21671_v47 = vunpack.i.l.bf16 %v21670_v38 }
 0x44e   : > { %v21677_v41 = vunpack.i.h.bf16 %v21675_v34  ;;  %v21676_v23 = vunpack.i.l.bf16 %v21675_v34 }
 0x44f   : > { %19115 = vmatmul.mubr.msk.f32.vlgmr.msra.gmra.mrb[18].mxu0 %vm1303_vm0, %v4488_v1  ;;  %v5034_v50 = vsel %vm2069_vm2, %v21671_v47, %v21672_v46 }
 0x450   : > { %20392 = vmatpush3.bf16.msra.mxu0 %v20389_v16  ;;  %4691 = vmatprep.mubr.f32.mxu0 %v26061_v0  ;;  %v5038_v52 = vsel %vm2069_vm2, %v21676_v23, %v21677_v41  ;;  %v21680_v53 = vpop.permute.xlu1 %21679  ;;  %v5037_v62 = vsel %vm2069_vm2, %v21662_v24, %v21676_v23  ;;  %v20413_v9 = vpack.c.bf16 %v21677_v41, %v21672_v46  ;;  %v5010_v16 = vld [vmem:[#allocation14 + $0x28] sm:$0xff] }
 0x451   : > { %20394 = vmatprep.subr.bf16.mxu0 %v23935_v61  ;;  %v21661_v61 = vunpack.i.l.bf16 %v21660_v27  ;;  %v21685_v6 = vpop.permute.xlu0 %21684  ;;  %v21682_v12 = vunpack.i.h.bf16 %v21680_v53  ;;  %v21681_v13 = vunpack.i.l.bf16 %v21680_v53 }
 0x452   : > { %v21687_v10 = vunpack.i.h.bf16 %v21685_v6 }
 0x453   : > { %19116 = vmatmul.mubr.msk.f32.gmra.mrb[20].mxu0 %vm1303_vm0, %v4489_v11  ;;  %v5035_v28 = vsel %vm2069_vm2, %v21667_v39, %v21661_v61 }
 0x454   : > { %19841 = vmatprep.mubr.msk.f32.mxu0 %vm1303_vm0, %v4488_v1  ;;  %v20409_v1 = vpack.c.bf16 %v5038_v52, %v5034_v50  ;;  %v21690_v8 = vpop.permute.xlu1 %21689  ;;  %v5295_v50 = vld [vmem:[#allocation14 + $0x30] sm:$0xff] }
 0x457   : > { %19842 = vmatmul.mubr.msk.f32.vlgmr.msra.gmra.mrb[22].mxu0 %vm1303_vm0, %v4489_v11  ;;  %v21686_v11 = vunpack.i.l.bf16 %v21685_v6 }
 0x458   : > { %20396 = vmatpush1.bf16.msra.mxu0 %v23946_v5  ;;  %4843 = vmatprep.mubr.f32.mxu0 %v26061_v0  ;;  %v21656_v5 = vunpack.i.l.bf16 %v21655_v22  ;;  %v21695_v22 = vpop.permute.xlu0 %21694  ;;  %v21700_v17 = vpop.permute.xlu1 %21699 }
 0x459   : > { %20398 = vmatprep.subr.bf16.mxu0 %v23967_v19  ;;  %v5036_v19 = vsel %vm2069_vm2, %v21661_v61, %v21662_v24  ;;  %v5329_v27 = vsel %vm2362_vm3, %v21686_v11, %v21687_v10  ;;  %v21692_v24 = vunpack.i.h.bf16 %v21690_v8  ;;  %v21691_v61 = vunpack.i.l.bf16 %v21690_v8 }
 0x45a   : > { %v5032_v35 = vsel %vm2069_vm2, %v21656_v5, %v21657_v33  ;;  %v5031_v49 = vsel %vm2069_vm2, %v21666_v40, %v21656_v5  ;;  %v21701_v5 = vunpack.i.l.bf16 %v21700_v17  ;;  %v21697_v34 = vunpack.i.h.bf16 %v21695_v22 }
 0x45b   : > { %19119 = vmatmul.mubr.msk.f32.vlgmr.msra.gmra.mrb[14].mxu0 %vm1303_vm0, %v4485_v26  ;;  %v20407_v54 = vpack.c.bf16 %v5035_v28, %v5031_v49  ;;  %v21696_v38 = vunpack.i.l.bf16 %v21695_v22  ;;  %v5323_v39 = vsel %vm2362_vm3, %v21691_v61, %v21681_v13 }
 0x45c   : > { %20400 = vmatpush1.bf16.msra.mxu0 %v23978_v21  ;;  %4849 = vmatprep.mubr.f32.mxu0 %v26061_v0  ;;  %v20405_v21 = vpack.c.bf16 %v5036_v19, %v5032_v35  ;;  %v21710_v19 = vpop.permute.xlu0 %21709  ;;  %v5328_v35 = vsel %vm2362_vm3, %v21692_v24, %v21686_v11  ;;  %v24121_v23 = vpop.permute.xlu1 %21704  ;;  %v5330_v49 = vsel %vm2362_vm3, %v21687_v10, %v21701_v5  ;;  %v5296_v10 = vld [vmem:[#allocation14 + $0x38] sm:$0xff] }
 0x45d   : > { %20402 = vmatprep.subr.bf16.mxu0 %v23992_v25  ;;  %v21712_v40 = vunpack.i.h.bf16 %v21710_v19  ;;  %v20419_v46 = vpack.c.bf16 %v5328_v35, %v5323_v39  ;;  %v21707_v8 = vunpack.i.h.bf16 %v24121_v23 }
 0x45f   : > { %19120 = vmatmul.mubr.msk.f32.gmra.mrb[16].mxu0 %vm1303_vm0, %v4486_v31 }
 0x460   : > { %4920 = vmatprep.mubr.f32.mxu0 %v26061_v0 }
 0x463   : > { %19121 = vmatmul.mubr.msk.f32.vlgmr.msra.gmra.mrb[18].mxu0 %vm1303_vm0, %v4485_v26 }
 0x464   : > { %20404 = vmatpush3.bf16.msra.mxu0 %v23992_v25  ;;  %4926 = vmatprep.mubr.f32.mxu0 %v26061_v0  ;;  %v5033_v25 = vsel %vm2069_vm2, %v21657_v33, %v21671_v47  ;;  %v21702_v33 = vunpack.i.h.bf16 %v21700_v17  ;;  %v5326_v47 = vsel %vm2362_vm3, %v21696_v38, %v21697_v34 }
 0x465   : > { %20406 = vmatprep.subr.bf16.mxu0 %v20405_v21  ;;  %v20411_v7 = vpack.c.bf16 %v5037_v62, %v5033_v25  ;;  %v21711_v21 = vunpack.i.l.bf16 %v21710_v19  ;;  %v21715_v62 = vpop.permute.xlu0 %21714 }
 0x466   : > { %v5331_v41 = vsel %vm2362_vm3, %v21701_v5, %v21702_v33  ;;  %v5332_v53 = vsel %vm2362_vm3, %v21702_v33, %v21712_v40  ;;  %v21717_v6 = vunpack.i.h.bf16 %v21715_v62 }
 0x467   : > { %19122 = vmatmul.mubr.msk.f32.gmra.mrb[20].mxu0 %vm1303_vm0, %v4486_v31  ;;  %v20421_v28 = vpack.c.bf16 %v5331_v41, %v5326_v47  ;;  %v5327_v52 = vsel %vm2362_vm3, %v21697_v34, %v21711_v21 }
 0x468   : > { %19848 = vmatprep.mubr.msk.f32.mxu0 %vm1303_vm0, %v4485_v26  ;;  %v5324_v26 = vsel %vm2362_vm3, %v21681_v13, %v21682_v12 }
 0x469   : > { %v21725_v11 = vpop.permute.xlu0 %21724 }
 0x46a   : > { %v21726_v33 = vunpack.i.l.bf16 %v21725_v11 }
 0x46b   : > { %19849 = vmatmul.mubr.msk.f32.vlgmr.msra.gmra.mrb[22].mxu0 %vm1303_vm0, %v4486_v31  ;;  %v20417_v31 = vpack.c.bf16 %v5329_v27, %v5324_v26 }
 0x46c   : > { %20408 = vmatpush1.bf16.msra.mxu0 %v20407_v54  ;;  %5119 = vmatprep.mubr.f32.mxu0 %v26061_v0  ;;  %v5325_v54 = vsel %vm2362_vm3, %v21682_v12, %v21696_v38 }
 0x46d   : > { %20410 = vmatprep.subr.bf16.mxu0 %v20409_v1  ;;  %v20423_v25 = vpack.c.bf16 %v5330_v49, %v5325_v54  ;;  %v21720_v1 = vpop.permute.xlu1 %21719  ;;  %v21740_v61 = vpop.permute.xlu0 %21739 }
 0x46e   : > { %v21722_v22 = vunpack.i.h.bf16 %v21720_v1  ;;  %v21721_v26 = vunpack.i.l.bf16 %v21720_v1  ;;  %v21742_v34 = vunpack.i.h.bf16 %v21740_v61  ;;  %v21741_v38 = vunpack.i.l.bf16 %v21740_v61 }
 0x46f   : > { %19125 = vmatmul.mubr.msk.f32.vlgmr.msra.gmra.mrb[14].mxu0 %vm1303_vm0, %v5009_v2 }
 0x470   : > { %20412 = vmatpush1.bf16.msra.mxu0 %v20411_v7  ;;  %5125 = vmatprep.mubr.f32.mxu0 %v26061_v0  ;;  %v21716_v7 = vunpack.i.l.bf16 %v21715_v62 }
 0x471   : > { %20414 = vmatprep.subr.bf16.mxu0 %v20413_v9 }
 0x472   : > { %v5621_v13 = vsel %vm2655_vm4, %v21716_v7, %v21717_v6  ;;  %v5620_v5 = vsel %vm2655_vm4, %v21722_v22, %v21716_v7 }
 0x473   : > { %19126 = vmatmul.mubr.msk.f32.gmra.mrb[16].mxu0 %vm1303_vm0, %v5010_v16 }
 0x474   : > { %5196 = vmatprep.mubr.f32.mxu0 %v26061_v0 }
 0x477   : > { %19127 = vmatmul.mubr.msk.f32.vlgmr.msra.gmra.mrb[18].mxu0 %vm1303_vm0, %v5009_v2 }
 0x478   : > { %20416 = vmatpush3.bf16.msra.mxu0 %v20413_v9  ;;  %5202 = vmatprep.mubr.f32.mxu0 %v26061_v0  ;;  %v21706_v9 = vunpack.i.l.bf16 %v24121_v23 }
 0x479   : > { %20418 = vmatprep.subr.bf16.mxu0 %v20417_v31  ;;  %v21727_v31 = vunpack.i.h.bf16 %v21725_v11 }
 0x47a   : > { %v5616_v12 = vsel %vm2655_vm4, %v21706_v9, %v21707_v8  ;;  %v5615_v19 = vsel %vm2655_vm4, %v21721_v26, %v21706_v9 }
 0x47b   : > { %19128 = vmatmul.mubr.msk.f32.gmra.mrb[20].mxu0 %vm1303_vm0, %v5010_v16  ;;  %v20429_v27 = vpack.c.bf16 %v5621_v13, %v5616_v12  ;;  %v20431_v40 = vpack.c.bf16 %v5620_v5, %v5615_v19  ;;  %v5618_v21 = vsel %vm2655_vm4, %v21726_v33, %v21727_v31  ;;  %v5619_v47 = vsel %vm2655_vm4, %v21727_v31, %v21741_v38 }
 0x47c   : > { %19855 = vmatprep.mubr.msk.f32.mxu0 %vm1303_vm0, %v5009_v2  ;;  %v20425_v2 = vpack.c.bf16 %v5332_v53, %v5327_v52 }
 0x47f   : > { %19856 = vmatmul.mubr.msk.f32.vlgmr.msra.gmra.mrb[22].mxu0 %vm1303_vm0, %v5010_v16  ;;  %v21730_v16 = vpop.permute.xlu1 %21729 }
 0x480   : > { %20420 = vmatpush1.bf16.msra.mxu0 %v20419_v46  ;;  %5413 = vmatprep.mubr.f32.mxu0 %v26061_v0  ;;  %v21732_v17 = vunpack.i.h.bf16 %v21730_v16  ;;  %v21731_v24 = vunpack.i.l.bf16 %v21730_v16  ;;  %v5589_v46 = vld [vmem:[#allocation14 + $0x40] sm:$0xff] }
 0x481   : > { %20422 = vmatprep.subr.bf16.mxu0 %v20421_v28  ;;  %v5617_v28 = vsel %vm2655_vm4, %v21707_v8, %v21726_v33 }
 0x482   : > { %v5623_v35 = vsel %vm2655_vm4, %v21731_v24, %v21732_v17  ;;  %v5622_v41 = vsel %vm2655_vm4, %v21717_v6, %v21731_v24  ;;  %v5624_v49 = vsel %vm2655_vm4, %v21732_v17, %v21742_v34  ;;  %v5590_v6 = vld [vmem:[#allocation14 + $0x48] sm:$0xff] }
 0x483   : > { %19131 = vmatmul.mubr.msk.f32.vlgmr.msra.gmra.mrb[14].mxu0 %vm1303_vm0, %v5295_v50  ;;  %v24145_v39 = vpop.permute.xlu1 %21734  ;;  %v20433_v23 = vpack.c.bf16 %v5623_v35, %v5618_v21  ;;  %v20435_v52 = vpack.c.bf16 %v5622_v41, %v5617_v28  ;;  %v20437_v54 = vpack.c.bf16 %v5624_v49, %v5619_v47  ;;  %v5881_v41 = vld [vmem:[#allocation14 + $0x50] sm:$0xff] }
 0x484   : > { %20424 = vmatpush1.bf16.msra.mxu0 %v20423_v25  ;;  %5419 = vmatprep.mubr.f32.mxu0 %v26061_v0  ;;  %v21737_v1 = vunpack.i.h.bf16 %v24145_v39 }
 0x485   : > { %20426 = vmatprep.subr.bf16.mxu0 %v20425_v2 }
 0x487   : > { %19132 = vmatmul.mubr.msk.f32.gmra.mrb[16].mxu0 %vm1303_vm0, %v5296_v10  ;;  %v21750_v53 = vpop.permute.xlu1 %21749 }
 0x488   : > { %5490 = vmatprep.mubr.f32.mxu0 %v26061_v0  ;;  %v21752_v11 = vunpack.i.h.bf16 %v21750_v53  ;;  %v21751_v12 = vunpack.i.l.bf16 %v21750_v53 }
 0x48b   : > { %19133 = vmatmul.mubr.msk.f32.vlgmr.msra.gmra.mrb[18].mxu0 %vm1303_vm0, %v5295_v50 }
 0x48c   : > { %20428 = vmatpush3.bf16.msra.mxu0 %v20425_v2  ;;  %5496 = vmatprep.mubr.f32.mxu0 %v26061_v0  ;;  %v21736_v2 = vunpack.i.l.bf16 %v24145_v39 }
 0x48d   : > { %20430 = vmatprep.subr.bf16.mxu0 %v20429_v27 }
 0x48e   : > { %v5908_v8 = vsel %vm2948_vm5, %v21736_v2, %v21737_v1  ;;  %v5907_v31 = vsel %vm2948_vm5, %v21751_v12, %v21736_v2 }
 0x48f   : > { %19134 = vmatmul.mubr.msk.f32.gmra.mrb[20].mxu0 %vm1303_vm0, %v5296_v10 }
 0x490   : > { %19862 = vmatprep.mubr.msk.f32.mxu0 %vm1303_vm0, %v5295_v50  ;;  %v21745_v50 = vpop.permute.xlu0 %21744 }
 0x491   : > { %v21747_v62 = vunpack.i.h.bf16 %v21745_v50  ;;  %v21746_v25 = vunpack.i.l.bf16 %v21745_v50 }
 0x493   : > { %19863 = vmatmul.mubr.msk.f32.vlgmr.msra.gmra.mrb[22].mxu0 %vm1303_vm0, %v5296_v10  ;;  %v5913_v9 = vsel %vm2948_vm5, %v21746_v25, %v21747_v62  ;;  %v21760_v10 = vpop.permute.xlu1 %21759  ;;  %v5912_v61 = vsel %vm2948_vm5, %v21752_v11, %v21746_v25 }
 0x494   : > { %20432 = vmatpush1.bf16.msra.mxu0 %v20431_v40  ;;  %5705 = vmatprep.mubr.f32.mxu0 %v26061_v0  ;;  %v21755_v7 = vpop.permute.xlu0 %21754  ;;  %v20441_v13 = vpack.c.bf16 %v5913_v9, %v5908_v8  ;;  %v21762_v16 = vunpack.i.h.bf16 %v21760_v10  ;;  %v21761_v22 = vunpack.i.l.bf16 %v21760_v10  ;;  %v20443_v35 = vpack.c.bf16 %v5912_v61, %v5907_v31 }
 0x495   : > { %20434 = vmatprep.subr.bf16.mxu0 %v20433_v23  ;;  %v21757_v27 = vunpack.i.h.bf16 %v21755_v7  ;;  %v21756_v17 = vunpack.i.l.bf16 %v21755_v7 }
 0x496   : > { %v5915_v34 = vsel %vm2948_vm5, %v21761_v22, %v21762_v16  ;;  %v5914_v40 = vsel %vm2948_vm5, %v21747_v62, %v21761_v22 }
 0x497   : > { %19137 = vmatmul.mubr.msk.f32.vlgmr.msra.gmra.mrb[14].mxu0 %vm1303_vm0, %v5589_v46  ;;  %v24173_v38 = vpop.permute.xlu1 %21764  ;;  %v5910_v39 = vsel %vm2948_vm5, %v21756_v17, %v21757_v27  ;;  %v5909_v47 = vsel %vm2948_vm5, %v21737_v1, %v21756_v17  ;;  %v5882_v1 = vld [vmem:[#allocation14 + $0x58] sm:$0xff] }
 0x498   : > { %20436 = vmatpush1.bf16.msra.mxu0 %v20435_v52  ;;  %5711 = vmatprep.mubr.f32.mxu0 %v26061_v0  ;;  %v21770_v26 = vpop.permute.xlu0 %21769  ;;  %v20445_v21 = vpack.c.bf16 %v5915_v34, %v5910_v39  ;;  %v20447_v28 = vpack.c.bf16 %v5914_v40, %v5909_v47  ;;  %v21767_v2 = vunpack.i.h.bf16 %v24173_v38  ;;  %v6173_v47 = vld [vmem:[#allocation14 + $0x60] sm:$0xff] }
 0x499   : > { %20438 = vmatprep.subr.bf16.mxu0 %v20437_v54  ;;  %v21772_v5 = vunpack.i.h.bf16 %v21770_v26  ;;  %v21771_v19 = vunpack.i.l.bf16 %v21770_v26 }
 0x49b   : > { %19138 = vmatmul.mubr.msk.f32.gmra.mrb[16].mxu0 %vm1303_vm0, %v5590_v6  ;;  %v5911_v23 = vsel %vm2948_vm5, %v21757_v27, %v21771_v19  ;;  %v21780_v52 = vpop.permute.xlu1 %21779 }
 0x49c   : > { %5782 = vmatprep.mubr.f32.mxu0 %v26061_v0  ;;  %v21775_v49 = vpop.permute.xlu0 %21774 }
 0x49d   : > { %v21777_v62 = vunpack.i.h.bf16 %v21775_v49  ;;  %v21776_v25 = vunpack.i.l.bf16 %v21775_v49 }
 0x49f   : > { %19139 = vmatmul.mubr.msk.f32.vlgmr.msra.gmra.mrb[18].mxu0 %vm1303_vm0, %v5589_v46  ;;  %v6205_v11 = vsel %vm26064_vm6, %v21776_v25, %v21777_v62  ;;  %v21790_v12 = vpop.permute.xlu1 %21789 }
 0x4a0   : > { %20440 = vmatpush3.bf16.msra.mxu0 %v20437_v54  ;;  %5788 = vmatprep.mubr.f32.mxu0 %v26061_v0  ;;  %v21785_v8 = vpop.permute.xlu0 %21784  ;;  %v21792_v26 = vunpack.i.h.bf16 %v21790_v12  ;;  %v21791_v27 = vunpack.i.l.bf16 %v21790_v12 }
 0x4a1   : > { %20442 = vmatprep.subr.bf16.mxu0 %v20441_v13  ;;  %v21782_v13 = vunpack.i.h.bf16 %v21780_v52  ;;  %v21787_v61 = vunpack.i.h.bf16 %v21785_v8  ;;  %v21786_v31 = vunpack.i.l.bf16 %v21785_v8 }
 0x4a3   : > { %v24164_v24 = vpop.f32.mrb[8].mxu0  ;;  %19140 = vmatmul.mubr.msk.f32.gmra.mrb[20].mxu0 %vm1303_vm0, %v5590_v6  ;;  %v24205_v39 = vpop.permute.xlu1 %21794 }
 0x4a4   : > { %v24169_v33 = vpop.f32.mrb[9].mxu0  ;;  %19869 = vmatprep.mubr.msk.f32.mxu0 %vm1303_vm0, %v5589_v46  ;;  %v5916_v46 = vsel %vm2948_vm5, %v21762_v16, %v21772_v5  ;;  %v21781_v16 = vunpack.i.l.bf16 %v21780_v52  ;;  %v21800_v17 = vpop.permute.xlu0 %21799  ;;  %v6204_v5 = vsel %vm26064_vm6, %v21782_v13, %v21776_v25  ;;  %v21797_v8 = vunpack.i.h.bf16 %v24205_v39 }
 0x4a5   : > { %v20449_v53 = vpack.c.bf16 %v5916_v46, %v5911_v23  ;;  %v21802_v34 = vunpack.i.h.bf16 %v21800_v17  ;;  %v6206_v23 = vsel %vm26064_vm6, %v21777_v62, %v21791_v27 }
 0x4a7   : > { %19870 = vmatmul.mubr.msk.f32.vlgmr.msra.gmra.mrb[22].mxu0 %vm1303_vm0, %v5590_v6  ;;  %v21766_v6 = vunpack.i.l.bf16 %v24173_v38  ;;  %v21801_v38 = vunpack.i.l.bf16 %v21800_v17  ;;  %v21810_v25 = vpop.permute.xlu1 %21809 }
 0x4a8   : > { %20444 = vmatpush1.bf16.msra.mxu0 %v20443_v35  ;;  %5997 = vmatprep.mubr.f32.mxu0 %v26061_v0  ;;  %v24182_v50 = vpop.f32.mrb[10].mxu0  ;;  %v6207_v35 = vsel %vm26064_vm6, %v21791_v27, %v21792_v26  ;;  %v21805_v52 = vpop.permute.xlu0 %21804 }
 0x4a9   : > { %20446 = vmatprep.subr.bf16.mxu0 %v20445_v21  ;;  %v24185_v54 = vpop.f32.mrb[11].mxu0  ;;  %v6200_v10 = vsel %vm26064_vm6, %v21766_v6, %v21767_v2  ;;  %v6199_v19 = vsel %vm26064_vm6, %v21781_v16, %v21766_v6  ;;  %v6202_v21 = vsel %vm26064_vm6, %v21786_v31, %v21787_v61  ;;  %v6203_v49 = vsel %vm26064_vm6, %v21787_v61, %v21801_v38 }
 0x4aa   : > { %v20453_v22 = vpack.c.bf16 %v6205_v11, %v6200_v10  ;;  %v20455_v40 = vpack.c.bf16 %v6204_v5, %v6199_v19  ;;  %v20457_v46 = vpack.c.bf16 %v6207_v35, %v6202_v21  ;;  %v21807_v6 = vunpack.i.h.bf16 %v21805_v52  ;;  %v6174_v11 = vld [vmem:[#allocation14 + $0x68] sm:$0xff] }
 0x4ab   : > { %19143 = vmatmul.mubr.msk.f32.vlgmr.msra.gmra.mrb[14].mxu0 %vm1303_vm0, %v5881_v41  ;;  %v21796_v10 = vunpack.i.l.bf16 %v24205_v39  ;;  %v21820_v16 = vpop.permute.xlu1 %21819 }
 0x4ac   : > { %20448 = vmatpush1.bf16.msra.mxu0 %v20447_v28  ;;  %6003 = vmatprep.mubr.f32.mxu0 %v26061_v0  ;;  %v24190_v7 = vpop.f32.mrb[12].mxu0  ;;  %v6201_v28 = vsel %vm26064_vm6, %v21767_v2, %v21786_v31  ;;  %v21815_v12 = vpop.permute.xlu0 %21814  ;;  %v21822_v17 = vunpack.i.h.bf16 %v21820_v16  ;;  %v21821_v61 = vunpack.i.l.bf16 %v21820_v16 }
 0x4ad   : > { %20450 = vmatprep.subr.bf16.mxu0 %v20449_v53  ;;  %v24193_v9 = vpop.f32.mrb[13].mxu0  ;;  %v6492_v2 = vsel %vm26063_vm7, %v21796_v10, %v21797_v8  ;;  %v21817_v5 = vunpack.i.h.bf16 %v21815_v12  ;;  %v21816_v19 = vunpack.i.l.bf16 %v21815_v12 }
 0x4af   : > { %19144 = vmatmul.mubr.msk.f32.gmra.mrb[16].mxu0 %vm1303_vm0, %v5882_v1  ;;  %v24229_v21 = vpop.permute.xlu1 %21824 }
 0x4b0   : > { %6074 = vmatprep.mubr.f32.mxu0 %v26061_v0  ;;  %v21830_v31 = vpop.permute.xlu0 %21829  ;;  %v21827_v12 = vunpack.i.h.bf16 %v24229_v21 }
 0x4b1   : > { %v21832_v35 = vunpack.i.h.bf16 %v21830_v31  ;;  %v21831_v39 = vunpack.i.l.bf16 %v21830_v31 }
 0x4b3   : > { %19145 = vmatmul.mubr.msk.f32.vlgmr.msra.gmra.mrb[18].mxu0 %vm1303_vm0, %v5881_v41 }
 0x4b4   : > { %20452 = vmatpush3.bf16.msra.mxu0 %v20449_v53  ;;  %6080 = vmatprep.mubr.f32.mxu0 %v26061_v0  ;;  %v20459_v53 = vpack.c.bf16 %v6206_v23, %v6201_v28  ;;  %v6465_v28 = vld [vmem:[#allocation14 + $0x70] sm:$0xff] }
 0x4b5   : > { %20454 = vmatprep.subr.bf16.mxu0 %v20453_v22  ;;  %v21812_v22 = vunpack.i.h.bf16 %v21810_v25 }
 0x4b7   : > { %19146 = vmatmul.mubr.msk.f32.gmra.mrb[20].mxu0 %vm1303_vm0, %v5882_v1 }
 0x4b8   : > { %19876 = vmatprep.mubr.msk.f32.mxu0 %vm1303_vm0, %v5881_v41  ;;  %v6208_v41 = vsel %vm26064_vm6, %v21792_v26, %v21802_v34  ;;  %v21811_v26 = vunpack.i.l.bf16 %v21810_v25  ;;  %v21835_v25 = vpop.permute.xlu0 %21834 }
 0x4b9   : > { %v20461_v62 = vpack.c.bf16 %v6208_v41, %v6203_v49  ;;  %v6498_v49 = vsel %vm26063_vm7, %v21807_v6, %v21821_v61 }
 0x4ba   : > { %v6491_v38 = vsel %vm26063_vm7, %v21811_v26, %v21796_v10  ;;  %v21837_v10 = vunpack.i.h.bf16 %v21835_v25 }
 0x4bb   : > { %19877 = vmatmul.mubr.msk.f32.vlgmr.msra.gmra.mrb[22].mxu0 %vm1303_vm0, %v5882_v1  ;;  %v21806_v1 = vunpack.i.l.bf16 %v21805_v52  ;;  %v6495_v52 = vsel %vm26063_vm7, %v21817_v5, %v21831_v39 }
 0x4bc   : > { %20456 = vmatpush1.bf16.msra.mxu0 %v20455_v40  ;;  %6289 = vmatprep.mubr.f32.mxu0 %v26061_v0  ;;  %v6499_v40 = vsel %vm26063_vm7, %v21821_v61, %v21822_v17  ;;  %v21845_v16 = vpop.permute.xlu0 %21844 }
 0x4bd   : > { %20458 = vmatprep.subr.bf16.mxu0 %v20457_v46  ;;  %v6497_v13 = vsel %vm26063_vm7, %v21806_v1, %v21807_v6  ;;  %v6496_v34 = vsel %vm26063_vm7, %v21812_v22, %v21806_v1  ;;  %v6494_v46 = vsel %vm26063_vm7, %v21816_v19, %v21817_v5  ;;  %v21840_v1 = vpop.permute.xlu1 %21839 }
 0x4be   : > { %v20465_v27 = vpack.c.bf16 %v6497_v13, %v6492_v2  ;;  %v20467_v23 = vpack.c.bf16 %v6496_v34, %v6491_v38  ;;  %v20469_v41 = vpack.c.bf16 %v6499_v40, %v6494_v46  ;;  %v21826_v2 = vunpack.i.l.bf16 %v24229_v21  ;;  %v6466_v13 = vld [vmem:[#allocation14 + $0x78] sm:$0xff] }
 0x4bf   : > { %19149 = vmatmul.mubr.msk.f32.vlgmr.msra.gmra.mrb[14].mxu0 %vm1303_vm0, %v6173_v47  ;;  %v21847_v34 = vunpack.i.h.bf16 %v21845_v16  ;;  %v21846_v38 = vunpack.i.l.bf16 %v21845_v16 }
 0x4c0   : > { %20460 = vmatpush1.bf16.msra.mxu0 %v20459_v53  ;;  %6295 = vmatprep.mubr.f32.mxu0 %v26061_v0  ;;  %v6493_v53 = vsel %vm26063_vm7, %v21797_v8, %v21816_v19  ;;  %v6784_v8 = vsel %vm26140_vm11, %v21826_v2, %v21827_v12  ;;  %v21855_v19 = vpop.permute.xlu0 %21854  ;;  %vm26146_vm11 = vmmov %vm26142_vm8 }
 0x4c1   : > { %20462 = vmatprep.subr.bf16.mxu0 %v20461_v62  ;;  %v21850_v26 = vpop.permute.xlu1 %21849  ;;  %v21857_v40 = vunpack.i.h.bf16 %v21855_v19  ;;  %v21856_v21 = vunpack.i.l.bf16 %v21855_v19 }
 0x4c2   : > { %v21852_v31 = vunpack.i.h.bf16 %v21850_v26  ;;  %v21851_v5 = vunpack.i.l.bf16 %v21850_v26 }
 0x4c3   : > { %19150 = vmatmul.mubr.msk.f32.gmra.mrb[16].mxu0 %vm1303_vm0, %v6174_v11 }
 0x4c4   : > { %6366 = vmatprep.mubr.f32.mxu0 %v26061_v0  ;;  %v7056_v16 = vpop.permute.xlu0 %7055 }
 0x4c7   : > { %19151 = vmatmul.mubr.msk.f32.vlgmr.msra.gmra.mrb[18].mxu0 %vm1303_vm0, %v6173_v47 }
 0x4c8   : > { %20464 = vmatpush3.bf16.msra.mxu0 %v20461_v62  ;;  %6372 = vmatprep.mubr.f32.mxu0 %v26061_v0  ;;  %v20471_v62 = vpack.c.bf16 %v6498_v49, %v6493_v53  ;;  %v6786_v49 = vsel %vm26145_vm15, %v21846_v38, %v21847_v34 }
 0x4c9   : > { %20466 = vmatprep.subr.bf16.mxu0 %v20465_v27  ;;  %v21842_v27 = vunpack.i.h.bf16 %v21840_v1 }
 0x4cb   : > { %19152 = vmatmul.mubr.msk.f32.gmra.mrb[20].mxu0 %vm1303_vm0, %v6174_v11 }
 0x4cc   : > { %19883 = vmatprep.mubr.msk.f32.mxu0 %vm1303_vm0, %v6173_v47  ;;  %v6500_v47 = vsel %vm26063_vm7, %v21822_v17, %v21832_v35  ;;  %v21841_v17 = vunpack.i.l.bf16 %v21840_v1 }
 0x4cd   : > { %v20473_v6 = vpack.c.bf16 %v6500_v47, %v6495_v52  ;;  %v6757_v47 = vld [vmem:[#allocation14 + $0x80] sm:$0xff] }
 0x4ce   : > { %v6783_v39 = vsel %vm26143_vm13, %v21841_v17, %v21826_v2  ;;  %vm26148_vm13 = vmmov %vm26142_vm8 }
 0x4cf   : > { %19884 = vmatmul.mubr.msk.f32.vlgmr.msra.gmra.mrb[22].mxu0 %vm1303_vm0, %v6174_v11  ;;  %v21836_v11 = vunpack.i.l.bf16 %v21835_v25  ;;  %v6792_v25 = vsel %vm26142_vm8, %v21852_v31, %v21857_v40 }
 0x4d0   : > { %20468 = vmatpush1.bf16.msra.mxu0 %v20467_v23  ;;  %6581 = vmatprep.mubr.f32.mxu0 %v26061_v0  ;;  %v6791_v23 = vsel %vm26144_vm14, %v21851_v5, %v21852_v31 }
 0x4d1   : > { %20470 = vmatprep.subr.bf16.mxu0 %v20469_v41  ;;  %v6789_v22 = vsel %vm26141_vm12, %v21836_v11, %v21837_v10  ;;  %v6788_v35 = vsel %vm26142_vm8, %v21842_v27, %v21836_v11  ;;  %v6790_v41 = vsel %vm26146_vm11, %v21837_v10, %v21851_v5  ;;  %v20481_v52 = vpack.c.bf16 %v6791_v23, %v6786_v49  ;;  %vm26147_vm12 = vmmov %vm26142_vm8  ;;  %v7051_v10 = vpop.permute.xlu1 %7050 }
 0x4d2   : > { %v20477_v61 = vpack.c.bf16 %v6789_v22, %v6784_v8  ;;  %v20479_v46 = vpack.c.bf16 %v6788_v35, %v6783_v39  ;;  %v6787_v53 = vsel %vm26147_vm12, %v21847_v34, %v21856_v21 }
 0x4d3   : > { %19155 = vmatmul.mubr.msk.f32.vlgmr.msra.gmra.mrb[14].mxu0 %vm1303_vm0, %v6465_v28  ;;  %v20485_v1 = vpack.c.bf16 %v6792_v25, %v6787_v53 }
 0x4d4   : > { %20472 = vmatpush1.bf16.msra.mxu0 %v20471_v62  ;;  %6587 = vmatprep.mubr.f32.mxu0 %v26061_v0 }
 0x4d5   : > { %20474 = vmatprep.subr.bf16.mxu0 %v20473_v6 }
 0x4d7   : > { %19156 = vmatmul.mubr.msk.f32.gmra.mrb[16].mxu0 %vm1303_vm0, %v6466_v13 }
 0x4d8   : > { %6658 = vmatprep.mubr.f32.mxu0 %v26061_v0 }
 0x4db   : > { %19157 = vmatmul.mubr.msk.f32.vlgmr.msra.gmra.mrb[18].mxu0 %vm1303_vm0, %v6465_v28 }
 0x4dc   : > { %20476 = vmatpush3.bf16.msra.mxu0 %v20473_v6  ;;  %6664 = vmatprep.mubr.f32.mxu0 %v26061_v0  ;;  %v6758_v6 = vld [vmem:[#allocation14 + $0x88] sm:$0xff] }
 0x4dd   : > { %20478 = vmatprep.subr.bf16.mxu0 %v20477_v61 }
 0x4df   : > { %19158 = vmatmul.mubr.msk.f32.gmra.mrb[20].mxu0 %vm1303_vm0, %v6466_v13 }
 0x4e0   : > { %19890 = vmatprep.mubr.msk.f32.mxu0 %vm1303_vm0, %v6465_v28  ;;  %v6785_v28 = vsel %vm26148_vm13, %v21827_v12, %v21846_v38 }
 0x4e1   : > { %v20483_v62 = vpack.c.bf16 %v6790_v41, %v6785_v28 }
 0x4e3   : > { %19891 = vmatmul.mubr.msk.f32.vlgmr.msra.gmra.mrb[22].mxu0 %vm1303_vm0, %v6466_v13 }
 0x4e4   : > { %20480 = vmatpush1.bf16.msra.mxu0 %v20479_v46  ;;  %6873 = vmatprep.mubr.f32.mxu0 %v26061_v0 }
 0x4e5   : > { %20482 = vmatprep.subr.bf16.mxu0 %v20481_v52 }
 0x4e7   : > { %19161 = vmatmul.mubr.msk.f32.vlgmr.msra.gmra.mrb[14].mxu0 %vm1303_vm0, %v6757_v47 }
 0x4e8   : > { %20484 = vmatpush1.bf16.msra.mxu0 %v20483_v62  ;;  %6879 = vmatprep.mubr.f32.mxu0 %v26061_v0 }
 0x4e9   : > { %20486 = vmatprep.subr.bf16.mxu0 %v20485_v1 }
 0x4eb   : > { %19162 = vmatmul.mubr.msk.f32.gmra.mrb[16].mxu0 %vm1303_vm0, %v6758_v6 }
 0x4ec   : > { %6950 = vmatprep.mubr.f32.mxu0 %v26061_v0 }
 0x4ef   : > { %19163 = vmatmul.mubr.msk.f32.vlgmr.msra.gmra.mrb[18].mxu0 %vm1303_vm0, %v6757_v47 }
 0x4f0   : > { %20488 = vmatpush3.bf16.msra.mxu0 %v20485_v1  ;;  %6956 = vmatprep.mubr.f32.mxu0 %v26061_v0 }
 0x4f3   : > { %19164 = vmatmul.mubr.msk.f32.gmra.mrb[20].mxu0 %vm1303_vm0, %v6758_v6 }
 0x4f4   : > { %19897 = vmatprep.mubr.msk.f32.mxu0 %vm1303_vm0, %v6757_v47 }
 0x4f7   : > { %19898 = vmatmul.mubr.msk.f32.vlgmr.msra.gmra.mrb[22].mxu0 %vm1303_vm0, %v6758_v6 }
 0x4f8   : > { %10223 = vmatprep.mubr.f32.mxu0 %v26061_v0 }
 0x5ba   : > { %v6875_v11 = vpop.f32.mrb[14].mxu0 }
 0x5bb   : > { %v7058_v12 = vadd.f32 %v7051_v10, %v6875_v11  ;;  %v6877_v2 = vpop.f32.mrb[15].mxu0 }
 0x5bc   : > { %v7059_v13 = vadd.f32 %v7051_v10, %v6877_v2 }
 0x5bd   : > { %7078 = vrot.lane.b32.xlu1 %v7058_v12, %s26045_s11 }
 0x5be   : > { %7080 = vrot.lane.b32.xlu0 %v7059_v13, %s26045_s11  ;;  %v6881_v8 = vpop.f32.mrb[16].mxu0 }
 0x5bf   : > { %v7063_v22 = vadd.f32 %v7056_v16, %v6881_v8  ;;  %v6883_v26 = vpop.f32.mrb[17].mxu0 }
 0x5c0   : > { %v7064_v27 = vadd.f32 %v7056_v16, %v6883_v26 }
 0x5c2   : > { %7088 = vrot.lane.b32.xlu0 %v7063_v22, %s26045_s11  ;;  %7090 = vrot.lane.b32.xlu1 %v7064_v27, %s26045_s11  ;;  %v6952_v17 = vpop.f32.mrb[18].mxu0 }
 0x5c3   : > { %v7060_v61 = vadd.f32 %v7051_v10, %v6952_v17  ;;  %v6954_v31 = vpop.f32.mrb[19].mxu0 }
 0x5c4   : > { %v7061_v38 = vadd.f32 %v7051_v10, %v6954_v31 }
 0x5c6   : > { %7082 = vrot.lane.b32.xlu1 %v7060_v61, %s26045_s11  ;;  %v6958_v5 = vpop.f32.mrb[20].mxu0 }
 0x5c7   : > { %v7065_v19 = vadd.f32 %v7056_v16, %v6958_v5  ;;  %v6960_v34 = vpop.f32.mrb[21].mxu0 }
 0x5c8   : > { %v7066_v40 = vadd.f32 %v7056_v16, %v6960_v34 }
 0x5c9   : > { %7092 = vrot.lane.b32.xlu0 %v7065_v19, %s26045_s11 }
 0x5ca   : > { %7084 = vrot.lane.b32.xlu1 %v7061_v38, %s26045_s11  ;;  %v19899_v35 = vpop.f32.mrb[22].mxu0 }
 0x5cb   : > { %v7029_v39 = vpop.f32.mrb[23].mxu0  ;;  %v7067_v23 = vadd.f32 %v19899_v35, %v7056_v16 }
 0x5cc   : > { %v7062_v21 = vadd.f32 %v7051_v10, %v7029_v39 }
 0x5ce   : > { %7094 = vrot.lane.b32.xlu1 %v7066_v40, %s26045_s11  ;;  %7086 = vrot.lane.b32.xlu0 %v7062_v21, %s26045_s11 }
 0x5d2   : > { %7096 = vrot.lane.b32.xlu0 %v7067_v23, %s26045_s11 }
 0x62f   : > { %v7079_v46 = vpop.permute.xlu1 %7078 }
 0x630   : > { %v7118_v49 = vsel %vm4143_vm9, 0.0, %v7079_v46  ;;  %v7081_v41 = vpop.permute.xlu0 %7080 }
 0x631   : > { %v7122_v52 = vmul.f32 %v7118_v49, %v23861_v32  ;;  %v7098_v47 = vsel %vm4143_vm9, %v7079_v46, %v7081_v41 }
 0x632   : > { %v7123_v53 = vmul.f32 %v7098_v47, %v23857_v29 }
 0x633   : > { %v7134_v25 = vadd.f32 %v7122_v52, %v23915_v42  ;;  %v24319_v52 = vld [vmem:[#allocation16] sm:$0xff] }
 0x634   : > { %v7135_v28 = vadd.f32 %v7123_v53, %v23884_v3  ;;  %v7089_v62 = vpop.permute.xlu0 %7088  ;;  %v7091_v1 = vpop.permute.xlu1 %7090 }
 0x635   : > { %v7119_v6 = vsel %vm4143_vm9, 0.0, %v7089_v62  ;;  %v7102_v10 = vsel %vm4143_vm9, %v7089_v62, %v7091_v1  ;;  %v7158_v2 = vmul.f32 0.05, %v7134_v25  ;;  %vm7146_vm14 = vcmp.ge.f32.partialorder %v7134_v25, 0.0 }
 0x636   : > { %v7128_v11 = vmul.f32 %v7119_v6, %v23861_v32  ;;  %v7129_v12 = vmul.f32 %v7102_v10, %v23857_v29  ;;  %v7159_v13 = vmul.f32 0.05, %v7135_v28  ;;  %vm7147_vm15 = vcmp.ge.f32.partialorder %v7135_v28, 0.0 }
 0x637   : > { %v24293_v27 = vsel %vm7146_vm14, %v7134_v25, %v7158_v2 }
 0x638   : > { %v7140_v16 = vadd.f32 %v7128_v11, %v23917_v43  ;;  %v7141_v8 = vadd.f32 %v7129_v12, %v23907_v37  ;;  %v7083_v42 = vpop.permute.xlu1 %7082  ;;  %v24296_v31 = vsel %vm7147_vm15, %v7135_v28, %v7159_v13 }
 0x639   : > { %v7099_v3 = vsel %vm4143_vm9, %v7081_v41, %v7083_v42 }
 0x63a   : > { %vm7152_vm11 = vcmp.ge.f32.partialorder %v7140_v16, 0.0  ;;  %v7164_v22 = vmul.f32 0.05, %v7140_v16  ;;  %vm7153_vm12 = vcmp.ge.f32.partialorder %v7141_v8, 0.0  ;;  %v7165_v26 = vmul.f32 0.05, %v7141_v8 }
 0x63b   : > { %v7124_v17 = vmul.f32 %v7099_v3, %v23859_v30  ;;  %v7093_v61 = vpop.permute.xlu0 %7092 }
 0x63c   : > { %v24298_v5 = vsel %vm7152_vm11, %v7140_v16, %v7164_v22  ;;  %v24300_v43 = vsel %vm7153_vm12, %v7141_v8, %v7165_v26  ;;  %v7103_v37 = vsel %vm4143_vm9, %v7091_v1, %v7093_v61  ;;  %v7085_v19 = vpop.permute.xlu1 %7084 }
 0x63d   : > { %v7136_v34 = vadd.f32 %v7124_v17, %v23886_v4  ;;  %v7130_v38 = vmul.f32 %v7103_v37, %v23859_v30  ;;  %v7100_v35 = vsel %vm4143_vm9, %v7083_v42, %v7085_v19  ;;  %v24308_v39 = vpack.c.bf16 %v24300_v43, %v24296_v31 }
 0x63e   : > { %v7125_v40 = vmul.f32 %v7100_v35, %v23871_v48  ;;  %v24313_v21 = vpack.c.bf16 %v24298_v5, %v24293_v27  ;;  %v24355_v17 = vpack.i.bf16 %v24298_v5, %v24293_v27 }
 0x63f   : > { %vm7148_vm8 = vcmp.ge.f32.partialorder %v7136_v34, 0.0  ;;  %v7160_v23 = vmul.f32 0.05, %v7136_v34  ;;  %v7142_v46 = vadd.f32 %v7130_v38, %v23905_v36  ;;  %20490 = vmatprep.subr.bf16.mxu1 %v24308_v39 }
 0x640   : > { %v7137_v4 = vadd.f32 %v7125_v40, %v23919_v44  ;;  %20492 = vmatpush1.bf16.msra.mxu1 %v24313_v21  ;;  %v7095_v49 = vpop.permute.xlu1 %7094  ;;  %v7087_v41 = vpop.permute.xlu0 %7086 }
 0x641   : > { %v24321_v47 = vsel %vm7148_vm8, %v7136_v34, %v7160_v23  ;;  %vm7154_vm13 = vcmp.ge.f32.partialorder %v7142_v46, 0.0  ;;  %v7166_v53 = vmul.f32 0.05, %v7142_v46  ;;  %v7104_v25 = vsel %vm4143_vm9, %v7093_v61, %v7095_v49 }
 0x642   : > { %v7131_v28 = vmul.f32 %v7104_v25, %v23871_v48  ;;  %v7101_v36 = vsel %vm4143_vm9, %v7085_v19, %v7087_v41  ;;  %v7120_v44 = vsel %vm4166_vm10, %v7087_v41, 0.0  ;;  %v24332_v6 = vpack.i.bf16 %v24321_v47, %v24296_v31 }
 0x643   : > { %v24326_v62 = vsel %vm7154_vm13, %v7142_v46, %v7166_v53  ;;  %v7126_v1 = vmul.f32 %v7101_v36, %v23876_v51  ;;  %19167 = vmatmul.mubr.msk.f32.vlgmr.msra.gmra.mrb[8].mxu1 %vm1303_vm0, %v24319_v52  ;;  %v7161_v10 = vmul.f32 0.05, %v7137_v4  ;;  %v7127_v12 = vmul.f32 %v7120_v44, %v23881_v63  ;;  %v7406_v36 = vld [vmem:[%s26149_s16 + $0x8] sm:$0xff] }
 0x644   : > { %v7143_v11 = vadd.f32 %v7131_v28, %v23957_v14  ;;  %v7097_v2 = vpop.permute.xlu0 %7096  ;;  %v24340_v13 = vpack.i.bf16 %v24326_v62, %v24300_v43  ;;  %7327 = vmatprep.mubr.f32.mxu1 %v26061_v0  ;;  %vm7149_vm14 = vcmp.ge.f32.partialorder %v7137_v4, 0.0  ;;  %21859 = vrot.lane.b32.xlu1 %v24332_v6, %s26043_s26  ;;  %v7405_v28 = vld [vmem:[%s26149_s16] sm:$0xff] }
 0x645   : > { %v7138_v16 = vadd.f32 %v7126_v1, %v23922_v45  ;;  %v7105_v8 = vsel %vm4143_vm9, %v7095_v49, %v7097_v2  ;;  %v7121_v42 = vsel %vm4166_vm10, %v7097_v2, 0.0  ;;  %v7139_v3 = vadd.f32 %v7127_v12, %v23973_v20 }
 0x646   : > { %vm7155_vm15 = vcmp.ge.f32.partialorder %v7143_v11, 0.0  ;;  %v7167_v14 = vmul.f32 0.05, %v7143_v11  ;;  %v7132_v22 = vmul.f32 %v7105_v8, %v23876_v51  ;;  %21864 = vrot.lane.b32.xlu0 %v24340_v13, %s26043_s26  ;;  %v7133_v45 = vmul.f32 %v7121_v42, %v23881_v63 }
 0x647   : > { %vm7150_vm11 = vcmp.ge.f32.partialorder %v7138_v16, 0.0  ;;  %v7162_v26 = vmul.f32 0.05, %v7138_v16  ;;  %v24357_v61 = vsel %vm7149_vm14, %v7137_v4, %v7161_v10  ;;  %v24364_v20 = vpack.c.bf16 %v24326_v62, %v24321_v47 }
 0x648   : > { %v24359_v37 = vsel %vm7155_vm15, %v7143_v11, %v7167_v14  ;;  %v7144_v19 = vadd.f32 %v7132_v22, %v23963_v18  ;;  %v7163_v34 = vmul.f32 0.05, %v7139_v3  ;;  %v7145_v35 = vadd.f32 %v7133_v45, %v23961_v15  ;;  %21869 = vrot.lane.b32.xlu1 %v24355_v17, %s26043_s26 }
 0x649   : > { %v24366_v38 = vsel %vm7150_vm11, %v7138_v16, %v7162_v26  ;;  %v24373_v40 = vpack.c.bf16 %v24359_v37, %v24357_v61  ;;  %vm7151_vm12 = vcmp.ge.f32.partialorder %v7139_v3, 0.0  ;;  %vm26150_vm14 = vcmask 605184  }
 0x64a   : > { %vm7156_vm8 = vcmp.ge.f32.partialorder %v7144_v19, 0.0  ;;  %v7168_v23 = vmul.f32 0.05, %v7144_v19  ;;  %v21873_v18 = vpack.i.bf16 %v24366_v38, %v24357_v61  ;;  %vm7157_vm13 = vcmp.ge.f32.partialorder %v7145_v35, 0.0  ;;  %vm26151_vm15 = vmmov %vm26150_vm14 }
 0x64b   : > { %v7169_v46 = vmul.f32 0.05, %v7145_v35  ;;  %20494 = vmatprep.subr.bf16.mxu1 %v24373_v40  ;;  %v24382_v15 = vsel %vm7151_vm12, %v7139_v3, %v7163_v34  ;;  %vm26152_vm11 = vmmov %vm26150_vm14 }
 0x64c   : > { %v24378_v4 = vsel %vm7156_vm8, %v7144_v19, %v7168_v23  ;;  %21874 = vrot.lane.b32.xlu0 %v21873_v18, %s26043_s26  ;;  %20496 = vmatpush1.bf16.msra.mxu1 %v24364_v20  ;;  %vm26153_vm12 = vmmov %vm26152_vm11 }
 0x64d   : > { %v24384_v49 = vsel %vm7157_vm13, %v7145_v35, %v7169_v46  ;;  %v21878_v41 = vpack.i.bf16 %v24378_v4, %v24359_v37  ;;  %v24390_v53 = vpack.c.bf16 %v24378_v4, %v24366_v38  ;;  %v7410_v35 = vld [vmem:[#allocation17 + $0x10] sm:$0xff]  ;;  %vm26154_vm8 = vmmov %vm26152_vm11 }
 0x64e   : > { %v20497_v25 = vpack.c.bf16 %v24384_v49, %v24382_v15  ;;  %vm26155_vm13 = vmmov %vm26154_vm8 }
 0x64f   : > { %21879 = vrot.lane.b32.xlu1 %v21878_v41, %s26043_s26  ;;  %19168 = vmatmul.mubr.msk.f32.vlgmr.msra.gmra.mrb[10].mxu1 %vm1303_vm0, %v24319_v52 }
 0x650   : > { %21884 = vrot.lane.b32.xlu0 %v24332_v6, %s26041_s22  ;;  %20498 = vmatprep.subr.bf16.mxu1 %v20497_v25 }
 0x651   : > { %20500 = vmatpush1.bf16.msra.mxu1 %v24390_v53  ;;  %7398 = vmatprep.mubr.f32.mxu1 %v26061_v0 }
 0x653   : > { %21889 = vrot.lane.b32.xlu1 %v24340_v13, %s26041_s22 }
 0x654   : > { %21894 = vrot.lane.b32.xlu0 %v24355_v17, %s26041_s22  ;;  %19169 = vmatmul.mubr.msk.f32.vlgmr.msra.gmra.mrb[12].mxu1 %vm1303_vm0, %v24319_v52  ;;  %v21938_v52 = vpack.i.bf16 %v24384_v49, %v24382_v15 }
 0x655   : > { %7530 = vmatprep.mubr.f32.mxu1 %v26061_v0 }
 0x657   : > { %21899 = vrot.lane.b32.xlu1 %v21873_v18, %s26041_s22 }
 0x658   : > { %21904 = vrot.lane.b32.xlu0 %v21878_v41, %s26041_s22 }
 0x65b   : > { %21909 = vrot.lane.b32.xlu1 %v24332_v6, %s22863_s6 }
 0x65c   : > { %21914 = vrot.lane.b32.xlu0 %v24340_v13, %s22863_s6 }
 0x65f   : > { %21919 = vrot.lane.b32.xlu1 %v24355_v17, %s22863_s6 }
 0x660   : > { %21924 = vrot.lane.b32.xlu0 %v21873_v18, %s22863_s6 }
 0x663   : > { %21929 = vrot.lane.b32.xlu1 %v21878_v41, %s22863_s6 }
 0x664   : > { %21939 = vrot.lane.b32.xlu0 %v21938_v52, %s22863_s6 }
 0x667   : > { %21934 = vrot.lane.b32.xlu1 %v24332_v6, %s22864_s23 }
 0x668   : > { %21944 = vrot.lane.b32.xlu0 %v24340_v13, %s22864_s23 }
 0x66b   : > { %21949 = vrot.lane.b32.xlu1 %v24355_v17, %s22864_s23 }
 0x66c   : > { %21954 = vrot.lane.b32.xlu0 %v21873_v18, %s22864_s23 }
 0x66f   : > { %21959 = vrot.lane.b32.xlu1 %v21878_v41, %s22864_s23 }
 0x670   : > { %21969 = vrot.lane.b32.xlu0 %v21938_v52, %s22864_s23 }
 0x673   : > { %21964 = vrot.lane.b32.xlu1 %v24332_v6, %s26050_s3 }
 0x674   : > { %21974 = vrot.lane.b32.xlu0 %v24340_v13, %s26050_s3 }
 0x677   : > { %21979 = vrot.lane.b32.xlu1 %v24355_v17, %s26050_s3 }
 0x678   : > { %21984 = vrot.lane.b32.xlu0 %v21873_v18, %s26050_s3 }
 0x67b   : > { %21989 = vrot.lane.b32.xlu1 %v21878_v41, %s26050_s3 }
 0x67c   : > { %21999 = vrot.lane.b32.xlu0 %v21938_v52, %s26050_s3 }
 0x67f   : > { %21994 = vrot.lane.b32.xlu1 %v24332_v6, %s26047_s1 }
 0x680   : > { %22004 = vrot.lane.b32.xlu0 %v24340_v13, %s26047_s1 }
 0x683   : > { %22009 = vrot.lane.b32.xlu1 %v24355_v17, %s26047_s1 }
 0x684   : > { %22014 = vrot.lane.b32.xlu0 %v21873_v18, %s26047_s1 }
 0x687   : > { %22019 = vrot.lane.b32.xlu1 %v21878_v41, %s26047_s1 }
 0x688   : > { %22029 = vrot.lane.b32.xlu0 %v21938_v52, %s26047_s1 }
 0x68b   : > { %22024 = vrot.lane.b32.xlu1 %v24332_v6, %s22867_s13 }
 0x68c   : > { %22034 = vrot.lane.b32.xlu0 %v24340_v13, %s22867_s13 }
 0x68f   : > { %22039 = vrot.lane.b32.xlu1 %v24355_v17, %s22867_s13 }
 0x690   : > { %22044 = vrot.lane.b32.xlu0 %v21873_v18, %s22867_s13 }
 0x693   : > { %22049 = vrot.lane.b32.xlu1 %v21878_v41, %s22867_s13 }
 0x694   : > { %22059 = vrot.lane.b32.xlu0 %v21938_v52, %s22867_s13 }
 0x697   : > { %22054 = vrot.lane.b32.xlu1 %v24332_v6, %s26065_s7 }
 0x698   : > { %22064 = vrot.lane.b32.xlu0 %v24340_v13, %s26065_s7 }
 0x69b   : > { %22069 = vrot.lane.b32.xlu1 %v24355_v17, %s26065_s7 }
 0x69c   : > { %22074 = vrot.lane.b32.xlu0 %v21873_v18, %s26065_s7 }
 0x69f   : > { %22079 = vrot.lane.b32.xlu1 %v21878_v41, %s26065_s7 }
 0x6a0   : > { %22084 = vrot.lane.b32.xlu0 %v21938_v52, %s26065_s7 }
 0x6a3   : > { %9972 = vperm.xlu1 %21627, %v7405_v28   ;;  %v7411_v28 = vld [vmem:[#allocation17 + $0x18] sm:$0xff] }
 0x6a4   : > { %9977 = vperm.xlu0 %21626, %v7406_v36  }
 0x6b6   : > { %v21860_v44 = vpop.permute.xlu1 %21859 }
 0x6b7   : > { %v21862_v1 = vunpack.i.h.bf16 %v21860_v44  ;;  %v21861_v10 = vunpack.i.l.bf16 %v21860_v44 }
 0x6b8   : > { %v21865_v6 = vpop.permute.xlu0 %21864 }
 0x6b9   : > { %v21867_v11 = vunpack.i.h.bf16 %v21865_v6  ;;  %v21866_v12 = vunpack.i.l.bf16 %v21865_v6  ;;  %v7443_v13 = vsel %vm1557_vm1, %v21861_v10, %v21862_v1  ;;  %v7407_v6 = vld [vmem:[#allocation17] sm:$0xff] }
 0x6ba   : > { %v21870_v2 = vpop.permute.xlu1 %21869 }
 0x6bb   : > { %v7447_v16 = vsel %vm1557_vm1, %v21866_v12, %v21867_v11  ;;  %v21872_v8 = vunpack.i.h.bf16 %v21870_v2  ;;  %v21871_v42 = vunpack.i.l.bf16 %v21870_v2 }
 0x6bc   : > { %v20501_v14 = vpack.c.bf16 %v7447_v16, %v7443_v13  ;;  %v7408_v13 = vld [vmem:[#allocation17 + $0x8] sm:$0xff] }
 0x6bd   : > { %v7442_v3 = vsel %vm1557_vm1, %v21871_v42, %v21861_v10  ;;  %v7446_v22 = vsel %vm1557_vm1, %v21872_v8, %v21866_v12 }
 0x6be   : > { %v21875_v26 = vpop.permute.xlu0 %21874  ;;  %20502 = vmatprep.subr.bf16.mxu1 %v20501_v14  ;;  %v20503_v45 = vpack.c.bf16 %v7446_v22, %v7442_v3 }
 0x6bf   : > { %v21877_v17 = vunpack.i.h.bf16 %v21875_v26  ;;  %v21876_v19 = vunpack.i.l.bf16 %v21875_v26 }
 0x6c0   : > { %20504 = vmatpush1.bf16.msra.mxu1 %v20503_v45 }
 0x6c1   : > { %v21880_v34 = vpop.permute.xlu1 %21879  ;;  %v7444_v46 = vsel %vm1557_vm1, %v21862_v1, %v21876_v19  ;;  %v7445_v25 = vsel %vm1557_vm1, %v21876_v19, %v21877_v17 }
 0x6c2   : > { %v21882_v23 = vunpack.i.h.bf16 %v21880_v34  ;;  %v21881_v18 = vunpack.i.l.bf16 %v21880_v34  ;;  %v21885_v1 = vpop.permute.xlu0 %21884 }
 0x6c3   : > { %19170 = vmatmul.mubr.msk.f32.vlgmr.msra.gmra.mrb[14].mxu1 %vm1303_vm0, %v7410_v35  ;;  %v21887_v16 = vunpack.i.h.bf16 %v21885_v1 }
 0x6c4   : > { %v7448_v41 = vsel %vm1557_vm1, %v21867_v11, %v21881_v18  ;;  %v7449_v52 = vsel %vm1557_vm1, %v21881_v18, %v21882_v23  ;;  %7536 = vmatprep.mubr.f32.mxu1 %v26061_v0  ;;  %v20509_v10 = vpack.c.bf16 %v21882_v23, %v21877_v17 }
 0x6c5   : > { %v20505_v36 = vpack.c.bf16 %v7449_v52, %v7445_v25  ;;  %v20507_v44 = vpack.c.bf16 %v7448_v41, %v7444_v46  ;;  %v21890_v11 = vpop.permute.xlu1 %21889 }
 0x6c6   : > { %v21895_v12 = vpop.permute.xlu0 %21894  ;;  %v21892_v2 = vunpack.i.h.bf16 %v21890_v11 }
 0x6c7   : > { %20506 = vmatprep.subr.bf16.mxu1 %v20505_v36  ;;  %19171 = vmatmul.mubr.msk.f32.gmra.mrb[16].mxu1 %vm1303_vm0, %v7411_v28  ;;  %v21897_v3 = vunpack.i.h.bf16 %v21895_v12  ;;  %v21896_v22 = vunpack.i.l.bf16 %v21895_v12 }
 0x6c8   : > { %20508 = vmatpush1.bf16.msra.mxu1 %v20507_v44  ;;  %7607 = vmatprep.mubr.f32.mxu1 %v26061_v0 }
 0x6c9   : > { %20510 = vmatprep.subr.bf16.mxu1 %v20509_v10  ;;  %v21900_v8 = vpop.permute.xlu1 %21899 }
 0x6ca   : > { %v21905_v42 = vpop.permute.xlu0 %21904  ;;  %v21902_v26 = vunpack.i.h.bf16 %v21900_v8  ;;  %v21901_v45 = vunpack.i.l.bf16 %v21900_v8 }
 0x6cb   : > { %19172 = vmatmul.mubr.msk.f32.vlgmr.msra.gmra.mrb[18].mxu1 %vm1303_vm0, %v7410_v35  ;;  %v21907_v17 = vunpack.i.h.bf16 %v21905_v42  ;;  %v21906_v19 = vunpack.i.l.bf16 %v21905_v42 }
 0x6cc   : > { %20512 = vmatpush3.bf16.msra.mxu1 %v20509_v10  ;;  %7613 = vmatprep.mubr.f32.mxu1 %v26061_v0  ;;  %v7956_v23 = vsel %vm2069_vm2, %v21901_v45, %v21902_v26  ;;  %v7955_v25 = vsel %vm2069_vm2, %v21887_v16, %v21901_v45 }
 0x6cd   : > { %20514 = vmatprep.subr.bf16.mxu1 %v24308_v39  ;;  %v21891_v39 = vunpack.i.l.bf16 %v21890_v11  ;;  %v7960_v18 = vsel %vm2069_vm2, %v21906_v19, %v21907_v17  ;;  %v21910_v46 = vpop.permute.xlu1 %21909 }
 0x6ce   : > { %v20529_v52 = vpack.c.bf16 %v7960_v18, %v7956_v23  ;;  %v21915_v36 = vpop.permute.xlu0 %21914  ;;  %v21911_v11 = vunpack.i.l.bf16 %v21910_v46 }
 0x6cf   : > { %19173 = vmatmul.mubr.msk.f32.gmra.mrb[20].mxu1 %vm1303_vm0, %v7411_v28  ;;  %v7957_v34 = vsel %vm2069_vm2, %v21897_v3, %v21891_v39  ;;  %v21917_v12 = vunpack.i.h.bf16 %v21915_v36 }
 0x6d0   : > { %19904 = vmatprep.mubr.msk.f32.mxu1 %vm1303_vm0, %v7410_v35 }
 0x6d1   : > { %v21920_v10 = vpop.permute.xlu1 %21919 }
 0x6d2   : > { %v21922_v8 = vunpack.i.h.bf16 %v21920_v10  ;;  %v21921_v42 = vunpack.i.l.bf16 %v21920_v10 }
 0x6d3   : > { %19905 = vmatmul.mubr.msk.f32.vlgmr.msra.gmra.mrb[22].mxu1 %vm1303_vm0, %v7411_v28  ;;  %v7931_v28 = vld [vmem:[#allocation17 + $0x20] sm:$0xff] }
 0x6d4   : > { %20516 = vmatpush1.bf16.msra.mxu1 %v24313_v21  ;;  %7765 = vmatprep.mubr.f32.mxu1 %v26061_v0  ;;  %v21886_v21 = vunpack.i.l.bf16 %v21885_v1  ;;  %v20533_v1 = vpack.c.bf16 %v21907_v17, %v21902_v26  ;;  %v8245_v17 = vsel %vm2362_vm3, %v21921_v42, %v21911_v11 }
 0x6d5   : > { %20518 = vmatprep.subr.bf16.mxu1 %v24373_v40  ;;  %v7958_v40 = vsel %vm2069_vm2, %v21891_v39, %v21892_v2  ;;  %v21916_v39 = vunpack.i.l.bf16 %v21915_v36 }
 0x6d6   : > { %v7954_v14 = vsel %vm2069_vm2, %v21886_v21, %v21887_v16  ;;  %v7953_v35 = vsel %vm2069_vm2, %v21896_v22, %v21886_v21 }
 0x6d7   : > { %19176 = vmatmul.mubr.msk.f32.vlgmr.msra.gmra.mrb[14].mxu1 %vm1303_vm0, %v7407_v6  ;;  %v20527_v41 = vpack.c.bf16 %v7957_v34, %v7953_v35  ;;  %v8251_v21 = vsel %vm2362_vm3, %v21916_v39, %v21917_v12 }
 0x6d8   : > { %20520 = vmatpush1.bf16.msra.mxu1 %v24364_v20  ;;  %7771 = vmatprep.mubr.f32.mxu1 %v26061_v0  ;;  %v20525_v20 = vpack.c.bf16 %v7958_v40, %v7954_v14  ;;  %v21930_v40 = vpop.permute.xlu1 %21929 }
 0x6d9   : > { %20522 = vmatprep.subr.bf16.mxu1 %v24390_v53  ;;  %v21932_v3 = vunpack.i.h.bf16 %v21930_v40  ;;  %v21931_v22 = vunpack.i.l.bf16 %v21930_v40 }
 0x6db   : > { %19177 = vmatmul.mubr.msk.f32.gmra.mrb[16].mxu1 %vm1303_vm0, %v7408_v13  ;;  %v8253_v23 = vsel %vm2362_vm3, %v21931_v22, %v21932_v3 }
 0x6dc   : > { %7842 = vmatprep.mubr.f32.mxu1 %v26061_v0  ;;  %v24523_v18 = vpop.permute.xlu1 %21934 }
 0x6df   : > { %19178 = vmatmul.mubr.msk.f32.vlgmr.msra.gmra.mrb[18].mxu1 %vm1303_vm0, %v7407_v6 }
 0x6e0   : > { %20524 = vmatpush3.bf16.msra.mxu1 %v24390_v53  ;;  %7848 = vmatprep.mubr.f32.mxu1 %v26061_v0  ;;  %v7959_v53 = vsel %vm2069_vm2, %v21892_v2, %v21906_v19  ;;  %v7932_v2 = vld [vmem:[#allocation17 + $0x28] sm:$0xff]  ;;  %v8250_v19 = vsel %vm2362_vm3, %v21922_v8, %v21916_v39  ;;  %v21937_v39 = vunpack.i.h.bf16 %v24523_v18 }
 0x6e1   : > { %20526 = vmatprep.subr.bf16.mxu1 %v20525_v20  ;;  %v20531_v44 = vpack.c.bf16 %v7959_v53, %v7955_v25  ;;  %v8252_v25 = vsel %vm2362_vm3, %v21917_v12, %v21931_v22 }
 0x6e3   : > { %19179 = vmatmul.mubr.msk.f32.gmra.mrb[20].mxu1 %vm1303_vm0, %v7408_v13 }
 0x6e4   : > { %19911 = vmatprep.mubr.msk.f32.mxu1 %vm1303_vm0, %v7407_v6  ;;  %v21912_v6 = vunpack.i.h.bf16 %v21910_v46  ;;  %v20539_v46 = vpack.c.bf16 %v8250_v19, %v8245_v17 }
 0x6e6   : > { %v8246_v16 = vsel %vm2362_vm3, %v21911_v11, %v21912_v6  ;;  %v21950_v11 = vpop.permute.xlu1 %21949 }
 0x6e7   : > { %19912 = vmatmul.mubr.msk.f32.vlgmr.msra.gmra.mrb[22].mxu1 %vm1303_vm0, %v7408_v13  ;;  %v21925_v13 = vpop.permute.xlu0 %21924  ;;  %v20537_v14 = vpack.c.bf16 %v8251_v21, %v8246_v16  ;;  %v8218_v21 = vld [vmem:[#allocation17 + $0x38] sm:$0xff] }
 0x6e8   : > { %20528 = vmatpush1.bf16.msra.mxu1 %v20527_v41  ;;  %8041 = vmatprep.mubr.f32.mxu1 %v26061_v0  ;;  %v21927_v26 = vunpack.i.h.bf16 %v21925_v13  ;;  %v21926_v45 = vunpack.i.l.bf16 %v21925_v13 }
 0x6e9   : > { %20530 = vmatprep.subr.bf16.mxu1 %v20529_v52  ;;  %v8217_v52 = vld [vmem:[#allocation17 + $0x30] sm:$0xff] }
 0x6ea   : > { %v8248_v41 = vsel %vm2362_vm3, %v21926_v45, %v21927_v26  ;;  %v21960_v42 = vpop.permute.xlu1 %21959 }
 0x6eb   : > { %19182 = vmatmul.mubr.msk.f32.vlgmr.msra.gmra.mrb[14].mxu1 %vm1303_vm0, %v7931_v28  ;;  %v21940_v20 = vpop.permute.xlu0 %21939  ;;  %v20541_v53 = vpack.c.bf16 %v8253_v23, %v8248_v41 }
 0x6ec   : > { %20532 = vmatpush1.bf16.msra.mxu1 %v20531_v44  ;;  %8047 = vmatprep.mubr.f32.mxu1 %v26061_v0  ;;  %v21942_v34 = vunpack.i.h.bf16 %v21940_v20  ;;  %v21941_v35 = vunpack.i.l.bf16 %v21940_v20  ;;  %v8247_v44 = vsel %vm2362_vm3, %v21912_v6, %v21926_v45  ;;  %v21962_v20 = vunpack.i.h.bf16 %v21960_v42 }
 0x6ed   : > { %20534 = vmatprep.subr.bf16.mxu1 %v20533_v1 }
 0x6ee   : > { %v8249_v36 = vsel %vm2362_vm3, %v21927_v26, %v21941_v35  ;;  %v21961_v26 = vunpack.i.l.bf16 %v21960_v42  ;;  %v24547_v41 = vpop.permute.xlu1 %21964 }
 0x6ef   : > { %19183 = vmatmul.mubr.msk.f32.gmra.mrb[16].mxu1 %vm1303_vm0, %v7932_v2  ;;  %v21945_v10 = vpop.permute.xlu0 %21944 }
 0x6f0   : > { %8118 = vmatprep.mubr.f32.mxu1 %v26061_v0  ;;  %v21947_v13 = vunpack.i.h.bf16 %v21945_v10  ;;  %v21946_v16 = vunpack.i.l.bf16 %v21945_v10 }
 0x6f2   : > { %v8543_v8 = vsel %vm2655_vm4, %v21946_v16, %v21947_v13 }
 0x6f3   : > { %19184 = vmatmul.mubr.msk.f32.vlgmr.msra.gmra.mrb[18].mxu1 %vm1303_vm0, %v7931_v28  ;;  %v21955_v40 = vpop.permute.xlu0 %21954 }
 0x6f4   : > { %20536 = vmatpush3.bf16.msra.mxu1 %v20533_v1  ;;  %8124 = vmatprep.mubr.f32.mxu1 %v26061_v0  ;;  %v20543_v1 = vpack.c.bf16 %v8252_v25, %v8247_v44  ;;  %v21957_v17 = vunpack.i.h.bf16 %v21955_v40  ;;  %v21956_v19 = vunpack.i.l.bf16 %v21955_v40  ;;  %v8511_v44 = vld [vmem:[#allocation17 + $0x40] sm:$0xff] }
 0x6f5   : > { %20538 = vmatprep.subr.bf16.mxu1 %v20537_v14  ;;  %v21952_v14 = vunpack.i.h.bf16 %v21950_v11 }
 0x6f7   : > { %19185 = vmatmul.mubr.msk.f32.gmra.mrb[20].mxu1 %vm1303_vm0, %v7932_v2  ;;  %v21970_v45 = vpop.permute.xlu0 %21969  ;;  %v8542_v35 = vsel %vm2655_vm4, %v21952_v14, %v21946_v16  ;;  %v21967_v16 = vunpack.i.h.bf16 %v24547_v41 }
 0x6f8   : > { %19918 = vmatprep.mubr.msk.f32.mxu1 %vm1303_vm0, %v7931_v28  ;;  %v8254_v28 = vsel %vm2362_vm3, %v21932_v3, %v21942_v34  ;;  %v21951_v3 = vunpack.i.l.bf16 %v21950_v11  ;;  %v21972_v23 = vunpack.i.h.bf16 %v21970_v45 }
 0x6f9   : > { %v20545_v12 = vpack.c.bf16 %v8254_v28, %v8249_v36  ;;  %v8544_v36 = vsel %vm2655_vm4, %v21947_v13, %v21961_v26 }
 0x6fb   : > { %19919 = vmatmul.mubr.msk.f32.vlgmr.msra.gmra.mrb[22].mxu1 %vm1303_vm0, %v7932_v2  ;;  %v21936_v2 = vunpack.i.l.bf16 %v24523_v18  ;;  %v21971_v18 = vunpack.i.l.bf16 %v21970_v45  ;;  %v21975_v11 = vpop.permute.xlu0 %21974 }
 0x6fc   : > { %20540 = vmatpush1.bf16.msra.mxu1 %v20539_v46  ;;  %8335 = vmatprep.mubr.f32.mxu1 %v26061_v0  ;;  %v8545_v46 = vsel %vm2655_vm4, %v21961_v26, %v21962_v20  ;;  %v21977_v40 = vunpack.i.h.bf16 %v21975_v11 }
 0x6fd   : > { %20542 = vmatprep.subr.bf16.mxu1 %v20541_v53  ;;  %v8538_v6 = vsel %vm2655_vm4, %v21936_v2, %v21937_v39  ;;  %v8537_v34 = vsel %vm2655_vm4, %v21951_v3, %v21936_v2  ;;  %v8540_v53 = vsel %vm2655_vm4, %v21956_v19, %v21957_v17  ;;  %v8541_v10 = vsel %vm2655_vm4, %v21957_v17, %v21971_v18  ;;  %v21980_v2 = vpop.permute.xlu1 %21979 }
 0x6fe   : > { %v20549_v22 = vpack.c.bf16 %v8543_v8, %v8538_v6  ;;  %v20551_v25 = vpack.c.bf16 %v8542_v35, %v8537_v34  ;;  %v20553_v28 = vpack.c.bf16 %v8545_v46, %v8540_v53  ;;  %v21976_v6 = vunpack.i.l.bf16 %v21975_v11  ;;  %v8512_v8 = vld [vmem:[#allocation17 + $0x48] sm:$0xff] }
 0x6ff   : > { %19188 = vmatmul.mubr.msk.f32.vlgmr.msra.gmra.mrb[14].mxu1 %vm1303_vm0, %v8217_v52  ;;  %v21985_v14 = vpop.permute.xlu0 %21984  ;;  %v21982_v26 = vunpack.i.h.bf16 %v21980_v2  ;;  %v21981_v45 = vunpack.i.l.bf16 %v21980_v2 }
 0x700   : > { %20544 = vmatpush1.bf16.msra.mxu1 %v20543_v1  ;;  %8341 = vmatprep.mubr.f32.mxu1 %v26061_v0  ;;  %v8539_v1 = vsel %vm2655_vm4, %v21937_v39, %v21956_v19  ;;  %v21986_v18 = vunpack.i.l.bf16 %v21985_v14 }
 0x701   : > { %20546 = vmatprep.subr.bf16.mxu1 %v20545_v12 }
 0x703   : > { %19189 = vmatmul.mubr.msk.f32.gmra.mrb[16].mxu1 %vm1303_vm0, %v8218_v21  ;;  %v22000_v35 = vpop.permute.xlu0 %21999 }
 0x704   : > { %8412 = vmatprep.mubr.f32.mxu1 %v26061_v0  ;;  %v22001_v53 = vunpack.i.l.bf16 %v22000_v35 }
 0x707   : > { %19190 = vmatmul.mubr.msk.f32.vlgmr.msra.gmra.mrb[18].mxu1 %vm1303_vm0, %v8217_v52 }
 0x708   : > { %20548 = vmatpush3.bf16.msra.mxu1 %v20545_v12  ;;  %8418 = vmatprep.mubr.f32.mxu1 %v26061_v0  ;;  %v20555_v12 = vpack.c.bf16 %v8544_v36, %v8539_v1 }
 0x709   : > { %20550 = vmatprep.subr.bf16.mxu1 %v20549_v22  ;;  %v8835_v22 = vsel %vm2948_vm5, %v21976_v6, %v21977_v40 }
 0x70b   : > { %19191 = vmatmul.mubr.msk.f32.gmra.mrb[20].mxu1 %vm1303_vm0, %v8218_v21 }
 0x70c   : > { %19925 = vmatprep.mubr.msk.f32.mxu1 %vm1303_vm0, %v8217_v52  ;;  %v8546_v52 = vsel %vm2655_vm4, %v21962_v20, %v21972_v23  ;;  %v21990_v20 = vpop.permute.xlu1 %21989  ;;  %v21987_v23 = vunpack.i.h.bf16 %v21985_v14  ;;  %v22005_v14 = vpop.permute.xlu0 %22004 }
 0x70d   : > { %v20557_v13 = vpack.c.bf16 %v8546_v52, %v8541_v10  ;;  %v21992_v19 = vunpack.i.h.bf16 %v21990_v20  ;;  %v21991_v34 = vunpack.i.l.bf16 %v21990_v20 }
 0x70e   : > { %v8832_v1 = vsel %vm2948_vm5, %v21986_v18, %v21987_v23 }
 0x70f   : > { %19926 = vmatmul.mubr.msk.f32.vlgmr.msra.gmra.mrb[22].mxu1 %vm1303_vm0, %v8218_v21  ;;  %v21966_v21 = vunpack.i.l.bf16 %v24547_v41  ;;  %v8834_v41 = vsel %vm2948_vm5, %v21982_v26, %v21976_v6  ;;  %v8837_v36 = vsel %vm2948_vm5, %v21991_v34, %v21992_v19  ;;  %v8831_v6 = vsel %vm2948_vm5, %v21967_v16, %v21986_v18 }
 0x710   : > { %20552 = vmatpush1.bf16.msra.mxu1 %v20551_v25  ;;  %8627 = vmatprep.mubr.f32.mxu1 %v26061_v0  ;;  %v22002_v25 = vunpack.i.h.bf16 %v22000_v35  ;;  %v20565_v2 = vpack.c.bf16 %v8837_v36, %v8832_v1 }
 0x711   : > { %20554 = vmatprep.subr.bf16.mxu1 %v20553_v28  ;;  %v8830_v3 = vsel %vm2948_vm5, %v21966_v21, %v21967_v16  ;;  %v8829_v46 = vsel %vm2948_vm5, %v21981_v45, %v21966_v21  ;;  %v24575_v28 = vpop.permute.xlu1 %21994  ;;  %v22007_v45 = vunpack.i.h.bf16 %v22005_v14 }
 0x712   : > { %v20561_v17 = vpack.c.bf16 %v8835_v22, %v8830_v3  ;;  %v20563_v52 = vpack.c.bf16 %v8834_v41, %v8829_v46  ;;  %v8838_v21 = vsel %vm2948_vm5, %v21992_v19, %v22002_v25  ;;  %v21996_v26 = vunpack.i.l.bf16 %v24575_v28  ;;  %v8804_v19 = vld [vmem:[#allocation17 + $0x58] sm:$0xff] }
 0x713   : > { %19194 = vmatmul.mubr.msk.f32.vlgmr.msra.gmra.mrb[14].mxu1 %vm1303_vm0, %v8511_v44 }
 0x714   : > { %20556 = vmatpush1.bf16.msra.mxu1 %v20555_v12  ;;  %8633 = vmatprep.mubr.f32.mxu1 %v26061_v0  ;;  %v8836_v12 = vsel %vm2948_vm5, %v21977_v40, %v21991_v34  ;;  %v22015_v34 = vpop.permute.xlu0 %22014 }
 0x715   : > { %20558 = vmatprep.subr.bf16.mxu1 %v20557_v13  ;;  %v20567_v3 = vpack.c.bf16 %v8836_v12, %v8831_v6  ;;  %v22010_v22 = vpop.permute.xlu1 %22009  ;;  %v22016_v1 = vunpack.i.l.bf16 %v22015_v34 }
 0x716   : > { %v24560_v42 = vpop.f32.mrb[8].mxu1  ;;  %v22012_v46 = vunpack.i.h.bf16 %v22010_v22  ;;  %v22011_v41 = vunpack.i.l.bf16 %v22010_v22 }
 0x717   : > { %v24562_v39 = vpop.f32.mrb[9].mxu1  ;;  %19195 = vmatmul.mubr.msk.f32.gmra.mrb[16].mxu1 %vm1303_vm0, %v8512_v8 }
 0x718   : > { %8704 = vmatprep.mubr.f32.mxu1 %v26061_v0  ;;  %v9121_v12 = vsel %vm26064_vm6, %v22011_v41, %v21996_v26 }
 0x719   : > { %v22020_v18 = vpop.permute.xlu1 %22019 }
 0x71a   : > { %v22021_v36 = vunpack.i.l.bf16 %v22020_v18 }
 0x71b   : > { %19196 = vmatmul.mubr.msk.f32.vlgmr.msra.gmra.mrb[18].mxu1 %vm1303_vm0, %v8511_v44 }
 0x71c   : > { %20560 = vmatpush3.bf16.msra.mxu1 %v20557_v13  ;;  %8710 = vmatprep.mubr.f32.mxu1 %v26061_v0  ;;  %v8833_v13 = vsel %vm2948_vm5, %v21987_v23, %v22001_v53  ;;  %v22022_v53 = vunpack.i.h.bf16 %v22020_v18 }
 0x71d   : > { %20562 = vmatprep.subr.bf16.mxu1 %v20561_v17  ;;  %v20569_v40 = vpack.c.bf16 %v8838_v21, %v8833_v13  ;;  %v22006_v17 = vunpack.i.l.bf16 %v22005_v14  ;;  %v24607_v14 = vpop.permute.xlu1 %22024 }
 0x71e   : > { %v9129_v6 = vsel %vm26064_vm6, %v22021_v36, %v22022_v53  ;;  %v22026_v41 = vunpack.i.l.bf16 %v24607_v14 }
 0x71f   : > { %19197 = vmatmul.mubr.msk.f32.gmra.mrb[20].mxu1 %vm1303_vm0, %v8512_v8  ;;  %v9127_v23 = vsel %vm26064_vm6, %v22006_v17, %v22007_v45 }
 0x720   : > { %19932 = vmatprep.mubr.msk.f32.mxu1 %vm1303_vm0, %v8511_v44  ;;  %v8803_v44 = vld [vmem:[#allocation17 + $0x50] sm:$0xff] }
 0x722   : > { %v24577_v10 = vpop.f32.mrb[10].mxu1 }
 0x723   : > { %v24580_v11 = vpop.f32.mrb[11].mxu1  ;;  %19933 = vmatmul.mubr.msk.f32.vlgmr.msra.gmra.mrb[22].mxu1 %vm1303_vm0, %v8512_v8  ;;  %v21997_v8 = vunpack.i.h.bf16 %v24575_v28  ;;  %v22030_v28 = vpop.permute.xlu0 %22029 }
 0x724   : > { %20564 = vmatpush1.bf16.msra.mxu1 %v20563_v52  ;;  %8919 = vmatprep.mubr.f32.mxu1 %v26061_v0  ;;  %v22017_v52 = vunpack.i.h.bf16 %v22015_v34  ;;  %v22032_v13 = vunpack.i.h.bf16 %v22030_v28  ;;  %v22031_v21 = vunpack.i.l.bf16 %v22030_v28  ;;  %v9096_v28 = vld [vmem:[#allocation17 + $0x68] sm:$0xff] }
 0x725   : > { %20566 = vmatprep.subr.bf16.mxu1 %v20565_v2  ;;  %v9122_v35 = vsel %vm26064_vm6, %v21996_v26, %v21997_v8  ;;  %v9126_v2 = vsel %vm26064_vm6, %v22012_v46, %v22006_v17  ;;  %v9095_v17 = vld [vmem:[#allocation17 + $0x60] sm:$0xff]  ;;  %v22040_v46 = vpop.permute.xlu1 %22039 }
 0x726   : > { %v20573_v25 = vpack.c.bf16 %v9127_v23, %v9122_v35  ;;  %v9124_v22 = vsel %vm26064_vm6, %v22016_v1, %v22017_v52  ;;  %v9125_v34 = vsel %vm26064_vm6, %v22017_v52, %v22031_v21  ;;  %v9123_v35 = vsel %vm26064_vm6, %v21997_v8, %v22016_v1 }
 0x727   : > { %19200 = vmatmul.mubr.msk.f32.vlgmr.msra.gmra.mrb[14].mxu1 %vm1303_vm0, %v8803_v44  ;;  %v24589_v20 = vpop.f32.mrb[12].mxu1  ;;  %v20577_v26 = vpack.c.bf16 %v9129_v6, %v9124_v22  ;;  %v22035_v23 = vpop.permute.xlu0 %22034 }
 0x728   : > { %20568 = vmatpush1.bf16.msra.mxu1 %v20567_v3  ;;  %8925 = vmatprep.mubr.f32.mxu1 %v26061_v0  ;;  %v24594_v16 = vpop.f32.mrb[13].mxu1  ;;  %v20575_v3 = vpack.c.bf16 %v9126_v2, %v9121_v12  ;;  %v22042_v12 = vunpack.i.h.bf16 %v22040_v46  ;;  %v22041_v2 = vunpack.i.l.bf16 %v22040_v46 }
 0x729   : > { %20570 = vmatprep.subr.bf16.mxu1 %v20569_v40  ;;  %v22050_v1 = vpop.permute.xlu1 %22049 }
 0x72a   : > { %v22052_v21 = vunpack.i.h.bf16 %v22050_v1  ;;  %v22051_v6 = vunpack.i.l.bf16 %v22050_v1 }
 0x72b   : > { %19201 = vmatmul.mubr.msk.f32.gmra.mrb[16].mxu1 %vm1303_vm0, %v8804_v19 }
 0x72c   : > { %8996 = vmatprep.mubr.f32.mxu1 %v26061_v0 }
 0x72f   : > { %19202 = vmatmul.mubr.msk.f32.vlgmr.msra.gmra.mrb[18].mxu1 %vm1303_vm0, %v8803_v44 }
 0x730   : > { %20572 = vmatpush3.bf16.msra.mxu1 %v20569_v40  ;;  %9002 = vmatprep.mubr.f32.mxu1 %v26061_v0  ;;  %v9128_v40 = vsel %vm26064_vm6, %v22007_v45, %v22021_v36  ;;  %v22036_v36 = vunpack.i.l.bf16 %v22035_v23 }
 0x731   : > { %20574 = vmatprep.subr.bf16.mxu1 %v20573_v25  ;;  %v20579_v18 = vpack.c.bf16 %v9128_v40, %v9123_v35  ;;  %v22037_v25 = vunpack.i.h.bf16 %v22035_v23  ;;  %v9413_v40 = vsel %vm26063_vm7, %v22041_v2, %v22026_v41  ;;  %v9421_v35 = vsel %vm26063_vm7, %v22051_v6, %v22052_v21  ;;  %v24631_v23 = vpop.permute.xlu1 %22054 }
 0x732   : > { %v22056_v2 = vunpack.i.l.bf16 %v24631_v23 }
 0x733   : > { %19203 = vmatmul.mubr.msk.f32.gmra.mrb[20].mxu1 %vm1303_vm0, %v8804_v19  ;;  %v9419_v52 = vsel %vm26063_vm7, %v22036_v36, %v22037_v25 }
 0x734   : > { %19939 = vmatprep.mubr.msk.f32.mxu1 %vm1303_vm0, %v8803_v44  ;;  %v9130_v44 = vsel %vm26064_vm6, %v22022_v53, %v22032_v13  ;;  %v22045_v53 = vpop.permute.xlu0 %22044 }
 0x735   : > { %v20581_v45 = vpack.c.bf16 %v9130_v44, %v9125_v34  ;;  %v22046_v22 = vunpack.i.l.bf16 %v22045_v53 }
 0x737   : > { %19940 = vmatmul.mubr.msk.f32.vlgmr.msra.gmra.mrb[22].mxu1 %vm1303_vm0, %v8804_v19  ;;  %v22027_v19 = vunpack.i.h.bf16 %v24607_v14 }
 0x738   : > { %20576 = vmatpush1.bf16.msra.mxu1 %v20575_v3  ;;  %9211 = vmatprep.mubr.f32.mxu1 %v26061_v0  ;;  %v22060_v14 = vpop.permute.xlu0 %22059  ;;  %v22047_v3 = vunpack.i.h.bf16 %v22045_v53 }
 0x739   : > { %20578 = vmatprep.subr.bf16.mxu1 %v20577_v26  ;;  %v9414_v8 = vsel %vm26063_vm7, %v22026_v41, %v22027_v19  ;;  %v9418_v26 = vsel %vm26063_vm7, %v22042_v12, %v22036_v36  ;;  %v22062_v34 = vunpack.i.h.bf16 %v22060_v14  ;;  %v22061_v44 = vunpack.i.l.bf16 %v22060_v14  ;;  %v9387_v36 = vld [vmem:[#allocation17 + $0x70] sm:$0xff]  ;;  %v22070_v12 = vpop.permute.xlu1 %22069  ;;  %v9388_v14 = vld [vmem:[#allocation17 + $0x78] sm:$0xff] }
 0x73a   : > { %v20585_v13 = vpack.c.bf16 %v9419_v52, %v9414_v8  ;;  %v9416_v46 = vsel %vm26063_vm7, %v22046_v22, %v22047_v3  ;;  %v9415_v8 = vsel %vm26063_vm7, %v22027_v19, %v22046_v22 }
 0x73b   : > { %19206 = vmatmul.mubr.msk.f32.vlgmr.msra.gmra.mrb[14].mxu1 %vm1303_vm0, %v9095_v17  ;;  %v20589_v41 = vpack.c.bf16 %v9421_v35, %v9416_v46  ;;  %v9417_v53 = vsel %vm26063_vm7, %v22047_v3, %v22061_v44 }
 0x73c   : > { %20580 = vmatpush1.bf16.msra.mxu1 %v20579_v18  ;;  %9217 = vmatprep.mubr.f32.mxu1 %v26061_v0  ;;  %v20587_v18 = vpack.c.bf16 %v9418_v26, %v9413_v40  ;;  %v22065_v52 = vpop.permute.xlu0 %22064  ;;  %v22072_v40 = vunpack.i.h.bf16 %v22070_v12  ;;  %v22071_v26 = vunpack.i.l.bf16 %v22070_v12 }
 0x73d   : > { %20582 = vmatprep.subr.bf16.mxu1 %v20581_v45  ;;  %v22080_v22 = vpop.permute.xlu1 %22079 }
 0x73e   : > { %v22082_v44 = vunpack.i.h.bf16 %v22080_v22  ;;  %v22081_v35 = vunpack.i.l.bf16 %v22080_v22 }
 0x73f   : > { %19207 = vmatmul.mubr.msk.f32.gmra.mrb[16].mxu1 %vm1303_vm0, %v9096_v28 }
 0x740   : > { %9288 = vmatprep.mubr.f32.mxu1 %v26061_v0 }
 0x743   : > { %19208 = vmatmul.mubr.msk.f32.vlgmr.msra.gmra.mrb[18].mxu1 %vm1303_vm0, %v9095_v17 }
 0x744   : > { %20584 = vmatpush3.bf16.msra.mxu1 %v20581_v45  ;;  %9294 = vmatprep.mubr.f32.mxu1 %v26061_v0  ;;  %v9420_v45 = vsel %vm26063_vm7, %v22037_v25, %v22051_v6  ;;  %v22066_v6 = vunpack.i.l.bf16 %v22065_v52 }
 0x745   : > { %20586 = vmatprep.subr.bf16.mxu1 %v20585_v13  ;;  %v20591_v1 = vpack.c.bf16 %v9420_v45, %v9415_v8  ;;  %v22067_v13 = vunpack.i.h.bf16 %v22065_v52  ;;  %v9705_v45 = vsel %vm26152_vm11, %v22071_v26, %v22056_v2  ;;  %v9713_v8 = vsel %vm26154_vm8, %v22081_v35, %v22082_v44  ;;  %vm26158_vm11 = vmmov %vm26154_vm8 }
 0x747   : > { %19209 = vmatmul.mubr.msk.f32.gmra.mrb[20].mxu1 %vm1303_vm0, %v9096_v28  ;;  %v9711_v3 = vsel %vm26151_vm15, %v22066_v6, %v22067_v13  ;;  %vm26157_vm15 = vmmov %vm26154_vm8 }
 0x748   : > { %19946 = vmatprep.mubr.msk.f32.mxu1 %vm1303_vm0, %v9095_v17  ;;  %v9422_v17 = vsel %vm26063_vm7, %v22052_v21, %v22062_v34  ;;  %v22075_v21 = vpop.permute.xlu0 %22074 }
 0x749   : > { %v20593_v25 = vpack.c.bf16 %v9422_v17, %v9417_v53  ;;  %v22076_v46 = vunpack.i.l.bf16 %v22075_v21 }
 0x74b   : > { %19947 = vmatmul.mubr.msk.f32.vlgmr.msra.gmra.mrb[22].mxu1 %vm1303_vm0, %v9096_v28  ;;  %v22057_v28 = vunpack.i.h.bf16 %v24631_v23 }
 0x74c   : > { %20588 = vmatpush1.bf16.msra.mxu1 %v20587_v18  ;;  %9503 = vmatprep.mubr.f32.mxu1 %v26061_v0  ;;  %v22085_v23 = vpop.permute.xlu0 %22084  ;;  %v22077_v18 = vunpack.i.h.bf16 %v22075_v21 }
 0x74d   : > { %20590 = vmatprep.subr.bf16.mxu1 %v20589_v41  ;;  %v9706_v19 = vsel %vm26150_vm14, %v22056_v2, %v22057_v28  ;;  %v9710_v41 = vsel %vm26153_vm12, %v22072_v40, %v22066_v6  ;;  %v22087_v53 = vunpack.i.h.bf16 %v22085_v23  ;;  %v22086_v17 = vunpack.i.l.bf16 %v22085_v23  ;;  %vm26156_vm14 = vmmov %vm26154_vm8  ;;  %v9679_v2 = vld [vmem:[#allocation17 + $0x80] sm:$0xff] }
 0x74e   : > { %v20597_v34 = vpack.c.bf16 %v9711_v3, %v9706_v19  ;;  %v20599_v52 = vpack.c.bf16 %v9710_v41, %v9705_v45  ;;  %v9712_v12 = vsel %vm26156_vm14, %v22067_v13, %v22081_v35  ;;  %vm26159_vm12 = vmmov %vm26154_vm8  ;;  %v9680_v13 = vld [vmem:[#allocation17 + $0x88] sm:$0xff] }
 0x74f   : > { %19212 = vmatmul.mubr.msk.f32.vlgmr.msra.gmra.mrb[14].mxu1 %vm1303_vm0, %v9387_v36  ;;  %v9709_v6 = vsel %vm26157_vm15, %v22077_v18, %v22086_v17  ;;  %v9714_v21 = vsel %vm26158_vm11, %v22082_v44, %v22087_v53 }
 0x750   : > { %20592 = vmatpush1.bf16.msra.mxu1 %v20591_v1  ;;  %9509 = vmatprep.mubr.f32.mxu1 %v26061_v0  ;;  %v9708_v1 = vsel %vm26155_vm13, %v22076_v46, %v22077_v18  ;;  %v20605_v3 = vpack.c.bf16 %v9714_v21, %v9709_v6 }
 0x751   : > { %20594 = vmatprep.subr.bf16.mxu1 %v20593_v25 }
 0x753   : > { %19213 = vmatmul.mubr.msk.f32.gmra.mrb[16].mxu1 %vm1303_vm0, %v9388_v14 }
 0x754   : > { %9580 = vmatprep.mubr.f32.mxu1 %v26061_v0 }
 0x757   : > { %19214 = vmatmul.mubr.msk.f32.vlgmr.msra.gmra.mrb[18].mxu1 %vm1303_vm0, %v9387_v36 }
 0x758   : > { %20596 = vmatpush3.bf16.msra.mxu1 %v20593_v25  ;;  %9586 = vmatprep.mubr.f32.mxu1 %v26061_v0  ;;  %v20601_v25 = vpack.c.bf16 %v9713_v8, %v9708_v1 }
 0x759   : > { %20598 = vmatprep.subr.bf16.mxu1 %v20597_v34  ;;  %v9978_v34 = vpop.permute.xlu0 %9977 }
 0x75b   : > { %19215 = vmatmul.mubr.msk.f32.gmra.mrb[20].mxu1 %vm1303_vm0, %v9388_v14 }
 0x75c   : > { %19953 = vmatprep.mubr.msk.f32.mxu1 %vm1303_vm0, %v9387_v36  ;;  %v9707_v36 = vsel %vm26159_vm12, %v22057_v28, %v22076_v46  ;;  %v9973_v28 = vpop.permute.xlu1 %9972 }
 0x75d   : > { %v20603_v19 = vpack.c.bf16 %v9712_v12, %v9707_v36 }
 0x75f   : > { %19954 = vmatmul.mubr.msk.f32.vlgmr.msra.gmra.mrb[22].mxu1 %vm1303_vm0, %v9388_v14 }
 0x760   : > { %20600 = vmatpush1.bf16.msra.mxu1 %v20599_v52  ;;  %9795 = vmatprep.mubr.f32.mxu1 %v26061_v0 }
 0x761   : > { %20602 = vmatprep.subr.bf16.mxu1 %v20601_v25 }
 0x763   : > { %19218 = vmatmul.mubr.msk.f32.vlgmr.msra.gmra.mrb[14].mxu1 %vm1303_vm0, %v9679_v2 }
 0x764   : > { %20604 = vmatpush1.bf16.msra.mxu1 %v20603_v19  ;;  %9801 = vmatprep.mubr.f32.mxu1 %v26061_v0 }
 0x765   : > { %20606 = vmatprep.subr.bf16.mxu1 %v20605_v3 }
 0x767   : > { %19219 = vmatmul.mubr.msk.f32.gmra.mrb[16].mxu1 %vm1303_vm0, %v9680_v13 }
 0x768   : > { %9872 = vmatprep.mubr.f32.mxu1 %v26061_v0 }
 0x76b   : > { %19220 = vmatmul.mubr.msk.f32.vlgmr.msra.gmra.mrb[18].mxu1 %vm1303_vm0, %v9679_v2 }
 0x76c   : > { %20608 = vmatpush3.bf16.msra.mxu1 %v20605_v3  ;;  %9878 = vmatprep.mubr.f32.mxu1 %v26061_v0 }
 0x76f   : > { %19221 = vmatmul.mubr.msk.f32.gmra.mrb[20].mxu1 %vm1303_vm0, %v9680_v13 }
 0x770   : > { %19960 = vmatprep.mubr.msk.f32.mxu1 %vm1303_vm0, %v9679_v2 }
 0x773   : > { %19961 = vmatmul.mubr.msk.f32.vlgmr.msra.gmra.mrb[22].mxu1 %vm1303_vm0, %v9680_v13 }
 0x836   : > { %v9797_v14 = vpop.f32.mrb[14].mxu1 }
 0x837   : > { %v9980_v22 = vadd.f32 %v9973_v28, %v9797_v14  ;;  %v9799_v40 = vpop.f32.mrb[15].mxu1 }
 0x838   : > { %v9981_v26 = vadd.f32 %v9973_v28, %v9799_v40 }
 0x839   : > { %10000 = vrot.lane.b32.xlu1 %v9980_v22, %s26045_s11 }
 0x83a   : > { %10002 = vrot.lane.b32.xlu0 %v9981_v26, %s26045_s11  ;;  %v9803_v44 = vpop.f32.mrb[16].mxu1 }
 0x83b   : > { %v9985_v35 = vadd.f32 %v9978_v34, %v9803_v44  ;;  %v9805_v23 = vpop.f32.mrb[17].mxu1 }
 0x83c   : > { %v9986_v18 = vadd.f32 %v9978_v34, %v9805_v23 }
 0x83e   : > { %10010 = vrot.lane.b32.xlu0 %v9985_v35, %s26045_s11  ;;  %10012 = vrot.lane.b32.xlu1 %v9986_v18, %s26045_s11  ;;  %v9874_v46 = vpop.f32.mrb[18].mxu1 }
 0x83f   : > { %v9982_v45 = vadd.f32 %v9973_v28, %v9874_v46  ;;  %v9876_v41 = vpop.f32.mrb[19].mxu1 }
 0x840   : > { %v9983_v52 = vadd.f32 %v9973_v28, %v9876_v41 }
 0x842   : > { %10004 = vrot.lane.b32.xlu1 %v9982_v45, %s26045_s11  ;;  %v9880_v53 = vpop.f32.mrb[20].mxu1 }
 0x843   : > { %v9987_v17 = vadd.f32 %v9978_v34, %v9880_v53  ;;  %v9882_v8 = vpop.f32.mrb[21].mxu1 }
 0x844   : > { %v9988_v25 = vadd.f32 %v9978_v34, %v9882_v8 }
 0x845   : > { %10014 = vrot.lane.b32.xlu0 %v9987_v17, %s26045_s11 }
 0x846   : > { %10006 = vrot.lane.b32.xlu1 %v9983_v52, %s26045_s11  ;;  %v19962_v1 = vpop.f32.mrb[22].mxu1 }
 0x847   : > { %v9951_v12 = vpop.f32.mrb[23].mxu1  ;;  %v9989_v6 = vadd.f32 %v19962_v1, %v9978_v34 }
 0x848   : > { %v9984_v2 = vadd.f32 %v9973_v28, %v9951_v12 }
 0x84a   : > { %10016 = vrot.lane.b32.xlu1 %v9988_v25, %s26045_s11  ;;  %10008 = vrot.lane.b32.xlu0 %v9984_v2, %s26045_s11 }
 0x84e   : > { %10018 = vrot.lane.b32.xlu0 %v9989_v6, %s26045_s11  ;;  %s26162_s11 = sld [smem:[#allocation37_spill]] }
 0x8ab   : > { %v10001_v21 = vpop.permute.xlu1 %10000 }
 0x8ac   : > { %v10040_v36 = vsel %vm4143_vm9, 0.0, %v10001_v21  ;;  %v10003_v19 = vpop.permute.xlu0 %10002 }
 0x8ad   : > { %v10044_v3 = vmul.f32 %v10040_v36, %v23861_v32  ;;  %v10020_v13 = vsel %vm4143_vm9, %v10001_v21, %v10003_v19 }
 0x8ae   : > { %v10045_v34 = vmul.f32 %v10020_v13, %v23857_v29 }
 0x8af   : > { %v10056_v14 = vadd.f32 %v10044_v3, %v24293_v27 }
 0x8b0   : > { %v10011_v22 = vpop.permute.xlu0 %10010  ;;  %v10013_v40 = vpop.permute.xlu1 %10012  ;;  %v10057_v27 = vadd.f32 %v10045_v34, %v24296_v31 }
 0x8b1   : > { %v10041_v28 = vsel %vm4143_vm9, 0.0, %v10011_v22  ;;  %v10024_v26 = vsel %vm4143_vm9, %v10011_v22, %v10013_v40  ;;  %v10080_v23 = vmul.f32 0.05, %v10056_v14  ;;  %vm10068_vm8 = vcmp.ge.f32.partialorder %v10056_v14, 0.0 }
 0x8b2   : > { %v10050_v44 = vmul.f32 %v10041_v28, %v23861_v32  ;;  %v10051_v35 = vmul.f32 %v10024_v26, %v23857_v29  ;;  %vm10069_vm14 = vcmp.ge.f32.partialorder %v10057_v27, 0.0 }
 0x8b3   : > { %v24695_v52 = vsel %vm10068_vm8, %v10056_v14, %v10080_v23 }
 0x8b4   : > { %v10062_v18 = vadd.f32 %v10050_v44, %v24298_v5  ;;  %v10005_v46 = vpop.permute.xlu1 %10004  ;;  %v10063_v53 = vadd.f32 %v10051_v35, %v24300_v43  ;;  %v10081_v43 = vmul.f32 0.05, %v10057_v27 }
 0x8b5   : > { %v10021_v45 = vsel %vm4143_vm9, %v10003_v19, %v10005_v46 }
 0x8b6   : > { %vm10074_vm13 = vcmp.ge.f32.partialorder %v10062_v18, 0.0  ;;  %v10086_v41 = vmul.f32 0.05, %v10062_v18  ;;  %v10046_v17 = vmul.f32 %v10021_v45, %v23859_v30  ;;  %v10087_v36 = vmul.f32 0.05, %v10063_v53 }
 0x8b7   : > { %v10015_v8 = vpop.permute.xlu0 %10014  ;;  %vm10075_vm11 = vcmp.ge.f32.partialorder %v10063_v53, 0.0  ;;  %v24718_v26 = vsel %vm10069_vm14, %v10057_v27, %v10081_v43 }
 0x8b8   : > { %v24697_v1 = vsel %vm10074_vm13, %v10062_v18, %v10086_v41  ;;  %v10025_v12 = vsel %vm4143_vm9, %v10013_v40, %v10015_v8  ;;  %v10007_v5 = vpop.permute.xlu1 %10006  ;;  %v10058_v25 = vadd.f32 %v10046_v17, %v24321_v47  ;;  %v24723_v44 = vsel %vm10075_vm11, %v10063_v53, %v10087_v36 }
 0x8b9   : > { %v10052_v2 = vmul.f32 %v10025_v12, %v23859_v30  ;;  %v10022_v31 = vsel %vm4143_vm9, %v10005_v46, %v10007_v5  ;;  %v24705_v6 = vpack.i.bf16 %v24697_v1, %v24695_v52  ;;  %v20622_v36 = vpack.c.bf16 %v24697_v1, %v24695_v52 }
 0x8ba   : > { %v10047_v21 = vmul.f32 %v10022_v31, %v23871_v48  ;;  %vm10070_vm15 = vcmp.ge.f32.partialorder %v10058_v25, 0.0  ;;  %v10082_v19 = vmul.f32 0.05, %v10058_v25  ;;  %vm22872_vm11 = vmmov 0  }
 0x8bb   : > { %v10064_v3 = vadd.f32 %v10052_v2, %v24326_v62  ;;  %22089 = vrot.lane.b32.xlu1 %v24705_v6, %s26043_s26  ;;  %19988 = vmatprep.mubr.msk.f32.mxu1 %vm22872_vm11, %v26061_v0 }
 0x8bc   : > { %v10059_v47 = vadd.f32 %v10047_v21, %v24357_v61  ;;  %v10017_v13 = vpop.permute.xlu1 %10016  ;;  %v24712_v14 = vpop.permute.xlu0 %10008  ;;  %v24714_v22 = vsel %vm10070_vm15, %v10058_v25, %v10082_v19  ;;  %v20620_v21 = vpack.c.bf16 %v24723_v44, %v24718_v26 }
 0x8bd   : > { %vm10076_vm12 = vcmp.ge.f32.partialorder %v10064_v3, 0.0  ;;  %v10088_v40 = vmul.f32 0.05, %v10064_v3  ;;  %v10026_v28 = vsel %vm4143_vm9, %v10015_v8, %v10017_v13  ;;  %v10023_v34 = vsel %vm4143_vm9, %v10007_v5, %v24712_v14 }
 0x8be   : > { %v10053_v62 = vmul.f32 %v10026_v28, %v23871_v48  ;;  %v10048_v35 = vmul.f32 %v10023_v34, %v23876_v51  ;;  %v24730_v23 = vpack.i.bf16 %v24714_v22, %v24718_v26  ;;  %v10083_v27 = vmul.f32 0.05, %v10059_v47 }
 0x8bf   : > { %v24725_v61 = vsel %vm10076_vm12, %v10064_v3, %v10088_v40  ;;  %vm10071_vm8 = vcmp.ge.f32.partialorder %v10059_v47, 0.0  ;;  %v26054_v3 = vmov 0.0|0.0   ;;  %v10042_v28 = vsel %vm4166_vm10, %v24712_v14, 0.0 }
 0x8c0   : > { %v10065_v18 = vadd.f32 %v10053_v62, %v24359_v37  ;;  %v10019_v46 = vpop.permute.xlu0 %10018  ;;  %v24735_v45 = vpack.i.bf16 %v24725_v61, %v24723_v44  ;;  %v10060_v41 = vadd.f32 %v10048_v35, %v24366_v38  ;;  %22094 = vrot.lane.b32.xlu1 %v24730_v23, %s26043_s26  ;;  %v24745_v5 = vsel %vm10071_vm8, %v10059_v47, %v10083_v27 }
 0x8c1   : > { %v10027_v53 = vsel %vm4143_vm9, %v10017_v13, %v10019_v46  ;;  %20650 = vmatprep.subr.bf16.mxu1 %v26054_v3  ;;  %v20626_v47 = vpack.c.bf16 %v24725_v61, %v24714_v22  ;;  %v10043_v40 = vsel %vm4166_vm10, %v10019_v46, 0.0  ;;  %v10049_v34 = vmul.f32 %v10042_v28, %v23881_v63 }
 0x8c2   : > { %v10054_v17 = vmul.f32 %v10027_v53, %v23876_v51  ;;  %22099 = vrot.lane.b32.xlu0 %v24735_v45, %s26043_s26  ;;  %vm10072_vm13 = vcmp.ge.f32.partialorder %v10060_v41, 0.0  ;;  %v10084_v37 = vmul.f32 0.05, %v10060_v41  ;;  %v10089_v8 = vmul.f32 0.05, %v10065_v18 }
 0x8c3   : > { %vm10077_vm14 = vcmp.ge.f32.partialorder %v10065_v18, 0.0  ;;  %v10055_v62 = vmul.f32 %v10043_v40, %v23881_v63  ;;  %v10061_v14 = vadd.f32 %v10049_v34, %v24382_v15 }
 0x8c4   : > { %v10066_v12 = vadd.f32 %v10054_v17, %v24378_v4  ;;  %v24747_v38 = vsel %vm10072_vm13, %v10060_v41, %v10084_v37  ;;  %v24753_v31 = vsel %vm10077_vm14, %v10065_v18, %v10089_v8  ;;  %v4261_v41 = vld [vmem:[%s26162_s11] sm:$0xff]  ;;  %vm26168_vm13 = vcmask 605184   ;;  %s26193_s11 = sld [smem:[#allocation45_spill]] }
 0x8c5   : > { %v24751_v2 = vpack.i.bf16 %v24747_v38, %v24745_v5  ;;  %v20624_v19 = vpack.c.bf16 %v24753_v31, %v24745_v5  ;;  %v10067_v35 = vadd.f32 %v10055_v62, %v24384_v49  ;;  %v10085_v46 = vmul.f32 0.05, %v10061_v14  ;;  %vm26172_vm14 = vmmov %vm26168_vm13 }
 0x8c6   : > { %vm10078_vm15 = vcmp.ge.f32.partialorder %v10066_v12, 0.0  ;;  %v10090_v25 = vmul.f32 0.05, %v10066_v12  ;;  %vm10073_vm8 = vcmp.ge.f32.partialorder %v10061_v14, 0.0 }
 0x8c7   : > { %22109 = vrot.lane.b32.xlu0 %v24751_v2, %s26043_s26  ;;  %v10091_v18 = vmul.f32 0.05, %v10067_v35  ;;  %vm10079_vm12 = vcmp.ge.f32.partialorder %v10067_v35, 0.0  ;;  %v10097_v49 = vsel %vm10073_vm8, %v10061_v14, %v10085_v46 }
 0x8c8   : > { %v24755_v43 = vsel %vm10078_vm15, %v10066_v12, %v10090_v25  ;;  %vm26174_vm15 = vmmov %vm26168_vm13 }
 0x8c9   : > { %v22103_v4 = vpack.i.bf16 %v24755_v43, %v24753_v31  ;;  %v20629_v13 = vpack.c.bf16 %v24755_v43, %v24747_v38  ;;  %v10103_v27 = vsel %vm10079_vm12, %v10067_v35, %v10091_v18  ;;  %vm26175_vm12 = vmmov %vm26168_vm13 }
 0x8ca   : > { %v22268_v15 = vpack.i.bf16 %v10103_v27, %v10097_v49  ;;  %vm26182_vm8 = vmmov %vm26175_vm12 }
 0x8cb   : > { %22104 = vrot.lane.b32.xlu1 %v22103_v4, %s26043_s26  ;;  %22114 = vrot.lane.b32.xlu0 %v24730_v23, %s26041_s22  ;;  %s26161_s26 = sld [smem:[#allocation35_spill]] }
 0x8cf   : > { %22119 = vrot.lane.b32.xlu1 %v24735_v45, %s26041_s22  ;;  %22124 = vrot.lane.b32.xlu0 %v24705_v6, %s26041_s22 }
 0x8d3   : > { %22134 = vrot.lane.b32.xlu1 %v24730_v23, %s22863_s6  ;;  %22129 = vrot.lane.b32.xlu0 %v22103_v4, %s26041_s22 }
 0x8d7   : > { %22144 = vrot.lane.b32.xlu1 %v24705_v6, %s22863_s6  ;;  %22139 = vrot.lane.b32.xlu0 %v24735_v45, %s22863_s6 }
 0x8db   : > { %22149 = vrot.lane.b32.xlu1 %v22103_v4, %s22863_s6  ;;  %22154 = vrot.lane.b32.xlu0 %v24730_v23, %s22864_s23 }
 0x8df   : > { %22159 = vrot.lane.b32.xlu1 %v24751_v2, %s26041_s22  ;;  %22169 = vrot.lane.b32.xlu0 %v24705_v6, %s22864_s23  ;;  %s26160_s22 = sld [smem:[#allocation44_spill]] }
 0x8e3   : > { %22164 = vrot.lane.b32.xlu1 %v24735_v45, %s22864_s23  ;;  %22174 = vrot.lane.b32.xlu0 %v22103_v4, %s22864_s23 }
 0x8e7   : > { %22179 = vrot.lane.b32.xlu1 %v24730_v23, %s26050_s3  ;;  %22184 = vrot.lane.b32.xlu0 %v24735_v45, %s26050_s3 }
 0x8eb   : > { %22189 = vrot.lane.b32.xlu1 %v24705_v6, %s26050_s3  ;;  %22199 = vrot.lane.b32.xlu0 %v24751_v2, %s22863_s6 }
 0x8ef   : > { %22194 = vrot.lane.b32.xlu1 %v22103_v4, %s26050_s3  ;;  %22204 = vrot.lane.b32.xlu0 %v24730_v23, %s26047_s1 }
 0x8f3   : > { %22209 = vrot.lane.b32.xlu1 %v24751_v2, %s22864_s23  ;;  %22219 = vrot.lane.b32.xlu0 %v24705_v6, %s26047_s1 }
 0x8f7   : > { %22214 = vrot.lane.b32.xlu1 %v24735_v45, %s26047_s1  ;;  %22224 = vrot.lane.b32.xlu0 %v22103_v4, %s26047_s1 }
 0x8fb   : > { %22229 = vrot.lane.b32.xlu1 %v24730_v23, %s22867_s13  ;;  %22234 = vrot.lane.b32.xlu0 %v24751_v2, %s26050_s3 }
 0x8ff   : > { %22244 = vrot.lane.b32.xlu1 %v24705_v6, %s22867_s13  ;;  %22239 = vrot.lane.b32.xlu0 %v24735_v45, %s22867_s13 }
 0x903   : > { %22259 = vrot.lane.b32.xlu1 %v24751_v2, %s26047_s1  ;;  %22249 = vrot.lane.b32.xlu0 %v22103_v4, %s22867_s13  ;;  %s26163_s1 = sld [smem:[#allocation40_spill]] }
 0x907   : > { %22264 = vrot.lane.b32.xlu1 %v24735_v45, %s26065_s7  ;;  %22254 = vrot.lane.b32.xlu0 %v24730_v23, %s26065_s7  ;;  %v10104_v23 = vld [vmem:[%s26160_s22] sm:$0xff]  ;;  %s26191_s22 = smov 27  }
 0x908   : > { %v1297_v45 = vld [vmem:[%s26161_s26] sm:$0xff]  ;;  %s26190_s26 = sld [smem:[#allocation46_spill]] }
 0x909   : > { %v7183_v53 = vld [vmem:[%s26163_s1] sm:$0xff]  ;;  %s26192_s1 = sld [smem:[#allocation47_spill]] }
 0x90b   : > { %22279 = vrot.lane.b32.xlu1 %v24751_v2, %s22867_s13  ;;  %22269 = vrot.lane.b32.xlu0 %v22268_v15, %s22863_s6 }
 0x90f   : > { %22284 = vrot.lane.b32.xlu1 %v22268_v15, %s22864_s23  ;;  %22274 = vrot.lane.b32.xlu0 %v24705_v6, %s26065_s7 }
 0x913   : > { %22289 = vrot.lane.b32.xlu1 %v22268_v15, %s26050_s3  ;;  %22294 = vrot.lane.b32.xlu0 %v22268_v15, %s26164_s2  ;;  %s26165_s3 = sld [smem:[#allocation43_spill]] }
 0x917   : > { %22304 = vrot.lane.b32.xlu1 %v24751_v2, %s26065_s7  ;;  %22299 = vrot.lane.b32.xlu0 %v22103_v4, %s26065_s7 }
 0x919   : > { %v19224_v27 = vld [vmem:[%s26165_s3 + $0x8] sm:$0xff] }
 0x91b   : > { %22309 = vrot.lane.b32.xlu1 %v22268_v15, %s22867_s13  ;;  %22314 = vrot.lane.b32.xlu0 %v22268_v15, %s26065_s7  ;;  %s26197_s7 = smov 100  }
 0x91f   : > { %12446 = vperm.xlu1 %21627, %v10104_v23   ;;  %1300 = vperm.xlu0 %21626, %v1297_v45  }
 0x923   : > { %4264 = vperm.xlu1 %21627, %v4261_v41   ;;  %7186 = vperm.xlu0 %21626, %v7183_v53  }
 0x92d   : > { %v22090_v6 = vpop.permute.xlu1 %22089 }
 0x92e   : > { %v22092_v25 = vunpack.i.h.bf16 %v22090_v6  ;;  %v22091_v2 = vunpack.i.l.bf16 %v22090_v6 }
 0x932   : > { %v22095_v17 = vpop.permute.xlu1 %22094 }
 0x933   : > { %v22097_v37 = vunpack.i.h.bf16 %v22095_v17  ;;  %v22096_v8 = vunpack.i.l.bf16 %v22095_v17 }
 0x934   : > { %v22100_v12 = vpop.permute.xlu0 %22099 }
 0x935   : > { %v22102_v4 = vunpack.i.h.bf16 %v22100_v12  ;;  %v22101_v40 = vunpack.i.l.bf16 %v22100_v12  ;;  %v10138_v28 = vsel %vm1557_vm1, %v22091_v2, %v22096_v8  ;;  %v10139_v34 = vsel %vm1557_vm1, %v22096_v8, %v22097_v37 }
 0x937   : > { %v10142_v62 = vsel %vm1557_vm1, %v22092_v25, %v22101_v40  ;;  %v10143_v35 = vsel %vm1557_vm1, %v22101_v40, %v22102_v4 }
 0x938   : > { %v20609_v14 = vpack.c.bf16 %v10143_v35, %v10139_v34  ;;  %v20611_v18 = vpack.c.bf16 %v10142_v62, %v10138_v28 }
 0x939   : > { %v22110_v46 = vpop.permute.xlu0 %22109 }
 0x93a   : > { %20610 = vmatprep.subr.bf16.mxu0 %v20609_v14  ;;  %v22112_v49 = vunpack.i.h.bf16 %v22110_v46  ;;  %v22111_v15 = vunpack.i.l.bf16 %v22110_v46  ;;  %v10105_v46 = vld [vmem:[%s26165_s3] sm:$0xff] }
 0x93b   : > { %20612 = vmatpush1.bf16.msra.mxu0 %v20611_v18 }
 0x93c   : > { %v10140_v6 = vsel %vm1557_vm1, %v22097_v37, %v22111_v15  ;;  %v10141_v8 = vsel %vm1557_vm1, %v22111_v15, %v22112_v49 }
 0x93d   : > { %v22105_v23 = vpop.permute.xlu1 %22104  ;;  %v24860_v53 = vpop.permute.xlu0 %22114 }
 0x93e   : > { %v22107_v45 = vunpack.i.h.bf16 %v22105_v23  ;;  %v22106_v41 = vunpack.i.l.bf16 %v22105_v23  ;;  %19225 = vmatmul.mubr.msk.f32.vlgmr.msra.gmra.mrb[24].mxu0 %vm1303_vm0, %v19224_v27  ;;  %v22116_v26 = vunpack.i.l.bf16 %v24860_v53 }
 0x93f   : > { %10294 = vmatprep.mubr.f32.mxu0 %v26061_v0 }
 0x940   : > { %v10144_v17 = vsel %vm1557_vm1, %v22102_v4, %v22106_v41  ;;  %v10145_v12 = vsel %vm1557_vm1, %v22106_v41, %v22107_v45  ;;  %v20618_v34 = vpack.c.bf16 %v22107_v45, %v22112_v49  ;;  %v22117_v49 = vunpack.i.h.bf16 %v24860_v53 }
 0x941   : > { %v24868_v25 = vpop.permute.xlu1 %22119  ;;  %v20613_v2 = vpack.c.bf16 %v10145_v12, %v10141_v8  ;;  %v20615_v40 = vpack.c.bf16 %v10144_v17, %v10140_v6  ;;  %v22125_v28 = vpop.permute.xlu0 %22124 }
 0x942   : > { %v22122_v14 = vunpack.i.h.bf16 %v24868_v25  ;;  %v22121_v18 = vunpack.i.l.bf16 %v24868_v25  ;;  %v22126_v15 = vunpack.i.l.bf16 %v22125_v28  ;;  %v10609_v5 = vsel %vm2069_vm2, %v22116_v26, %v22117_v49 }
 0x943   : > { %20614 = vmatprep.subr.bf16.mxu0 %v20613_v2  ;;  %v19231_v2 = vld [vmem:[%s26165_s3 + $0x10] sm:$0xff] }
 0x944   : > { %20616 = vmatpush1.bf16.msra.mxu0 %v20615_v40  ;;  %v10613_v52 = vsel %vm2069_vm2, %v22121_v18, %v22122_v14  ;;  %v10608_v61 = vsel %vm2069_vm2, %v22126_v15, %v22116_v26 }
 0x945   : > { %v24870_v62 = vpop.permute.xlu1 %22134  ;;  %20617 = vmatprep.subr.bf16.mxu0 %v26054_v3  ;;  %v24873_v37 = vpop.permute.xlu0 %22129 }
 0x946   : > { %v22132_v31 = vunpack.i.h.bf16 %v24873_v37  ;;  %v22136_v40 = vunpack.i.l.bf16 %v24870_v62 }
 0x947   : > { %19226 = vmatmul.mubr.msk.f32.vlgmr.msra.gmra.mrb[26].mxu0 %vm1303_vm0, %v19224_v27 }
 0x948   : > { %20619 = vmatpush3.bf16.msra.mxu0 %v20618_v34  ;;  %19967 = vmatprep.mubr.msk.f32.mxu0 %vm22872_vm11, %v26061_v0 }
 0x949   : > { %v24878_v4 = vpop.permute.xlu1 %22144  ;;  %20621 = vmatprep.subr.bf16.mxu0 %v20620_v21  ;;  %v24883_v35 = vpop.permute.xlu0 %22139 }
 0x94a   : > { %v22142_v12 = vunpack.i.h.bf16 %v24883_v35  ;;  %v22141_v25 = vunpack.i.l.bf16 %v24883_v35  ;;  %v22147_v34 = vunpack.i.h.bf16 %v24878_v4 }
 0x94b   : > { %19968 = vmatmul.mubr.msk.f32.vlgmr.msra.gmra.mrb[28].mxu0 %vm1303_vm0, %v19224_v27  ;;  %v22127_v27 = vunpack.i.h.bf16 %v22125_v28 }
 0x94c   : > { %20623 = vmatpush1.bf16.msra.mxu0 %v20622_v36  ;;  %10438 = vmatprep.mubr.f32.mxu0 %v26061_v0  ;;  %v22131_v36 = vunpack.i.l.bf16 %v24873_v37  ;;  %v22146_v37 = vunpack.i.l.bf16 %v24878_v4 }
 0x94d   : > { %v24895_v44 = vpop.permute.xlu1 %22149  ;;  %20625 = vmatprep.subr.bf16.mxu0 %v20624_v19  ;;  %v24900_v21 = vpop.permute.xlu0 %22154  ;;  %v10612_v22 = vsel %vm2069_vm2, %v22127_v27, %v22121_v18 }
 0x94e   : > { %v20633_v17 = vpack.c.bf16 %v10612_v22, %v10608_v61  ;;  %v10615_v8 = vsel %vm2069_vm2, %v22131_v36, %v22132_v31  ;;  %v10614_v28 = vsel %vm2069_vm2, %v22122_v14, %v22131_v36  ;;  %v10879_v14 = vsel %vm2362_vm3, %v22147_v34, %v22141_v25 }
 0x94f   : > { %19228 = vmatmul.mubr.msk.f32.vlgmr.msra.gmra.mrb[24].mxu0 %vm1303_vm0, %v10105_v46  ;;  %v22152_v27 = vunpack.i.h.bf16 %v24895_v44  ;;  %v22151_v15 = vunpack.i.l.bf16 %v24895_v44  ;;  %v22157_v36 = vunpack.i.h.bf16 %v24900_v21 }
 0x950   : > { %20627 = vmatpush1.bf16.msra.mxu0 %v20626_v47  ;;  %10509 = vmatprep.mubr.f32.mxu0 %v26061_v0  ;;  %v20631_v47 = vpack.c.bf16 %v10613_v52, %v10609_v5 }
 0x951   : > { %v22160_v1 = vpop.permute.xlu1 %22159  ;;  %20628 = vmatprep.subr.bf16.mxu0 %v26054_v3  ;;  %v24912_v45 = vpop.permute.xlu0 %22169 }
 0x952   : > { %v22162_v19 = vunpack.i.h.bf16 %v22160_v1  ;;  %v22161_v23 = vunpack.i.l.bf16 %v22160_v1 }
 0x953   : > { %19229 = vmatmul.mubr.msk.f32.vlgmr.msra.gmra.mrb[26].mxu0 %vm1303_vm0, %v10105_v46 }
 0x954   : > { %20630 = vmatpush3.bf16.msra.mxu0 %v20629_v13  ;;  %19974 = vmatprep.mubr.msk.f32.mxu0 %vm22872_vm11, %v26061_v0  ;;  %v10611_v41 = vsel %vm2069_vm2, %v22161_v23, %v22162_v19  ;;  %v10610_v38 = vsel %vm2069_vm2, %v22117_v49, %v22161_v23  ;;  %v22137_v13 = vunpack.i.h.bf16 %v24870_v62  ;;  %v10880_v49 = vsel %vm2362_vm3, %v22141_v25, %v22142_v12 }
 0x955   : > { %v24923_v53 = vpop.permute.xlu1 %22164  ;;  %20632 = vmatprep.subr.bf16.mxu0 %v20631_v47  ;;  %v24925_v6 = vpop.permute.xlu0 %22174  ;;  %v20635_v43 = vpack.c.bf16 %v10615_v8, %v10611_v41  ;;  %v10874_v62 = vsel %vm2362_vm3, %v22146_v37, %v22136_v40  ;;  %v20640_v52 = vpack.c.bf16 %v22132_v31, %v22162_v19  ;;  %v22156_v23 = vunpack.i.l.bf16 %v24900_v21  ;;  %v24984_v37 = vld [vmem:[%s26165_s3 + $0x18] sm:$0xff] }
 0x956   : > { %v10875_v4 = vsel %vm2362_vm3, %v22136_v40, %v22137_v13  ;;  %v22167_v47 = vunpack.i.h.bf16 %v24923_v53  ;;  %v22166_v41 = vunpack.i.l.bf16 %v24923_v53  ;;  %v10882_v8 = vsel %vm2362_vm3, %v22151_v15, %v22152_v27 }
 0x957   : > { %19975 = vmatmul.mubr.msk.f32.vlgmr.msra.gmra.mrb[30].mxu0 %vm1303_vm0, %v10105_v46  ;;  %v20637_v46 = vpack.c.bf16 %v10614_v28, %v10610_v38  ;;  %v20642_v5 = vpack.c.bf16 %v10880_v49, %v10875_v4  ;;  %v10881_v53 = vsel %vm2362_vm3, %v22142_v12, %v22151_v15  ;;  %v22172_v40 = vunpack.i.h.bf16 %v24912_v45 }
 0x958   : > { %20634 = vmatpush1.bf16.msra.mxu0 %v20633_v17  ;;  %10693 = vmatprep.mubr.f32.mxu0 %v26061_v0  ;;  %v20644_v17 = vpack.c.bf16 %v10879_v14, %v10874_v62  ;;  %v22171_v28 = vunpack.i.l.bf16 %v24912_v45  ;;  %v26056_v34 = vunpack.i.h.bf16 %v24925_v6  ;;  %v11146_v12 = vsel %vm2655_vm4, %v22166_v41, %v22167_v47 }
 0x959   : > { %v24939_v35 = vpop.permute.xlu1 %22179  ;;  %20636 = vmatprep.subr.bf16.mxu0 %v20635_v43  ;;  %v24941_v18 = vpop.permute.xlu0 %22184  ;;  %v11141_v43 = vsel %vm2655_vm4, %v22156_v23, %v22157_v36 }
 0x95a   : > { %v22187_v49 = vunpack.i.h.bf16 %v24941_v18  ;;  %v22186_v45 = vunpack.i.l.bf16 %v24941_v18 }
 0x95b   : > { %19232 = vmatmul.mubr.msk.f32.vlgmr.msra.gmra.mrb[24].mxu0 %vm1303_vm0, %v19231_v2 }
 0x95c   : > { %20638 = vmatpush1.bf16.msra.mxu0 %v20637_v46  ;;  %10764 = vmatprep.mubr.f32.mxu0 %v26061_v0  ;;  %v22181_v46 = vunpack.i.l.bf16 %v24939_v35 }
 0x95d   : > { %v24948_v26 = vpop.permute.xlu1 %22189  ;;  %20639 = vmatprep.subr.bf16.mxu0 %v26054_v3  ;;  %v24954_v1 = vpop.permute.xlu0 %22199 }
 0x95e   : > { %v22202_v22 = vunpack.i.h.bf16 %v24954_v1  ;;  %v22201_v61 = vunpack.i.l.bf16 %v24954_v1 }
 0x95f   : > { %19233 = vmatmul.mubr.msk.f32.vlgmr.msra.gmra.mrb[26].mxu0 %vm1303_vm0, %v19231_v2 }
 0x960   : > { %20641 = vmatpush3.bf16.msra.mxu0 %v20640_v52  ;;  %19981 = vmatprep.mubr.msk.f32.mxu0 %vm22872_vm11, %v26061_v0  ;;  %v10877_v21 = vsel %vm2362_vm3, %v22201_v61, %v22202_v22  ;;  %v10876_v25 = vsel %vm2362_vm3, %v22137_v13, %v22201_v61  ;;  %v22176_v13 = vunpack.i.l.bf16 %v24925_v6  ;;  %v11140_v61 = vsel %vm2655_vm4, %v22171_v28, %v22156_v23  ;;  %v25022_v28 = vld [vmem:[%s26165_s3 + $0x20] sm:$0xff] }
 0x961   : > { %v24965_v31 = vpop.permute.xlu1 %22194  ;;  %20643 = vmatprep.subr.bf16.mxu0 %v20642_v5  ;;  %v24970_v19 = vpop.permute.xlu0 %22204  ;;  %v20646_v38 = vpack.c.bf16 %v10882_v8, %v10877_v21  ;;  %v20648_v52 = vpack.c.bf16 %v10881_v53, %v10876_v25  ;;  %v11145_v5 = vsel %vm2655_vm4, %v22172_v40, %v22166_v41  ;;  %v11412_v25 = vsel %vm2948_vm5, %v22186_v45, %v22187_v49 }
 0x962   : > { %v20655_v41 = vpack.c.bf16 %v11145_v5, %v11140_v61  ;;  %v11148_v8 = vsel %vm2655_vm4, %v22176_v13, %v26056_v34  ;;  %v26052_v5 = vunpack.i.h.bf16 %v24965_v31 }
 0x963   : > { %19982 = vmatmul.mubr.msk.f32.vlgmr.msra.gmra.mrb[32].mxu0 %vm1303_vm0, %v19231_v2  ;;  %v22182_v2 = vunpack.i.h.bf16 %v24939_v35  ;;  %v20653_v35 = vpack.c.bf16 %v11146_v12, %v11141_v43  ;;  %v22191_v43 = vunpack.i.l.bf16 %v24948_v26  ;;  %v11147_v12 = vsel %vm2655_vm4, %v22167_v47, %v22176_v13 }
 0x964   : > { %20645 = vmatpush1.bf16.msra.mxu0 %v20644_v17  ;;  %10961 = vmatprep.mubr.f32.mxu0 %v26061_v0 }
 0x965   : > { %v24991_v62 = vpop.permute.xlu1 %22209  ;;  %20647 = vmatprep.subr.bf16.mxu0 %v20646_v38  ;;  %v24996_v15 = vpop.permute.xlu0 %22219  ;;  %v11407_v53 = vsel %vm2948_vm5, %v22181_v46, %v22182_v2  ;;  %v22192_v38 = vunpack.i.h.bf16 %v24948_v26  ;;  %v22196_v26 = vunpack.i.l.bf16 %v24965_v31 }
 0x966   : > { %v26059_v14 = vunpack.i.h.bf16 %v24991_v62  ;;  %v22211_v4 = vunpack.i.l.bf16 %v24991_v62 }
 0x967   : > { %19236 = vmatmul.mubr.msk.f32.vlgmr.msra.gmra.mrb[24].mxu0 %vm1303_vm0, %v24984_v37  ;;  %v11411_v61 = vsel %vm2948_vm5, %v22192_v38, %v22186_v45 }
 0x968   : > { %20649 = vmatpush1.bf16.msra.mxu0 %v20648_v52  ;;  %11032 = vmatprep.mubr.f32.mxu0 %v26061_v0  ;;  %v11143_v18 = vsel %vm2655_vm4, %v22211_v4, %v26059_v14  ;;  %v11142_v23 = vsel %vm2655_vm4, %v22157_v36, %v22211_v4  ;;  %v20664_v4 = vpack.c.bf16 %v11412_v25, %v11407_v53  ;;  %v22207_v53 = vunpack.i.h.bf16 %v24970_v19 }
 0x969   : > { %v25006_v21 = vpop.permute.xlu1 %22214  ;;  %20654 = vmatprep.subr.bf16.mxu0 %v20653_v35  ;;  %v25008_v17 = vpop.permute.xlu0 %22224  ;;  %v20657_v40 = vpack.c.bf16 %v11148_v8, %v11143_v18  ;;  %v20659_v36 = vpack.c.bf16 %v11147_v12, %v11142_v23  ;;  %v11406_v18 = vsel %vm2948_vm5, %v22191_v43, %v22181_v46  ;;  %v22206_v46 = vunpack.i.l.bf16 %v24970_v19  ;;  %v25056_v12 = vld [vmem:[%s26165_s3 + $0x28] sm:$0xff] }
 0x96a   : > { %v22217_v47 = vunpack.i.h.bf16 %v25006_v21  ;;  %v22216_v13 = vunpack.i.l.bf16 %v25006_v21  ;;  %v20666_v43 = vpack.c.bf16 %v11411_v61, %v11406_v18  ;;  %v11414_v21 = vsel %vm2948_vm5, %v22196_v26, %v26052_v5 }
 0x96b   : > { %19237 = vmatmul.mubr.msk.f32.vlgmr.msra.gmra.mrb[26].mxu0 %vm1303_vm0, %v24984_v37  ;;  %v11413_v19 = vsel %vm2948_vm5, %v22187_v49, %v22196_v26  ;;  %v22221_v18 = vunpack.i.l.bf16 %v24996_v15  ;;  %v26058_v61 = vunpack.i.h.bf16 %v25008_v17  ;;  %v22226_v49 = vunpack.i.l.bf16 %v25008_v17 }
 0x96c   : > { %20656 = vmatpush1.bf16.msra.mxu0 %v20655_v41  ;;  %11227 = vmatprep.mubr.f32.mxu0 %v26061_v0 }
 0x96d   : > { %v25025_v52 = vpop.permute.xlu1 %22229  ;;  %20658 = vmatprep.subr.bf16.mxu0 %v20657_v40  ;;  %v25029_v35 = vpop.permute.xlu0 %22234 }
 0x96e   : > { %v26053_v41 = vunpack.i.h.bf16 %v25029_v35  ;;  %v22236_v8 = vunpack.i.l.bf16 %v25029_v35  ;;  %v22232_v3 = vunpack.i.h.bf16 %v25025_v52  ;;  %v22231_v34 = vunpack.i.l.bf16 %v25025_v52 }
 0x96f   : > { %19240 = vmatmul.mubr.msk.f32.vlgmr.msra.gmra.mrb[24].mxu0 %vm1303_vm0, %v25022_v28  ;;  %v11680_v52 = vsel %vm26064_vm6, %v22226_v49, %v26058_v61 }
 0x970   : > { %20660 = vmatpush1.bf16.msra.mxu0 %v20659_v36  ;;  %11298 = vmatprep.mubr.f32.mxu0 %v26061_v0  ;;  %v11409_v25 = vsel %vm2948_vm5, %v22236_v8, %v26053_v41  ;;  %v11408_v23 = vsel %vm2948_vm5, %v22182_v2, %v22236_v8  ;;  %v11678_v36 = vsel %vm26064_vm6, %v22216_v13, %v22217_v47 }
 0x971   : > { %v22245_v45 = vpop.permute.xlu1 %22244  ;;  %20665 = vmatprep.subr.bf16.mxu0 %v20664_v4  ;;  %v25045_v38 = vpop.permute.xlu0 %22239  ;;  %v20668_v40 = vpack.c.bf16 %v11414_v21, %v11409_v25  ;;  %v22222_v4 = vunpack.i.h.bf16 %v24996_v15  ;;  %v11673_v8 = vsel %vm26064_vm6, %v22206_v46, %v22207_v53  ;;  %v20670_v21 = vpack.c.bf16 %v11413_v19, %v11408_v23 }
 0x972   : > { %v22242_v15 = vunpack.i.h.bf16 %v25045_v38  ;;  %v22241_v41 = vunpack.i.l.bf16 %v25045_v38  ;;  %v22247_v19 = vunpack.i.h.bf16 %v22245_v45  ;;  %v22246_v38 = vunpack.i.l.bf16 %v22245_v45 }
 0x973   : > { %19241 = vmatmul.mubr.msk.f32.vlgmr.msra.gmra.mrb[26].mxu0 %vm1303_vm0, %v25022_v28  ;;  %v11677_v5 = vsel %vm26064_vm6, %v22222_v4, %v22216_v13  ;;  %v11672_v13 = vsel %vm26064_vm6, %v22221_v18, %v22206_v46  ;;  %v11679_v45 = vsel %vm26064_vm6, %v22217_v47, %v22226_v49  ;;  %v25096_v18 = vld [vmem:[%s26165_s3 + $0x30] sm:$0xff] }
 0x974   : > { %20667 = vmatpush1.bf16.msra.mxu0 %v20666_v43  ;;  %11493 = vmatprep.mubr.f32.mxu0 %v26061_v0  ;;  %v11944_v46 = vsel %vm26063_vm7, %v22241_v41, %v22242_v15 }
 0x975   : > { %v25062_v2 = vpop.permute.xlu1 %22259  ;;  %20669 = vmatprep.subr.bf16.mxu0 %v20668_v40  ;;  %v25068_v43 = vpop.permute.xlu0 %22249  ;;  %v20675_v40 = vpack.c.bf16 %v11678_v36, %v11673_v8  ;;  %v20677_v8 = vpack.c.bf16 %v11677_v5, %v11672_v13  ;;  %v11939_v5 = vsel %vm26063_vm7, %v22231_v34, %v22232_v3  ;;  %v11943_v13 = vsel %vm26063_vm7, %v22247_v19, %v22241_v41 }
 0x976   : > { %v26057_v26 = vunpack.i.h.bf16 %v25062_v2  ;;  %v22261_v25 = vunpack.i.l.bf16 %v25062_v2  ;;  %v20686_v61 = vpack.c.bf16 %v11944_v46, %v11939_v5 }
 0x977   : > { %19244 = vmatmul.mubr.msk.f32.vlgmr.msra.gmra.mrb[24].mxu0 %vm1303_vm0, %v25056_v12 }
 0x978   : > { %20671 = vmatpush1.bf16.msra.mxu0 %v20670_v21  ;;  %11564 = vmatprep.mubr.f32.mxu0 %v26061_v0  ;;  %v11675_v23 = vsel %vm26064_vm6, %v22261_v25, %v26057_v26  ;;  %v11674_v21 = vsel %vm26064_vm6, %v22207_v53, %v22261_v25  ;;  %v22251_v25 = vunpack.i.l.bf16 %v25068_v43 }
 0x979   : > { %v25082_v4 = vpop.permute.xlu1 %22264  ;;  %20676 = vmatprep.subr.bf16.mxu0 %v20675_v40  ;;  %v25084_v36 = vpop.permute.xlu0 %22254  ;;  %v20679_v26 = vpack.c.bf16 %v11680_v52, %v11675_v23  ;;  %v11938_v40 = vsel %vm26063_vm7, %v22246_v38, %v22231_v34  ;;  %v20681_v52 = vpack.c.bf16 %v11679_v45, %v11674_v21 }
 0x97a   : > { %v22266_v34 = vunpack.i.l.bf16 %v25082_v4  ;;  %v20688_v53 = vpack.c.bf16 %v11943_v13, %v11938_v40  ;;  %v11945_v46 = vsel %vm26063_vm7, %v22242_v15, %v22251_v25  ;;  %v26167_v1 = vunpack.i.h.bf16 %v25082_v4 }
 0x97b   : > { %19245 = vmatmul.mubr.msk.f32.vlgmr.msra.gmra.mrb[26].mxu0 %vm1303_vm0, %v25056_v12 }
 0x97c   : > { %20678 = vmatpush1.bf16.msra.mxu0 %v20677_v8  ;;  %11759 = vmatprep.mubr.f32.mxu0 %v26061_v0 }
 0x97d   : > { %v25103_v23 = vpop.permute.xlu1 %22279  ;;  %20680 = vmatprep.subr.bf16.mxu0 %v20679_v26  ;;  %v22270_v8 = vpop.permute.xlu0 %22269  ;;  %v22256_v26 = vunpack.i.l.bf16 %v25084_v36 }
 0x97e   : > { %v26060_v47 = vunpack.i.h.bf16 %v25103_v23  ;;  %v22281_v49 = vunpack.i.l.bf16 %v25103_v23  ;;  %v22272_v38 = vunpack.i.h.bf16 %v22270_v8  ;;  %v22271_v41 = vunpack.i.l.bf16 %v22270_v8 }
 0x97f   : > { %19248 = vmatmul.mubr.msk.f32.vlgmr.msra.gmra.mrb[24].mxu0 %vm1303_vm0, %v25096_v18 }
 0x980   : > { %20682 = vmatpush1.bf16.msra.mxu0 %v20681_v52  ;;  %11830 = vmatprep.mubr.f32.mxu0 %v26061_v0  ;;  %v11941_v21 = vsel %vm26063_vm7, %v22281_v49, %v26060_v47  ;;  %v10883_v45 = vsel %vm2362_vm3, %v22152_v27, %v22272_v38  ;;  %v10878_v5 = vsel %vm2362_vm3, %v22202_v22, %v22271_v41  ;;  %v26166_v52 = vunpack.i.h.bf16 %v25068_v43  ;;  %v25140_v38 = vld [vmem:[%s26165_s3 + $0x38] sm:$0xff] }
 0x981   : > { %v22285_v8 = vpop.permute.xlu1 %22284  ;;  %20687 = vmatprep.subr.bf16.mxu0 %v20686_v61  ;;  %v11940_v13 = vsel %vm26063_vm7, %v22232_v3, %v22281_v49  ;;  %v22275_v15 = vpop.permute.xlu0 %22274  ;;  %v20651_v19 = vpack.c.bf16 %v10883_v45, %v10878_v5  ;;  %v12210_v22 = vsel %vm26168_vm13, %v22266_v34, %v26167_v1  ;;  %v26169_v61 = vunpack.i.h.bf16 %v24991_v62  ;;  %vm26183_vm13 = vmmov %vm26182_vm8 }
 0x982   : > { %v11946_v40 = vsel %vm26063_vm7, %v22251_v25, %v26166_v52  ;;  %v22287_v47 = vunpack.i.h.bf16 %v22285_v8  ;;  %v22286_v0 = vunpack.i.l.bf16 %v22285_v8  ;;  %v22277_v44 = vunpack.i.h.bf16 %v22275_v15 }
 0x983   : > { %v22276_v14 = vunpack.i.l.bf16 %v22275_v15  ;;  %19249 = vmatmul.mubr.msk.f32.vlgmr.msra.gmra.mrb[26].mxu0 %vm1303_vm0, %v25096_v18  ;;  %v20690_v27 = vpack.c.bf16 %v11946_v40, %v11941_v21  ;;  %v26170_v3 = vunpack.i.h.bf16 %v24925_v6  ;;  %20652 = vmatpush3.bf16.msra.mxu1 %v20651_v19  ;;  %v26171_v41 = vunpack.i.h.bf16 %v25084_v36 }
 0x984   : > { %v11144_v25 = vsel %vm2655_vm4, %v26169_v61, %v22286_v0  ;;  %20689 = vmatpush1.bf16.msra.mxu0 %v20688_v53  ;;  %v26173_v5 = vmov 0.0|0.0   ;;  %v20692_v62 = vpack.c.bf16 %v11945_v46, %v11940_v13  ;;  %v12209_v0 = vsel %vm26174_vm15, %v22277_v44, %v22266_v34  ;;  %vm26186_vm15 = vmmov %vm26182_vm8 }
 0x985   : > { %v11149_v49 = vsel %vm2655_vm4, %v26170_v3, %v22287_v47  ;;  %v12205_v21 = vsel %vm26172_vm14, %v22256_v26, %v26171_v41  ;;  %v22290_v45 = vpop.permute.xlu1 %22289  ;;  %20691 = vmatprep.subr.bf16.mxu0 %v20690_v27  ;;  %20661 = vmatprep.subr.bf16.mxu1 %v26173_v5  ;;  %v12204_v6 = vsel %vm26175_vm12, %v22276_v14, %v22256_v26  ;;  %v22295_v19 = vpop.permute.xlu0 %22294  ;;  %v26176_v53 = vmov 0.0   ;;  %vm26185_vm14 = vmmov %vm26182_vm8 }
 0x986   : > { %v20662_v8 = vpack.c.bf16 %v11149_v49, %v11144_v25  ;;  %v22292_v52 = vunpack.i.h.bf16 %v22290_v45  ;;  %v22291_v47 = vunpack.i.l.bf16 %v22290_v45  ;;  %12025 = vmatprep.mubr.f32.mxu0 %v26176_v53  ;;  %v22297_v40 = vunpack.i.h.bf16 %v22295_v19  ;;  %19989 = vmatmul.mubr.msk.f32.vlgmr.msra.gmra.mrb[24].mxu1 %vm1303_vm0, %v24984_v37  ;;  %vm26189_vm12 = vmmov %vm26182_vm8 }
 0x987   : > { %v22296_v15 = vunpack.i.l.bf16 %v22295_v19  ;;  %19252 = vmatmul.mubr.msk.f32.vlgmr.msra.gmra.mrb[24].mxu0 %vm1303_vm0, %v25140_v38  ;;  %v20697_v27 = vpack.c.bf16 %v12210_v22, %v12205_v21  ;;  %v26177_v46 = vunpack.i.h.bf16 %v25029_v35  ;;  %v26178_v14 = vunpack.i.h.bf16 %v24965_v31  ;;  %19995 = vmatprep.mubr.msk.f32.mxu1 %vm22872_vm11, %v26176_v53  ;;  %v19255_v21 = vld [vmem:[%s26165_s3 + $0x40] sm:$0xff]  ;;  %s26198_s3 = sld [smem:[#allocation51_spill]] }
 0x988   : > { %20663 = vmatpush3.bf16.msra.mxu1 %v20662_v8  ;;  %20693 = vmatpush1.bf16.msra.mxu0 %v20692_v62  ;;  %v20699_v44 = vpack.c.bf16 %v12209_v0, %v12204_v6  ;;  %v26179_v1 = vunpack.i.h.bf16 %v25062_v2  ;;  %v26180_v22 = vunpack.i.h.bf16 %v25008_v17  ;;  %v26181_v2 = vunpack.i.h.bf16 %v25084_v36 }
 0x989   : > { %v11410_v34 = vsel %vm2948_vm5, %v26177_v46, %v22291_v47  ;;  %v11415_v26 = vsel %vm2948_vm5, %v26178_v14, %v22292_v52  ;;  %v22305_v13 = vpop.permute.xlu1 %22304  ;;  %20698 = vmatprep.subr.bf16.mxu0 %v20697_v27  ;;  %v22300_v3 = vpop.permute.xlu0 %22299  ;;  %20672 = vmatprep.subr.bf16.mxu1 %v26173_v5  ;;  %v26184_v8 = vunpack.i.h.bf16 %v25082_v4  ;;  %v26187_v27 = vunpack.i.h.bf16 %v25103_v23 }
 0x98a   : > { %v20673_v37 = vpack.c.bf16 %v11415_v26, %v11410_v34  ;;  %v11676_v35 = vsel %vm26064_vm6, %v26179_v1, %v22296_v15  ;;  %v11681_v31 = vsel %vm26064_vm6, %v26180_v22, %v22297_v40  ;;  %v22307_v61 = vunpack.i.h.bf16 %v22305_v13  ;;  %12096 = vmatprep.mubr.f32.mxu0 %v26176_v53 }
 0x98b   : > { %v22306_v25 = vunpack.i.l.bf16 %v22305_v13  ;;  %v22302_v49 = vunpack.i.h.bf16 %v22300_v3  ;;  %v22301_v41 = vunpack.i.l.bf16 %v22300_v3  ;;  %19996 = vmatmul.mubr.msk.f32.vlgmr.msra.gmra.mrb[26].mxu1 %vm1303_vm0, %v25022_v28  ;;  %19253 = vmatmul.mubr.msk.f32.vlgmr.msra.gmra.mrb[26].mxu0 %vm1303_vm0, %v25140_v38  ;;  %v20684_v28 = vpack.c.bf16 %v11681_v31, %v11676_v35 }
 0x98c   : > { %20674 = vmatpush3.bf16.msra.mxu1 %v20673_v37  ;;  %20700 = vmatpush1.bf16.msra.mxu0 %v20699_v44  ;;  %v26188_v34 = vunpack.i.h.bf16 %v25068_v43 }
 0x98d   : > { %v12206_v17 = vsel %vm26182_vm8, %v26181_v2, %v22306_v25  ;;  %v12207_v45 = vsel %vm26183_vm13, %v22306_v25, %v22307_v61  ;;  %v12211_v62 = vsel %vm26185_vm14, %v26184_v8, %v22301_v41  ;;  %v22310_v0 = vpop.permute.xlu1 %22309  ;;  %20002 = vmatprep.mubr.msk.f32.mxu1 %vm22872_vm11, %v26176_v53  ;;  %20683 = vmatprep.subr.bf16.mxu1 %v26173_v5  ;;  %v22315_v47 = vpop.permute.xlu0 %22314 }
 0x98e   : > { %v12212_v36 = vsel %vm26186_vm15, %v22301_v41, %v22302_v49  ;;  %v22312_v6 = vunpack.i.h.bf16 %v22310_v0  ;;  %v22311_v52 = vunpack.i.l.bf16 %v22310_v0  ;;  %12291 = vmatprep.mubr.f32.mxu0 %v26176_v53  ;;  %v20703_v40 = vpack.c.bf16 %v12211_v62, %v12206_v17 }
 0x98f   : > { %v20701_v19 = vpack.c.bf16 %v12212_v36, %v12207_v45  ;;  %v22317_v15 = vunpack.i.h.bf16 %v22315_v47  ;;  %v22316_v4 = vunpack.i.l.bf16 %v22315_v47  ;;  %20003 = vmatmul.mubr.msk.f32.vlgmr.msra.gmra.mrb[28].mxu1 %vm1303_vm0, %v25056_v12  ;;  %19256 = vmatmul.mubr.msk.f32.vlgmr.msra.gmra.mrb[24].mxu0 %vm1303_vm0, %v19255_v21 }
 0x990   : > { %v11942_v46 = vsel %vm26063_vm7, %v26187_v27, %v22311_v52  ;;  %v11947_v14 = vsel %vm26063_vm7, %v26188_v34, %v22312_v6  ;;  %20685 = vmatpush3.bf16.msra.mxu1 %v20684_v28  ;;  %20009 = vmatprep.mubr.msk.f32.mxu1 %vm22872_vm11, %v26176_v53 }
 0x991   : > { %20702 = vmatprep.subr.bf16.mxu0 %v20701_v19  ;;  %v20695_v26 = vpack.c.bf16 %v11947_v14, %v11942_v46  ;;  %20694 = vmatprep.subr.bf16.mxu1 %v26173_v5  ;;  %v12208_v12 = vsel %vm26189_vm12, %v22307_v61, %v22316_v4  ;;  %v12213_v23 = vsel %vm26182_vm8, %v22302_v49, %v22317_v15 }
 0x992   : > { %20704 = vmatpush1.bf16.msra.mxu0 %v20703_v40  ;;  %12362 = vmatprep.mubr.f32.mxu0 %v26176_v53  ;;  %v20706_v43 = vpack.c.bf16 %v12213_v23, %v12208_v12 }
 0x993   : > { %20010 = vmatmul.mubr.msk.f32.vlgmr.msra.gmra.mrb[30].mxu1 %vm1303_vm0, %v25096_v18 }
 0x994   : > { %20696 = vmatpush3.bf16.msra.mxu1 %v20695_v26  ;;  %20016 = vmatprep.mubr.msk.f32.mxu1 %vm22872_vm11, %v26176_v53 }
 0x995   : > { %19257 = vmatmul.mubr.msk.f32.vlgmr.msra.gmra.mrb[26].mxu0 %vm1303_vm0, %v19255_v21  ;;  %20705 = vmatprep.subr.bf16.mxu1 %v26173_v5 }
 0x996   : > { %12885 = vmatprep.mubr.f32.mxu0 %v26176_v53 }
 0x997   : > { %20017 = vmatmul.mubr.msk.f32.vlgmr.msra.gmra.mrb[32].mxu1 %vm1303_vm0, %v25140_v38 }
 0x998   : > { %20707 = vmatpush3.bf16.msra.mxu1 %v20706_v43  ;;  %20023 = vmatprep.mubr.msk.f32.mxu1 %vm22872_vm11, %v26176_v53 }
 0x99b   : > { %20024 = vmatmul.mubr.msk.f32.vlgmr.msra.gmra.mrb[34].mxu1 %vm1303_vm0, %v19255_v21 }
 0x99c   : > { %12644 = vmatprep.mubr.f32.mxu1 %v26176_v53 }
 0x99e   : > { %v25214_v18 = vpop.permute.xlu1 %12446  ;;  %v1301_v13 = vpop.permute.xlu0 %1300 }
 0x99f   : > { %v1376_v37 = vadd.f32 %v23837_v58, %v1301_v13  ;;  %v1374_v44 = vadd.f32 %v23834_v57, %v1301_v13  ;;  %v1447_v22 = vadd.f32 %v23831_v56, %v1301_v13  ;;  %v1445_v57 = vadd.f32 %v23829_v55, %v1301_v13 }
 0x9a0   : > { %v1516_v55 = vadd.f32 %v23840_v59, %v1301_v13 }
 0x9a1   : > { %v12512_v35 = vmul.f32 0.05, %v1376_v37  ;;  %vm12488_vm13 = vcmp.ge.f32.partialorder %v1376_v37, 0.0  ;;  %v12511_v61 = vmul.f32 0.05, %v1374_v44  ;;  %vm12487_vm14 = vcmp.ge.f32.partialorder %v1374_v44, 0.0 }
 0x9a2   : > { %v4265_v1 = vpop.permute.xlu1 %4264  ;;  %v12514_v56 = vmul.f32 0.05, %v1447_v22  ;;  %vm12490_vm8 = vcmp.ge.f32.partialorder %v1447_v22, 0.0  ;;  %vm12489_vm6 = vcmp.ge.f32.partialorder %v1445_v57, 0.0  ;;  %v12513_v8 = vmul.f32 0.05, %v1445_v57 }
 0x9a3   : > { %v4339_v38 = vadd.f32 %v24169_v33, %v4265_v1  ;;  %v4337_v31 = vadd.f32 %v24164_v24, %v4265_v1  ;;  %v4410_v25 = vadd.f32 %v24185_v54, %v4265_v1  ;;  %v12536_v58 = vsel %vm12488_vm13, %v1376_v37, %v12512_v35 }
 0x9a4   : > { %v12535_v2 = vsel %vm12487_vm14, %v1374_v44, %v12511_v61  ;;  %v4408_v45 = vadd.f32 %v24182_v50, %v4265_v1  ;;  %v1518_v54 = vadd.f32 %v23842_v60, %v1301_v13  ;;  %v4481_v62 = vadd.f32 %v24193_v9, %v4265_v1 }
 0x9a5   : > { %vm12494_vm15 = vcmp.ge.f32.partialorder %v4339_v38, 0.0  ;;  %v12518_v3 = vmul.f32 0.05, %v4339_v38  ;;  %vm12493_vm12 = vcmp.ge.f32.partialorder %v4337_v31, 0.0  ;;  %v12517_v49 = vmul.f32 0.05, %v4337_v31 }
 0x9a6   : > { %vm12496_vm7 = vcmp.ge.f32.partialorder %v4410_v25, 0.0  ;;  %v12520_v24 = vmul.f32 0.05, %v4410_v25  ;;  %v25227_v0 = vsel %vm12490_vm8, %v1447_v22, %v12514_v56  ;;  %vm12495_vm13 = vcmp.ge.f32.partialorder %v4408_v45, 0.0 }
 0x9a7   : > { %v12542_v41 = vsel %vm12494_vm15, %v4339_v38, %v12518_v3  ;;  %v12541_v17 = vsel %vm12493_vm12, %v4337_v31, %v12517_v49  ;;  %v12519_v36 = vmul.f32 0.05, %v4408_v45  ;;  %v25233_v50 = vsel %vm12489_vm6, %v1445_v57, %v12513_v8 }
 0x9a8   : > { %v20708_v21 = vpack.c.bf16 %v12542_v41, %v12536_v58  ;;  %v20710_v33 = vpack.c.bf16 %v12541_v17, %v12535_v2  ;;  %v25229_v28 = vsel %vm12496_vm7, %v4410_v25, %v12520_v24  ;;  %vm12492_vm14 = vcmp.ge.f32.partialorder %v1518_v54, 0.0 }
 0x9a9   : > { %v20716_v6 = vpack.c.bf16 %v25229_v28, %v25227_v0  ;;  %v25235_v60 = vsel %vm12495_vm13, %v4408_v45, %v12519_v36  ;;  %vm12498_vm15 = vcmp.ge.f32.partialorder %v4481_v62, 0.0  ;;  %v12516_v59 = vmul.f32 0.05, %v1518_v54  ;;  %v12561_v36 = vld [vmem:[%s26190_s26] sm:$0xff] }
 0x9aa   : > { %20709 = vmatprep.subr.bf16.mxu1 %v20708_v21  ;;  %v20718_v9 = vpack.c.bf16 %v25235_v60, %v25233_v50  ;;  %v12522_v52 = vmul.f32 0.05, %v4481_v62  ;;  %v4479_v47 = vadd.f32 %v24190_v7, %v4265_v1  ;;  %v12515_v19 = vmul.f32 0.05, %v1516_v55 }
 0x9ab   : > { %20711 = vmatpush1.bf16.msra.mxu1 %v20710_v33  ;;  %v25240_v40 = vsel %vm12492_vm14, %v1518_v54, %v12516_v59  ;;  %vm12491_vm7 = vcmp.ge.f32.partialorder %v1516_v55, 0.0 }
 0x9ac   : > { %v25242_v15 = vsel %vm12498_vm15, %v4481_v62, %v12522_v52  ;;  %vm12497_vm6 = vcmp.ge.f32.partialorder %v4479_v47, 0.0  ;;  %v12521_v27 = vmul.f32 0.05, %v4479_v47  ;;  %v25246_v46 = vsel %vm12491_vm7, %v1516_v55, %v12515_v19  ;;  %v12812_v19 = vld [vmem:[%s26192_s1] sm:$0xf]  ;;  %s26195_s1 = smov 127  }
 0x9ad   : > { %v20724_v4 = vpack.c.bf16 %v25242_v15, %v25240_v40 }
 0x9ae   : > { %v25248_v34 = vsel %vm12497_vm6, %v4479_v47, %v12521_v27 }
 0x9af   : > { %v20726_v14 = vpack.c.bf16 %v25248_v34, %v25246_v46 }
 0xa1e   : > { %v10367_v26 = vpop.f32.mrb[28].mxu0 }
 0xa1f   : > { %v19969_v7 = vpop.f32.mrb[29].mxu0 }
 0xa20   : > { %v7187_v7 = vpop.permute.xlu0 %7186 }
 0xa2a   : > { %v10582_v12 = vpop.f32.mrb[30].mxu0 }
 0xa2b   : > { %v10583_v23 = vadd.f32 %v10582_v12, %v10367_v26  ;;  %v19976_v43 = vpop.f32.mrb[31].mxu0  ;;  %v12562_v26 = vld [vmem:[%s26190_s26 + $0x8] sm:$0xff]  ;;  %v7261_v12 = vadd.f32 %v24562_v39, %v7187_v7 }
 0xa2c   : > { %v7259_v43 = vadd.f32 %v24560_v42, %v7187_v7  ;;  %v7332_v42 = vadd.f32 %v24580_v11, %v7187_v7 }
 0xa2d   : > { %vm12500_vm8 = vcmp.ge.f32.partialorder %v7261_v12, 0.0 }
 0xa2e   : > { %vm12499_vm14 = vcmp.ge.f32.partialorder %v7259_v43, 0.0  ;;  %vm12502_vm15 = vcmp.ge.f32.partialorder %v7332_v42, 0.0 }
 0xa36   : > { %v10837_v13 = vpop.f32.mrb[32].mxu0 }
 0xa37   : > { %v10845_v37 = vadd.f32 %v10837_v13, %v10583_v23  ;;  %v19983_v44 = vpop.f32.mrb[33].mxu0 }
 0xa59   : > { %v11105_v1 = vpop.f32.mrb[24].mxu1 }
 0xa5a   : > { %v11113_v35 = vadd.f32 %v11105_v1, %v10845_v37  ;;  %v19990_v22 = vpop.f32.mrb[25].mxu1 }
 0xa5e   : > { %v11371_v38 = vpop.f32.mrb[26].mxu1 }
 0xa5f   : > { %v11379_v31 = vadd.f32 %v11371_v38, %v11113_v35  ;;  %v19997_v61 = vpop.f32.mrb[27].mxu1  ;;  %v12524_v35 = vmul.f32 0.05, %v7261_v12  ;;  %v12523_v38 = vmul.f32 0.05, %v7259_v43 }
 0xa62   : > { %v11637_v25 = vpop.f32.mrb[28].mxu1  ;;  %v12293_v3 = vpop.f32.mrb[24].mxu0 }
 0xa63   : > { %v11645_v49 = vadd.f32 %v11637_v25, %v11379_v31  ;;  %v12449_v58 = vadd.f32 %v25214_v18, %v12293_v3  ;;  %v12295_v57 = vpop.f32.mrb[25].mxu0  ;;  %v20004_v41 = vpop.f32.mrb[29].mxu1 }
 0xa64   : > { %v12450_v2 = vadd.f32 %v25214_v18, %v12295_v57 }
 0xa65   : > { %12459 = vrot.lane.b32.xlu1 %v12449_v58, %s26191_s22 }
 0xa66   : > { %v11903_v17 = vpop.f32.mrb[30].mxu1  ;;  %12461 = vrot.lane.b32.xlu0 %v12450_v2, %s26191_s22  ;;  %v12547_v2 = vsel %vm12499_vm14, %v7259_v43, %v12523_v38 }
 0xa67   : > { %v11911_v56 = vadd.f32 %v11903_v17, %v11645_v49  ;;  %v20011_v33 = vpop.f32.mrb[31].mxu1  ;;  %v7330_v17 = vadd.f32 %v24577_v10, %v7187_v7  ;;  %v7403_v10 = vadd.f32 %v24594_v16, %v7187_v7 }
 0xa68   : > { %v12364_v21 = vpop.f32.mrb[26].mxu0 }
 0xa69   : > { %v12451_v24 = vadd.f32 %v25214_v18, %v12364_v21  ;;  %v12366_v45 = vpop.f32.mrb[27].mxu0  ;;  %v12526_v21 = vmul.f32 0.05, %v7332_v42 }
 0xa6a   : > { %v12452_v54 = vadd.f32 %v25214_v18, %v12366_v45  ;;  %v12169_v8 = vpop.f32.mrb[32].mxu1 }
 0xa6b   : > { %12463 = vrot.lane.b32.xlu1 %v12451_v24, %s26191_s22  ;;  %v12177_v62 = vadd.f32 %v12169_v8, %v11911_v56  ;;  %v20018_v55 = vpop.f32.mrb[33].mxu1  ;;  %v12525_v24 = vmul.f32 0.05, %v7330_v17  ;;  %v12550_v45 = vsel %vm12502_vm15, %v7332_v42, %v12526_v21  ;;  %vm13060_vm15 = vcmask 1043456  }
 0xa6c   : > { %12465 = vrot.lane.b32.xlu0 %v12452_v54, %s26191_s22 }
 0xa6e   : > { %v12435_v59 = vpop.f32.mrb[34].mxu1 }
 0xa6f   : > { %v12443_v52 = vadd.f32 %v12435_v59, %v12177_v62  ;;  %v20025_v47 = vpop.f32.mrb[35].mxu1  ;;  %v7401_v59 = vadd.f32 %v24589_v20, %v7187_v7 }
 0xa70   : > { %12565 = vperm.xlu0 %21626, %v12561_v36   ;;  %v12528_v47 = vmul.f32 0.05, %v7403_v10 }
 0xa71   : > { %v12453_v27 = vadd.f32 %v25214_v18, %v12443_v52  ;;  %vm12503_vm14 = vcmp.ge.f32.partialorder %v7401_v59, 0.0 }
 0xa73   : > { %12467 = vrot.lane.b32.xlu1 %v12453_v27, %s26191_s22  ;;  %s26194_s22 = smov %s26193_s11 }
 0xa74   : > { %12815 = vperm.xlu0 %21626, %v12812_v19   ;;  %v12560_v0 = vld [vmem:[%s26194_s22 + $0x8] sm:$0xff] }
 0xa77   : > { %12570 = vperm.xlu1 %21627, %v12562_v26  }
 0xad7   : > { %v12460_v23 = vpop.permute.xlu1 %12459 }
 0xad8   : > { %v12479_v13 = vsel %vm4143_vm9, 0.0, %v12460_v23  ;;  %v12462_v37 = vpop.permute.xlu0 %12461 }
 0xad9   : > { %v12481_v44 = vmul.f32 %v12479_v13, %v23861_v32  ;;  %v12469_v1 = vsel %vm4143_vm9, %v12460_v23, %v12462_v37 }
 0xada   : > { %v12482_v18 = vmul.f32 %v12469_v1, %v23857_v29  ;;  %v12548_v29 = vsel %vm12500_vm8, %v7261_v12, %v12524_v35  ;;  %vm12501_vm8 = vcmp.ge.f32.partialorder %v7330_v17, 0.0 }
 0xadb   : > { %vm12505_vm12 = vcmp.ge.f32.partialorder %v12481_v44, 0.0  ;;  %v12529_v22 = vmul.f32 0.05, %v12481_v44 }
 0xadc   : > { %v12530_v31 = vmul.f32 0.05, %v12482_v18  ;;  %vm12506_vm13 = vcmp.ge.f32.partialorder %v12482_v18, 0.0 }
 0xadd   : > { %v12464_v61 = vpop.permute.xlu1 %12463  ;;  %v12553_v39 = vsel %vm12505_vm12, %v12481_v44, %v12529_v22  ;;  %vm12573_vm12 = vcmask 261120  }
 0xade   : > { %v12470_v25 = vsel %vm4143_vm9, %v12462_v37, %v12464_v61  ;;  %v12466_v3 = vpop.permute.xlu0 %12465  ;;  %v12554_v58 = vsel %vm12506_vm13, %v12482_v18, %v12530_v31  ;;  %v20714_v56 = vpack.c.bf16 %v12553_v39, %v12547_v2  ;;  %v12811_v18 = vld [vmem:[#allocation19] sm:$0xf] }
 0xadf   : > { %v12483_v32 = vmul.f32 %v12470_v25, %v23859_v30  ;;  %v12471_v49 = vsel %vm4143_vm9, %v12464_v61, %v12466_v3  ;;  %v20712_v41 = vpack.c.bf16 %v12554_v58, %v12548_v29  ;;  %v12559_v30 = vld [vmem:[%s26193_s11] sm:$0xff]  ;;  %s26196_s11 = smov 126  }
 0xae0   : > { %v12484_v57 = vmul.f32 %v12471_v49, %v23871_v48 }
 0xae1   : > { %v12531_v11 = vmul.f32 0.05, %v12483_v32  ;;  %20713 = vmatprep.subr.bf16.mxu1 %v20712_v41  ;;  %vm12507_vm6 = vcmp.ge.f32.partialorder %v12483_v32, 0.0 }
 0xae2   : > { %v12532_v33 = vmul.f32 0.05, %v12484_v57  ;;  %vm12508_vm7 = vcmp.ge.f32.partialorder %v12484_v57, 0.0  ;;  %20715 = vmatpush1.bf16.msra.mxu1 %v20714_v56 }
 0xae3   : > { %20717 = vmatprep.subr.bf16.mxu1 %v20716_v6  ;;  %v12555_v54 = vsel %vm12507_vm6, %v12483_v32, %v12531_v11  ;;  %v12549_v6 = vsel %vm12501_vm8, %v7330_v17, %v12525_v24  ;;  %vm26204_vm6 = vcmask 613376   ;;  %vm26207_vm8 = vcmask 605184  }
 0xae4   : > { %v12556_v48 = vsel %vm12508_vm7, %v12484_v57, %v12532_v33  ;;  %v20722_v52 = vpack.c.bf16 %v12555_v54, %v12549_v6  ;;  %vm13056_vm7 = vcmask 31744  }
 0xae5   : > { %v12468_v8 = vpop.permute.xlu1 %12467  ;;  %19259 = vmatmul.mubr.msk.f32.vlgmr.msra.gmra.mrb[36].mxu1 %vm12573_vm12, %v12559_v30  ;;  %v20720_v62 = vpack.c.bf16 %v12556_v48, %v12550_v45 }
 0xae6   : > { %v12472_v55 = vsel %vm4143_vm9, %v12466_v3, %v12468_v8  ;;  %v12480_v36 = vsel %vm4166_vm10, %v12468_v8, 0.0  ;;  %20719 = vmatpush1.bf16.msra.mxu1 %v20718_v9  ;;  %12650 = vmatprep.mubr.f32.mxu1 %v26176_v53  ;;  %vm12504_vm9 = vcmp.ge.f32.partialorder %v7403_v10, 0.0 }
 0xae7   : > { %v12485_v28 = vmul.f32 %v12472_v55, %v23876_v51  ;;  %v12486_v16 = vmul.f32 %v12480_v36, %v23881_v63  ;;  %20721 = vmatprep.subr.bf16.mxu1 %v20720_v62  ;;  %v12527_v63 = vmul.f32 0.05, %v7401_v59  ;;  %v12552_v50 = vsel %vm12504_vm9, %v7403_v10, %v12528_v47  ;;  %vm26208_vm9 = vmmov %vm26207_vm8 }
 0xae9   : > { %v12533_v19 = vmul.f32 0.05, %v12485_v28  ;;  %v12534_v27 = vmul.f32 0.05, %v12486_v16  ;;  %19260 = vmatmul.mubr.msk.f32.gmra.mrb[38].mxu1 %vm12573_vm12, %v12560_v0  ;;  %vm12510_vm10 = vcmp.ge.f32.partialorder %v12486_v16, 0.0  ;;  %vm12509_vm13 = vcmp.ge.f32.partialorder %v12485_v28, 0.0 }
 0xaea   : > { %20723 = vmatpush1.bf16.msra.mxu1 %v20722_v52  ;;  %12721 = vmatprep.mubr.f32.mxu1 %v26176_v53  ;;  %v12551_v9 = vsel %vm12503_vm14, %v7401_v59, %v12527_v63 }
 0xaeb   : > { %20725 = vmatprep.subr.bf16.mxu1 %v20724_v4  ;;  %v12558_v51 = vsel %vm12510_vm10, %v12486_v16, %v12534_v27  ;;  %v12557_v20 = vsel %vm12509_vm13, %v12485_v28, %v12533_v19 }
 0xaec   : > { %v20728_v60 = vpack.c.bf16 %v12558_v51, %v12552_v50  ;;  %v20730_v26 = vpack.c.bf16 %v12557_v20, %v12551_v9 }
 0xaed   : > { %19261 = vmatmul.mubr.msk.f32.vlgmr.msra.gmra.mrb[40].mxu1 %vm12573_vm12, %v12559_v30 }
 0xaee   : > { %20727 = vmatpush1.bf16.msra.mxu1 %v20726_v14  ;;  %12727 = vmatprep.mubr.f32.mxu1 %v26176_v53 }
 0xaef   : > { %20729 = vmatprep.subr.bf16.mxu1 %v20728_v60  ;;  %v12566_v34 = vpop.permute.xlu0 %12565 }
 0xaf1   : > { %19262 = vmatmul.mubr.msk.f32.gmra.mrb[42].mxu1 %vm12573_vm12, %v12560_v0 }
 0xaf2   : > { %20731 = vmatpush1.bf16.msra.mxu1 %v20730_v26  ;;  %12798 = vmatprep.mubr.f32.mxu1 %v26176_v53 }
 0xaf3   : > { %v12816_v21 = vpop.permute.xlu0 %12815 }
 0xaf5   : > { %19263 = vmatmul.mubr.msk.f32.vlgmr.msra.gmra.mrb[44].mxu1 %vm12573_vm12, %v12559_v30 }
 0xaf6   : > { %12804 = vmatprep.mubr.f32.mxu1 %v26176_v53  ;;  %v12571_v4 = vpop.permute.xlu1 %12570 }
 0xaf9   : > { %19264 = vmatmul.mubr.msk.f32.gmra.mrb[46].mxu1 %vm12573_vm12, %v12560_v0  ;;  %v15327_v0 = vld [vmem:[%s26198_s3] sm:$0xf]  ;;  %vm26205_vm12 = vmmov %vm26204_vm6  ;;  %s22876_s3 = smov 84  }
 0xafa   : > { %12956 = vmatprep.mubr.f32.mxu1 %v26176_v53 }
 0xbb8   : > { %v12646_v40 = vpop.f32.mrb[36].mxu1 }
 0xbb9   : > { %v12648_v15 = vpop.f32.mrb[37].mxu1  ;;  %v25315_v43 = vadd.f32 %v12646_v40, %v12566_v34 }
 0xbba   : > { %v25311_v12 = vadd.f32 %v12648_v15, %v12566_v34 }
 0xbbc   : > { %v12652_v46 = vpop.f32.mrb[38].mxu1 }
 0xbbd   : > { %v25309_v14 = vadd.f32 %v12652_v46, %v12571_v4  ;;  %v12654_v7 = vpop.f32.mrb[39].mxu1 }
 0xbbe   : > { %v25313_v23 = vadd.f32 %v12654_v7, %v12571_v4 }
 0xbbf   : > { %v20734_v44 = vpack.c.bf16 %v25309_v14, %v25315_v43 }
 0xbc0   : > { %v20732_v13 = vpack.c.bf16 %v25313_v23, %v25311_v12  ;;  %v12723_v37 = vpop.f32.mrb[40].mxu1 }
 0xbc1   : > { %v12725_v1 = vpop.f32.mrb[41].mxu1  ;;  %v25328_v42 = vadd.f32 %v12723_v37, %v12566_v34 }
 0xbc2   : > { %20733 = vmatprep.subr.bf16.mxu0 %v20732_v13  ;;  %v25323_v31 = vadd.f32 %v12725_v1, %v12566_v34 }
 0xbc3   : > { %20735 = vmatpush1.bf16.msra.mxu0 %v20734_v44 }
 0xbc4   : > { %v12729_v35 = vpop.f32.mrb[42].mxu1 }
 0xbc5   : > { %v25321_v22 = vadd.f32 %v12729_v35, %v12571_v4  ;;  %v12731_v38 = vpop.f32.mrb[43].mxu1 }
 0xbc6   : > { %v25325_v61 = vadd.f32 %v12731_v38, %v12571_v4  ;;  %19265 = vmatmul.mubr.msk.f32.vlgmr.msra.gmra.mrb[34].mxu0 %vm1303_vm0, %v12811_v18 }
 0xbc7   : > { %13027 = vmatprep.mubr.f32.mxu0 %v26176_v53  ;;  %v20738_v3 = vpack.c.bf16 %v25321_v22, %v25328_v42 }
 0xbc8   : > { %v20736_v39 = vpack.c.bf16 %v25325_v61, %v25323_v31  ;;  %v12800_v25 = vpop.f32.mrb[44].mxu1 }
 0xbc9   : > { %v12802_v32 = vpop.f32.mrb[45].mxu1  ;;  %v25342_v2 = vadd.f32 %v12800_v25, %v12566_v34 }
 0xbca   : > { %20737 = vmatprep.subr.bf16.mxu1 %v20736_v39  ;;  %v25337_v57 = vadd.f32 %v12802_v32, %v12566_v34 }
 0xbcb   : > { %20739 = vmatpush1.bf16.msra.mxu1 %v20738_v3 }
 0xbcc   : > { %v12806_v49 = vpop.f32.mrb[46].mxu1 }
 0xbcd   : > { %v25335_v29 = vadd.f32 %v12806_v49, %v12571_v4  ;;  %v12808_v58 = vpop.f32.mrb[47].mxu1 }
 0xbce   : > { %v25339_v41 = vadd.f32 %v12808_v58, %v12571_v4  ;;  %19266 = vmatmul.mubr.msk.f32.vlgmr.msra.gmra.mrb[48].mxu1 %vm1303_vm0, %v12811_v18 }
 0xbcf   : > { %13135 = vmatprep.mubr.f32.mxu1 %v26176_v53  ;;  %v20742_v56 = vpack.c.bf16 %v25335_v29, %v25342_v2 }
 0xbd0   : > { %v20740_v17 = vpack.c.bf16 %v25339_v41, %v25337_v57 }
 0xbd2   : > { %20741 = vmatprep.subr.bf16.mxu0 %v20740_v17 }
 0xbd3   : > { %20743 = vmatpush1.bf16.msra.mxu0 %v20742_v56 }
 0xbd6   : > { %19267 = vmatmul.mubr.msk.f32.vlgmr.msra.gmra.mrb[36].mxu0 %vm1303_vm0, %v12811_v18 }
 0xbd7   : > { %13206 = vmatprep.mubr.f32.mxu0 %v26176_v53 }
 0xc99   : > { %v12887_v11 = vpop.f32.mrb[34].mxu0 }
 0xc9a   : > { %v25351_v33 = vadd.f32 %v12887_v11, %v12816_v21  ;;  %v12889_v30 = vpop.f32.mrb[35].mxu0 }
 0xc9b   : > { %v25363_v10 = vadd.f32 %v12889_v30, %v12816_v21 }
 0xc9c   : > { %13042 = vrot.lane.b32.xlu1 %v25351_v33, %s26195_s1 }
 0xca0   : > { %13510 = vrot.lane.b32.xlu1 %v25351_v33, %s26196_s11 }
 0xca1   : > { %v12958_v48 = vpop.f32.mrb[48].mxu1 }
 0xca2   : > { %v25357_v24 = vadd.f32 %v12958_v48, %v12816_v21  ;;  %v12960_v45 = vpop.f32.mrb[49].mxu1 }
 0xca3   : > { %v25373_v62 = vadd.f32 %v12960_v45, %v12816_v21 }
 0xca4   : > { %13046 = vrot.lane.b32.xlu0 %v25357_v24, %s26195_s1  ;;  %13757 = vrot.lane.b32.xlu1 %v25351_v33, %s22863_s6 }
 0xca8   : > { %13514 = vrot.lane.b32.xlu0 %v25357_v24, %s26196_s11  ;;  %13044 = vrot.lane.b32.xlu1 %v25363_v10, %s26195_s1 }
 0xca9   : > { %v13029_v54 = vpop.f32.mrb[36].mxu0 }
 0xcaa   : > { %v13031_v8 = vpop.f32.mrb[37].mxu0  ;;  %v25379_v55 = vadd.f32 %v13029_v54, %v12816_v21 }
 0xcab   : > { %v25397_v36 = vadd.f32 %v13031_v8, %v12816_v21 }
 0xcac   : > { %13761 = vrot.lane.b32.xlu0 %v25357_v24, %s22863_s6  ;;  %13512 = vrot.lane.b32.xlu1 %v25363_v10, %s26196_s11 }
 0xcb0   : > { %13048 = vrot.lane.b32.xlu0 %v25373_v62, %s26195_s1  ;;  %13759 = vrot.lane.b32.xlu1 %v25363_v10, %s22863_s6 }
 0xcb4   : > { %13050 = vrot.lane.b32.xlu0 %v25379_v55, %s26195_s1  ;;  %14008 = vrot.lane.b32.xlu1 %v25363_v10, %s22864_s23 }
 0xcb8   : > { %14010 = vrot.lane.b32.xlu0 %v25357_v24, %s22864_s23  ;;  %14006 = vrot.lane.b32.xlu1 %v25351_v33, %s22864_s23 }
 0xcbc   : > { %14257 = vrot.lane.b32.xlu0 %v25363_v10, %s26197_s7  ;;  %14259 = vrot.lane.b32.xlu1 %v25357_v24, %s26197_s7 }
 0xcc0   : > { %14255 = vrot.lane.b32.xlu0 %v25351_v33, %s26197_s7  ;;  %14263 = vrot.lane.b32.xlu1 %v25379_v55, %s26197_s7 }
 0xcc4   : > { %13518 = vrot.lane.b32.xlu0 %v25379_v55, %s26196_s11  ;;  %13767 = vrot.lane.b32.xlu1 %v25397_v36, %s22863_s6 }
 0xcc8   : > { %13765 = vrot.lane.b32.xlu0 %v25379_v55, %s22863_s6  ;;  %13516 = vrot.lane.b32.xlu1 %v25373_v62, %s26196_s11 }
 0xccc   : > { %14014 = vrot.lane.b32.xlu0 %v25379_v55, %s22864_s23  ;;  %14016 = vrot.lane.b32.xlu1 %v25397_v36, %s22864_s23 }
 0xcd0   : > { %14506 = vrot.lane.b32.xlu0 %v25363_v10, %s26164_s2  ;;  %14508 = vrot.lane.b32.xlu1 %v25357_v24, %s26164_s2 }
 0xcd4   : > { %14504 = vrot.lane.b32.xlu0 %v25351_v33, %s26164_s2  ;;  %14512 = vrot.lane.b32.xlu1 %v25379_v55, %s26164_s2 }
 0xcd8   : > { %14755 = vrot.lane.b32.xlu0 %v25363_v10, %s22867_s13  ;;  %13763 = vrot.lane.b32.xlu1 %v25373_v62, %s22863_s6  ;;  %s26200_s6 = sld [smem:[#allocation50_spill]] }
 0xcdc   : > { %14265 = vrot.lane.b32.xlu0 %v25397_v36, %s26197_s7  ;;  %14757 = vrot.lane.b32.xlu1 %v25357_v24, %s22867_s13 }
 0xcde   : > { %v19268_v51 = vld [vmem:[%s26200_s6 + $0x4] sm:$0xf]  ;;  %v13034_v34 = vld [vmem:[%s26200_s6] sm:$0xf]  ;;  %v19285_v35 = vld [vmem:[%s26200_s6 + $0x8] sm:$0xf] }
 0xcdf   : > { %v19294_v58 = vld [vmem:[%s26200_s6 + $0xc] sm:$0xf] }
 0xce0   : > { %14753 = vrot.lane.b32.xlu0 %v25351_v33, %s22867_s13  ;;  %14761 = vrot.lane.b32.xlu1 %v25379_v55, %s22867_s13 }
 0xce4   : > { %14514 = vrot.lane.b32.xlu0 %v25397_v36, %s26164_s2  ;;  %14012 = vrot.lane.b32.xlu1 %v25373_v62, %s22864_s23  ;;  %s22875_s23 = smov 117  }
 0xce8   : > { %15004 = vrot.lane.b32.xlu0 %v25363_v10, %s26199_s4  ;;  %15006 = vrot.lane.b32.xlu1 %v25357_v24, %s26199_s4 }
 0xcec   : > { %14763 = vrot.lane.b32.xlu0 %v25397_v36, %s22867_s13  ;;  %14261 = vrot.lane.b32.xlu1 %v25373_v62, %s26197_s7  ;;  %s22878_s7 = smov 62  }
 0xcf0   : > { %15002 = vrot.lane.b32.xlu0 %v25351_v33, %s26199_s4  ;;  %14759 = vrot.lane.b32.xlu1 %v25373_v62, %s22867_s13  ;;  %s22877_s13 = smov 95  }
 0xcf4   : > { %14510 = vrot.lane.b32.xlu0 %v25373_v62, %s26164_s2  ;;  %15010 = vrot.lane.b32.xlu1 %v25379_v55, %s26199_s4  ;;  %s22879_s2 = smov 73  }
 0xcf8   : > { %15008 = vrot.lane.b32.xlu0 %v25373_v62, %s26199_s4  ;;  %15330 = vperm.xlu1 %21627, %v15327_v0   ;;  %v19303_v0 = vld [vmem:[%s26200_s6 + $0x10] sm:$0xf] }
 0xcfc   : > { %15012 = vrot.lane.b32.xlu0 %v25397_v36, %s26199_s4  ;;  %s22874_s4 = smov 106  }
 0xd0e   : > { %v13043_v28 = vpop.permute.xlu1 %13042 }
 0xd12   : > { %v13511_v16 = vpop.permute.xlu1 %13510 }
 0xd16   : > { %v13047_v6 = vpop.permute.xlu0 %13046  ;;  %v13758_v59 = vpop.permute.xlu1 %13757 }
 0xd1a   : > { %v25456_v52 = vpop.permute.xlu0 %13514  ;;  %v13045_v47 = vpop.permute.xlu1 %13044 }
 0xd1b   : > { %v13052_v19 = vsel %vm1557_vm1, %v13043_v28, %v13045_v47  ;;  %v13053_v27 = vsel %vm1557_vm1, %v13045_v47, %v13047_v6 }
 0xd1c   : > { %19269 = vmatprep.subr.msk.mxu1 %vm13060_vm15, %v13053_v27  ;;  %v19312_v27 = vld [vmem:[%s26200_s6 + $0x14] sm:$0xf] }
 0xd1d   : > { %19270 = vmatpush1.msk.msra.mxu1 %vm13060_vm15, %v13052_v19 }
 0xd1e   : > { %v25463_v63 = vpop.permute.xlu0 %13761  ;;  %v13513_v50 = vpop.permute.xlu1 %13512  ;;  %19271 = vmatmul.mubr.msk.f32.vlgmr.msra.gmra.mrb[50].mxu1 %vm13056_vm7, %v19268_v51  ;;  %20026 = vmatprep.subr.mxu1 %v26176_v53 }
 0xd1f   : > { %20028 = vmatprep.mubr.msk.f32.mxu1 %vm22872_vm11, %v26176_v53  ;;  %v13521_v7 = vsel %vm2069_vm2, %v13513_v50, %v25456_v52  ;;  %v13520_v44 = vsel %vm2069_vm2, %v13511_v16, %v13513_v50 }
 0xd22   : > { %v13049_v20 = vpop.permute.xlu0 %13048  ;;  %v13760_v60 = vpop.permute.xlu1 %13759 }
 0xd23   : > { %v13054_v15 = vsel %vm1557_vm1, %v13047_v6, %v13049_v20  ;;  %v13770_v25 = vsel %vm2362_vm3, %v13760_v60, %v25463_v63  ;;  %v13769_v3 = vsel %vm2362_vm3, %v13758_v59, %v13760_v60 }
 0xd26   : > { %v13051_v9 = vpop.permute.xlu0 %13050  ;;  %v25469_v26 = vpop.permute.xlu1 %14008 }
 0xd27   : > { %v13055_v40 = vsel %vm1557_vm1, %v13049_v20, %v13051_v9  ;;  %20027 = vmatpush3.msk.msra.mxu1 %vm13060_vm15, %v13051_v9  ;;  %vm26201_vm1 = vcmask 621568  }
 0xd28   : > { %19272 = vmatprep.subr.msk.mxu0 %vm13060_vm15, %v13055_v40  ;;  %20029 = vmatmul.mubr.msk.f32.vlgmr.msra.gmra.mrb[52].mxu1 %vm13056_vm7, %v19268_v51  ;;  %vm26210_vm10 = vmmov %vm26201_vm1 }
 0xd29   : > { %19277 = vmatprep.subr.msk.mxu1 %vm13060_vm15, %v25363_v10  ;;  %19273 = vmatpush1.msk.msra.mxu0 %vm13060_vm15, %v13054_v15 }
 0xd2a   : > { %19278 = vmatpush1.msk.msra.mxu1 %vm13060_vm15, %v25351_v33  ;;  %19280 = vmatprep.subr.msk.mxu0 %vm13060_vm15, %v25373_v62  ;;  %v25483_v4 = vpop.permute.xlu0 %14010  ;;  %v14007_v46 = vpop.permute.xlu1 %14006 }
 0xd2b   : > { %19274 = vmatmul.mubr.msk.f32.vlgmr.msra.gmra.mrb[38].mxu0 %vm13056_vm7, %v19268_v51  ;;  %13360 = vmatprep.mubr.f32.mxu1 %v26176_v53  ;;  %v14019_v11 = vsel %vm2655_vm4, %v25469_v26, %v25483_v4  ;;  %v14018_v45 = vsel %vm2655_vm4, %v14007_v46, %v25469_v26  ;;  %v19321_v46 = vld [vmem:[%s26200_s6 + $0x18] sm:$0xf] }
 0xd2c   : > { %19281 = vmatpush1.msk.msra.mxu0 %vm13060_vm15, %v25357_v24  ;;  %20031 = vmatprep.subr.mxu1 %v26176_v53 }
 0xd2d   : > { %19279 = vmatmul.mubr.msk.f32.vlgmr.msra.gmra.mrb[50].mxu1 %vm13056_vm7, %v13034_v34  ;;  %13431 = vmatprep.mubr.f32.mxu0 %v26176_v53 }
 0xd2e   : > { %20032 = vmatpush3.msk.msra.mxu1 %vm13060_vm15, %v25379_v55  ;;  %v14258_v13 = vpop.permute.xlu0 %14257  ;;  %v25497_v37 = vpop.permute.xlu1 %14259  ;;  %20033 = vmatprep.mubr.msk.f32.mxu1 %vm22872_vm11, %v26176_v53 }
 0xd2f   : > { %19286 = vmatprep.subr.msk.mxu1 %vm13060_vm15, %v13521_v7  ;;  %v14268_v16 = vsel %vm2948_vm5, %v14258_v13, %v25497_v37 }
 0xd31   : > { %20034 = vmatmul.mubr.msk.f32.vlgmr.msra.gmra.mrb[52].mxu1 %vm13056_vm7, %v13034_v34 }
 0xd32   : > { %19287 = vmatpush1.msk.msra.mxu1 %vm13060_vm15, %v13520_v44  ;;  %v14256_v1 = vpop.permute.xlu0 %14255  ;;  %v25505_v18 = vpop.permute.xlu1 %14263  ;;  %13601 = vmatprep.mubr.f32.mxu1 %v26176_v53 }
 0xd33   : > { %20036 = vmatprep.subr.mxu1 %v26176_v53  ;;  %19282 = vmatmul.mubr.msk.f32.vlgmr.msra.gmra.mrb[38].mxu0 %vm13056_vm7, %v13034_v34 }
 0xd34   : > { %13672 = vmatprep.mubr.f32.mxu0 %v26176_v53 }
 0xd35   : > { %19288 = vmatmul.mubr.msk.f32.vlgmr.msra.gmra.mrb[50].mxu1 %vm13056_vm7, %v19285_v35 }
 0xd36   : > { %v13519_v38 = vpop.permute.xlu0 %13518  ;;  %v13768_v39 = vpop.permute.xlu1 %13767  ;;  %20038 = vmatprep.mubr.msk.f32.mxu1 %vm22872_vm11, %v26176_v53 }
 0xd37   : > { %20037 = vmatpush3.msk.msra.mxu1 %vm13060_vm15, %v13519_v38 }
 0xd38   : > { %19295 = vmatprep.subr.msk.mxu1 %vm13060_vm15, %v13770_v25  ;;  %v19330_v25 = vld [vmem:[%s26200_s6 + $0x1c] sm:$0xf] }
 0xd39   : > { %20039 = vmatmul.mubr.msk.f32.vlgmr.msra.gmra.mrb[52].mxu1 %vm13056_vm7, %v19285_v35 }
 0xd3a   : > { %19296 = vmatpush1.msk.msra.mxu1 %vm13060_vm15, %v13769_v3  ;;  %v13766_v32 = vpop.permute.xlu0 %13765  ;;  %v13517_v49 = vpop.permute.xlu1 %13516  ;;  %13851 = vmatprep.mubr.f32.mxu1 %v26176_v53 }
 0xd3b   : > { %v13773_v17 = vsel %vm2362_vm3, %v13766_v32, %v13768_v39  ;;  %v13522_v56 = vsel %vm2069_vm2, %v25456_v52, %v13517_v49  ;;  %v13523_v21 = vsel %vm2069_vm2, %v13517_v49, %v13519_v38  ;;  %20041 = vmatprep.subr.mxu1 %v26176_v53  ;;  %v14267_v52 = vsel %vm2948_vm5, %v14256_v1, %v14258_v13  ;;  %vm26202_vm2 = vmmov %vm26201_vm1 }
 0xd3c   : > { %19289 = vmatprep.subr.msk.mxu0 %vm13060_vm15, %v13523_v21 }
 0xd3d   : > { %19297 = vmatmul.mubr.msk.f32.vlgmr.msra.gmra.mrb[50].mxu1 %vm13056_vm7, %v19294_v58  ;;  %19290 = vmatpush1.msk.msra.mxu0 %vm13060_vm15, %v13522_v56 }
 0xd3e   : > { %20042 = vmatpush3.msk.msra.mxu1 %vm13060_vm15, %v13773_v17  ;;  %v14015_v30 = vpop.permute.xlu0 %14014  ;;  %v14017_v48 = vpop.permute.xlu1 %14016  ;;  %20043 = vmatprep.mubr.msk.f32.mxu1 %vm22872_vm11, %v26176_v53 }
 0xd3f   : > { %19304 = vmatprep.subr.msk.mxu1 %vm13060_vm15, %v14019_v11  ;;  %19291 = vmatmul.mubr.msk.f32.vlgmr.msra.gmra.mrb[38].mxu0 %vm13056_vm7, %v19285_v35  ;;  %v14022_v28 = vsel %vm2655_vm4, %v14015_v30, %v14017_v48  ;;  %v25628_v11 = vld [vmem:[%s26200_s6 + $0x20] sm:$0xf]  ;;  %s26072_s6 = smov 118  }
 0xd40   : > { %13922 = vmatprep.mubr.f32.mxu0 %v26176_v53 }
 0xd41   : > { %20044 = vmatmul.mubr.msk.f32.vlgmr.msra.gmra.mrb[52].mxu1 %vm13056_vm7, %v19294_v58 }
 0xd42   : > { %19305 = vmatpush1.msk.msra.mxu1 %vm13060_vm15, %v14018_v45  ;;  %v14507_v54 = vpop.permute.xlu0 %14506  ;;  %v25545_v8 = vpop.permute.xlu1 %14508  ;;  %14100 = vmatprep.mubr.f32.mxu1 %v26176_v53 }
 0xd43   : > { %20046 = vmatprep.subr.mxu1 %v26176_v53  ;;  %v14517_v9 = vsel %vm26201_vm1, %v14507_v54, %v25545_v8 }
 0xd45   : > { %19306 = vmatmul.mubr.msk.f32.vlgmr.msra.gmra.mrb[50].mxu1 %vm13056_vm7, %v19303_v0 }
 0xd46   : > { %20047 = vmatpush3.msk.msra.mxu1 %vm13060_vm15, %v14022_v28  ;;  %v14505_v6 = vpop.permute.xlu0 %14504  ;;  %v25555_v59 = vpop.permute.xlu1 %14512  ;;  %20048 = vmatprep.mubr.msk.f32.mxu1 %vm22872_vm11, %v26176_v53 }
 0xd47   : > { %19313 = vmatprep.subr.msk.mxu1 %vm13060_vm15, %v14268_v16  ;;  %v14516_v26 = vsel %vm26202_vm2, %v14505_v6, %v14507_v54  ;;  %v15313_v6 = vld [vmem:[#allocation7 + $0x200] sm:$0xff] }
 0xd49   : > { %20049 = vmatmul.mubr.msk.f32.vlgmr.msra.gmra.mrb[52].mxu1 %vm13056_vm7, %v19303_v0 }
 0xd4a   : > { %19314 = vmatpush1.msk.msra.mxu1 %vm13060_vm15, %v14267_v52  ;;  %v14756_v47 = vpop.permute.xlu0 %14755  ;;  %v13764_v19 = vpop.permute.xlu1 %13763  ;;  %14349 = vmatprep.mubr.f32.mxu1 %v26176_v53  ;;  %v15265_v52 = vld [vmem:[#allocation7 + $0x80] sm:$0xff] }
 0xd4b   : > { %v13771_v51 = vsel %vm2362_vm3, %v25463_v63, %v13764_v19  ;;  %v13772_v50 = vsel %vm2362_vm3, %v13764_v19, %v13766_v32  ;;  %20051 = vmatprep.subr.mxu1 %v26176_v53  ;;  %vm26203_vm3 = vmmov %vm26201_vm1 }
 0xd4c   : > { %19298 = vmatprep.subr.msk.mxu0 %vm13060_vm15, %v13772_v50  ;;  %v15315_v50 = vld [vmem:[#allocation7 + $0x210] sm:$0xff] }
 0xd4d   : > { %19299 = vmatpush1.msk.msra.mxu0 %vm13060_vm15, %v13771_v51  ;;  %19315 = vmatmul.mubr.msk.f32.vlgmr.msra.gmra.mrb[50].mxu1 %vm13056_vm7, %v19312_v27 }
 0xd4e   : > { %v14266_v20 = vpop.permute.xlu0 %14265  ;;  %v25572_v60 = vpop.permute.xlu1 %14757  ;;  %20053 = vmatprep.mubr.msk.f32.mxu1 %vm22872_vm11, %v26176_v53  ;;  %19300 = vmatmul.mubr.msk.f32.vlgmr.msra.gmra.mrb[38].mxu0 %vm13056_vm7, %v19294_v58 }
 0xd4f   : > { %v14271_v63 = vsel %vm2948_vm5, %v25505_v18, %v14266_v20  ;;  %14171 = vmatprep.mubr.f32.mxu0 %v26176_v53  ;;  %v14766_v35 = vsel %vm26204_vm6, %v14756_v47, %v25572_v60  ;;  %v15316_v20 = vld [vmem:[#allocation7 + $0x218] sm:$0xff] }
 0xd50   : > { %20052 = vmatpush3.msk.msra.mxu1 %vm13060_vm15, %v14271_v63 }
 0xd51   : > { %20054 = vmatmul.mubr.msk.f32.vlgmr.msra.gmra.mrb[52].mxu1 %vm13056_vm7, %v19312_v27  ;;  %19322 = vmatprep.subr.msk.mxu1 %vm13060_vm15, %v14517_v9  ;;  %v20812_v9 = vpack.c.bf16 %v15316_v20, %v15315_v50  ;;  %v15278_v50 = vld [vmem:[#allocation7 + $0xe8] sm:$0xff] }
 0xd52   : > { %v14754_v40 = vpop.permute.xlu0 %14753  ;;  %19323 = vmatpush1.msk.msra.mxu1 %vm13060_vm15, %v14516_v26  ;;  %v14762_v15 = vpop.permute.xlu1 %14761  ;;  %14598 = vmatprep.mubr.f32.mxu1 %v26176_v53  ;;  %v15317_v26 = vld [vmem:[#allocation7 + $0x220] sm:$0xff] }
 0xd53   : > { %20056 = vmatprep.subr.mxu1 %v26176_v53  ;;  %v14765_v38 = vsel %vm26205_vm12, %v14754_v40, %v14756_v47  ;;  %v15266_v47 = vld [vmem:[#allocation7 + $0x88] sm:$0xff]  ;;  %vm22873_vm12 = vmmov 1  }
 0xd54   : > { %v15318_v40 = vld [vmem:[#allocation7 + $0x228] sm:$0xff] }
 0xd55   : > { %19324 = vmatmul.mubr.msk.f32.vlgmr.msra.gmra.mrb[50].mxu1 %vm13056_vm7, %v19321_v46 }
 0xd56   : > { %v14515_v34 = vpop.permute.xlu0 %14514  ;;  %v14013_v7 = vpop.permute.xlu1 %14012  ;;  %20058 = vmatprep.mubr.msk.f32.mxu1 %vm22872_vm11, %v26176_v53 }
 0xd57   : > { %v14520_v13 = vsel %vm26203_vm3, %v25555_v59, %v14515_v34  ;;  %v14020_v44 = vsel %vm2655_vm4, %v25483_v4, %v14013_v7  ;;  %v14021_v1 = vsel %vm2655_vm4, %v14013_v7, %v14015_v30  ;;  %vm26206_vm4 = vmmov %vm26204_vm6  ;;  %v15267_v34 = vld [vmem:[#allocation7 + $0x90] sm:$0xff]  ;;  %v15268_v7 = vld [vmem:[#allocation7 + $0x98] sm:$0xff]  ;;  %vm15337_vm6 = vcmask 1045504  }
 0xd58   : > { %19307 = vmatprep.subr.msk.mxu0 %vm13060_vm15, %v14021_v1  ;;  %20057 = vmatpush3.msk.msra.mxu1 %vm13060_vm15, %v14520_v13  ;;  %vm26211_vm13 = vmmov %vm26206_vm4  ;;  %v20815_v13 = vpack.c.bf16 %v15318_v40, %v15317_v26  ;;  %v15319_v1 = vld [vmem:[#allocation7 + $0x230] sm:$0xff]  ;;  %v15280_v40 = vld [vmem:[#allocation7 + $0xf8] sm:$0xff] }
 0xd59   : > { %19308 = vmatpush1.msk.msra.mxu0 %vm13060_vm15, %v14020_v44  ;;  %20059 = vmatmul.mubr.msk.f32.vlgmr.msra.gmra.mrb[52].mxu1 %vm13056_vm7, %v19321_v46  ;;  %vm26212_vm14 = vmmov %vm26206_vm4  ;;  %v15279_v26 = vld [vmem:[#allocation7 + $0xf0] sm:$0xff] }
 0xd5a   : > { %19331 = vmatprep.subr.msk.mxu1 %vm13060_vm15, %v14766_v35  ;;  %v15005_v39 = vpop.permute.xlu0 %15004  ;;  %19309 = vmatmul.mubr.msk.f32.vlgmr.msra.gmra.mrb[38].mxu0 %vm13056_vm7, %v19303_v0  ;;  %v15007_v4 = vpop.permute.xlu1 %15006  ;;  %v15320_v35 = vld [vmem:[#allocation7 + $0x238] sm:$0xff] }
 0xd5b   : > { %19332 = vmatpush1.msk.msra.mxu1 %vm13060_vm15, %v14765_v38  ;;  %14847 = vmatprep.mubr.f32.mxu1 %v26176_v53  ;;  %v15015_v56 = vsel %vm26207_vm8, %v15005_v39, %v15007_v4  ;;  %v20748_v38 = vpack.c.bf16 %v15268_v7, %v15267_v34  ;;  %v15263_v34 = vld [vmem:[#allocation7 + $0x70] sm:$0xff]  ;;  %v15264_v7 = vld [vmem:[#allocation7 + $0x78] sm:$0xff] }
 0xd5c   : > { %20061 = vmatprep.subr.mxu1 %v26176_v53  ;;  %14420 = vmatprep.mubr.f32.mxu0 %v26176_v53 }
 0xd5d   : > { %19333 = vmatmul.mubr.msk.f32.vlgmr.msra.gmra.mrb[50].mxu1 %vm13056_vm7, %v19330_v25 }
 0xd5e   : > { %v14764_v3 = vpop.permute.xlu0 %14763  ;;  %v14262_v32 = vpop.permute.xlu1 %14261  ;;  %20063 = vmatprep.mubr.msk.f32.mxu1 %vm22872_vm11, %v26176_v53 }
 0xd5f   : > { %v14769_v49 = vsel %vm26206_vm4, %v14762_v15, %v14764_v3  ;;  %v14269_v58 = vsel %vm2948_vm5, %v25497_v37, %v14262_v32  ;;  %v14270_v17 = vsel %vm2948_vm5, %v14262_v32, %v25505_v18  ;;  %vm26209_vm5 = vmmov %vm26201_vm1  ;;  %v15270_v3 = vld [vmem:[#allocation7 + $0xa8] sm:$0xff]  ;;  %v20818_v32 = vpack.c.bf16 %v15320_v35, %v15319_v1  ;;  %v15321_v35 = vld [vmem:[#allocation7 + $0x240] sm:$0xff] }
 0xd60   : > { %19316 = vmatprep.subr.msk.mxu0 %vm13060_vm15, %v14270_v17  ;;  %20062 = vmatpush3.msk.msra.mxu1 %vm13060_vm15, %v14769_v49  ;;  %vm26213_vm1 = vmmov %vm26207_vm8  ;;  %v15253_v17 = vld [vmem:[#allocation7 + $0x20] sm:$0xff]  ;;  %v15298_v1 = vld [vmem:[#allocation7 + $0x188] sm:$0xff]  ;;  %vm15333_vm8 = vcmask 900096  }
 0xd61   : > { %19317 = vmatpush1.msk.msra.mxu0 %vm13060_vm15, %v14269_v58  ;;  %20064 = vmatmul.mubr.msk.f32.vlgmr.msra.gmra.mrb[52].mxu1 %vm13056_vm7, %v19330_v25  ;;  %vm26214_vm2 = vmmov %vm26213_vm1 }
 0xd62   : > { %19340 = vmatprep.subr.msk.mxu1 %vm13060_vm15, %v15015_v56  ;;  %v15003_v21 = vpop.permute.xlu0 %15002  ;;  %19318 = vmatmul.mubr.msk.f32.vlgmr.msra.gmra.mrb[38].mxu0 %vm13056_vm7, %v19312_v27  ;;  %v14760_v18 = vpop.permute.xlu1 %14759  ;;  %vm26215_vm3 = vmmov %vm26213_vm1  ;;  %v15254_v56 = vld [vmem:[#allocation7 + $0x28] sm:$0xff] }
 0xd63   : > { %v15014_v37 = vsel %vm26208_vm9, %v15003_v21, %v15005_v39  ;;  %15096 = vmatprep.mubr.f32.mxu1 %v26176_v53  ;;  %14669 = vmatprep.mubr.f32.mxu0 %v26176_v53  ;;  %v14768_v54 = vsel %vm26211_vm13, %v14760_v18, %v14762_v15  ;;  %v14767_v0 = vsel %vm26212_vm14, %v25572_v60, %v14760_v18  ;;  %v15249_v15 = vld [vmem:[#allocation7] sm:$0xff]  ;;  %v15251_v39 = vld [vmem:[#allocation7 + $0x10] sm:$0xff]  ;;  %vm20828_vm4 = vmpackc.low %vm15337_vm6, %vm22873_vm12  ;;  %vm15580_vm9 = vcmask 76824  }
 0xd64   : > { %19341 = vmatpush1.msk.msra.mxu1 %vm13060_vm15, %v15014_v37  ;;  %v20744_v60 = vpack.c.bf16 %v15266_v47, %v15265_v52  ;;  %v15271_v21 = vld [vmem:[#allocation7 + $0xb0] sm:$0xff]  ;;  %v15272_v37 = vld [vmem:[#allocation7 + $0xb8] sm:$0xff]  ;;  %v20754_v18 = vpack.c.bf16 %v15254_v56, %v15253_v17  ;;  %v15281_v56 = vld [vmem:[#allocation7 + $0x100] sm:$0xff]  ;;  %vm15588_vm13 = vcmask 347424   ;;  %vm15592_vm14 = vcmask 7168  }
 0xd65   : > { %19342 = vmatmul.mubr.msk.f32.vlgmr.msra.gmra.mrb[50].mxu1 %vm13056_vm7, %v25628_v11  ;;  %20066 = vmatprep.subr.mxu1 %v26176_v53  ;;  %vm16404_vm6 = vcmask 89088  }
 0xd66   : > { %v14511_v30 = vpop.permute.xlu0 %14510  ;;  %20068 = vmatprep.mubr.msk.f32.mxu1 %vm22872_vm11, %v26176_v53  ;;  %v15011_v28 = vpop.permute.xlu1 %15010 }
 0xd67   : > { %v14518_v48 = vsel %vm26209_vm5, %v25545_v8, %v14511_v30  ;;  %v14519_v45 = vsel %vm26210_vm10, %v14511_v30, %v25555_v59  ;;  %v15314_v59 = vld [vmem:[#allocation7 + $0x208] sm:$0xff]  ;;  %v20756_v30 = vpack.c.bf16 %v15272_v37, %v15271_v21  ;;  %v15299_v37 = vld [vmem:[#allocation7 + $0x190] sm:$0xff]  ;;  %vm15576_vm5 = vcmask 52224  }
 0xd68   : > { %19325 = vmatprep.subr.msk.mxu0 %vm13060_vm15, %v14519_v45  ;;  %v20809_v27 = vpack.c.bf16 %v15314_v59, %v15313_v6  ;;  %v15273_v45 = vld [vmem:[#allocation7 + $0xc0] sm:$0xff]  ;;  %v15275_v6 = vld [vmem:[#allocation7 + $0xd0] sm:$0xff]  ;;  %v15276_v59 = vld [vmem:[#allocation7 + $0xd8] sm:$0xff]  ;;  %vm15584_vm10 = vcmask 322824  }
 0xd69   : > { %19326 = vmatpush1.msk.msra.mxu0 %vm13060_vm15, %v14518_v48  ;;  %v15256_v48 = vld [vmem:[#allocation7 + $0x38] sm:$0xff]  ;;  %v20764_v47 = vpack.c.bf16 %v15276_v59, %v15275_v6  ;;  %v15282_v21 = vld [vmem:[#allocation7 + $0x108] sm:$0xff]  ;;  %v15285_v59 = vld [vmem:[#allocation7 + $0x120] sm:$0xff] }
 0xd6a   : > { %v15009_v16 = vpop.permute.xlu0 %15008  ;;  %19327 = vmatmul.mubr.msk.f32.vlgmr.msra.gmra.mrb[38].mxu0 %vm13056_vm7, %v19321_v46  ;;  %19334 = vmatprep.subr.msk.mxu0 %vm13060_vm15, %v14768_v54  ;;  %v15250_v46 = vld [vmem:[#allocation7 + $0x8] sm:$0xff] }
 0xd6b   : > { %v15017_v8 = vsel %vm26213_vm1, %v15009_v16, %v15011_v28  ;;  %19335 = vmatpush1.msk.msra.mxu0 %vm13060_vm15, %v14767_v0  ;;  %14918 = vmatprep.mubr.f32.mxu0 %v26176_v53  ;;  %v15016_v63 = vsel %vm26215_vm3, %v15007_v4, %v15009_v16  ;;  %v20746_v44 = vpack.c.bf16 %v15250_v46, %v15249_v15  ;;  %v15252_v4 = vld [vmem:[#allocation7 + $0x18] sm:$0xff]  ;;  %v15274_v54 = vld [vmem:[#allocation7 + $0xc8] sm:$0xff]  ;;  %v15257_v16 = vld [vmem:[#allocation7 + $0x40] sm:$0xff]  ;;  %vm15594_vm1 = vcmask 15360  }
 0xd6c   : > { %19343 = vmatprep.subr.msk.mxu0 %vm13060_vm15, %v15017_v8  ;;  %v20750_v49 = vpack.c.bf16 %v15252_v4, %v15251_v39  ;;  %v15258_v8 = vld [vmem:[#allocation7 + $0x48] sm:$0xff]  ;;  %v20772_v46 = vpack.c.bf16 %v15280_v40, %v15279_v26  ;;  %vm16402_vm3 = vcmask 39936  }
 0xd6d   : > { %v20762_v52 = vpack.c.bf16 %v15258_v8, %v15257_v16  ;;  %v15322_v39 = vld [vmem:[#allocation7 + $0x248] sm:$0xff] }
 0xd6e   : > { %v15013_v19 = vpop.permute.xlu0 %15012  ;;  %v20821_v4 = vpack.c.bf16 %v15322_v39, %v15321_v35  ;;  %v15302_v16 = vld [vmem:[#allocation7 + $0x1a8] sm:$0xff]  ;;  %v15291_v35 = vld [vmem:[#allocation7 + $0x150] sm:$0xff]  ;;  %v15309_v39 = vld [vmem:[#allocation7 + $0x1e0] sm:$0xff] }
 0xd6f   : > { %v15018_v51 = vsel %vm26214_vm2, %v15011_v28, %v15013_v19  ;;  %v20760_v28 = vpack.c.bf16 %v15274_v54, %v15273_v45  ;;  %v15259_v19 = vld [vmem:[#allocation7 + $0x50] sm:$0xff]  ;;  %vm15596_vm2 = vcmask 23552  }
 0xd70   : > { %20067 = vmatpush3.msk.msra.mxu1 %vm13060_vm15, %v15018_v51  ;;  %v15277_v51 = vld [vmem:[#allocation7 + $0xe0] sm:$0xff]  ;;  %v15283_v54 = vld [vmem:[#allocation7 + $0x110] sm:$0xff] }
 0xd71   : > { %20069 = vmatmul.mubr.msk.f32.vlgmr.msra.gmra.mrb[52].mxu1 %vm13056_vm7, %v25628_v11  ;;  %20808 = vmatprep.subr.bf16.mxu1 %v26173_v5 }
 0xd72   : > { %19336 = vmatmul.mubr.msk.f32.vlgmr.msra.gmra.mrb[38].mxu0 %vm13056_vm7, %v19330_v25  ;;  %20810 = vmatpush3.bf16.msra.mxu1 %v20809_v27  ;;  %v15269_v25 = vld [vmem:[#allocation7 + $0xa0] sm:$0xff]  ;;  %v15260_v27 = vld [vmem:[#allocation7 + $0x58] sm:$0xff] }
 0xd73   : > { %19344 = vmatpush1.msk.msra.mxu0 %vm13060_vm15, %v15016_v63  ;;  %15167 = vmatprep.mubr.f32.mxu0 %v26176_v53  ;;  %v20752_v58 = vpack.c.bf16 %v15270_v3, %v15269_v25  ;;  %v20766_v20 = vpack.c.bf16 %v15260_v27, %v15259_v19  ;;  %v15261_v63 = vld [vmem:[#allocation7 + $0x60] sm:$0xff]  ;;  %v15323_v25 = vld [vmem:[#allocation7 + $0x250] sm:$0xff]  ;;  %v15324_v3 = vld [vmem:[#allocation7 + $0x258] sm:$0xff] }
 0xd74   : > { %20745 = vmatprep.subr.bf16.mxu0 %v20744_v60  ;;  %20811 = vmatprep.subr.bf16.mxu1 %v26173_v5  ;;  %v20768_v60 = vpack.c.bf16 %v15278_v50, %v15277_v51  ;;  %v15304_v19 = vld [vmem:[#allocation7 + $0x1b8] sm:$0xff]  ;;  %v15287_v50 = vld [vmem:[#allocation7 + $0x130] sm:$0xff] }
 0xd75   : > { %20099 = vmatprep.mubr.msk.f32.mxu1 %vm22872_vm11, %v26176_v53 }
 0xd76   : > { %20813 = vmatpush3.bf16.msra.mxu1 %v20812_v9  ;;  %v15262_v9 = vld [vmem:[#allocation7 + $0x68] sm:$0xff] }
 0xd77   : > { %20814 = vmatprep.subr.bf16.mxu1 %v26173_v5  ;;  %v20770_v15 = vpack.c.bf16 %v15262_v9, %v15261_v63  ;;  %v15306_v63 = vld [vmem:[#allocation7 + $0x1c8] sm:$0xff] }
 0xd7a   : > { %19345 = vmatmul.mubr.msk.f32.vlgmr.msra.gmra.mrb[38].mxu0 %vm13056_vm7, %v25628_v11  ;;  %20816 = vmatpush3.bf16.msra.mxu1 %v20815_v13  ;;  %v15255_v11 = vld [vmem:[#allocation7 + $0x30] sm:$0xff]  ;;  %v20774_v13 = vpack.c.bf16 %v15264_v7, %v15263_v34  ;;  %v15290_v34 = vld [vmem:[#allocation7 + $0x148] sm:$0xff] }
 0xd7b   : > { %20747 = vmatpush3.bf16.msra.mxu0 %v20746_v44  ;;  %20817 = vmatprep.subr.bf16.mxu1 %v26173_v5  ;;  %v20758_v0 = vpack.c.bf16 %v15256_v48, %v15255_v11  ;;  %v15297_v44 = vld [vmem:[#allocation7 + $0x180] sm:$0xff]  ;;  %v20778_v11 = vpack.c.bf16 %v15282_v21, %v15281_v56  ;;  %v15307_v7 = vld [vmem:[#allocation7 + $0x1d0] sm:$0xff]  ;;  %v15312_v21 = vld [vmem:[#allocation7 + $0x1f8] sm:$0xff] }
 0xd7c   : > { %20749 = vmatprep.subr.bf16.mxu0 %v20748_v38  ;;  %v20776_v38 = vpack.c.bf16 %v15298_v1, %v15297_v44  ;;  %v15311_v56 = vld [vmem:[#allocation7 + $0x1f0] sm:$0xff] }
 0xd7e   : > { %20819 = vmatpush3.bf16.msra.mxu1 %v20818_v32  ;;  %v20824_v32 = vpack.c.bf16 %v15324_v3, %v15323_v25 }
 0xd7f   : > { %20751 = vmatpush3.bf16.msra.mxu0 %v20750_v49  ;;  %20820 = vmatprep.subr.bf16.mxu1 %v26173_v5  ;;  %v15325_v49 = vld [vmem:[#allocation7 + $0x260] sm:$0xff] }
 0xd80   : > { %20753 = vmatprep.subr.bf16.mxu0 %v20752_v58  ;;  %v15326_v58 = vld [vmem:[#allocation7 + $0x268] sm:$0x3f] }
 0xd81   : > { %v20827_v17 = vpack.c.bf16 %v15326_v58, %v15325_v49  ;;  %v15293_v49 = vld [vmem:[#allocation7 + $0x160] sm:$0xff]  ;;  %v15294_v58 = vld [vmem:[#allocation7 + $0x168] sm:$0xff] }
 0xd82   : > { %20822 = vmatpush3.bf16.msra.mxu1 %v20821_v4  ;;  %v15310_v4 = vld [vmem:[#allocation7 + $0x1e8] sm:$0xff] }
 0xd83   : > { %20755 = vmatpush3.bf16.msra.mxu0 %v20754_v18  ;;  %20823 = vmatprep.subr.bf16.mxu1 %v26173_v5  ;;  %v15300_v18 = vld [vmem:[#allocation7 + $0x198] sm:$0xff] }
 0xd84   : > { %20757 = vmatprep.subr.bf16.mxu0 %v20756_v30  ;;  %v20780_v45 = vpack.c.bf16 %v15300_v18, %v15299_v37  ;;  %v20802_v37 = vpack.c.bf16 %v15294_v58, %v15293_v49  ;;  %v20804_v18 = vpack.c.bf16 %v15312_v21, %v15311_v56 }
 0xd86   : > { %20825 = vmatpush3.bf16.msra.mxu1 %v20824_v32  ;;  %v20800_v32 = vpack.c.bf16 %v15310_v4, %v15309_v39 }
 0xd87   : > { %20759 = vmatpush3.bf16.msra.mxu0 %v20758_v0  ;;  %20826 = vmatprep.subr.bf16.mxu1 %v26173_v5  ;;  %v15284_v0 = vld [vmem:[#allocation7 + $0x118] sm:$0xff] }
 0xd88   : > { %20761 = vmatprep.subr.bf16.mxu0 %v20760_v28  ;;  %v15301_v28 = vld [vmem:[#allocation7 + $0x1a0] sm:$0xff]  ;;  %v20782_v8 = vpack.c.bf16 %v15284_v0, %v15283_v54 }
 0xd89   : > { %v20784_v6 = vpack.c.bf16 %v15302_v16, %v15301_v28 }
 0xd8a   : > { %20829 = vmatpush3.bf16.msk.msra.mxu1 %vm20828_vm4, %v20827_v17 }
 0xd8b   : > { %20763 = vmatpush3.bf16.msra.mxu0 %v20762_v52  ;;  %20102 = vmatprep.subr.mxu1 %v26176_v53  ;;  %v15286_v52 = vld [vmem:[#allocation7 + $0x128] sm:$0xff] }
 0xd8c   : > { %20765 = vmatprep.subr.bf16.mxu0 %v20764_v47  ;;  %v15303_v47 = vld [vmem:[#allocation7 + $0x1b0] sm:$0xff]  ;;  %v20786_v27 = vpack.c.bf16 %v15286_v52, %v15285_v59 }
 0xd8d   : > { %v20788_v51 = vpack.c.bf16 %v15304_v19, %v15303_v47 }
 0xd8f   : > { %20767 = vmatpush3.bf16.msra.mxu0 %v20766_v20  ;;  %v15288_v20 = vld [vmem:[#allocation7 + $0x138] sm:$0xff] }
 0xd90   : > { %20769 = vmatprep.subr.bf16.mxu0 %v20768_v60  ;;  %v15305_v60 = vld [vmem:[#allocation7 + $0x1c0] sm:$0xff]  ;;  %v20790_v26 = vpack.c.bf16 %v15288_v20, %v15287_v50 }
 0xd93   : > { %20771 = vmatpush3.bf16.msra.mxu0 %v20770_v15  ;;  %v20792_v15 = vpack.c.bf16 %v15306_v63, %v15305_v60 }
 0xd94   : > { %20773 = vmatprep.subr.bf16.mxu0 %v20772_v46  ;;  %v15289_v46 = vld [vmem:[#allocation7 + $0x140] sm:$0xff] }
 0xd95   : > { %v20794_v44 = vpack.c.bf16 %v15290_v34, %v15289_v46 }
 0xd97   : > { %20775 = vmatpush3.bf16.msra.mxu0 %v20774_v13  ;;  %v15308_v13 = vld [vmem:[#allocation7 + $0x1d8] sm:$0xff] }
 0xd98   : > { %20777 = vmatprep.subr.bf16.mxu0 %v20776_v38  ;;  %v20796_v1 = vpack.c.bf16 %v15308_v13, %v15307_v7  ;;  %v15292_v38 = vld [vmem:[#allocation7 + $0x158] sm:$0xff] }
 0xd99   : > { %v20798_v25 = vpack.c.bf16 %v15292_v38, %v15291_v35  ;;  %v15598_v38 = vld [vmem:[#allocation10] sm:$0xf] }
 0xe38   : > { %v15098_v30 = vpop.f32.mrb[50].mxu1 }
 0xe39   : > { %v15100_v48 = vpop.f32.mrb[51].mxu1 }
 0xe3a   : > { %15405 = vmatprep.mubr.f32.mxu0 %v15100_v48 }
 0xe3b   : > { %15406 = vmatmul.mubr.f32.vlgmr.msra.gmra.mrb[40].mxu0 %v15098_v30  ;;  %v15295_v30 = vld [vmem:[#allocation7 + $0x170] sm:$0xff] }
 0xe3c   : > { %20779 = vmatpush3.bf16.msra.mxu0 %v20778_v11  ;;  %v15296_v11 = vld [vmem:[#allocation7 + $0x178] sm:$0xff] }
 0xe3d   : > { %20781 = vmatprep.subr.bf16.mxu0 %v20780_v45  ;;  %v20806_v48 = vpack.c.bf16 %v15296_v11, %v15295_v30 }
 0xe40   : > { %20783 = vmatpush3.bf16.msra.mxu0 %v20782_v8 }
 0xe41   : > { %20785 = vmatprep.subr.bf16.mxu0 %v20784_v6  ;;  %v15331_v6 = vpop.permute.xlu1 %15330 }
 0xe44   : > { %20787 = vmatpush3.bf16.msra.mxu0 %v20786_v27  ;;  %v15240_v9 = vpop.f32.mrb[52].mxu1 }
 0xe45   : > { %v20070_v40 = vpop.f32.mrb[53].mxu1  ;;  %20100 = vmatmul.mubr.msk.f32.vlgmr.msra.gmra.mrb[54].mxu1 %vm15333_vm8, %v15240_v9  ;;  %20789 = vmatprep.subr.bf16.mxu0 %v20788_v51 }
 0xe46   : > { %20104 = vmatprep.mubr.msk.f32.mxu1 %vm22872_vm11, %v26176_v53  ;;  %20103 = vmatpush3.msk.msra.mxu1 %vm13060_vm15, %v15598_v38 }
 0xe47   : > { %20112 = vmatprep.subr.mxu1 %v26176_v53 }
 0xe48   : > { %20791 = vmatpush3.bf16.msra.mxu0 %v20790_v26 }
 0xe49   : > { %20793 = vmatprep.subr.bf16.mxu0 %v20792_v15 }
 0xe4c   : > { %20795 = vmatpush3.bf16.msra.mxu0 %v20794_v44 }
 0xe4d   : > { %v15169_v3 = vpop.f32.mrb[38].mxu0  ;;  %20797 = vmatprep.subr.bf16.mxu0 %v20796_v1 }
 0xe4e   : > { %v15171_v17 = vpop.f32.mrb[39].mxu0 }
 0xe4f   : > { %15475 = vmatprep.mubr.f32.mxu0 %v15171_v17 }
 0xe50   : > { %20799 = vmatpush3.bf16.msra.mxu0 %v20798_v25 }
 0xe51   : > { %20801 = vmatprep.subr.bf16.mxu0 %v20800_v32 }
 0xe54   : > { %20803 = vmatpush3.bf16.msra.mxu0 %v20802_v37 }
 0xe55   : > { %20805 = vmatprep.subr.bf16.mxu0 %v20804_v18 }
 0xe58   : > { %20807 = vmatpush3.bf16.msra.mxu0 %v20806_v48 }
 0xe59   : > { %20107 = vmatprep.subr.mxu0 %v26176_v53 }
 0xe5b   : > { %15476 = vmatmul.mubr.f32.vlgmr.msra.gmra.mrb[42].mxu0 %v15169_v3 }
 0xe5c   : > { %20109 = vmatprep.mubr.msk.f32.mxu0 %vm22872_vm11, %v26176_v53 }
 0xf0e   : > { %v19662_v45 = vpop.f32.mrb[40].mxu0 }
 0xf0f   : > { %v19663_v54 = vpop.f32.mrb[41].mxu0 }
 0xf10   : > { %v19664_v0 = vadd.f32 %v19663_v54, %v19662_v45 }
 0xf12   : > { %v15408_v52 = vadd.f32 %v19664_v0, %v15331_v6 }
 0xf18   : > { %v15547_v28 = vpop.f32.mrb[54].mxu1 }
 0xf19   : > { %v20101_v16 = vpop.f32.mrb[55].mxu1 }
 0xf2e   : > { %v19697_v8 = vpop.f32.mrb[42].mxu0 }
 0xf2f   : > { %v19698_v59 = vpop.f32.mrb[43].mxu0 }
 0xf30   : > { %v19699_v47 = vadd.f32 %v19698_v59, %v19697_v8 }
 0xf32   : > { %v15478_v19 = vadd.f32 %v19699_v47, %v15408_v52 }
 0xf34   : > { %v15548_v27 = vadd.f32 %v15547_v28, %v15478_v19 }
 0xf36   : > { %15556 = vrot.lane.b32.xlu1 %v15548_v27, %s22874_s4  ;;  %15552 = vrot.lane.b32.xlu0 %v15548_v27, %s22875_s23  ;;  %s26216_s4 = sld [smem:[#allocation52_spill]]  ;;  %s26217_s23 = sld [smem:[#allocation53_spill]] }
 0xf3a   : > { %15564 = vrot.lane.b32.xlu1 %v15548_v27, %s22876_s3  ;;  %15560 = vrot.lane.b32.xlu0 %v15548_v27, %s22877_s13  ;;  %s26077_s3 = smov 122   ;;  %s22881_s13 = smov 124  }
 0xf3c   : > { %v15676_v56 = vld [vmem:[%s26216_s4] sm:$0xf]  ;;  %v19352_v18 = vld [vmem:[%s26216_s4 + $0x4] sm:$0xf]  ;;  %v19357_v48 = vld [vmem:[%s26216_s4 + $0x8] sm:$0xf] }
 0xf3d   : > { %v15675_v37 = vld [vmem:[%s26217_s23] sm:$0xf]  ;;  %v19360_v45 = vld [vmem:[%s26216_s4 + $0xc] sm:$0xf]  ;;  %v19363_v28 = vld [vmem:[%s26216_s4 + $0x10] sm:$0xf] }
 0xf3e   : > { %15572 = vrot.lane.b32.xlu1 %v15548_v27, %s22878_s7  ;;  %15568 = vrot.lane.b32.xlu0 %v15548_v27, %s22879_s2  ;;  %s26070_s7 = smov 119   ;;  %s22883_s2 = smov 123   ;;  %v19366_v16 = vld [vmem:[%s26216_s4 + $0x14] sm:$0xf]  ;;  %v19369_v59 = vld [vmem:[%s26216_s4 + $0x18] sm:$0xf] }
 0xf3f   : > { %v19372_v47 = vld [vmem:[%s26216_s4 + $0x1c] sm:$0xf]  ;;  %v19375_v19 = vld [vmem:[%s26216_s4 + $0x20] sm:$0xf]  ;;  %s26218_s23 = sld [smem:[#allocation54_spill]]  ;;  %s26221_s4 = smov 119  }
 0xfa8   : > { %v15557_v51 = vpop.permute.xlu1 %15556  ;;  %v15553_v50 = vpop.permute.xlu0 %15552 }
 0xfa9   : > { %v15555_v20 = vmax.f32 %v15548_v27, %v15553_v50 }
 0xfab   : > { %v15559_v60 = vmax.f32 %v15555_v20, %v15557_v51 }
 0xfac   : > { %v15565_v63 = vpop.permute.xlu1 %15564  ;;  %v15561_v9 = vpop.permute.xlu0 %15560 }
 0xfad   : > { %v15563_v26 = vmax.f32 %v15559_v60, %v15561_v9 }
 0xfaf   : > { %v15567_v40 = vmax.f32 %v15563_v26, %v15565_v63 }
 0xfb0   : > { %v15569_v15 = vpop.permute.xlu0 %15568  ;;  %v15573_v34 = vpop.permute.xlu1 %15572 }
 0xfb1   : > { %v15571_v46 = vmax.f32 %v15567_v40, %v15569_v15 }
 0xfb3   : > { %v15575_v7 = vmax.f32 %v15571_v46, %v15573_v34 }
 0xfb5   : > { %v15581_v13 = vsel %vm15580_vm9, %v15575_v7, -inf  ;;  %v15577_v44 = vsel %vm15576_vm5, %v15575_v7, -inf  ;;  %v15585_v1 = vsel %vm15584_vm10, %v15575_v7, -inf  ;;  %v15589_v35 = vsel %vm15588_vm13, %v15575_v7, -inf }
 0xfb6   : > { %15582 = vmax.xlane.f32.xlu1 %v15581_v13  ;;  %15578 = vmax.xlane.f32.xlu0 %v15577_v44 }
 0xfba   : > { %15586 = vmax.xlane.f32.xlu0 %v15585_v1 }
 0xfbe   : > { %15590 = vmax.xlane.f32.xlu0 %v15589_v35 }
0x1043   : > { %v15579_v39 = vpop.xlane.xlu0 %15578  ;;  %v15583_v4 = vpop.xlane.xlu1 %15582 }
0x1044   : > { %v15593_v3 = vsel %vm15592_vm14, %v15579_v39, %v15583_v4 }
0x1047   : > { %v15587_v25 = vpop.xlane.xlu0 %15586 }
0x1048   : > { %v15595_v32 = vsel %vm15594_vm1, %v15593_v3, %v15587_v25 }
0x104b   : > { %v15591_v49 = vpop.xlane.xlu0 %15590 }
0x104c   : > { %v15597_v58 = vsel %vm15596_vm2, %v15595_v32, %v15591_v49 }
0x104d   : > { %20105 = vmatmul.mubr.msk.f32.vlgmr.msra.gmra.mrb[56].mxu1 %vm13056_vm7, %v15597_v58 }
0x104e   : > { %20114 = vmatprep.mubr.msk.f32.mxu1 %vm22872_vm11, %v26176_v53 }
0x1120   : > { %v15671_v17 = vpop.f32.mrb[56].mxu1 }
0x1121   : > { %15834 = vrot.lane.b32.xlu0 %v15671_v17, %s26196_s11  ;;  %15680 = vrot.lane.b32.xlu1 %v15671_v17, %s26195_s1  ;;  %v20106_v21 = vpop.f32.mrb[57].mxu1 }
0x1122   : > { %20113 = vmatpush3.msk.msra.mxu1 %vm13060_vm15, %v15671_v17 }
0x1123   : > { %20115 = vmatmul.mubr.msk.f32.vlgmr.msra.gmra.mrb[58].mxu1 %vm13056_vm7, %v15676_v56  ;;  %20122 = vmatprep.subr.mxu1 %v26176_v53 }
0x1124   : > { %20124 = vmatprep.mubr.msk.f32.mxu1 %vm22872_vm11, %v26176_v53 }
0x1125   : > { %16074 = vrot.lane.b32.xlu0 %v15671_v17, %s26077_s3  ;;  %15914 = vrot.lane.b32.xlu1 %v15671_v17, %s22881_s13 }
0x1129   : > { %16234 = vrot.lane.b32.xlu0 %v15671_v17, %s26070_s7  ;;  %15994 = vrot.lane.b32.xlu1 %v15671_v17, %s22883_s2  ;;  %s26074_s7 = smov 5  }
0x112d   : > { %16394 = vperm.xlu0 %21626, %v15675_v37   ;;  %16154 = vrot.lane.b32.xlu1 %v15671_v17, %s26078_s5 }
0x1131   : > { %16314 = vrot.lane.b32.xlu1 %v15671_v17, %s26072_s6  ;;  %s26219_s6 = sld [smem:[#allocation55_spill]] }
0x1193   : > { %v15835_v30 = vpop.permute.xlu0 %15834  ;;  %v15681_v11 = vpop.permute.xlu1 %15680 }
0x1194   : > { %20108 = vmatpush3.msk.msra.mxu0 %vm13060_vm15, %v15681_v11 }
0x1195   : > { %20110 = vmatmul.mubr.msk.f32.vlgmr.msra.gmra.mrb[44].mxu0 %vm13056_vm7, %v19352_v18  ;;  %20117 = vmatprep.subr.mxu0 %v26176_v53  ;;  %v25748_v18 = vld [vmem:[#allocation5] ss:$0 sm:$0xff] }
0x1196   : > { %20118 = vmatpush3.msk.msra.mxu0 %vm13060_vm15, %v15835_v30  ;;  %20119 = vmatprep.mubr.msk.f32.mxu0 %vm22872_vm11, %v26176_v53 }
0x1197   : > { %v16075_v54 = vpop.permute.xlu0 %16074  ;;  %v15915_v0 = vpop.permute.xlu1 %15914  ;;  %20127 = vmatprep.subr.mxu0 %v26176_v53 }
0x1198   : > { %20123 = vmatpush3.msk.msra.mxu1 %vm13060_vm15, %v15915_v0  ;;  %v16415_v0 = vld [vmem:[%s26218_s23] sm:$0xf] }
0x1199   : > { %20120 = vmatmul.mubr.msk.f32.vlgmr.msra.gmra.mrb[46].mxu0 %vm13056_vm7, %v19357_v48  ;;  %20125 = vmatmul.mubr.msk.f32.vlgmr.msra.gmra.mrb[60].mxu1 %vm13056_vm7, %v19360_v45 }
0x119a   : > { %20132 = vmatprep.subr.mxu1 %v26176_v53  ;;  %20129 = vmatprep.mubr.msk.f32.mxu0 %vm22872_vm11, %v26176_v53 }
0x119b   : > { %20133 = vmatpush3.msk.msra.mxu1 %vm13060_vm15, %v16075_v54  ;;  %v16235_v8 = vpop.permute.xlu0 %16234  ;;  %v15995_v6 = vpop.permute.xlu1 %15994  ;;  %20134 = vmatprep.mubr.msk.f32.mxu1 %vm22872_vm11, %v26176_v53 }
0x119c   : > { %20128 = vmatpush3.msk.msra.mxu0 %vm13060_vm15, %v15995_v6  ;;  %20142 = vmatprep.subr.mxu1 %v26176_v53 }
0x119d   : > { %20130 = vmatmul.mubr.msk.f32.vlgmr.msra.gmra.mrb[48].mxu0 %vm13056_vm7, %v19363_v28  ;;  %20135 = vmatmul.mubr.msk.f32.vlgmr.msra.gmra.mrb[62].mxu1 %vm13056_vm7, %v19366_v16  ;;  %v16414_v28 = vld [vmem:[%s26219_s6] sm:$0xf]  ;;  %v19379_v16 = vld [vmem:[%s26218_s23 + $0x4] sm:$0xf]  ;;  %s26222_s6 = sld [smem:[#allocation56_spill]] }
0x119e   : > { %20143 = vmatpush3.msk.msra.mxu1 %vm13060_vm15, %v16235_v8  ;;  %20137 = vmatprep.subr.mxu0 %v26176_v53 }
0x119f   : > { %v16155_v52 = vpop.permute.xlu1 %16154  ;;  %20139 = vmatprep.mubr.msk.f32.mxu0 %vm22872_vm11, %v26176_v53  ;;  %20144 = vmatprep.mubr.msk.f32.mxu1 %vm22872_vm11, %v26176_v53 }
0x11a0   : > { %20138 = vmatpush3.msk.msra.mxu0 %vm13060_vm15, %v16155_v52  ;;  %20152 = vmatprep.subr.mxu1 %v26176_v53  ;;  %v19387_v52 = vld [vmem:[%s26218_s23 + $0xc] sm:$0xf] }
0x11a1   : > { %20140 = vmatmul.mubr.msk.f32.vlgmr.msra.gmra.mrb[50].mxu0 %vm13056_vm7, %v19369_v59  ;;  %20147 = vmatprep.subr.mxu0 %v26176_v53  ;;  %v19384_v59 = vld [vmem:[%s26218_s23 + $0x8] sm:$0xf] }
0x11a2   : > { %20145 = vmatmul.mubr.msk.f32.vlgmr.msra.gmra.mrb[64].mxu1 %vm13056_vm7, %v19372_v47  ;;  %20149 = vmatprep.mubr.msk.f32.mxu0 %vm22872_vm11, %v26176_v53 }
0x11a3   : > { %v16315_v27 = vpop.permute.xlu1 %16314  ;;  %20154 = vmatprep.mubr.msk.f32.mxu1 %vm22872_vm11, %v26176_v53 }
0x11a4   : > { %20148 = vmatpush3.msk.msra.mxu0 %vm13060_vm15, %v16315_v27  ;;  %v19390_v27 = vld [vmem:[%s26218_s23 + $0x10] sm:$0xf] }
0x11a5   : > { %20150 = vmatmul.mubr.msk.f32.vlgmr.msra.gmra.mrb[52].mxu0 %vm13056_vm7, %v19375_v19  ;;  %20157 = vmatprep.subr.mxu0 %v26176_v53 }
0x11a6   : > { %20159 = vmatprep.mubr.msk.f32.mxu0 %vm22872_vm11, %v26176_v53 }
0x11ac   : > { %v16395_v21 = vpop.permute.xlu0 %16394 }
0x11f6   : > { %v15828_v51 = vpop.f32.mrb[58].mxu1 }
0x11f7   : > { %v20116_v50 = vpop.f32.mrb[59].mxu1 }
0x1268   : > { %v15753_v20 = vpop.f32.mrb[44].mxu0 }
0x1269   : > { %v20111_v60 = vpop.f32.mrb[45].mxu0  ;;  %v15829_v63 = vadd.f32 %v15828_v51, %v15753_v20  ;;  %v19393_v51 = vld [vmem:[%s26218_s23 + $0x14] sm:$0xf] }
0x126a   : > { %v19396_v60 = vld [vmem:[%s26218_s23 + $0x18] sm:$0xf] }
0x126c   : > { %v15907_v9 = vpop.f32.mrb[46].mxu0  ;;  %v15987_v26 = vpop.f32.mrb[60].mxu1 }
0x126d   : > { %v15911_v40 = vadd.f32 %v15907_v9, %v15829_v63  ;;  %v20121_v15 = vpop.f32.mrb[47].mxu0  ;;  %v20126_v46 = vpop.f32.mrb[61].mxu1  ;;  %v19399_v63 = vld [vmem:[%s26218_s23 + $0x1c] sm:$0xf] }
0x126f   : > { %v15991_v34 = vadd.f32 %v15987_v26, %v15911_v40  ;;  %v19402_v40 = vld [vmem:[%s26218_s23 + $0x20] sm:$0xf] }
0x1270   : > { %v16067_v7 = vpop.f32.mrb[48].mxu0  ;;  %v16147_v13 = vpop.f32.mrb[62].mxu1 }
0x1271   : > { %v16071_v44 = vadd.f32 %v16067_v7, %v15991_v34  ;;  %v20131_v1 = vpop.f32.mrb[49].mxu0  ;;  %v20136_v35 = vpop.f32.mrb[63].mxu1 }
0x1273   : > { %v16151_v38 = vadd.f32 %v16147_v13, %v16071_v44 }
0x1274   : > { %v16227_v39 = vpop.f32.mrb[50].mxu0 }
0x1275   : > { %v16231_v4 = vadd.f32 %v16227_v39, %v16151_v38  ;;  %v20141_v25 = vpop.f32.mrb[51].mxu0  ;;  %v16307_v3 = vpop.f32.mrb[64].mxu1 }
0x1276   : > { %v20146_v32 = vpop.f32.mrb[65].mxu1 }
0x1277   : > { %v16311_v49 = vadd.f32 %v16307_v3, %v16231_v4 }
0x1278   : > { %v16387_v58 = vpop.f32.mrb[52].mxu0 }
0x1279   : > { %v16391_v17 = vadd.f32 %v16387_v58, %v16311_v49  ;;  %v20151_v56 = vpop.f32.mrb[53].mxu0 }
0x127b   : > { %v16397_v37 = vadd.f32 %v16395_v21, %v16391_v17 }
0x127d   : > { %16399 = vrot.lane.b32.xlu1 %v16397_v37, %s26074_s7  ;;  %s26220_s7 = smov 118  }
0x12ef   : > { %v16400_v30 = vpop.permute.xlu1 %16399 }
0x12f0   : > { %v16403_v11 = vsel %vm16402_vm3, 0.0, %v16400_v30 }
0x12f1   : > { %v16405_v48 = vsel %vm16404_vm6, %v16403_v11, 0.0 }
0x12f2   : > { %v16412_v45 = vmul.f32 %v25748_v18, %v16405_v48 }
0x12f4   : > { %v16413_v54 = vmax.f32 %v16412_v45, 0.0 }
0x12f6   : > { %16573 = vrot.lane.b32.xlu1 %v16413_v54, %s26196_s11  ;;  %16419 = vrot.lane.b32.xlu0 %v16413_v54, %s26195_s1 }
0x12f7   : > { %20158 = vmatpush3.msk.msra.mxu0 %vm13060_vm15, %v16413_v54 }
0x12f8   : > { %20160 = vmatmul.mubr.msk.f32.vlgmr.msra.gmra.mrb[54].mxu0 %vm13056_vm7, %v16415_v0  ;;  %20167 = vmatprep.subr.mxu0 %v26176_v53 }
0x12f9   : > { %20169 = vmatprep.mubr.msk.f32.mxu0 %vm22872_vm11, %v26176_v53 }
0x12fa   : > { %16733 = vrot.lane.b32.xlu1 %v16413_v54, %s22883_s2  ;;  %16653 = vrot.lane.b32.xlu0 %v16413_v54, %s22881_s13 }
0x12fe   : > { %16893 = vrot.lane.b32.xlu1 %v16413_v54, %s26078_s5  ;;  %16813 = vrot.lane.b32.xlu0 %v16413_v54, %s26077_s3  ;;  %s26223_s3 = smov 5   ;;  %s26224_s5 = sld [smem:[#allocation49_spill]] }
0x1302   : > { %17053 = vrot.lane.b32.xlu1 %v16413_v54, %s26220_s7  ;;  %16973 = vrot.lane.b32.xlu0 %v16413_v54, %s26221_s4 }
0x1306   : > { %17133 = vperm.xlu0 %21626, %v16414_v28  }
0x1368   : > { %v16574_v8 = vpop.permute.xlu1 %16573  ;;  %v16420_v6 = vpop.permute.xlu0 %16419 }
0x1369   : > { %20153 = vmatpush3.msk.msra.mxu1 %vm13060_vm15, %v16420_v6 }
0x136a   : > { %20155 = vmatmul.mubr.msk.f32.vlgmr.msra.gmra.mrb[66].mxu1 %vm13056_vm7, %v19379_v16  ;;  %20162 = vmatprep.subr.mxu1 %v26176_v53 }
0x136b   : > { %20163 = vmatpush3.msk.msra.mxu1 %vm13060_vm15, %v16574_v8  ;;  %20164 = vmatprep.mubr.msk.f32.mxu1 %vm22872_vm11, %v26176_v53 }
0x136c   : > { %v16734_v47 = vpop.permute.xlu1 %16733  ;;  %v16654_v19 = vpop.permute.xlu0 %16653  ;;  %20172 = vmatprep.subr.mxu1 %v26176_v53 }
0x136d   : > { %20168 = vmatpush3.msk.msra.mxu0 %vm13060_vm15, %v16654_v19  ;;  %v17146_v19 = vld [vmem:[%s26222_s6] sm:$0xf] }
0x136e   : > { %20165 = vmatmul.mubr.msk.f32.vlgmr.msra.gmra.mrb[68].mxu1 %vm13056_vm7, %v19384_v59  ;;  %20170 = vmatmul.mubr.msk.f32.vlgmr.msra.gmra.mrb[56].mxu0 %vm13056_vm7, %v19387_v52 }
0x136f   : > { %20173 = vmatpush3.msk.msra.mxu1 %vm13060_vm15, %v16734_v47  ;;  %20177 = vmatprep.subr.mxu0 %v26176_v53 }
0x1370   : > { %v16894_v50 = vpop.permute.xlu1 %16893  ;;  %v16814_v20 = vpop.permute.xlu0 %16813  ;;  %20174 = vmatprep.mubr.msk.f32.mxu1 %vm22872_vm11, %v26176_v53  ;;  %20182 = vmatprep.subr.mxu1 %v26176_v53 }
0x1371   : > { %20178 = vmatpush3.msk.msra.mxu0 %vm13060_vm15, %v16814_v20  ;;  %20179 = vmatprep.mubr.msk.f32.mxu0 %vm22872_vm11, %v26176_v53  ;;  %v19405_v20 = vld [vmem:[%s26222_s6 + $0x4] sm:$0xf] }
0x1372   : > { %20175 = vmatmul.mubr.msk.f32.vlgmr.msra.gmra.mrb[70].mxu1 %vm13056_vm7, %v19390_v27  ;;  %20180 = vmatmul.mubr.msk.f32.vlgmr.msra.gmra.mrb[58].mxu0 %vm13056_vm7, %v19393_v51  ;;  %v17145_v27 = vld [vmem:[%s23068_s29] sm:$0xf] }
0x1373   : > { %20183 = vmatpush3.msk.msra.mxu1 %vm13060_vm15, %v16894_v50  ;;  %20187 = vmatprep.subr.mxu0 %v26176_v53  ;;  %v17954_v51 = vld [vmem:[%s26224_s5] sm:$0xf]  ;;  %v18415_v50 = vld [vmem:[%s23078_s27 + $0x8] sm:$0xff]  ;;  %s26227_s5 = sld [smem:[#allocation33_spill]] }
0x1374   : > { %v17054_v9 = vpop.permute.xlu1 %17053  ;;  %v16974_v26 = vpop.permute.xlu0 %16973  ;;  %20184 = vmatprep.mubr.msk.f32.mxu1 %vm22872_vm11, %v26176_v53  ;;  %20192 = vmatprep.subr.mxu1 %v26176_v53 }
0x1375   : > { %20188 = vmatpush3.msk.msra.mxu0 %vm13060_vm15, %v16974_v26  ;;  %20189 = vmatprep.mubr.msk.f32.mxu0 %vm22872_vm11, %v26176_v53  ;;  %v19413_v26 = vld [vmem:[%s26222_s6 + $0xc] sm:$0xf] }
0x1376   : > { %20185 = vmatmul.mubr.msk.f32.vlgmr.msra.gmra.mrb[72].mxu1 %vm13056_vm7, %v19396_v60  ;;  %20190 = vmatmul.mubr.msk.f32.vlgmr.msra.gmra.mrb[60].mxu0 %vm13056_vm7, %v19399_v63 }
0x1377   : > { %20193 = vmatpush3.msk.msra.mxu1 %vm13060_vm15, %v17054_v9  ;;  %20194 = vmatprep.mubr.msk.f32.mxu1 %vm22872_vm11, %v26176_v53  ;;  %v19410_v9 = vld [vmem:[%s26222_s6 + $0x8] sm:$0xf] }
0x1378   : > { %20202 = vmatprep.subr.mxu1 %v26176_v53  ;;  %20197 = vmatprep.subr.mxu0 %v26176_v53 }
0x1379   : > { %20199 = vmatprep.mubr.msk.f32.mxu0 %vm22872_vm11, %v26176_v53 }
0x137a   : > { %20195 = vmatmul.mubr.msk.f32.vlgmr.msra.gmra.mrb[74].mxu1 %vm13056_vm7, %v19402_v40 }
0x137b   : > { %20204 = vmatprep.mubr.msk.f32.mxu1 %vm22872_vm11, %v26176_v53 }
0x1385   : > { %v17134_v28 = vpop.permute.xlu0 %17133 }
0x13cb   : > { %v16567_v15 = vpop.f32.mrb[54].mxu0 }
0x13cc   : > { %v20161_v46 = vpop.f32.mrb[55].mxu0 }
0x13cd   : > { %v19416_v46 = vld [vmem:[%s26222_s6 + $0x10] sm:$0xf] }
0x143d   : > { %v16492_v34 = vpop.f32.mrb[66].mxu1 }
0x143e   : > { %v20156_v7 = vpop.f32.mrb[67].mxu1  ;;  %v16568_v13 = vadd.f32 %v16567_v15, %v16492_v34  ;;  %v19419_v34 = vld [vmem:[%s26222_s6 + $0x14] sm:$0xf] }
0x1441   : > { %v16646_v44 = vpop.f32.mrb[68].mxu1  ;;  %v16726_v1 = vpop.f32.mrb[56].mxu0 }
0x1442   : > { %v16650_v35 = vadd.f32 %v16646_v44, %v16568_v13  ;;  %v20166_v38 = vpop.f32.mrb[69].mxu1  ;;  %v20171_v39 = vpop.f32.mrb[57].mxu0  ;;  %v17875_v44 = vld [vmem:[%s26227_s5] sm:$0xff] }
0x1444   : > { %v16730_v4 = vadd.f32 %v16726_v1, %v16650_v35  ;;  %v17876_v1 = vld [vmem:[%s26227_s5 + $0x8] sm:$0xff]  ;;  %v19422_v35 = vld [vmem:[%s26222_s6 + $0x18] sm:$0xf] }
0x1445   : > { %v16806_v25 = vpop.f32.mrb[70].mxu1  ;;  %v16886_v3 = vpop.f32.mrb[58].mxu0 }
0x1446   : > { %v16810_v32 = vadd.f32 %v16806_v25, %v16730_v4  ;;  %v20176_v49 = vpop.f32.mrb[71].mxu1  ;;  %v20181_v58 = vpop.f32.mrb[59].mxu0  ;;  %v19425_v4 = vld [vmem:[%s26222_s6 + $0x1c] sm:$0xf]  ;;  %v20831_v25 = vpack.c.bf16 %v17876_v1, %v17875_v44 }
0x1448   : > { %v16890_v17 = vadd.f32 %v16886_v3, %v16810_v32  ;;  %v19428_v3 = vld [vmem:[%s26222_s6 + $0x20] sm:$0xf] }
0x1449   : > { %v16966_v56 = vpop.f32.mrb[72].mxu1  ;;  %v17046_v21 = vpop.f32.mrb[60].mxu0 }
0x144a   : > { %v16970_v37 = vadd.f32 %v16966_v56, %v16890_v17  ;;  %v20186_v30 = vpop.f32.mrb[73].mxu1  ;;  %v20191_v11 = vpop.f32.mrb[61].mxu0 }
0x144c   : > { %v17050_v48 = vadd.f32 %v17046_v21, %v16970_v37 }
0x144d   : > { %v17126_v45 = vpop.f32.mrb[74].mxu1 }
0x144e   : > { %v17130_v54 = vadd.f32 %v17126_v45, %v17050_v48  ;;  %v20196_v0 = vpop.f32.mrb[75].mxu1 }
0x1450   : > { %v17136_v16 = vadd.f32 %v17134_v28, %v17130_v54 }
0x1452   : > { %17138 = vrot.lane.b32.xlu1 %v17136_v16, %s26223_s3 }
0x14c4   : > { %v17139_v8 = vpop.permute.xlu1 %17138 }
0x14c5   : > { %v17141_v6 = vsel %vm16402_vm3, 0.0, %v17139_v8 }
0x14c6   : > { %v17142_v59 = vsel %vm16404_vm6, %v17141_v6, 0.0 }
0x14c7   : > { %v17143_v52 = vmul.f32 %v25748_v18, %v17142_v59 }
0x14c9   : > { %v17144_v47 = vmax.f32 %v17143_v52, 0.0 }
0x14cb   : > { %17304 = vrot.lane.b32.xlu1 %v17144_v47, %s26196_s11  ;;  %17150 = vrot.lane.b32.xlu0 %v17144_v47, %s26195_s1  ;;  %s26226_s11 = smov 122  }
0x14cc   : > { %20203 = vmatpush3.msk.msra.mxu1 %vm13060_vm15, %v17144_v47 }
0x14cd   : > { %20205 = vmatmul.mubr.msk.f32.vlgmr.msra.gmra.mrb[76].mxu1 %vm13056_vm7, %v17146_v19  ;;  %20212 = vmatprep.subr.mxu1 %v26176_v53 }
0x14ce   : > { %20214 = vmatprep.mubr.msk.f32.mxu1 %vm22872_vm11, %v26176_v53 }
0x14cf   : > { %17464 = vrot.lane.b32.xlu1 %v17144_v47, %s22883_s2  ;;  %17384 = vrot.lane.b32.xlu0 %v17144_v47, %s22881_s13 }
0x14d3   : > { %17624 = vrot.lane.b32.xlu1 %v17144_v47, %s26225_s8  ;;  %17544 = vrot.lane.b32.xlu0 %v17144_v47, %s26226_s11  ;;  %s1274_s8 = sand.u32 1, %s22799_s10  }
0x14d4   : > { %s21165_s1 = smul.u32 96, %s1274_s8  ;;  %s25980_s2 = scalar_lea.sflag [#allocation4], %s1274_s8 }
0x14d7   : > { %17784 = vrot.lane.b32.xlu1 %v17144_v47, %s26220_s7  ;;  %17704 = vrot.lane.b32.xlu0 %v17144_v47, %s26221_s4  ;;  %s25945_s4 = scalar_lea.vmem [#allocation22], %s21165_s1 }
0x14d8   : > { %s18792_s13 = sshll.u32 %s25945_s4, 4  ;;  %s25970_s13 = int_to_ptr.vmem [resolvable:$true] %s18792_s13 }
0x14d9   : > { %s22717_s11 = scalar_lea.vmem %s25970_s13, 1536 }
0x14da   : > { %p22718_p2 = scmp.ne.s32.totalorder %s25970_s13, %s22717_s11 }
0x14db   : > { %17864 = vperm.xlu0 %21626, %v17145_v27  }
0x14dc   : > { %p22719_p3 = pnand %p22718_p2, %p26228_p0 }
0x14de   : > { %p22720_p4 = pneg %p22719_p3 }
0x14df   : > { %17957 = vperm.xlu0 %21626, %v17954_v51  }
0x14e3   : > { %18423 = vperm.xlu0 %21626, %v18415_v50   ;;  %v18414_v50 = vld [vmem:[%s23078_s27] sm:$0xff] }
0x153d   : > { %v17305_v60 = vpop.permute.xlu1 %17304  ;;  %v17151_v63 = vpop.permute.xlu0 %17150 }
0x153e   : > { %20198 = vmatpush3.msk.msra.mxu0 %vm13060_vm15, %v17151_v63 }
0x153f   : > { %20200 = vmatmul.mubr.msk.f32.vlgmr.msra.gmra.mrb[62].mxu0 %vm13056_vm7, %v19405_v20  ;;  %20207 = vmatprep.subr.mxu0 %v26176_v53  ;;  %v17950_v20 = vld [vmem:[#allocation8] sm:$0xff] }
0x1540   : > { %20208 = vmatpush3.msk.msra.mxu0 %vm13060_vm15, %v17305_v60  ;;  %20209 = vmatprep.mubr.msk.f32.mxu0 %vm22872_vm11, %v26176_v53  ;;  %v18181_v60 = vcombine.high %v17950_v20, %v17950_v20 }
0x1541   : > { %v17465_v40 = vpop.permute.xlu1 %17464  ;;  %v17385_v15 = vpop.permute.xlu0 %17384  ;;  %20217 = vmatprep.subr.mxu0 %v26176_v53 }
0x1542   : > { %20213 = vmatpush3.msk.msra.mxu1 %vm13060_vm15, %v17385_v15 }
0x1543   : > { %20210 = vmatmul.mubr.msk.f32.vlgmr.msra.gmra.mrb[64].mxu0 %vm13056_vm7, %v19410_v9  ;;  %20215 = vmatmul.mubr.msk.f32.vlgmr.msra.gmra.mrb[78].mxu1 %vm13056_vm7, %v19413_v26  ;;  %v17951_v9 = vld [vmem:[#allocation8 + $0x8] sm:$0xff] }
0x1544   : > { %20218 = vmatpush3.msk.msra.mxu0 %vm13060_vm15, %v17465_v40  ;;  %20222 = vmatprep.subr.mxu1 %v26176_v53 }
0x1545   : > { %v17625_v7 = vpop.permute.xlu1 %17624  ;;  %v17545_v13 = vpop.permute.xlu0 %17544  ;;  %20219 = vmatprep.mubr.msk.f32.mxu0 %vm22872_vm11, %v26176_v53  ;;  %20227 = vmatprep.subr.mxu0 %v26176_v53 }
0x1546   : > { %20223 = vmatpush3.msk.msra.mxu1 %vm13060_vm15, %v17545_v13  ;;  %20224 = vmatprep.mubr.msk.f32.mxu1 %vm22872_vm11, %v26176_v53 }
0x1547   : > { %20220 = vmatmul.mubr.msk.f32.vlgmr.msra.gmra.mrb[66].mxu0 %vm13056_vm7, %v19416_v46  ;;  %20225 = vmatmul.mubr.msk.f32.vlgmr.msra.gmra.mrb[80].mxu1 %vm13056_vm7, %v19419_v34  ;;  %v18182_v46 = vcombine.high %v17951_v9, %v17951_v9  ;;  %v17952_v34 = vld [vmem:[#allocation8 + $0x10] sm:$0xff] }
0x1548   : > { %20228 = vmatpush3.msk.msra.mxu0 %vm13060_vm15, %v17625_v7  ;;  %20232 = vmatprep.subr.mxu1 %v26176_v53  ;;  %v18183_v7 = vcombine.high %v17952_v34, %v17952_v34 }
0x1549   : > { %v17785_v38 = vpop.permute.xlu1 %17784  ;;  %v17705_v39 = vpop.permute.xlu0 %17704  ;;  %20229 = vmatprep.mubr.msk.f32.mxu0 %vm22872_vm11, %v26176_v53  ;;  %20237 = vmatprep.subr.mxu0 %v26176_v53 }
0x154a   : > { %20233 = vmatpush3.msk.msra.mxu1 %vm13060_vm15, %v17705_v39  ;;  %20234 = vmatprep.mubr.msk.f32.mxu1 %vm22872_vm11, %v26176_v53 }
0x154b   : > { %20230 = vmatmul.mubr.msk.f32.vlgmr.msra.gmra.mrb[68].mxu0 %vm13056_vm7, %v19422_v35  ;;  %20830 = vmatprep.subr.bf16.mxu1 %v26173_v5  ;;  %v17953_v5 = vld [vmem:[#allocation20] sm:$0xf] }
0x154c   : > { %20238 = vmatpush3.msk.msra.mxu0 %vm13060_vm15, %v17785_v38  ;;  %20235 = vmatmul.mubr.msk.f32.vlgmr.msra.gmra.mrb[82].mxu1 %vm13056_vm7, %v19425_v4 }
0x154d   : > { %20832 = vmatpush3.bf16.msra.mxu1 %v20831_v25  ;;  %19432 = vmatprep.subr.msk.mxu0 %vm13060_vm15, %v25363_v10 }
0x154e   : > { %19435 = vmatprep.subr.msk.mxu1 %vm13060_vm15, %v25373_v62  ;;  %20239 = vmatprep.mubr.msk.f32.mxu0 %vm22872_vm11, %v26176_v53 }
0x154f   : > { %20240 = vmatmul.mubr.msk.f32.vlgmr.msra.gmra.mrb[70].mxu0 %vm13056_vm7, %v19428_v3  ;;  %20246 = vmatprep.mubr.msk.f32.mxu1 %vm22872_vm11, %v26176_v53 }
0x1550   : > { %19433 = vmatpush1.msk.msra.mxu0 %vm13060_vm15, %v25351_v33  ;;  %18029 = vmatprep.mubr.f32.mxu0 %v26176_v53 }
0x1551   : > { %19438 = vmatprep.subr.msk.mxu0 %vm13060_vm15, %v25397_v36 }
0x1553   : > { %19434 = vmatmul.mubr.msk.f32.vlgmr.msra.gmra.mrb[72].mxu0 %vm13056_vm7, %v17953_v5 }
0x1554   : > { %19439 = vmatpush1.msk.msra.mxu0 %vm13060_vm15, %v25379_v55  ;;  %18171 = vmatprep.mubr.f32.mxu0 %v26176_v53 }
0x1555   : > { %19441 = vmatprep.subr.msk.mxu0 %vm13060_vm15, %v18181_v60 }
0x1557   : > { %19440 = vmatmul.mubr.msk.f32.vlgmr.msra.gmra.mrb[74].mxu0 %vm13056_vm7, %v17953_v5 }
0x1558   : > { %18263 = vmatprep.mubr.f32.mxu0 %v26176_v53  ;;  %19442 = vmatpush1.msk.msra.mxu0 %vm13060_vm15, %v17950_v20 }
0x1559   : > { %19447 = vmatprep.subr.msk.mxu0 %vm13060_vm15, %v18183_v7 }
0x155a   : > { %v17865_v27 = vpop.permute.xlu0 %17864 }
0x15a0   : > { %v17298_v10 = vpop.f32.mrb[76].mxu1 }
0x15a1   : > { %v20206_v62 = vpop.f32.mrb[77].mxu1 }
0x1612   : > { %v17223_v33 = vpop.f32.mrb[62].mxu0 }
0x1613   : > { %v20201_v32 = vpop.f32.mrb[63].mxu0  ;;  %v17299_v49 = vadd.f32 %v17298_v10, %v17223_v33 }
0x1616   : > { %v17377_v58 = vpop.f32.mrb[64].mxu0  ;;  %v17457_v17 = vpop.f32.mrb[78].mxu1 }
0x1617   : > { %v17381_v56 = vadd.f32 %v17377_v58, %v17299_v49  ;;  %v20211_v36 = vpop.f32.mrb[65].mxu0  ;;  %v20216_v21 = vpop.f32.mrb[79].mxu1  ;;  %v18413_v49 = vld [vmem:[%s23073_s12 + $0x8] sm:$0xff] }
0x1619   : > { %v17461_v37 = vadd.f32 %v17457_v17, %v17381_v56 }
0x161a   : > { %v17537_v30 = vpop.f32.mrb[66].mxu0  ;;  %v17617_v11 = vpop.f32.mrb[80].mxu1 }
0x161b   : > { %v17541_v55 = vadd.f32 %v17537_v30, %v17461_v37  ;;  %v20221_v48 = vpop.f32.mrb[67].mxu0  ;;  %v20226_v45 = vpop.f32.mrb[81].mxu1 }
0x161d   : > { %v17621_v54 = vadd.f32 %v17617_v11, %v17541_v55 }
0x161e   : > { %v17697_v0 = vpop.f32.mrb[68].mxu0 }
0x161f   : > { %v17701_v28 = vadd.f32 %v17697_v0, %v17621_v54  ;;  %v20231_v16 = vpop.f32.mrb[69].mxu0  ;;  %v17777_v8 = vpop.f32.mrb[82].mxu1 }
0x1620   : > { %v20236_v6 = vpop.f32.mrb[83].mxu1 }
0x1621   : > { %v17781_v59 = vadd.f32 %v17777_v8, %v17701_v28 }
0x1622   : > { %v17857_v52 = vpop.f32.mrb[70].mxu0 }
0x1623   : > { %v17861_v47 = vadd.f32 %v17857_v52, %v17781_v59  ;;  %v20241_v19 = vpop.f32.mrb[71].mxu0 }
0x1625   : > { %v17867_v51 = vadd.f32 %v17865_v27, %v17861_v47 }
0x1627   : > { %17869 = vrot.lane.b32.xlu1 %v17867_v51, %s26223_s3  ;;  %s21167_s3 = smul.u32 1536, %s23106_s0  ;;  %s22887_s0 = smov [#allocation22]  }
0x1628   : > { %s22721_s1 = sshll.u32 %s22887_s0, 4  ;;  %s22722_s1 = int_to_ptr.vmem [resolvable:$false] %s22721_s1 }
0x1629   : > { %s25974_s7 = scalar_lea.hbm %s23083_s14, %s21167_s3  ;;  %s22723_s5 = scalar_lea.vmem %s22722_s1, 3072 }
0x162a   : > { %p22724_p12 = scmp.lt.s32.totalorder %s25970_s13, %s22722_s1  ;;  %p22725_p5 = scmp.lt.s32.totalorder %s22723_s5, %s22717_s11 }
0x162b   : > { %18418 = vperm.xlu1 %21627, %v18414_v50  }
0x162c   : > { %p22726_p6 = por %p22725_p5, %p22724_p12 }
0x162e   : > { %p22727_p9 = pnand %p22726_p6, %p22720_p4 }
0x1699   : > { %v17870_v63 = vpop.permute.xlu1 %17869 }
0x169a   : > { %v17872_v26 = vsel %vm16402_vm3, 0.0, %v17870_v63 }
0x169b   : > { %v17873_v40 = vsel %vm16404_vm6, %v17872_v26, 0.0 }
0x169c   : > { %v17874_v15 = vmul.f32 %v25748_v18, %v17873_v40 }
0x169e   : > { %20247 = vmatmul.mubr.msk.f32.vlgmr.msra.gmra.mrb[84].mxu1 %vm1303_vm0, %v17874_v15  ;;  %vm18770_vm0 = vcmask 293888  }
0x169f   : > { %19436 = vmatpush1.msk.msra.mxu1 %vm13060_vm15, %v25357_v24  ;;  %18100 = vmatprep.mubr.f32.mxu1 %v26176_v53  ;;  %v17958_v24 = vpop.permute.xlu0 %17957 }
0x16a0   : > { %19444 = vmatprep.subr.msk.mxu1 %vm13060_vm15, %v18182_v46 }
0x16a2   : > { %19437 = vmatmul.mubr.msk.f32.vlgmr.msra.gmra.mrb[86].mxu1 %vm13056_vm7, %v17953_v5  ;;  %v18412_v5 = vld [vmem:[%s23073_s12] sm:$0xff] }
0x16a3   : > { %19445 = vmatpush1.msk.msra.mxu1 %vm13060_vm15, %v17951_v9  ;;  %18334 = vmatprep.mubr.f32.mxu1 %v26176_v53  ;;  %v18424_v48 = vpop.permute.xlu0 %18423 }
0x16aa   : > { %v18419_v58 = vpop.permute.xlu1 %18418 }
0x1771   : > { %v17946_v18 = vpop.f32.mrb[84].mxu1 }
0x1772   : > { %v20248_v13 = vpop.f32.mrb[85].mxu1  ;;  %19443 = vmatmul.mubr.msk.f32.vlgmr.msra.gmra.mrb[72].mxu0 %vm13056_vm7, %v17946_v18  ;;  %19446 = vmatmul.mubr.msk.f32.vlgmr.msra.gmra.mrb[86].mxu1 %vm13056_vm7, %v17946_v18 }
0x1773   : > { %19448 = vmatpush1.msk.msra.mxu0 %vm13060_vm15, %v17952_v34  ;;  %18405 = vmatprep.mubr.f32.mxu0 %v26176_v53 }
0x1774   : > { %18514 = vmatprep.mubr.f32.mxu1 %v26176_v53 }
0x1776   : > { %19449 = vmatmul.mubr.msk.f32.vlgmr.msra.gmra.mrb[74].mxu0 %vm13056_vm7, %v17946_v18 }
0x1777   : > { %18591 = vmatprep.mubr.f32.mxu0 %v26176_v53 }
0x1845   : > { %v18265_v44 = vpop.f32.mrb[72].mxu0  ;;  %v18336_v1 = vpop.f32.mrb[86].mxu1 }
0x1846   : > { %v18267_v35 = vpop.f32.mrb[73].mxu0  ;;  %v18338_v38 = vpop.f32.mrb[87].mxu1  ;;  %v20833_v25 = vadd.f32 %v18265_v44, %v17958_v24  ;;  %v20835_v3 = vadd.f32 %v18336_v1, %v17958_v24 }
0x1847   : > { %v20834_v39 = vadd.f32 %v18267_v35, %v17958_v24  ;;  %v20836_v4 = vadd.f32 %v18338_v38, %v17958_v24 }
0x1849   : > { %v18407_v10 = vpop.f32.mrb[74].mxu0  ;;  %19450 = vmatprep.subr.msk.mxu1 %vm13060_vm15, %v20834_v39  ;;  %19454 = vmatprep.subr.msk.mxu0 %vm13060_vm15, %v20836_v4 }
0x184a   : > { %v18409_v62 = vpop.f32.mrb[75].mxu0  ;;  %19451 = vmatpush1.msk.msra.mxu1 %vm13060_vm15, %v20833_v25  ;;  %19455 = vmatpush1.msk.msra.mxu0 %vm13060_vm15, %v20835_v3  ;;  %v20837_v32 = vadd.f32 %v18407_v10, %v17958_v24 }
0x184b   : > { %v20838_v33 = vadd.f32 %v18409_v62, %v17958_v24  ;;  %19452 = vmatmul.mubr.msk.f32.vlgmr.msra.gmra.mrb[88].mxu1 %vm13056_vm7, %v18412_v5  ;;  %19456 = vmatmul.mubr.msk.f32.vlgmr.msra.gmra.mrb[76].mxu0 %vm13056_vm7, %v18412_v5 }
0x184c   : > { %18520 = vmatprep.mubr.f32.mxu1 %v26176_v53  ;;  %18597 = vmatprep.mubr.f32.mxu0 %v26176_v53 }
0x184d   : > { %19458 = vmatprep.subr.msk.mxu1 %vm13060_vm15, %v20838_v33 }
0x184e   : > { %19459 = vmatpush1.msk.msra.mxu1 %vm13060_vm15, %v20837_v32 }
0x184f   : > { %19453 = vmatmul.mubr.msk.f32.gmra.mrb[90].mxu1 %vm13056_vm7, %v18413_v49  ;;  %19457 = vmatmul.mubr.msk.f32.gmra.mrb[78].mxu0 %vm13056_vm7, %v18413_v49 }
0x1850   : > { %18668 = vmatprep.mubr.f32.mxu1 %v26176_v53 }
0x1853   : > { %19460 = vmatmul.mubr.msk.f32.vlgmr.msra.gmra.mrb[92].mxu1 %vm13056_vm7, %v18412_v5 }
0x1854   : > { %18674 = vmatprep.mubr.f32.mxu1 %v26176_v53 }
0x1857   : > { %19461 = vmatmul.mubr.msk.f32.gmra.mrb[94].mxu1 %vm13056_vm7, %v18413_v49 }
0x191e   : > { %v18516_v17 = vpop.f32.mrb[88].mxu1  ;;  %v18593_v56 = vpop.f32.mrb[76].mxu0 }
0x191f   : > { %v18517_v36 = vadd.f32 %v18516_v17, %v18419_v58  ;;  %v18594_v21 = vadd.f32 %v18593_v56, %v18419_v58  ;;  %v18518_v37 = vpop.f32.mrb[89].mxu1  ;;  %v18595_v30 = vpop.f32.mrb[77].mxu0 }
0x1920   : > { %v18519_v11 = vadd.f32 %v18518_v37, %v18419_v58  ;;  %v18596_v55 = vadd.f32 %v18595_v30, %v18419_v58 }
0x1921   : > { %v19462_v45 = vmul.f32 -1.442695, %v18517_v36  ;;  %v19464_v54 = vmul.f32 -1.442695, %v18594_v21 }
0x1922   : > { %v19463_v0 = vmul.f32 -1.442695, %v18519_v11  ;;  %v19465_v28 = vmul.f32 -1.442695, %v18596_v55  ;;  %v18522_v16 = vpop.f32.mrb[90].mxu1  ;;  %v18599_v8 = vpop.f32.mrb[78].mxu0 }
0x1923   : > { %22321 = vpow2.f32 %v19462_v45  ;;  %v18523_v53 = vadd.f32 %v18522_v16, %v18424_v48  ;;  %v18600_v6 = vadd.f32 %v18599_v8, %v18424_v48  ;;  %v18524_v59 = vpop.f32.mrb[91].mxu1  ;;  %v18601_v52 = vpop.f32.mrb[79].mxu0 }
0x1924   : > { %22323 = vpow2.f32 %v19464_v54  ;;  %v18525_v47 = vadd.f32 %v18524_v59, %v18424_v48  ;;  %v18602_v19 = vadd.f32 %v18601_v52, %v18424_v48 }
0x1925   : > { %22325 = vpow2.f32 %v19463_v0  ;;  %v19468_v27 = vmul.f32 -1.442695, %v18523_v53  ;;  %v19470_v51 = vmul.f32 -1.442695, %v18600_v6 }
0x1926   : > { %22327 = vpow2.f32 %v19465_v28  ;;  %v19469_v50 = vmul.f32 -1.442695, %v18525_v47  ;;  %v19471_v20 = vmul.f32 -1.442695, %v18602_v19  ;;  %v18670_v60 = vpop.f32.mrb[92].mxu1 }
0x1927   : > { %22329 = vpow2.f32 %v19468_v27  ;;  %v18671_v63 = vadd.f32 %v18670_v60, %v18419_v58  ;;  %v18672_v9 = vpop.f32.mrb[93].mxu1 }
0x1928   : > { %22331 = vpow2.f32 %v19470_v51  ;;  %v18673_v26 = vadd.f32 %v18672_v9, %v18419_v58 }
0x1929   : > { %22333 = vpow2.f32 %v19469_v50  ;;  %v19466_v40 = vmul.f32 -1.442695, %v18671_v63 }
0x192a   : > { %22335 = vpow2.f32 %v19471_v20  ;;  %v19467_v15 = vmul.f32 -1.442695, %v18673_v26  ;;  %v18676_v46 = vpop.f32.mrb[94].mxu1 }
0x192b   : > { %22337 = vpow2.f32 %v19466_v40  ;;  %v18677_v34 = vadd.f32 %v18676_v46, %v18424_v48  ;;  %v18678_v7 = vpop.f32.mrb[95].mxu1 }
0x192c   : > { %22339 = vpow2.f32 %v19467_v15  ;;  %v18679_v10 = vadd.f32 %v18678_v7, %v18424_v48 }
0x192d   : > { %v22322_v18 = vpop.eup %22321  ;;  %v19472_v13 = vmul.f32 -1.442695, %v18677_v34 }
0x192e   : > { %v22324_v24 = vpop.eup %22323  ;;  %v18717_v44 = vadd.f32 1.0, %v22322_v18  ;;  %v19473_v21 = vmul.f32 -1.442695, %v18679_v10 }
0x192f   : > { %v22326_v1 = vpop.eup %22325  ;;  %v18719_v35 = vadd.f32 1.0, %v22324_v24  ;;  %22341 = vpow2.f32 %v19472_v13 }
0x1930   : > { %v22328_v38 = vpop.eup %22327  ;;  %22343 = vrcp.f32 %v18717_v44  ;;  %v18718_v39 = vadd.f32 1.0, %v22326_v1 }
0x1931   : > { %v22330_v4 = vpop.eup %22329  ;;  %22345 = vrcp.f32 %v18719_v35  ;;  %v18720_v25 = vadd.f32 1.0, %v22328_v38 }
0x1932   : > { %v22332_v3 = vpop.eup %22331  ;;  %22347 = vrcp.f32 %v18718_v39  ;;  %v18723_v5 = vadd.f32 1.0, %v22330_v4 }
0x1933   : > { %v22334_v62 = vpop.eup %22333  ;;  %22349 = vrcp.f32 %v18720_v25  ;;  %v18725_v33 = vadd.f32 1.0, %v22332_v3 }
0x1934   : > { %v22336_v32 = vpop.eup %22335  ;;  %22351 = vrcp.f32 %v18723_v5  ;;  %v18724_v49 = vadd.f32 1.0, %v22334_v62 }
0x1935   : > { %v22338_v58 = vpop.eup %22337  ;;  %22353 = vrcp.f32 %v18725_v33  ;;  %v18726_v17 = vadd.f32 1.0, %v22336_v32 }
0x1936   : > { %v22340_v56 = vpop.eup %22339  ;;  %22355 = vrcp.f32 %v18724_v49  ;;  %v18721_v36 = vadd.f32 1.0, %v22338_v58 }
0x1937   : > { %22357 = vrcp.f32 %v18726_v17  ;;  %v18722_v37 = vadd.f32 1.0, %v22340_v56 }
0x1938   : > { %22359 = vrcp.f32 %v18721_v36 }
0x1939   : > { %v22342_v30 = vpop.eup %22341  ;;  %22361 = vrcp.f32 %v18722_v37 }
0x193a   : > { %v22344_v11 = vpop.eup %22343  ;;  %v18727_v55 = vadd.f32 1.0, %v22342_v30  ;;  %22363 = vpow2.f32 %v19473_v21 }
0x193b   : > { %v22346_v48 = vpop.eup %22345  ;;  %v18753_v45 = vmul.f32 %v22344_v11, %v25315_v43 }
0x193c   : > { %v22348_v54 = vpop.eup %22347  ;;  %v18755_v0 = vmul.f32 %v22346_v48, %v25328_v42  ;;  %22365 = vrcp.f32 %v18727_v55 }
0x193d   : > { %v22350_v28 = vpop.eup %22349  ;;  %18765 = vst [vmem:[%s25945_s4] sm:$0xff] %v18753_v45  ;;  %v18754_v16 = vmul.f32 %v22348_v54, %v25311_v12 }
0x193e   : > { %v22352_v8 = vpop.eup %22351  ;;  %18767 = vst [vmem:[%s25945_s4 + $0x10] sm:$0xff] %v18755_v0  ;;  %v18756_v43 = vmul.f32 %v22350_v28, %v25323_v31 }
0x193f   : > { %v22354_v53 = vpop.eup %22353  ;;  %18766 = vst [vmem:[%s25945_s4 + $0x8] sm:$0xff] %v18754_v16  ;;  %v18759_v42 = vmul.f32 %v22352_v8, %v25309_v14 }
0x1940   : > { %v22356_v6 = vpop.eup %22355  ;;  %18768 = vst [vmem:[%s25945_s4 + $0x18] sm:$0xff] %v18756_v43  ;;  %v18761_v59 = vmul.f32 %v22354_v53, %v25321_v22 }
0x1941   : > { %v22358_v52 = vpop.eup %22357  ;;  %18772 = vst [vmem:[%s25945_s4 + $0x30] sm:$0xff] %v18759_v42  ;;  %v18760_v12 = vmul.f32 %v22356_v6, %v25313_v23 }
0x1942   : > { %v22360_v47 = vpop.eup %22359  ;;  %18774 = vst [vmem:[%s25945_s4 + $0x40] sm:$0xff] %v18761_v59  ;;  %v18762_v31 = vmul.f32 %v22358_v52, %v25325_v61 }
0x1943   : > { %v22362_v19 = vpop.eup %22361  ;;  %18773 = vst [vmem:[%s25945_s4 + $0x38] sm:$0xff] %v18760_v12  ;;  %v18757_v14 = vmul.f32 %v22360_v47, %v25342_v2 }
0x1944   : > { %v22364_v27 = vpop.eup %22363  ;;  %18775 = vst [vmem:[%s25945_s4 + $0x48] sm:$0xff] %v18762_v31  ;;  %v18758_v22 = vmul.f32 %v22362_v19, %v25337_v57 }
0x1945   : > { %18769 = vst [vmem:[%s25945_s4 + $0x20] sm:$0xff] %v18757_v14  ;;  %v18728_v23 = vadd.f32 1.0, %v22364_v27 }
0x1946   : > { %v22366_v51 = vpop.eup %22365  ;;  %18771 = vst.msk [vmem:[%s25945_s4 + $0x28] sm:$0xff] %vm18770_vm0, %v18758_v22 }
0x1947   : > { %v18763_v61 = vmul.f32 %v22366_v51, %v25335_v29  ;;  %22367 = vrcp.f32 %v18728_v23 }
0x1949   : > { %18776 = vst [vmem:[%s25945_s4 + $0x50] sm:$0xff] %v18763_v61 }
0x1951   : > { %v22368_v2 = vpop.eup %22367 }
0x1952   : > { %v18764_v57 = vmul.f32 %v22368_v2, %v25339_v41 }
0x1954   : > { %18777 = vst.msk [vmem:[%s25945_s4 + $0x58] sm:$0xff] %vm18770_vm0, %v18764_v57 }
0x1955   : > { %22730 = shalt.err (!%p22727_p9)
}
0x1956   : > { %s22731_s8 = scalar_lea.hbm %s25974_s7, 1536  ;;  %s22735_s4 = scalar_lea.hbm %s23083_s14, 3072 }
0x1957   : > { %p22732_p10 = scmp.ne.s32.totalorder %s25974_s7, %s22731_s8  ;;  %p22736_p11 = scmp.lt.u32.totalorder %s25974_s7, %s23083_s14 }
0x1958   : > { %p22737_p13 = scmp.lt.u32.totalorder %s22735_s4, %s22731_s8  ;;  %p22739_p2 = scmp.lt.u32.totalorder %s22731_s8, %s25974_s7 }
0x1959   : > { %p22733_p7 = pnand %p22732_p10, %p26228_p0 }
0x195a   : > { %p22738_p1 = por %p22737_p13, %p22736_p11 }
0x195b   : > { %p22734_p8 = pneg %p22733_p7 }
0x195c   : > { %p22740_p3 = por %p22739_p2, %p22738_p1 }
0x195e   : > { %p22741_p4 = pnand %p22740_p3, %p22734_p8 }
0x1960   : > { %22744 = shalt.err (!%p22741_p4)
}
0x1961   : > { %s22888_s5 = smov 768   ;;  %s22889_s3 = smov 48  }
0x1962   : > { %21216 = dma.vmem_to_hbm [thread:$0]  (%p26228_p0), %s25970_s13, 1536, %s25974_s7, %s25980_s2, %s22888_s5, %s22888_s5, %s22889_s3  }
0x1963 PF: > { %s26229_s11 = sld [smem:[#allocation57_spill]]  ;;  %s26230_s0 = sld [smem:[#allocation61_spill]] }
0x1964   : > { %p21283_p12 = scmp.ge.s32.totalorder %s22807_s15, 2 }
0x1969   : > { %s18807_s1 = sand.u32 1, %s26229_s11   ;;  %p26231_p5 = scmp.ne.s32.totalorder %s26230_s0, 0 }
0x196a   : > { %s18808_s8 = scalar_lea.sflag [#allocation4], %s18807_s1 }
0x196b   : > { %p21256_p6 = pnand %p21283_p12, %p26231_p5 }
0x196d   : > { %22790 = dma.done.wait (!%p21256_p6), %s18808_s8, 1536  }
0x196e   : > { %22792 = vsyncadd (!%p21256_p6), %s18808_s8, 4294965760  ;;  %s26232_s15 = sld [smem:[#allocation59_spill]]  ;;  %s26233_s4 = sld [smem:[#allocation58_spill]] }
0x196f   : > { %s26234_s11 = sld [smem:[#allocation60_spill]]  ;;  %s26235_s7 = smov %s22799_s10 }
0x1974   : > { %p92_p9 = scmp.ge.s32.totalorder %s26232_s15, 4   ;;  %s26236_s10 = smov %s26233_s4 }
0x1976   :  { %94 = sbr.rel (!%p92_p9) target bundleno = 78 (0x4e), region = 353 }
0x197d   :  { %18813 = vsyncpa [#allocation3], 1 }
0x197e   :  { %18815 = vsyncpa [#allocation3 + $0x1], 1 }
0x197f   :  { %18816 = vsyncpa [#allocation6], 1 }
0x1980   :  { %18817 = vsyncpa [#allocation9], 1 }
0x1981   :  { %18818 = vsyncpa [#allocation12], 1 }
0x1982   :  { %18819 = vsyncpa [#allocation15], 1 }
0x1983   :  { %18820 = vsyncpa [#allocation18], 1 }
0x1984   :  { %18821 = vsyncpa [#allocation21], 1 }
0x1985   :  { %18822 = vsyncpa [#allocation4], 1 }
0x1986   :  { %18824 = vsyncpa [#allocation4 + $0x1], 1 }

</bundles_post_ra>
